<compile_context>
chip_gen: v7x
topology: tpu7x:2x2x1
jax: 0.10.0
libtpu: 0.0.40
codegen_flags: <defaults>
</compile_context>

<pallas_src>
import functools

import jax
import jax.numpy as jnp
from jax import lax
from jax.experimental import pallas as pl
from jax.experimental.pallas import tpu as pltpu


_LANE = 128
_VMEM_BUDGET_BYTES = 24 * 1024 * 1024      # conservative even on v7x (64 MiB phys)
_A_RESIDENT_MAX_BYTES = 4 * 1024 * 1024    # keep A fully VMEM-resident below this


def _round_up(v, m):
    return ((v + m - 1) // m) * m


# ----------------------------------------------------------------------------
# In-kernel helpers
# ----------------------------------------------------------------------------
def _top1_select(logits, num_experts):
    """Index of the top-1 expert per row (ties -> lowest index), shape [TM, 1]."""
    gmax = jnp.max(logits, axis=-1, keepdims=True)
    eidx = lax.broadcasted_iota(jnp.int32, logits.shape, 1)
    return jnp.min(jnp.where(logits >= gmax, eidx, num_experts),
                   axis=-1, keepdims=True)


def _moe_expert_mix(h_f32, gate_in_bf16, wg_ref, w_ref, b_ref,
                    *, num_experts, c_pad, tile_m):
    """Top-1 gated mixture-of-experts applied to aggregated features h.

    h_f32        : [TM, Cin]       aggregated features (f32)
    gate_in_bf16 : [TM, Cin_gate]  raw layer input for the gating network (bf16)
    wg_ref       : [Cin_gate, E]   gating weights (bf16)
    w_ref        : [Cin, E*Cp]     fused, lane-padded expert weights (bf16)
    b_ref        : [E, Cp]         lane-padded expert biases (f32)
    returns      : [TM, Cp]        gated expert output (f32); padded cols are 0
    """
    logits = jnp.dot(gate_in_bf16, wg_ref[...],
                     preferred_element_type=jnp.float32)            # [TM, E]
    sel = _top1_select(logits, num_experts)                         # [TM, 1]

    # all experts in one wide, lane-aligned MXU matmul
    y = jnp.dot(h_f32.astype(jnp.bfloat16), w_ref[...],
                preferred_element_type=jnp.float32)                 # [TM, E*Cp]

    # gated combine; bias folded in as VPU broadcast adds (no f32 MXU matmul)
    acc = jnp.zeros((tile_m, c_pad), jnp.float32)
    for e in range(num_experts):
        ge = (sel == e).astype(jnp.float32)                         # [TM, 1] 0/1
        acc = acc + ge * (y[:, e * c_pad:(e + 1) * c_pad] + b_ref[e])
    return acc


# ----------------------------------------------------------------------------
# Fused two-layer MoE-GCN kernel.
#   grid = (2, n_tiles): phase 0 computes x1 row tiles into the VMEM-resident
#   x1 output; phase 1 aggregates the full resident x1 and writes x2 tiles.
# ----------------------------------------------------------------------------
def fused_moe_gcn_kernel(a_ref, x_ref, xt_ref,
                         wg1_ref, w1_ref, b1_ref,
                         wg2_ref, w2_ref, b2_ref,
                         x1_ref, x2_ref,
                         *, num_experts, h_pad, c2_pad, tile_m, a_resident):
    phase = pl.program_id(0)
    i = pl.program_id(1)
    row0 = pl.multiple_of(i * tile_m, tile_m)

    if a_resident:
        a = a_ref[pl.ds(row0, tile_m), :]      # rows of the resident A (bf16)
    else:
        a = a_ref[...]                         # streamed A row tile (bf16)

    @pl.when(phase == 0)
    def _layer1():
        h = jnp.dot(a, x_ref[...], preferred_element_type=jnp.float32)  # [TM, Cin]
        acc = _moe_expert_mix(h, xt_ref[...], wg1_ref, w1_ref, b1_ref,
                              num_experts=num_experts, c_pad=h_pad,
                              tile_m=tile_m)
        x1_ref[pl.ds(row0, tile_m), :] = acc   # stays resident in VMEM

    @pl.when(phase == 1)
    def _layer2():
        x1_all = x1_ref[...].astype(jnp.bfloat16)                        # [N, Hp]
        x1_tile = x1_ref[pl.ds(row0, tile_m), :].astype(jnp.bfloat16)    # [TM, Hp]
        h = jnp.dot(a, x1_all, preferred_element_type=jnp.float32)       # [TM, Hp]
        acc = _moe_expert_mix(h, x1_tile, wg2_ref, w2_ref, b2_ref,
                              num_experts=num_experts, c_pad=c2_pad,
                              tile_m=tile_m)
        x2_ref[...] = acc


# ----------------------------------------------------------------------------
# Wrapper: operand packing, VMEM-aware tiling, pallas_call
# ----------------------------------------------------------------------------
def _pack_experts(w_experts, c_in_pad, c_out_pad):
    """[E, Cin, Cout] -> [Cin_pad, E*Cout_pad] bf16 (one lane-aligned matmul)."""
    e, c_in, c_out = w_experts.shape
    w = jnp.transpose(w_experts, (1, 0, 2))                       # [Cin, E, Cout]
    w = jnp.pad(w, ((0, c_in_pad - c_in), (0, 0), (0, c_out_pad - c_out)))
    return w.reshape(c_in_pad, e * c_out_pad).astype(jnp.bfloat16)


def _pick_tile_m(n, per_row_stream_bytes, budget_bytes):
    """Largest row tile that divides N and keeps double-buffered streamed
    blocks within the remaining VMEM budget."""
    budget_bytes = max(budget_bytes, 2 * 8 * per_row_stream_bytes)
    for tm in (256, 128, 64, 32, 16, 8):
        if n % tm == 0 and 2 * tm * per_row_stream_bytes <= budget_bytes:
            return tm
    return n


def gcn_moe_fused(a_norm_bf16, x, params):
    """Both MoE-GCN layers in one Pallas kernel.  Returns (x1, x2)."""
    n, c_in = x.shape
    p1, p2 = params["conv1"], params["conv2"]
    num_experts, _, hidden = p1["w_experts"].shape
    _, _, c_out = p2["w_experts"].shape
    h_pad = _round_up(hidden, _LANE)
    c2_pad = _round_up(c_out, _LANE)

    # ---- operand packing (all tiny; plain XLA, once per call) ----
    x_bf = x.astype(jnp.bfloat16)
    wg1 = p1["w_gate"].astype(jnp.bfloat16)                                # [Cin, E]
    wg2 = jnp.pad(p2["w_gate"],
                  ((0, h_pad - hidden), (0, 0))).astype(jnp.bfloat16)       # [Hp, E]
    w1 = _pack_experts(p1["w_experts"], c_in, h_pad)                       # [Cin, E*Hp]
    w2 = _pack_experts(p2["w_experts"], h_pad, c2_pad)                     # [Hp, E*C2p]
    b1 = jnp.pad(p1["b_experts"].astype(jnp.float32),
                 ((0, 0), (0, h_pad - hidden)))                            # [E, Hp]
    b2 = jnp.pad(p2["b_experts"].astype(jnp.float32),
                 ((0, 0), (0, c2_pad - c_out)))                            # [E, C2p]

    # ---- VMEM-aware tiling (budget-derived, portable across v5e/v6e/v7x) ----
    a_bytes = n * n * 2
    a_resident = a_bytes <= _A_RESIDENT_MAX_BYTES
    resident = (x_bf.size * 2 + n * h_pad * 4          # x + resident x1 output
                + wg1.size * 2 + w1.size * 2 + b1.size * 4
                + wg2.size * 2 + w2.size * 2 + b2.size * 4)
    if a_resident:
        resident += a_bytes
    per_row_stream = c_in * 2 + c2_pad * 4 + (0 if a_resident else n * 2)
    tile_m = _pick_tile_m(n, per_row_stream, _VMEM_BUDGET_BYTES - resident)
    n_tiles = n // tile_m

    streamed = 2 * tile_m * per_row_stream
    temporaries = 4 * tile_m * num_experts * max(h_pad, c2_pad) * 4
    vmem_limit = int(1.25 * (resident + streamed + temporaries)) + (4 << 20)

    if a_resident:
        a_spec = pl.BlockSpec((n, n), lambda p, i: (0, 0))          # fetched once
    else:
        a_spec = pl.BlockSpec((tile_m, n), lambda p, i: (i, 0))     # streamed

    kernel = functools.partial(
        fused_moe_gcn_kernel, num_experts=num_experts, h_pad=h_pad,
        c2_pad=c2_pad, tile_m=tile_m, a_resident=a_resident)

    x1_pad, x2_pad = pl.pallas_call(
        kernel,
        out_shape=(jax.ShapeDtypeStruct((n, h_pad), jnp.float32),
                   jax.ShapeDtypeStruct((n, c2_pad), jnp.float32)),
        grid=(2, n_tiles),
        in_specs=[
            a_spec,
            pl.BlockSpec((n, c_in), lambda p, i: (0, 0)),                # x resident
            pl.BlockSpec((tile_m, c_in), lambda p, i: ((1 - p) * i, 0)), # x row tile (gating)
            pl.BlockSpec((c_in, num_experts), lambda p, i: (0, 0)),      # gate W1
            pl.BlockSpec((c_in, num_experts * h_pad), lambda p, i: (0, 0)),
            pl.BlockSpec((num_experts, h_pad), lambda p, i: (0, 0)),
            pl.BlockSpec((h_pad, num_experts), lambda p, i: (0, 0)),     # gate W2
            pl.BlockSpec((h_pad, num_experts * c2_pad), lambda p, i: (0, 0)),
            pl.BlockSpec((num_experts, c2_pad), lambda p, i: (0, 0)),
        ],
        out_specs=(
            # x1: constant block index -> resident accumulator, single HBM
            # writeback at kernel end (written in phase 0, read in phase 1).
            pl.BlockSpec((n, h_pad), lambda p, i: (0, 0)),
            # x2: stays on block 0 through phase 0 (never written back early),
            # advances and is written only in phase 1.
            pl.BlockSpec((tile_m, c2_pad), lambda p, i: (p * i, 0)),
        ),
        compiler_params=pltpu.CompilerParams(
            # Phase axis carries the x1 dependency, and phase 1 reads the
            # single-core-resident x1 buffer -> both axes must run
            # sequentially on one TensorCore.
            dimension_semantics=("arbitrary", "arbitrary"),
            vmem_limit_bytes=vmem_limit,
        ),
    )(a_norm_bf16, x_bf, x_bf, wg1, w1, b1, wg2, w2, b2)

    return x1_pad[:, :hidden], x2_pad[:, :c_out]


# ----------------------------------------------------------------------------
# Glue (plain JAX): GCNAdjNorm — dense A_hat = D^{-1/2} (A + A^T + I) D^{-1/2}
# ----------------------------------------------------------------------------
def gcn_adj_norm(edge_index, num_nodes):
    # NOTE: edges are assumed to carry no explicit self-loops (loops are added
    # here before symmetric normalization, matching the previous version).
    src, dst = edge_index[0], edge_index[1]
    a = jnp.zeros((num_nodes, num_nodes), jnp.float32)
    a = a.at[src, dst].set(1.0)
    a = a.at[dst, src].set(1.0)                        # symmetrize
    a = a + jnp.eye(num_nodes, dtype=jnp.float32)      # self-loops
    deg = jnp.sum(a, axis=-1)
    d_inv_sqrt = jnp.where(deg > 0, 1.0 / jnp.sqrt(deg), 0.0)
    return a * d_inv_sqrt[:, None] * d_inv_sqrt[None, :]


# ----------------------------------------------------------------------------
# GCN_moe forward (default flags): two MoE GCN convolutions, fused kernel.
# ----------------------------------------------------------------------------
def gcn_moe_forward(x, pos_edge_index, params):
    n = x.shape[0]
    # NOTE: for repeated forward passes on a fixed graph, build a_norm once
    # outside the step function and call gcn_moe_fused directly — the dense
    # adjacency construction is O(N^2) XLA work that never changes per step.
    a_norm_bf16 = gcn_adj_norm(pos_edge_index, n).astype(jnp.bfloat16)
    x1, x2 = gcn_moe_fused(a_norm_bf16, x, params)
    # dropout=0.0 -> identity; return (x, output1, output2) like the module.
    return x2, x1, x2


def init_params(key, in_channels, hidden_dim, out_channels, num_experts):
    def layer(k, c_in, c_out):
        k1, k2, k3 = jax.random.split(k, 3)
        scale = 1.0 / jnp.sqrt(jnp.float32(c_in))
        return {
            "w_gate": jax.random.normal(k1, (c_in, num_experts), jnp.float32) * scale,
            "w_experts": jax.random.normal(k2, (num_experts, c_in, c_out),
                                           jnp.float32) * scale,
            "b_experts": jax.random.normal(k3, (num_experts, c_out),
                                           jnp.float32) * 0.01,
        }

    k1, k2 = jax.random.split(key, 2)
    return {
        "conv1": layer(k1, in_channels, hidden_dim),
        "conv2": layer(k2, hidden_dim, out_channels),
    }


if __name__ == "__main__":
    # Small shapes consistent with the module's node-feature forward pass.
    N = 512            # number of nodes
    IN_CHANNELS = 16
    HIDDEN_DIM = 128   # module default hidden_dim
    OUT_CHANNELS = 8
    NUM_EXPERTS = 4
    NUM_EDGES = 2048

    key = jax.random.PRNGKey(0)
    kx, ke, kp = jax.random.split(key, 3)

    x = jax.random.normal(kx, (N, IN_CHANNELS), jnp.float32)
    pos_edge_index = jax.random.randint(ke, (2, NUM_EDGES), 0, N, jnp.int32)
    params = init_params(kp, IN_CHANNELS, HIDDEN_DIM, OUT_CHANNELS, NUM_EXPERTS)

    out, out1, out2 = jax.jit(gcn_moe_forward)(x, pos_edge_index, params)
    jax.block_until_ready((out, out1, out2))

    assert out.shape == (N, OUT_CHANNELS)
    assert out1.shape == (N, HIDDEN_DIM)
    assert out2.shape == (N, OUT_CHANNELS)
    print("KERNEL_OK")
</pallas_src>

<mosaic_0001>
module attributes {stable_mosaic.version = 11 : i64} {
  func.func @fused_moe_gcn_kernel(%arg0: i32, %arg1: i32, %arg2: memref<512x512xbf16, #tpu.memory_space<vmem>>, %arg3: memref<512x16xbf16, #tpu.memory_space<vmem>>, %arg4: memref<256x16xbf16, #tpu.memory_space<vmem>>, %arg5: memref<16x4xbf16, #tpu.memory_space<vmem>>, %arg6: memref<16x512xbf16, #tpu.memory_space<vmem>>, %arg7: memref<4x128xf32, #tpu.memory_space<vmem>>, %arg8: memref<128x4xbf16, #tpu.memory_space<vmem>>, %arg9: memref<128x512xbf16, #tpu.memory_space<vmem>>, %arg10: memref<4x128xf32, #tpu.memory_space<vmem>>, %arg11: memref<512x128xf32, #tpu.memory_space<vmem>>, %arg12: memref<256x128xf32, #tpu.memory_space<vmem>>) attributes {dimension_semantics = [#tpu.dimension_semantics<arbitrary>, #tpu.dimension_semantics<arbitrary>], iteration_bounds = array<i64: 2, 2>, scalar_prefetch = 0 : i64, scratch_operands = 0 : i64, tpu.core_type = #tpu.core_type<tc>, window_params = [{pipeline_mode = #tpu.pipeline_mode<synchronous>, transform_indices = @transform_0, window_bounds = array<i64: 512, 512>}, {pipeline_mode = #tpu.pipeline_mode<synchronous>, transform_indices = @transform_1, window_bounds = array<i64: 512, 16>}, {transform_indices = @transform_2, window_bounds = array<i64: 256, 16>}, {pipeline_mode = #tpu.pipeline_mode<synchronous>, transform_indices = @transform_3, window_bounds = array<i64: 16, 4>}, {pipeline_mode = #tpu.pipeline_mode<synchronous>, transform_indices = @transform_4, window_bounds = array<i64: 16, 512>}, {pipeline_mode = #tpu.pipeline_mode<synchronous>, transform_indices = @transform_5, window_bounds = array<i64: 4, 128>}, {pipeline_mode = #tpu.pipeline_mode<synchronous>, transform_indices = @transform_6, window_bounds = array<i64: 128, 4>}, {pipeline_mode = #tpu.pipeline_mode<synchronous>, transform_indices = @transform_7, window_bounds = array<i64: 128, 512>}, {pipeline_mode = #tpu.pipeline_mode<synchronous>, transform_indices = @transform_8, window_bounds = array<i64: 4, 128>}, {pipeline_mode = #tpu.pipeline_mode<synchronous>, transform_indices = @transform_9, window_bounds = array<i64: 512, 128>}, {transform_indices = @transform_10, window_bounds = array<i64: 256, 128>}]} {
    %c256_i32 = arith.constant 256 : i32
    %0 = arith.muli %arg1, %c256_i32 : i32
    %1 = tpu.assume_multiple %0, 256 : i32
    %2 = arith.index_cast %1 : i32 to index
    %c0 = arith.constant 0 : index
    %3 = vector.load %arg2[%2, %c0] : memref<512x512xbf16, #tpu.memory_space<vmem>>, vector<256x512xbf16>
    %c0_i32 = arith.constant 0 : i32
    %4 = arith.cmpi eq, %arg0, %c0_i32 : i32
    %5 = arith.extui %4 : i1 to i32
    %c0_i32_0 = arith.constant 0 : i32
    %6 = arith.cmpi ne, %5, %c0_i32_0 : i32
    scf.if %6 {
      %c0_2 = arith.constant 0 : index
      %c0_3 = arith.constant 0 : index
      %10 = vector.load %arg3[%c0_2, %c0_3] : memref<512x16xbf16, #tpu.memory_space<vmem>>, vector<512x16xbf16>
      %cst = arith.constant dense<0.000000e+00> : vector<256x16xf32>
      %11 = tpu.matmul %3, %10, %cst {dimension_numbers = #tpu.dot_dimension_numbers<[1], [0], [0], [1], [0, 0, 1, 1], [], []>} : vector<256x512xbf16>, vector<512x16xbf16>, vector<256x16xf32> -> vector<256x16xf32>
      %c0_4 = arith.constant 0 : index
      %c0_5 = arith.constant 0 : index
      %12 = vector.load %arg4[%c0_4, %c0_5] : memref<256x16xbf16, #tpu.memory_space<vmem>>, vector<256x16xbf16>
      %c0_6 = arith.constant 0 : index
      %c0_7 = arith.constant 0 : index
      %13 = vector.load %arg5[%c0_6, %c0_7] : memref<16x4xbf16, #tpu.memory_space<vmem>>, vector<16x4xbf16>
      %cst_8 = arith.constant dense<0.000000e+00> : vector<256x4xf32>
      %14 = tpu.matmul %12, %13, %cst_8 {dimension_numbers = #tpu.dot_dimension_numbers<[1], [0], [0], [1], [0, 0, 1, 1], [], []>} : vector<256x16xbf16>, vector<16x4xbf16>, vector<256x4xf32> -> vector<256x4xf32>
      %cst_9 = arith.constant dense<0xFF800000> : vector<256xf32>
      %15 = vector.multi_reduction <maximumf>, %14, %cst_9 [1] : vector<256x4xf32> to vector<256xf32>
      %16 = vector.shape_cast %15 : vector<256xf32> to vector<256x1xf32>
      %17 = tpu.iota {dimensions = array<i32: 1>} : vector<256x4xi32>
      %18 = vector.broadcast %16 : vector<256x1xf32> to vector<256x4xf32>
      %19 = arith.cmpf oge, %14, %18 : vector<256x4xf32>
      %c4_i32 = arith.constant 4 : i32
      %20 = vector.broadcast %c4_i32 : i32 to vector<256x4xi32>
      %21 = arith.select %19, %17, %20 : vector<256x4xi1>, vector<256x4xi32>
      %cst_10 = arith.constant dense<2147483647> : vector<256xi32>
      %22 = vector.multi_reduction <minsi>, %21, %cst_10 [1] : vector<256x4xi32> to vector<256xi32>
      %23 = vector.shape_cast %22 : vector<256xi32> to vector<256x1xi32>
      %24 = arith.truncf %11 : vector<256x16xf32> to vector<256x16xbf16>
      %c0_11 = arith.constant 0 : index
      %c0_12 = arith.constant 0 : index
      %25 = vector.load %arg6[%c0_11, %c0_12] : memref<16x512xbf16, #tpu.memory_space<vmem>>, vector<16x512xbf16>
      %cst_13 = arith.constant dense<0.000000e+00> : vector<256x512xf32>
      %26 = tpu.matmul %24, %25, %cst_13 {dimension_numbers = #tpu.dot_dimension_numbers<[1], [0], [0], [1], [0, 0, 1, 1], [], []>} : vector<256x16xbf16>, vector<16x512xbf16>, vector<256x512xf32> -> vector<256x512xf32>
      %cst_14 = arith.constant 0.000000e+00 : f32
      %27 = vector.broadcast %cst_14 : f32 to vector<256x128xf32>
      %c0_i32_15 = arith.constant 0 : i32
      %28 = vector.broadcast %c0_i32_15 : i32 to vector<256x1xi32>
      %29 = arith.cmpi eq, %23, %28 : vector<256x1xi32>
      %30 = arith.extui %29 : vector<256x1xi1> to vector<256x1xi32>
      %31 = arith.sitofp %30 : vector<256x1xi32> to vector<256x1xf32>
      %32 = vector.extract_strided_slice %26 {offsets = [0, 0], sizes = [256, 128], strides = [1, 1]} : vector<256x512xf32> to vector<256x128xf32>
      %c0_16 = arith.constant 0 : index
      %c0_17 = arith.constant 0 : index
      %33 = vector.load %arg7[%c0_16, %c0_17] : memref<4x128xf32, #tpu.memory_space<vmem>>, vector<1x128xf32>
      %34 = vector.shape_cast %33 : vector<1x128xf32> to vector<128xf32>
      %35 = vector.shape_cast %34 : vector<128xf32> to vector<1x128xf32>
      %36 = vector.broadcast %35 : vector<1x128xf32> to vector<256x128xf32>
      %37 = arith.addf %32, %36 : vector<256x128xf32>
      %38 = vector.broadcast %31 : vector<256x1xf32> to vector<256x128xf32>
      %39 = arith.mulf %38, %37 : vector<256x128xf32>
      %40 = arith.addf %27, %39 : vector<256x128xf32>
      %c1_i32_18 = arith.constant 1 : i32
      %41 = vector.broadcast %c1_i32_18 : i32 to vector<256x1xi32>
      %42 = arith.cmpi eq, %23, %41 : vector<256x1xi32>
      %43 = arith.extui %42 : vector<256x1xi1> to vector<256x1xi32>
      %44 = arith.sitofp %43 : vector<256x1xi32> to vector<256x1xf32>
      %45 = vector.extract_strided_slice %26 {offsets = [0, 128], sizes = [256, 128], strides = [1, 1]} : vector<256x512xf32> to vector<256x128xf32>
      %c1 = arith.constant 1 : index
      %c0_19 = arith.constant 0 : index
      %46 = vector.load %arg7[%c1, %c0_19] : memref<4x128xf32, #tpu.memory_space<vmem>>, vector<1x128xf32>
      %47 = vector.shape_cast %46 : vector<1x128xf32> to vector<128xf32>
      %48 = vector.shape_cast %47 : vector<128xf32> to vector<1x128xf32>
      %49 = vector.broadcast %48 : vector<1x128xf32> to vector<256x128xf32>
      %50 = arith.addf %45, %49 : vector<256x128xf32>
      %51 = vector.broadcast %44 : vector<256x1xf32> to vector<256x128xf32>
      %52 = arith.mulf %51, %50 : vector<256x128xf32>
      %53 = arith.addf %40, %52 : vector<256x128xf32>
      %c2_i32 = arith.constant 2 : i32
      %54 = vector.broadcast %c2_i32 : i32 to vector<256x1xi32>
      %55 = arith.cmpi eq, %23, %54 : vector<256x1xi32>
      %56 = arith.extui %55 : vector<256x1xi1> to vector<256x1xi32>
      %57 = arith.sitofp %56 : vector<256x1xi32> to vector<256x1xf32>
      %58 = vector.extract_strided_slice %26 {offsets = [0, 256], sizes = [256, 128], strides = [1, 1]} : vector<256x512xf32> to vector<256x128xf32>
      %c2 = arith.constant 2 : index
      %c0_20 = arith.constant 0 : index
      %59 = vector.load %arg7[%c2, %c0_20] : memref<4x128xf32, #tpu.memory_space<vmem>>, vector<1x128xf32>
      %60 = vector.shape_cast %59 : vector<1x128xf32> to vector<128xf32>
      %61 = vector.shape_cast %60 : vector<128xf32> to vector<1x128xf32>
      %62 = vector.broadcast %61 : vector<1x128xf32> to vector<256x128xf32>
      %63 = arith.addf %58, %62 : vector<256x128xf32>
      %64 = vector.broadcast %57 : vector<256x1xf32> to vector<256x128xf32>
      %65 = arith.mulf %64, %63 : vector<256x128xf32>
      %66 = arith.addf %53, %65 : vector<256x128xf32>
      %c3_i32 = arith.constant 3 : i32
      %67 = vector.broadcast %c3_i32 : i32 to vector<256x1xi32>
      %68 = arith.cmpi eq, %23, %67 : vector<256x1xi32>
      %69 = arith.extui %68 : vector<256x1xi1> to vector<256x1xi32>
      %70 = arith.sitofp %69 : vector<256x1xi32> to vector<256x1xf32>
      %71 = vector.extract_strided_slice %26 {offsets = [0, 384], sizes = [256, 128], strides = [1, 1]} : vector<256x512xf32> to vector<256x128xf32>
      %c3 = arith.constant 3 : index
      %c0_21 = arith.constant 0 : index
      %72 = vector.load %arg7[%c3, %c0_21] : memref<4x128xf32, #tpu.memory_space<vmem>>, vector<1x128xf32>
      %73 = vector.shape_cast %72 : vector<1x128xf32> to vector<128xf32>
      %74 = vector.shape_cast %73 : vector<128xf32> to vector<1x128xf32>
      %75 = vector.broadcast %74 : vector<1x128xf32> to vector<256x128xf32>
      %76 = arith.addf %71, %75 : vector<256x128xf32>
      %77 = vector.broadcast %70 : vector<256x1xf32> to vector<256x128xf32>
      %78 = arith.mulf %77, %76 : vector<256x128xf32>
      %79 = arith.addf %66, %78 : vector<256x128xf32>
      %80 = arith.index_cast %1 : i32 to index
      %c0_22 = arith.constant 0 : index
      %81 = vector.load %arg11[%80, %c0_22] : memref<512x128xf32, #tpu.memory_space<vmem>>, vector<256x128xf32>
      tpu.vector_store %arg11[%80, %c0_22], %79 {strides = array<i32>} : memref<512x128xf32, #tpu.memory_space<vmem>>, vector<256x128xf32>,
    } else {
    }
    %c1_i32 = arith.constant 1 : i32
    %7 = arith.cmpi eq, %arg0, %c1_i32 : i32
    %8 = arith.extui %7 : i1 to i32
    %c0_i32_1 = arith.constant 0 : i32
    %9 = arith.cmpi ne, %8, %c0_i32_1 : i32
    scf.if %9 {
      %c0_2 = arith.constant 0 : index
      %c0_3 = arith.constant 0 : index
      %10 = vector.load %arg11[%c0_2, %c0_3] : memref<512x128xf32, #tpu.memory_space<vmem>>, vector<512x128xf32>
      %11 = arith.truncf %10 : vector<512x128xf32> to vector<512x128xbf16>
      %12 = arith.index_cast %1 : i32 to index
      %c0_4 = arith.constant 0 : index
      %13 = vector.load %arg11[%12, %c0_4] : memref<512x128xf32, #tpu.memory_space<vmem>>, vector<256x128xf32>
      %14 = arith.truncf %13 : vector<256x128xf32> to vector<256x128xbf16>
      %cst = arith.constant dense<0.000000e+00> : vector<256x128xf32>
      %15 = tpu.matmul %3, %11, %cst {dimension_numbers = #tpu.dot_dimension_numbers<[1], [0], [0], [1], [0, 0, 1, 1], [], []>} : vector<256x512xbf16>, vector<512x128xbf16>, vector<256x128xf32> -> vector<256x128xf32>
      %c0_5 = arith.constant 0 : index
      %c0_6 = arith.constant 0 : index
      %16 = vector.load %arg8[%c0_5, %c0_6] : memref<128x4xbf16, #tpu.memory_space<vmem>>, vector<128x4xbf16>
      %cst_7 = arith.constant dense<0.000000e+00> : vector<256x4xf32>
      %17 = tpu.matmul %14, %16, %cst_7 {dimension_numbers = #tpu.dot_dimension_numbers<[1], [0], [0], [1], [0, 0, 1, 1], [], []>} : vector<256x128xbf16>, vector<128x4xbf16>, vector<256x4xf32> -> vector<256x4xf32>
      %cst_8 = arith.constant dense<0xFF800000> : vector<256xf32>
      %18 = vector.multi_reduction <maximumf>, %17, %cst_8 [1] : vector<256x4xf32> to vector<256xf32>
      %19 = vector.shape_cast %18 : vector<256xf32> to vector<256x1xf32>
      %20 = tpu.iota {dimensions = array<i32: 1>} : vector<256x4xi32>
      %21 = vector.broadcast %19 : vector<256x1xf32> to vector<256x4xf32>
      %22 = arith.cmpf oge, %17, %21 : vector<256x4xf32>
      %c4_i32 = arith.constant 4 : i32
      %23 = vector.broadcast %c4_i32 : i32 to vector<256x4xi32>
      %24 = arith.select %22, %20, %23 : vector<256x4xi1>, vector<256x4xi32>
      %cst_9 = arith.constant dense<2147483647> : vector<256xi32>
      %25 = vector.multi_reduction <minsi>, %24, %cst_9 [1] : vector<256x4xi32> to vector<256xi32>
      %26 = vector.shape_cast %25 : vector<256xi32> to vector<256x1xi32>
      %27 = arith.truncf %15 : vector<256x128xf32> to vector<256x128xbf16>
      %c0_10 = arith.constant 0 : index
      %c0_11 = arith.constant 0 : index
      %28 = vector.load %arg9[%c0_10, %c0_11] : memref<128x512xbf16, #tpu.memory_space<vmem>>, vector<128x512xbf16>
      %cst_12 = arith.constant dense<0.000000e+00> : vector<256x512xf32>
      %29 = tpu.matmul %27, %28, %cst_12 {dimension_numbers = #tpu.dot_dimension_numbers<[1], [0], [0], [1], [0, 0, 1, 1], [], []>} : vector<256x128xbf16>, vector<128x512xbf16>, vector<256x512xf32> -> vector<256x512xf32>
      %cst_13 = arith.constant 0.000000e+00 : f32
      %30 = vector.broadcast %cst_13 : f32 to vector<256x128xf32>
      %c0_i32_14 = arith.constant 0 : i32
      %31 = vector.broadcast %c0_i32_14 : i32 to vector<256x1xi32>
      %32 = arith.cmpi eq, %26, %31 : vector<256x1xi32>
      %33 = arith.extui %32 : vector<256x1xi1> to vector<256x1xi32>
      %34 = arith.sitofp %33 : vector<256x1xi32> to vector<256x1xf32>
      %35 = vector.extract_strided_slice %29 {offsets = [0, 0], sizes = [256, 128], strides = [1, 1]} : vector<256x512xf32> to vector<256x128xf32>
      %c0_15 = arith.constant 0 : index
      %c0_16 = arith.constant 0 : index
      %36 = vector.load %arg10[%c0_15, %c0_16] : memref<4x128xf32, #tpu.memory_space<vmem>>, vector<1x128xf32>
      %37 = vector.shape_cast %36 : vector<1x128xf32> to vector<128xf32>
      %38 = vector.shape_cast %37 : vector<128xf32> to vector<1x128xf32>
      %39 = vector.broadcast %38 : vector<1x128xf32> to vector<256x128xf32>
      %40 = arith.addf %35, %39 : vector<256x128xf32>
      %41 = vector.broadcast %34 : vector<256x1xf32> to vector<256x128xf32>
      %42 = arith.mulf %41, %40 : vector<256x128xf32>
      %43 = arith.addf %30, %42 : vector<256x128xf32>
      %c1_i32_17 = arith.constant 1 : i32
      %44 = vector.broadcast %c1_i32_17 : i32 to vector<256x1xi32>
      %45 = arith.cmpi eq, %26, %44 : vector<256x1xi32>
      %46 = arith.extui %45 : vector<256x1xi1> to vector<256x1xi32>
      %47 = arith.sitofp %46 : vector<256x1xi32> to vector<256x1xf32>
      %48 = vector.extract_strided_slice %29 {offsets = [0, 128], sizes = [256, 128], strides = [1, 1]} : vector<256x512xf32> to vector<256x128xf32>
      %c1 = arith.constant 1 : index
      %c0_18 = arith.constant 0 : index
      %49 = vector.load %arg10[%c1, %c0_18] : memref<4x128xf32, #tpu.memory_space<vmem>>, vector<1x128xf32>
      %50 = vector.shape_cast %49 : vector<1x128xf32> to vector<128xf32>
      %51 = vector.shape_cast %50 : vector<128xf32> to vector<1x128xf32>
      %52 = vector.broadcast %51 : vector<1x128xf32> to vector<256x128xf32>
      %53 = arith.addf %48, %52 : vector<256x128xf32>
      %54 = vector.broadcast %47 : vector<256x1xf32> to vector<256x128xf32>
      %55 = arith.mulf %54, %53 : vector<256x128xf32>
      %56 = arith.addf %43, %55 : vector<256x128xf32>
      %c2_i32 = arith.constant 2 : i32
      %57 = vector.broadcast %c2_i32 : i32 to vector<256x1xi32>
      %58 = arith.cmpi eq, %26, %57 : vector<256x1xi32>
      %59 = arith.extui %58 : vector<256x1xi1> to vector<256x1xi32>
      %60 = arith.sitofp %59 : vector<256x1xi32> to vector<256x1xf32>
      %61 = vector.extract_strided_slice %29 {offsets = [0, 256], sizes = [256, 128], strides = [1, 1]} : vector<256x512xf32> to vector<256x128xf32>
      %c2 = arith.constant 2 : index
      %c0_19 = arith.constant 0 : index
      %62 = vector.load %arg10[%c2, %c0_19] : memref<4x128xf32, #tpu.memory_space<vmem>>, vector<1x128xf32>
      %63 = vector.shape_cast %62 : vector<1x128xf32> to vector<128xf32>
      %64 = vector.shape_cast %63 : vector<128xf32> to vector<1x128xf32>
      %65 = vector.broadcast %64 : vector<1x128xf32> to vector<256x128xf32>
      %66 = arith.addf %61, %65 : vector<256x128xf32>
      %67 = vector.broadcast %60 : vector<256x1xf32> to vector<256x128xf32>
      %68 = arith.mulf %67, %66 : vector<256x128xf32>
      %69 = arith.addf %56, %68 : vector<256x128xf32>
      %c3_i32 = arith.constant 3 : i32
      %70 = vector.broadcast %c3_i32 : i32 to vector<256x1xi32>
      %71 = arith.cmpi eq, %26, %70 : vector<256x1xi32>
      %72 = arith.extui %71 : vector<256x1xi1> to vector<256x1xi32>
      %73 = arith.sitofp %72 : vector<256x1xi32> to vector<256x1xf32>
      %74 = vector.extract_strided_slice %29 {offsets = [0, 384], sizes = [256, 128], strides = [1, 1]} : vector<256x512xf32> to vector<256x128xf32>
      %c3 = arith.constant 3 : index
      %c0_20 = arith.constant 0 : index
      %75 = vector.load %arg10[%c3, %c0_20] : memref<4x128xf32, #tpu.memory_space<vmem>>, vector<1x128xf32>
      %76 = vector.shape_cast %75 : vector<1x128xf32> to vector<128xf32>
      %77 = vector.shape_cast %76 : vector<128xf32> to vector<1x128xf32>
      %78 = vector.broadcast %77 : vector<1x128xf32> to vector<256x128xf32>
      %79 = arith.addf %74, %78 : vector<256x128xf32>
      %80 = vector.broadcast %73 : vector<256x1xf32> to vector<256x128xf32>
      %81 = arith.mulf %80, %79 : vector<256x128xf32>
      %82 = arith.addf %69, %81 : vector<256x128xf32>
      %c0_21 = arith.constant 0 : index
      %c0_22 = arith.constant 0 : index
      %83 = vector.load %arg12[%c0_21, %c0_22] : memref<256x128xf32, #tpu.memory_space<vmem>>, vector<256x128xf32>
      tpu.vector_store %arg12[%c0_21, %c0_22], %82 {strides = array<i32>} : memref<256x128xf32, #tpu.memory_space<vmem>>, vector<256x128xf32>,
    } else {
    }
    return
  }
  func.func @transform_0(%arg0: i32, %arg1: i32) -> (i32, i32) {
    %c0_i32 = arith.constant 0 : i32
    %c0_i32_0 = arith.constant 0 : i32
    %c0_i32_1 = arith.constant 0 : i32
    return %c0_i32, %c0_i32_0 : i32, i32
  }
  func.func @transform_1(%arg0: i32, %arg1: i32) -> (i32, i32) {
    %c0_i32 = arith.constant 0 : i32
    %c0_i32_0 = arith.constant 0 : i32
    %c0_i32_1 = arith.constant 0 : i32
    return %c0_i32, %c0_i32_0 : i32, i32
  }
  func.func @transform_2(%arg0: i32, %arg1: i32) -> (i32, i32) {
    %c1_i32 = arith.constant 1 : i32
    %0 = arith.subi %c1_i32, %arg0 : i32
    %1 = arith.muli %0, %arg1 : i32
    %c0_i32 = arith.constant 0 : i32
    %c0_i32_0 = arith.constant 0 : i32
    return %1, %c0_i32 : i32, i32
  }
  func.func @transform_3(%arg0: i32, %arg1: i32) -> (i32, i32) {
    %c0_i32 = arith.constant 0 : i32
    %c0_i32_0 = arith.constant 0 : i32
    %c0_i32_1 = arith.constant 0 : i32
    return %c0_i32, %c0_i32_0 : i32, i32
  }
  func.func @transform_4(%arg0: i32, %arg1: i32) -> (i32, i32) {
    %c0_i32 = arith.constant 0 : i32
    %c0_i32_0 = arith.constant 0 : i32
    %c0_i32_1 = arith.constant 0 : i32
    return %c0_i32, %c0_i32_0 : i32, i32
  }
  func.func @transform_5(%arg0: i32, %arg1: i32) -> (i32, i32) {
    %c0_i32 = arith.constant 0 : i32
    %c0_i32_0 = arith.constant 0 : i32
    %c0_i32_1 = arith.constant 0 : i32
    return %c0_i32, %c0_i32_0 : i32, i32
  }
  func.func @transform_6(%arg0: i32, %arg1: i32) -> (i32, i32) {
    %c0_i32 = arith.constant 0 : i32
    %c0_i32_0 = arith.constant 0 : i32
    %c0_i32_1 = arith.constant 0 : i32
    return %c0_i32, %c0_i32_0 : i32, i32
  }
  func.func @transform_7(%arg0: i32, %arg1: i32) -> (i32, i32) {
    %c0_i32 = arith.constant 0 : i32
    %c0_i32_0 = arith.constant 0 : i32
    %c0_i32_1 = arith.constant 0 : i32
    return %c0_i32, %c0_i32_0 : i32, i32
  }
  func.func @transform_8(%arg0: i32, %arg1: i32) -> (i32, i32) {
    %c0_i32 = arith.constant 0 : i32
    %c0_i32_0 = arith.constant 0 : i32
    %c0_i32_1 = arith.constant 0 : i32
    return %c0_i32, %c0_i32_0 : i32, i32
  }
  func.func @transform_9(%arg0: i32, %arg1: i32) -> (i32, i32) {
    %c0_i32 = arith.constant 0 : i32
    %c0_i32_0 = arith.constant 0 : i32
    %c0_i32_1 = arith.constant 0 : i32
    return %c0_i32, %c0_i32_0 : i32, i32
  }
  func.func @transform_10(%arg0: i32, %arg1: i32) -> (i32, i32) {
    %0 = arith.muli %arg0, %arg1 : i32
    %c0_i32 = arith.constant 0 : i32
    %c0_i32_0 = arith.constant 0 : i32
    return %0, %c0_i32 : i32, i32
  }
}

</mosaic_0001>

<bundles_post_ra>
// kernel: gcn_moe_forward.1
= control target key start
LH: loop header
LB: loop body
LE: loop exit
PB: predicated region body
PF: predicated region fallthrough
CT: control target
= control target key end

     0   :  { %16 = vsyncpa [#allocation3], 0  ;;  %s8269_s13 = smov 0   ;;  %s8271_s14 = smov 0   ;;  %s13038_s0 = inlined_call_operand.vmem [shape: bf16[512,512], index: 0, kind: input, shape index: {}]   ;;  %s13039_s1 = inlined_call_operand.vmem [shape: bf16[512,16], index: 1, kind: input, shape index: {}, may-alias: {1,2}]   ;;  %s13040_s2 = inlined_call_operand.vmem [shape: bf16[512,16], index: 2, kind: input, shape index: {}, may-alias: {1,2}]   ;;  %s13041_s3 = inlined_call_operand.vmem [shape: bf16[16,4], index: 3, kind: input, shape index: {}]   ;;  %s13042_s4 = inlined_call_operand.vmem [shape: bf16[16,512], index: 4, kind: input, shape index: {}]   ;;  %s13043_s5 = inlined_call_operand.vmem [shape: f32[4,128], index: 5, kind: input, shape index: {}]   ;;  %s13044_s6 = inlined_call_operand.vmem [shape: bf16[128,4], index: 6, kind: input, shape index: {}]   ;;  %s13045_s7 = inlined_call_operand.vmem [shape: bf16[128,512], index: 7, kind: input, shape index: {}]   ;;  %s13046_s8 = inlined_call_operand.vmem [shape: f32[4,128], index: 8, kind: input, shape index: {}]   ;;  %s13047_s9 = inlined_call_operand.hbm [shape: f32[512,128], index: 9, kind: output, shape index: {0}]   ;;  %s13048_s10 = inlined_call_operand.vmem [shape: f32[512,128], index: 10, kind: output, shape index: {1}]  }
   0x1   :  { %s8273_s15 = smov 0   ;;  %s8275_s16 = smov 0  }
   0x2   :  { %s8277_s17 = smov 0  }
   0x3 LB: > { %s6810_s18 = sadd.s32 4294967295, %s8205_s17   ;;  %s31_s19 = sadd.s32 1, %s8197_s15  ;;  %s8205_s17 = sphi %s8277_s17, %s22_s17   ;;  %s8201_s16 = sphi %s8275_s16, %s14336_s16   ;;  %s8197_s15 = sphi %s8273_s15, %s14335_s15   ;;  %s8193_s14 = sphi %s8271_s14, %s14334_s14   ;;  %s8189_s13 = sphi %s8269_s13, %s14333_s13  }
   0x4   : > { %p32_p0 = scmp.ge.s32.totalorder %s31_s19, 2  ;;  %s34_s20 = sadd.s32 1, %s8201_s16 }
   0x5   : > { %p6814_p1 = scmp.ge.s32.totalorder %s8205_s17, 1  ;;  %p334_p2 = scmp.lt.s32.totalorder %s8205_s17, 5 }
   0x6   : > { %s14338_s19 = smov (%p32_p0, %s31_s19), 0  ;;  %s14340_s20 = smov (!%p32_p0, %s34_s20), %s8201_s16 }
   0x7   : > { %p335_p3 = pnand %p6814_p1, %p334_p2  ;;  %p36_p4 = scmp.ge.s32.totalorder %s14340_s20, 2 }
   0x9   : > { %s14342_s20 = smov (%p36_p4, %s14340_s20), 0  ;;  %338 = sbr.rel (%p335_p3) target bundleno = 1942 (0x796), region = 56 }
  0x10   : > { %s375_s21 = ssub.s32 1, %s8193_s14  ;;  %s385_s22 = smul.u32 %s8189_s13, %s8193_s14 }
  0x11   : > { %s376_s23 = smul.u32 %s8189_s13, %s375_s21  ;;  %s8304_s24 = sshll.u32 %s8189_s13, 8 }
  0x12   : > { %s6817_s25 = sshll.u32 %s385_s22, 5  ;;  %s395_s26 = sshra.s32 %s8304_s24, 3 }
  0x13   : > { %s6815_s27 = sshll.u32 %s376_s23, 5  ;;  %p387_p5 = scmp.lt.s32.totalorder %s6817_s25, 63 }
  0x14   : > { %p378_p6 = scmp.lt.s32.totalorder %s6815_s27, 63  ;;  %s7361_s28 = sshll.u32 %s395_s26, 4 }
  0x15   : > { %s14344_s25 = smov (!%p387_p5, %s6817_s25), 63  ;;  %s8310_s12 = scalar_lea.vmem %s13038_s0, %s7361_s28 }
  0x16   : > { %s14346_s27 = smov (!%p378_p6, %s6815_s27), 63  ;;  %s6818_s29 = sshll.u32 %s14344_s25, 3  ;;  %v8318_v0 = vld [vmem:[%s8310_s12] sm:$0xff]  ;;  %v8321_v1 = vld [vmem:[%s8310_s12 + $0x8] sm:$0xff]  ;;  %v8324_v2 = vld [vmem:[%s8310_s12 + $0x10] sm:$0xff] }
  0x17   : > { %s6816_s13 = sshll.u32 %s14346_s27, 2  ;;  %s8315_s23 = scalar_lea.vmem %s13048_s10, %s6818_s29  ;;  %13205 = vst [vmem:[#allocation5_spill] sm:$0xff] %v8318_v0  ;;  %13206 = vst [vmem:[#allocation6_spill] sm:$0xff] %v8321_v1  ;;  %v8332_v3 = vld [vmem:[%s8310_s12 + $0x18] sm:$0xff]  ;;  %v8335_v4 = vld [vmem:[%s8310_s12 + $0x20] sm:$0xff] }
  0x18   : > { %13207 = vst [vmem:[#allocation7_spill] sm:$0xff] %v8324_v2  ;;  %s8329_s27 = scalar_lea.vmem %s13040_s2, %s6816_s13  ;;  %13208 = vst [vmem:[#allocation8_spill] sm:$0xff] %v8332_v3  ;;  %v8338_v5 = vld [vmem:[%s8310_s12 + $0x28] sm:$0xff]  ;;  %v8341_v6 = vld [vmem:[%s8310_s12 + $0x30] sm:$0xff]  ;;  %p6822_p7 = scmp.ne.s32.totalorder %s8193_s14, 0 }
  0x19   : > { %13209 = vst [vmem:[#allocation9_spill] sm:$0xff] %v8335_v4  ;;  %13210 = vst [vmem:[#allocation10_spill] sm:$0xff] %v8338_v5  ;;  %v8344_v7 = vld [vmem:[%s8310_s12 + $0x38] sm:$0xff]  ;;  %v8347_v8 = vld [vmem:[%s8310_s12 + $0x40] sm:$0xff] }
  0x1a   : > { %13211 = vst [vmem:[#allocation11_spill] sm:$0xff] %v8341_v6  ;;  %13212 = vst [vmem:[#allocation12_spill] sm:$0xff] %v8344_v7  ;;  %v8350_v9 = vld [vmem:[%s8310_s12 + $0x48] sm:$0xff]  ;;  %v8353_v10 = vld [vmem:[%s8310_s12 + $0x50] sm:$0xff] }
  0x1b   : > { %13213 = vst [vmem:[#allocation13_spill] sm:$0xff] %v8347_v8  ;;  %13214 = vst [vmem:[#allocation14_spill] sm:$0xff] %v8350_v9  ;;  %v8356_v11 = vld [vmem:[%s8310_s12 + $0x58] sm:$0xff]  ;;  %v8359_v12 = vld [vmem:[%s8310_s12 + $0x60] sm:$0xff] }
  0x1c   : > { %13215 = vst [vmem:[#allocation15_spill] sm:$0xff] %v8353_v10  ;;  %13216 = vst [vmem:[#allocation16_spill] sm:$0xff] %v8356_v11  ;;  %v8362_v13 = vld [vmem:[%s8310_s12 + $0x68] sm:$0xff]  ;;  %v8365_v14 = vld [vmem:[%s8310_s12 + $0x70] sm:$0xff] }
  0x1d   : > { %13217 = vst [vmem:[#allocation17_spill] sm:$0xff] %v8359_v12  ;;  %13218 = vst [vmem:[#allocation18_spill] sm:$0xff] %v8362_v13  ;;  %v8368_v15 = vld [vmem:[%s8310_s12 + $0x78] sm:$0xff]  ;;  %v8371_v16 = vld [vmem:[%s8310_s12 + $0x80] sm:$0xff] }
  0x1e   : > { %13219 = vst [vmem:[#allocation19_spill] sm:$0xff] %v8365_v14  ;;  %13220 = vst [vmem:[#allocation20_spill] sm:$0xff] %v8368_v15  ;;  %v8374_v17 = vld [vmem:[%s8310_s12 + $0x88] sm:$0xff]  ;;  %v8377_v18 = vld [vmem:[%s8310_s12 + $0x90] sm:$0xff] }
  0x1f   : > { %13221 = vst [vmem:[#allocation21_spill] sm:$0xff] %v8371_v16  ;;  %13222 = vst [vmem:[#allocation22_spill] sm:$0xff] %v8374_v17  ;;  %v8380_v19 = vld [vmem:[%s8310_s12 + $0x98] sm:$0xff]  ;;  %v8383_v20 = vld [vmem:[%s8310_s12 + $0xa0] sm:$0xff] }
  0x20   : > { %13223 = vst [vmem:[#allocation23_spill] sm:$0xff] %v8377_v18  ;;  %13224 = vst [vmem:[#allocation24_spill] sm:$0xff] %v8380_v19  ;;  %v8386_v21 = vld [vmem:[%s8310_s12 + $0xa8] sm:$0xff]  ;;  %v8389_v22 = vld [vmem:[%s8310_s12 + $0xb0] sm:$0xff] }
  0x21   : > { %13225 = vst [vmem:[#allocation25_spill] sm:$0xff] %v8383_v20  ;;  %13226 = vst [vmem:[#allocation26_spill] sm:$0xff] %v8386_v21  ;;  %v8392_v23 = vld [vmem:[%s8310_s12 + $0xb8] sm:$0xff]  ;;  %v8395_v24 = vld [vmem:[%s8310_s12 + $0xc0] sm:$0xff] }
  0x22   : > { %13227 = vst [vmem:[#allocation27_spill] sm:$0xff] %v8389_v22  ;;  %13228 = vst [vmem:[#allocation28_spill] sm:$0xff] %v8392_v23  ;;  %v8398_v25 = vld [vmem:[%s8310_s12 + $0xc8] sm:$0xff]  ;;  %v8401_v26 = vld [vmem:[%s8310_s12 + $0xd0] sm:$0xff] }
  0x23   : > { %13229 = vst [vmem:[#allocation29_spill] sm:$0xff] %v8395_v24  ;;  %13230 = vst [vmem:[#allocation30_spill] sm:$0xff] %v8398_v25  ;;  %v8404_v27 = vld [vmem:[%s8310_s12 + $0xd8] sm:$0xff]  ;;  %v8407_v28 = vld [vmem:[%s8310_s12 + $0xe0] sm:$0xff] }
  0x24   : > { %13231 = vst [vmem:[#allocation31_spill] sm:$0xff] %v8401_v26  ;;  %13232 = vst [vmem:[#allocation32_spill] sm:$0xff] %v8404_v27  ;;  %v8410_v29 = vld [vmem:[%s8310_s12 + $0xe8] sm:$0xff]  ;;  %v8413_v30 = vld [vmem:[%s8310_s12 + $0xf0] sm:$0xff] }
  0x25   : > { %13233 = vst [vmem:[#allocation33_spill] sm:$0xff] %v8407_v28  ;;  %13234 = vst [vmem:[#allocation34_spill] sm:$0xff] %v8410_v29  ;;  %v8416_v31 = vld [vmem:[%s8310_s12 + $0xf8] sm:$0xff]  ;;  %v8419_v32 = vld [vmem:[%s8310_s12 + $0x100] sm:$0xff] }
  0x26   : > { %13235 = vst [vmem:[#allocation35_spill] sm:$0xff] %v8413_v30  ;;  %13236 = vst [vmem:[#allocation36_spill] sm:$0xff] %v8416_v31  ;;  %v8422_v33 = vld [vmem:[%s8310_s12 + $0x108] sm:$0xff]  ;;  %v8425_v34 = vld [vmem:[%s8310_s12 + $0x110] sm:$0xff] }
  0x27   : > { %13237 = vst [vmem:[#allocation37_spill] sm:$0xff] %v8419_v32  ;;  %13238 = vst [vmem:[#allocation38_spill] sm:$0xff] %v8422_v33  ;;  %v8428_v35 = vld [vmem:[%s8310_s12 + $0x118] sm:$0xff]  ;;  %v8431_v36 = vld [vmem:[%s8310_s12 + $0x120] sm:$0xff] }
  0x28   : > { %13239 = vst [vmem:[#allocation39_spill] sm:$0xff] %v8425_v34  ;;  %13240 = vst [vmem:[#allocation40_spill] sm:$0xff] %v8428_v35  ;;  %v8434_v37 = vld [vmem:[%s8310_s12 + $0x128] sm:$0xff]  ;;  %v8437_v38 = vld [vmem:[%s8310_s12 + $0x130] sm:$0xff] }
  0x29   : > { %13241 = vst [vmem:[#allocation41_spill] sm:$0xff] %v8431_v36  ;;  %13242 = vst [vmem:[#allocation42_spill] sm:$0xff] %v8434_v37  ;;  %v8440_v39 = vld [vmem:[%s8310_s12 + $0x138] sm:$0xff]  ;;  %v8443_v40 = vld [vmem:[%s8310_s12 + $0x140] sm:$0xff] }
  0x2a   : > { %13243 = vst [vmem:[#allocation43_spill] sm:$0xff] %v8437_v38  ;;  %13244 = vst [vmem:[#allocation44_spill] sm:$0xff] %v8440_v39  ;;  %v8446_v41 = vld [vmem:[%s8310_s12 + $0x148] sm:$0xff]  ;;  %v8449_v42 = vld [vmem:[%s8310_s12 + $0x150] sm:$0xff] }
  0x2b   : > { %13245 = vst [vmem:[#allocation45_spill] sm:$0xff] %v8443_v40  ;;  %13246 = vst [vmem:[#allocation46_spill] sm:$0xff] %v8446_v41  ;;  %v8452_v43 = vld [vmem:[%s8310_s12 + $0x158] sm:$0xff]  ;;  %v8455_v44 = vld [vmem:[%s8310_s12 + $0x160] sm:$0xff] }
  0x2c   : > { %13247 = vst [vmem:[#allocation47_spill] sm:$0xff] %v8449_v42  ;;  %13248 = vst [vmem:[#allocation48_spill] sm:$0xff] %v8452_v43  ;;  %v8458_v45 = vld [vmem:[%s8310_s12 + $0x168] sm:$0xff]  ;;  %v8461_v46 = vld [vmem:[%s8310_s12 + $0x170] sm:$0xff] }
  0x2d   : > { %13249 = vst [vmem:[#allocation49_spill] sm:$0xff] %v8455_v44  ;;  %13250 = vst [vmem:[#allocation50_spill] sm:$0xff] %v8458_v45  ;;  %v8464_v47 = vld [vmem:[%s8310_s12 + $0x178] sm:$0xff]  ;;  %v8467_v48 = vld [vmem:[%s8310_s12 + $0x180] sm:$0xff] }
  0x2e   : > { %13251 = vst [vmem:[#allocation51_spill] sm:$0xff] %v8461_v46  ;;  %13252 = vst [vmem:[#allocation52_spill] sm:$0xff] %v8464_v47  ;;  %v8470_v49 = vld [vmem:[%s8310_s12 + $0x188] sm:$0xff]  ;;  %v8473_v50 = vld [vmem:[%s8310_s12 + $0x190] sm:$0xff] }
  0x2f   : > { %13253 = vst [vmem:[#allocation53_spill] sm:$0xff] %v8467_v48  ;;  %13254 = vst [vmem:[#allocation54_spill] sm:$0xff] %v8470_v49  ;;  %v8476_v51 = vld [vmem:[%s8310_s12 + $0x198] sm:$0xff]  ;;  %v8479_v52 = vld [vmem:[%s8310_s12 + $0x1a0] sm:$0xff] }
  0x30   : > { %13255 = vst [vmem:[#allocation55_spill] sm:$0xff] %v8473_v50  ;;  %13256 = vst [vmem:[#allocation56_spill] sm:$0xff] %v8476_v51  ;;  %v8482_v53 = vld [vmem:[%s8310_s12 + $0x1a8] sm:$0xff]  ;;  %v8485_v54 = vld [vmem:[%s8310_s12 + $0x1b0] sm:$0xff]  ;;  %467 = sbr.rel (%p6822_p7) target bundleno = 980 (0x3d4), region = 60 }
  0x31   : > { %13257 = vst [vmem:[#allocation57_spill] sm:$0xff] %v8479_v52  ;;  %13258 = vst [vmem:[#allocation58_spill] sm:$0xff] %v8482_v53  ;;  %v8488_v55 = vld [vmem:[%s8310_s12 + $0x1b8] sm:$0xff]  ;;  %v8491_v56 = vld [vmem:[%s8310_s12 + $0x1c0] sm:$0xff] }
  0x32   : > { %13259 = vst [vmem:[#allocation59_spill] sm:$0xff] %v8485_v54  ;;  %13260 = vst [vmem:[#allocation60_spill] sm:$0xff] %v8488_v55  ;;  %v8494_v57 = vld [vmem:[%s8310_s12 + $0x1c8] sm:$0xff]  ;;  %v8497_v58 = vld [vmem:[%s8310_s12 + $0x1d0] sm:$0xff] }
  0x33   : > { %13261 = vst [vmem:[#allocation61_spill] sm:$0xff] %v8491_v56  ;;  %13262 = vst [vmem:[#allocation62_spill] sm:$0xff] %v8494_v57  ;;  %v8500_v59 = vld [vmem:[%s8310_s12 + $0x1d8] sm:$0xff]  ;;  %v8503_v60 = vld [vmem:[%s8310_s12 + $0x1e0] sm:$0xff] }
  0x34   : > { %13263 = vst [vmem:[#allocation63_spill] sm:$0xff] %v8497_v58  ;;  %13264 = vst [vmem:[#allocation64_spill] sm:$0xff] %v8500_v59  ;;  %v8506_v61 = vld [vmem:[%s8310_s12 + $0x1e8] sm:$0xff]  ;;  %v8509_v62 = vld [vmem:[%s8310_s12 + $0x1f0] sm:$0xff] }
  0x35   : > { %13265 = vst [vmem:[#allocation65_spill] sm:$0xff] %v8503_v60  ;;  %13266 = vst [vmem:[#allocation66_spill] sm:$0xff] %v8506_v61  ;;  %v8512_v63 = vld [vmem:[%s8310_s12 + $0x1f8] sm:$0xff] }
  0x36   : > { %13267 = vst [vmem:[#allocation67_spill] sm:$0xff] %v8509_v62  ;;  %13268 = vst [vmem:[#allocation68_spill] sm:$0xff] %v8512_v63 }
  0x37   : > { %v8018_v53 = vld [vmem:[%s13039_s1 + $0x40] sm:$0xff]   ;;  %v6824_v59 = vcombine.high %v8318_v0, %v8324_v2  ;;  %v6872_v61 = vcombine.high %v8467_v48, %v8473_v50  ;;  %v8020_v63 = vld [vmem:[%s13039_s1 + $0x48] sm:$0xff]   ;;  %v8022_v49 = vld [vmem:[%s13039_s1 + $0x50] sm:$0xff]   ;;  %v6828_v51 = vcombine.high %v8335_v4, %v8341_v6  ;;  %vm1486_vm0 = vcmask 130048   ;;  %s10393_s29 = scalar_lea.vmem [#allocation2], %s8304_s24 }
  0x38   : > { %v8019_v57 = vld [vmem:[%s13039_s1] sm:$0xff]   ;;  %7362 = vmatprep.subr.bf16.mxu0 %v8018_v53  ;;  %7933 = vmatprep.subr.bf16.mxu1 %v8018_v53  ;;  %v8021_v55 = vld [vmem:[%s13039_s1 + $0x8] sm:$0xff]   ;;  %v8023_v53 = vld [vmem:[%s13039_s1 + $0x10] sm:$0xff]   ;;  %vm1696_vm1 = vcmask 31744  }
  0x39   : > { %7363 = vmatpush3.bf16.msra.mxu0 %v8019_v57  ;;  %7941 = vmatpush3.bf16.msra.mxu1 %v8019_v57  ;;  %v8024_v57 = vld [vmem:[%s13039_s1 + $0x58] sm:$0xff]  }
  0x3a   : > { %7364 = vmatprep.subr.bf16.mxu0 %v8020_v63  ;;  %7934 = vmatprep.subr.bf16.mxu1 %v8020_v63  ;;  %v8025_v63 = vld [vmem:[%s13039_s1 + $0x18] sm:$0xff]  }
  0x3b   : > { %1076 = vmatprep.mubr.bf16.mxu0 %v6824_v59  ;;  %1172 = vmatprep.mubr.bf16.mxu1 %v6872_v61  ;;  %v8028_v59 = vld [vmem:[%s13039_s1 + $0x68] sm:$0xff]  }
  0x3c   : > { %v8029_v61 = vld [vmem:[%s13039_s1 + $0x28] sm:$0xff]  }
  0x3d   : > { %7365 = vmatpush3.bf16.msra.mxu0 %v8021_v55  ;;  %7942 = vmatpush3.bf16.msra.mxu1 %v8021_v55  ;;  %v8026_v55 = vld [vmem:[%s13039_s1 + $0x60] sm:$0xff]  }
  0x3e   : > { %7366 = vmatprep.subr.bf16.mxu0 %v8022_v49  ;;  %7935 = vmatprep.subr.bf16.mxu1 %v8022_v49  ;;  %v8027_v49 = vld [vmem:[%s13039_s1 + $0x20] sm:$0xff]  }
  0x41   : > { %7367 = vmatpush3.bf16.msra.mxu0 %v8023_v53  ;;  %7943 = vmatpush3.bf16.msra.mxu1 %v8023_v53  ;;  %v8030_v53 = vld [vmem:[%s13039_s1 + $0x70] sm:$0xff]  }
  0x42   : > { %7368 = vmatprep.subr.bf16.mxu0 %v8024_v57  ;;  %7936 = vmatprep.subr.bf16.mxu1 %v8024_v57  ;;  %v8031_v57 = vld [vmem:[%s13039_s1 + $0x30] sm:$0xff]  }
  0x45   : > { %7369 = vmatpush3.bf16.msra.mxu0 %v8025_v63  ;;  %7944 = vmatpush3.bf16.msra.mxu1 %v8025_v63  ;;  %v8032_v63 = vld [vmem:[%s13039_s1 + $0x78] sm:$0xff]  }
  0x46   : > { %7370 = vmatprep.subr.bf16.mxu0 %v8026_v55  ;;  %7937 = vmatprep.subr.bf16.mxu1 %v8026_v55  ;;  %v8033_v55 = vld [vmem:[%s13039_s1 + $0x38] sm:$0xff]  }
  0x49   : > { %7371 = vmatpush3.bf16.msra.mxu0 %v8027_v49  ;;  %7945 = vmatpush3.bf16.msra.mxu1 %v8027_v49  ;;  %v8034_v49 = vld [vmem:[%s13039_s1 + $0xc0] sm:$0xff]  }
  0x4a   : > { %7372 = vmatprep.subr.bf16.mxu0 %v8028_v59  ;;  %7938 = vmatprep.subr.bf16.mxu1 %v8028_v59  ;;  %v8035_v59 = vld [vmem:[%s13041_s3] sm:$0xff]  }
  0x4d   : > { %7373 = vmatpush3.bf16.msra.mxu0 %v8029_v61  ;;  %7946 = vmatpush3.bf16.msra.mxu1 %v8029_v61  ;;  %v6823_v61 = vcombine.low %v8318_v0, %v8324_v2  ;;  %v6876_v0 = vcombine.high %v8479_v52, %v8485_v54 }
  0x4e   : > { %7374 = vmatprep.subr.bf16.mxu0 %v8030_v53  ;;  %7939 = vmatprep.subr.bf16.mxu1 %v8030_v53  ;;  %v6871_v53 = vcombine.low %v8467_v48, %v8473_v50  ;;  %v6827_v48 = vcombine.low %v8335_v4, %v8341_v6 }
  0x51   : > { %7375 = vmatpush3.bf16.msra.mxu0 %v8031_v57  ;;  %7947 = vmatpush3.bf16.msra.mxu1 %v8031_v57  ;;  %v8036_v57 = vld [vmem:[%s13039_s1 + $0x80] sm:$0xff]  }
  0x52   : > { %7376 = vmatprep.subr.bf16.mxu0 %v8032_v63  ;;  %7940 = vmatprep.subr.bf16.mxu1 %v8032_v63  ;;  %v8037_v63 = vld [vmem:[%s13039_s1 + $0xc8] sm:$0xff]  }
  0x55   : > { %7377 = vmatpush3.bf16.msra.mxu0 %v8033_v55  ;;  %7948 = vmatpush3.bf16.msra.mxu1 %v8033_v55  ;;  %v8038_v55 = vld [vmem:[%s13039_s1 + $0x88] sm:$0xff]  }
  0x56   : > { %7474 = vmatprep.subr.bf16.mxu1 %v8034_v49  ;;  %7851 = vmatprep.subr.bf16.mxu0 %v8035_v59  ;;  %v8039_v49 = vld [vmem:[%s13039_s1 + $0xd0] sm:$0xff]  }
  0x58   : > { %1077 = vmatmul.mubr.bf16.vlgmr.msra.gmra.mrb[0].mxu0 %v6823_v61  ;;  %1173 = vmatmul.mubr.bf16.vlgmr.msra.gmra.mrb[0].mxu1 %v6871_v53  ;;  %v6875_v61 = vcombine.low %v8479_v52, %v8485_v54  ;;  %v6832_v53 = vcombine.high %v8347_v8, %v8353_v10 }
  0x59   : > { %7475 = vmatpush3.bf16.msra.mxu1 %v8036_v57  ;;  %7852 = vmatpush3.bf16.msra.mxu0 %v8035_v59  ;;  %v8040_v59 = vld [vmem:[%s13039_s1 + $0x90] sm:$0xff]   ;;  %v8042_v57 = vld [vmem:[%s13039_s1 + $0x98] sm:$0xff]  }
  0x5a   : > { %7476 = vmatprep.subr.bf16.mxu1 %v8037_v63  ;;  %1084 = vmatprep.mubr.bf16.mxu0 %v6828_v51  ;;  %v8041_v51 = vld [vmem:[%s13039_s1 + $0xd8] sm:$0xff]   ;;  %v8043_v63 = vld [vmem:[%s13039_s1 + $0xe0] sm:$0xff]  }
  0x5b   : > { %1180 = vmatprep.mubr.bf16.mxu1 %v6876_v0  ;;  %v6880_v0 = vcombine.high %v8491_v56, %v8497_v58 }
  0x5d   : > { %7477 = vmatpush3.bf16.msra.mxu1 %v8038_v55  ;;  %v8044_v55 = vld [vmem:[%s13039_s1 + $0xa0] sm:$0xff]  }
  0x5e   : > { %7478 = vmatprep.subr.bf16.mxu1 %v8039_v49  ;;  %v6879_v49 = vcombine.low %v8491_v56, %v8497_v58 }
  0x60   : > { %1085 = vmatmul.mubr.bf16.gmra.mrb[4].mxu0 %v6827_v48  ;;  %1181 = vmatmul.mubr.bf16.gmra.mrb[4].mxu1 %v6875_v61  ;;  %v6831_v48 = vcombine.low %v8347_v8, %v8353_v10  ;;  %v8045_v61 = vld [vmem:[%s13039_s1 + $0xe8] sm:$0xff]  }
  0x61   : > { %7479 = vmatpush3.bf16.msra.mxu1 %v8040_v59  ;;  %1092 = vmatprep.mubr.bf16.mxu0 %v6832_v53  ;;  %v6836_v59 = vcombine.high %v8359_v12, %v8365_v14  ;;  %v6884_v53 = vcombine.high %v8503_v60, %v8509_v62 }
  0x62   : > { %7480 = vmatprep.subr.bf16.mxu1 %v8041_v51  ;;  %1188 = vmatprep.mubr.bf16.mxu1 %v6880_v0  ;;  %v8046_v51 = vld [vmem:[%s13039_s1 + $0xa8] sm:$0xff]   ;;  %v8047_v0 = vld [vmem:[%s13039_s1 + $0xf0] sm:$0xff]  }
  0x65   : > { %7481 = vmatpush3.bf16.msra.mxu1 %v8042_v57  ;;  %v6835_v57 = vcombine.low %v8359_v12, %v8365_v14 }
  0x66   : > { %7482 = vmatprep.subr.bf16.mxu1 %v8043_v63  ;;  %v6883_v63 = vcombine.low %v8503_v60, %v8509_v62 }
  0x68   : > { %1093 = vmatmul.mubr.bf16.gmra.mrb[8].mxu0 %v6831_v48  ;;  %1189 = vmatmul.mubr.bf16.gmra.mrb[8].mxu1 %v6879_v49  ;;  %v6840_v48 = vcombine.high %v8371_v16, %v8377_v18  ;;  %v8049_v49 = vld [vmem:[%s13039_s1 + $0xf8] sm:$0xff]  }
  0x69   : > { %7483 = vmatpush3.bf16.msra.mxu1 %v8044_v55  ;;  %1100 = vmatprep.mubr.bf16.mxu0 %v6836_v59  ;;  %v8048_v55 = vld [vmem:[%s13039_s1 + $0xb0] sm:$0xff]   ;;  %v8050_v59 = vld [vmem:[%s13039_s1 + $0xb8] sm:$0xff]  }
  0x6a   : > { %7484 = vmatprep.subr.bf16.mxu1 %v8045_v61  ;;  %1196 = vmatprep.mubr.bf16.mxu1 %v6884_v53  ;;  %v6826_v61 = vcombine.high %v8321_v1, %v8332_v3  ;;  %v6839_v53 = vcombine.low %v8371_v16, %v8377_v18 }
  0x6d   : > { %7485 = vmatpush3.bf16.msra.mxu1 %v8046_v51  ;;  %v6825_v51 = vcombine.low %v8321_v1, %v8332_v3 }
  0x6e   : > { %7486 = vmatprep.subr.bf16.mxu1 %v8047_v0  ;;  %v6844_v0 = vcombine.high %v8383_v20, %v8389_v22 }
  0x70   : > { %1101 = vmatmul.mubr.bf16.gmra.mrb[12].mxu0 %v6835_v57  ;;  %1197 = vmatmul.mubr.bf16.gmra.mrb[12].mxu1 %v6883_v63  ;;  %v6830_v57 = vcombine.high %v8338_v5, %v8344_v7  ;;  %v6843_v63 = vcombine.low %v8383_v20, %v8389_v22 }
  0x71   : > { %7487 = vmatpush3.bf16.msra.mxu1 %v8048_v55  ;;  %1108 = vmatprep.mubr.bf16.mxu0 %v6840_v48  ;;  %v6829_v55 = vcombine.low %v8338_v5, %v8344_v7  ;;  %v6848_v48 = vcombine.high %v8395_v24, %v8401_v26 }
  0x72   : > { %7488 = vmatprep.subr.bf16.mxu1 %v8049_v49  ;;  %1237 = vmatprep.mubr.bf16.mxu1 %v6826_v61  ;;  %v6834_v49 = vcombine.high %v8350_v9, %v8356_v11  ;;  %v6847_v61 = vcombine.low %v8395_v24, %v8401_v26 }
  0x75   : > { %7489 = vmatpush3.bf16.msra.mxu1 %v8050_v59  ;;  %v6833_v59 = vcombine.low %v8350_v9, %v8356_v11 }
  0x78   : > { %1109 = vmatmul.mubr.bf16.gmra.mrb[16].mxu0 %v6839_v53  ;;  %1238 = vmatmul.mubr.bf16.vlgmr.msra.gmra.mrb[16].mxu1 %v6825_v51  ;;  %v6852_v53 = vcombine.high %v8407_v28, %v8413_v30  ;;  %v6838_v51 = vcombine.high %v8362_v13, %v8368_v15 }
  0x79   : > { %1116 = vmatprep.mubr.bf16.mxu0 %v6844_v0  ;;  %1245 = vmatprep.mubr.bf16.mxu1 %v6830_v57  ;;  %v6851_v0 = vcombine.low %v8407_v28, %v8413_v30  ;;  %v6837_v57 = vcombine.low %v8362_v13, %v8368_v15 }
  0x80   : > { %1117 = vmatmul.mubr.bf16.gmra.mrb[20].mxu0 %v6843_v63  ;;  %1246 = vmatmul.mubr.bf16.gmra.mrb[20].mxu1 %v6829_v55  ;;  %v6856_v63 = vcombine.high %v8419_v32, %v8425_v34  ;;  %v6842_v55 = vcombine.high %v8374_v17, %v8380_v19 }
  0x81   : > { %1124 = vmatprep.mubr.bf16.mxu0 %v6848_v48  ;;  %1253 = vmatprep.mubr.bf16.mxu1 %v6834_v49  ;;  %v6855_v48 = vcombine.low %v8419_v32, %v8425_v34  ;;  %v6841_v49 = vcombine.low %v8374_v17, %v8380_v19 }
  0x88   : > { %1125 = vmatmul.mubr.bf16.gmra.mrb[24].mxu0 %v6847_v61  ;;  %1254 = vmatmul.mubr.bf16.gmra.mrb[24].mxu1 %v6833_v59  ;;  %v6860_v61 = vcombine.high %v8431_v36, %v8437_v38  ;;  %v6846_v59 = vcombine.high %v8386_v21, %v8392_v23 }
  0x89   : > { %1132 = vmatprep.mubr.bf16.mxu0 %v6852_v53  ;;  %1261 = vmatprep.mubr.bf16.mxu1 %v6838_v51  ;;  %v6859_v53 = vcombine.low %v8431_v36, %v8437_v38  ;;  %v6845_v51 = vcombine.low %v8386_v21, %v8392_v23 }
  0x90   : > { %1133 = vmatmul.mubr.bf16.gmra.mrb[28].mxu0 %v6851_v0  ;;  %1262 = vmatmul.mubr.bf16.gmra.mrb[28].mxu1 %v6837_v57  ;;  %v6864_v0 = vcombine.high %v8443_v40, %v8449_v42  ;;  %v6850_v57 = vcombine.high %v8398_v25, %v8404_v27 }
  0x91   : > { %1140 = vmatprep.mubr.bf16.mxu0 %v6856_v63  ;;  %1269 = vmatprep.mubr.bf16.mxu1 %v6842_v55  ;;  %v6863_v63 = vcombine.low %v8443_v40, %v8449_v42  ;;  %v6849_v55 = vcombine.low %v8398_v25, %v8404_v27 }
  0x98   : > { %1141 = vmatmul.mubr.bf16.gmra.mrb[32].mxu0 %v6855_v48  ;;  %1270 = vmatmul.mubr.bf16.gmra.mrb[32].mxu1 %v6841_v49  ;;  %v6868_v48 = vcombine.high %v8455_v44, %v8461_v46  ;;  %v6854_v49 = vcombine.high %v8410_v29, %v8416_v31 }
  0x99   : > { %1148 = vmatprep.mubr.bf16.mxu0 %v6860_v61  ;;  %1277 = vmatprep.mubr.bf16.mxu1 %v6846_v59  ;;  %v6867_v61 = vcombine.low %v8455_v44, %v8461_v46  ;;  %v6853_v59 = vcombine.low %v8410_v29, %v8416_v31 }
  0xa0   : > { %1149 = vmatmul.mubr.bf16.gmra.mrb[36].mxu0 %v6859_v53  ;;  %1278 = vmatmul.mubr.bf16.gmra.mrb[36].mxu1 %v6845_v51  ;;  %v6858_v53 = vcombine.high %v8422_v33, %v8428_v35  ;;  %v8051_v51 = vld [vmem:[%s8329_s27] sm:$0xff]  }
  0xa1   : > { %1156 = vmatprep.mubr.bf16.mxu0 %v6864_v0  ;;  %1285 = vmatprep.mubr.bf16.mxu1 %v6850_v57  ;;  %v6857_v0 = vcombine.low %v8422_v33, %v8428_v35  ;;  %v8052_v57 = vld [vmem:[%s8329_s27 + $0x8] sm:$0xff]  }
  0xa8   : > { %1157 = vmatmul.mubr.bf16.gmra.mrb[40].mxu0 %v6863_v63  ;;  %1286 = vmatmul.mubr.bf16.gmra.mrb[40].mxu1 %v6849_v55  ;;  %v6862_v63 = vcombine.high %v8434_v37, %v8440_v39  ;;  %v8053_v55 = vld [vmem:[%s8329_s27 + $0x10] sm:$0xff]  }
  0xa9   : > { %1164 = vmatprep.mubr.bf16.mxu0 %v6868_v48  ;;  %1293 = vmatprep.mubr.bf16.mxu1 %v6854_v49  ;;  %v6861_v48 = vcombine.low %v8434_v37, %v8440_v39  ;;  %v8054_v49 = vld [vmem:[%s8329_s27 + $0x18] sm:$0xff]  }
  0xb0   : > { %1165 = vmatmul.mubr.bf16.gmra.mrb[44].mxu0 %v6867_v61  ;;  %1294 = vmatmul.mubr.bf16.gmra.mrb[44].mxu1 %v6853_v59  ;;  %v6866_v61 = vcombine.high %v8446_v41, %v8452_v43  ;;  %v8055_v59 = vld [vmem:[%s8329_s27 + $0x20] sm:$0xff]  }
  0xb1   : > { %1301 = vmatprep.mubr.bf16.mxu1 %v6858_v53  ;;  %7853 = vmatprep.mubr.msk.bf16.mxu0 %vm1486_vm0, %v8051_v51  ;;  %v6865_v53 = vcombine.low %v8446_v41, %v8452_v43  ;;  %v8056_v51 = vld [vmem:[%s8329_s27 + $0x28] sm:$0xff]   ;;  %v8069_v41 = vld [vmem:[%s13042_s4 + $0x4] ss:$16 sps:$4 sm:$0xff]  }
  0xb2   : > { %2427 = vmatprep.subr.bf16.mxu1 %v8069_v41  ;;  %v8062_v41 = vld [vmem:[%s8329_s27 + $0x58] sm:$0xff]  }
  0xb8   : > { %1302 = vmatmul.mubr.bf16.gmra.mrb[48].mxu1 %v6857_v0  ;;  %7854 = vmatmul.mubr.msk.bf16.vlgmr.msra.gmra.mrb[48].mxu0 %vm1486_vm0, %v8052_v57  ;;  %v6870_v0 = vcombine.high %v8458_v45, %v8464_v47  ;;  %v8057_v57 = vld [vmem:[%s8329_s27 + $0x30] sm:$0xff]  }
  0xb9   : > { %1309 = vmatprep.mubr.bf16.mxu1 %v6862_v63  ;;  %7857 = vmatprep.mubr.msk.bf16.mxu0 %vm1486_vm0, %v8053_v55  ;;  %v6869_v63 = vcombine.low %v8458_v45, %v8464_v47  ;;  %v8058_v55 = vld [vmem:[%s8329_s27 + $0x38] sm:$0xff]   ;;  %v13272_v47 = vld [vmem:[#allocation58_spill] sm:$0xff] }
  0xba   : > { %v13271_v45 = vld [vmem:[#allocation60_spill] sm:$0xff] }
  0xbb   : > { %v6878_v43 = vcombine.high %v13272_v47, %v13271_v45 }
  0xc0   : > { %1310 = vmatmul.mubr.bf16.gmra.mrb[52].mxu1 %v6861_v48  ;;  %7858 = vmatmul.mubr.msk.bf16.gmra.mrb[52].mxu0 %vm1486_vm0, %v8054_v49  ;;  %v8059_v48 = vld [vmem:[%s8329_s27 + $0x40] sm:$0xff]   ;;  %v13269_v49 = vld [vmem:[#allocation56_spill] sm:$0xff] }
  0xc1   : > { %1317 = vmatprep.mubr.bf16.mxu1 %v6866_v61  ;;  %7861 = vmatprep.mubr.msk.bf16.mxu0 %vm1486_vm0, %v8055_v59  ;;  %v13270_v61 = vld [vmem:[#allocation54_spill] sm:$0xff] }
  0xc2   : > { %v6874_v59 = vcombine.high %v13270_v61, %v13269_v49 }
  0xc8   : > { %1318 = vmatmul.mubr.bf16.gmra.mrb[56].mxu1 %v6865_v53  ;;  %7862 = vmatmul.mubr.msk.bf16.gmra.mrb[56].mxu0 %vm1486_vm0, %v8056_v51  ;;  %v8072_v53 = vld [vmem:[%s13042_s4 + $0xc] ss:$16 sps:$4 sm:$0xff]   ;;  %v8067_v51 = vld [vmem:[%s13042_s4] ss:$16 sps:$4 sm:$0xff]  }
  0xc9   : > { %1325 = vmatprep.mubr.bf16.mxu1 %v6870_v0  ;;  %7865 = vmatprep.mubr.msk.bf16.mxu0 %vm1486_vm0, %v8057_v57  ;;  %v8070_v0 = vld [vmem:[%s13042_s4 + $0x8] ss:$16 sps:$4 sm:$0xff]  }
  0xca   : > { %2620 = vmatprep.subr.bf16.mxu0 %v8072_v53  ;;  %2428 = vmatpush1.bf16.msra.mxu1 %v8067_v51  ;;  %v8060_v57 = vld [vmem:[%s8329_s27 + $0x48] sm:$0xff]   ;;  %v13273_v53 = vld [vmem:[#allocation64_spill] sm:$0xff] }
  0xcb   : > { %2621 = vmatpush1.bf16.msra.mxu0 %v8070_v0  ;;  %v13274_v51 = vld [vmem:[#allocation62_spill] sm:$0xff] }
  0xcc   : > { %v6881_v0 = vcombine.low %v13274_v51, %v13273_v53 }
  0xd0   : > { %1326 = vmatmul.mubr.bf16.gmra.mrb[60].mxu1 %v6869_v63  ;;  %7866 = vmatmul.mubr.msk.bf16.gmra.mrb[60].mxu0 %vm1486_vm0, %v8058_v55  ;;  %v6873_v63 = vcombine.low %v13270_v61, %v13269_v49  ;;  %v8061_v55 = vld [vmem:[%s8329_s27 + $0x50] sm:$0xff]   ;;  %v6882_v49 = vcombine.high %v13274_v51, %v13273_v53  ;;  %v8064_v61 = vld [vmem:[%s8329_s27 + $0x68] sm:$0xff]  }
  0xd1   : > { %7869 = vmatprep.mubr.msk.bf16.mxu0 %vm1486_vm0, %v8059_v48  ;;  %1333 = vmatprep.mubr.bf16.mxu1 %v6874_v59  ;;  %v6877_v48 = vcombine.low %v13272_v47, %v13271_v45  ;;  %v8063_v59 = vld [vmem:[%s8329_s27 + $0x60] sm:$0xff]   ;;  %v8066_v45 = vld [vmem:[%s8329_s27 + $0x78] sm:$0xff]  }
  0xd8   : > { %7870 = vmatmul.mubr.msk.bf16.gmra.mrb[64].mxu0 %vm1486_vm0, %v8060_v57  ;;  %1334 = vmatmul.mubr.bf16.gmra.mrb[64].mxu1 %v6873_v63  ;;  %v13275_v57 = vld [vmem:[#allocation68_spill] sm:$0xff]  ;;  %v13276_v63 = vld [vmem:[#allocation66_spill] sm:$0xff] }
  0xd9   : > { %7873 = vmatprep.mubr.msk.bf16.mxu0 %vm1486_vm0, %v8061_v55  ;;  %1341 = vmatprep.mubr.bf16.mxu1 %v6878_v43  ;;  %v8065_v43 = vld [vmem:[%s8329_s27 + $0x70] sm:$0xff]   ;;  %v6886_v55 = vcombine.high %v13276_v63, %v13275_v57  ;;  %v6885_v47 = vcombine.low %v13276_v63, %v13275_v57 }
  0xe0   : > { %7874 = vmatmul.mubr.msk.bf16.gmra.mrb[68].mxu0 %vm1486_vm0, %v8062_v41  ;;  %1342 = vmatmul.mubr.bf16.gmra.mrb[68].mxu1 %v6877_v48  ;;  %v13085_v41 = vmov 0  }
  0xe1   : > { %7877 = vmatprep.mubr.msk.bf16.mxu0 %vm1486_vm0, %v8063_v59  ;;  %1349 = vmatprep.mubr.bf16.mxu1 %v6882_v49 }
  0xe8   : > { %7878 = vmatmul.mubr.msk.bf16.gmra.mrb[72].mxu0 %vm1486_vm0, %v8064_v61  ;;  %1350 = vmatmul.mubr.bf16.gmra.mrb[72].mxu1 %v6881_v0 }
  0xe9   : > { %7881 = vmatprep.mubr.msk.bf16.mxu0 %vm1486_vm0, %v8065_v43  ;;  %1357 = vmatprep.mubr.bf16.mxu1 %v6886_v55 }
  0xf0   : > { %7882 = vmatmul.mubr.msk.bf16.gmra.mrb[76].mxu0 %vm1486_vm0, %v8066_v45  ;;  %1358 = vmatmul.mubr.bf16.gmra.mrb[76].mxu1 %v6885_v47 }
  0xf1   : > { %2459 = vmatprep.mubr.bf16.mxu1 %v13085_v41  ;;  %2652 = vmatprep.mubr.bf16.mxu0 %v13085_v41 }
 0x12b   : > { %v7378_v48 = vpop.f32.mrb[0].mxu0  ;;  %v7450_v59 = vpop.f32.mrb[0].mxu1 }
 0x12c   : > { %v7379_v53 = vpop.f32.mrb[1].mxu0  ;;  %v7451_v51 = vpop.f32.mrb[1].mxu1 }
 0x12d   : > { %v7380_v49 = vadd.f32 %v7379_v53, %v7378_v48  ;;  %v7381_v61 = vpop.f32.mrb[2].mxu0  ;;  %v8788_v0 = vadd.f32 %v7451_v51, %v7450_v59  ;;  %v7453_v43 = vpop.f32.mrb[2].mxu1 }
 0x12e   : > { %v7382_v55 = vpop.f32.mrb[3].mxu0  ;;  %v7454_v37 = vpop.f32.mrb[3].mxu1 }
 0x12f   : > { %v7383_v57 = vadd.f32 %v7382_v55, %v7381_v61  ;;  %v8790_v63 = vadd.f32 %v7454_v37, %v7453_v43 }
 0x133   : > { %v7384_v45 = vpop.f32.mrb[4].mxu0  ;;  %v7456_v47 = vpop.f32.mrb[4].mxu1 }
 0x134   : > { %v7385_v39 = vpop.f32.mrb[5].mxu0  ;;  %v7457_v33 = vpop.f32.mrb[5].mxu1 }
 0x135   : > { %v7386_v35 = vadd.f32 %v7385_v39, %v7384_v45  ;;  %v7387_v41 = vpop.f32.mrb[6].mxu0  ;;  %v8792_v29 = vadd.f32 %v7457_v33, %v7456_v47  ;;  %v7459_v31 = vpop.f32.mrb[6].mxu1 }
 0x136   : > { %v7388_v44 = vpop.f32.mrb[7].mxu0  ;;  %v7460_v48 = vpop.f32.mrb[7].mxu1 }
 0x137   : > { %v7389_v53 = vadd.f32 %v7388_v44, %v7387_v41  ;;  %v8794_v59 = vadd.f32 %v7460_v48, %v7459_v31 }
 0x13b   : > { %v7390_v51 = vpop.f32.mrb[8].mxu0  ;;  %v7462_v46 = vpop.f32.mrb[8].mxu1 }
 0x13c   : > { %v7391_v25 = vpop.f32.mrb[9].mxu0  ;;  %v7463_v61 = vpop.f32.mrb[9].mxu1 }
 0x13d   : > { %v8796_v37 = vadd.f32 %v7391_v25, %v7390_v51  ;;  %v7393_v43 = vpop.f32.mrb[10].mxu0  ;;  %v8798_v55 = vadd.f32 %v7463_v61, %v7462_v46  ;;  %v7465_v27 = vpop.f32.mrb[10].mxu1 }
 0x13e   : > { %v7394_v39 = vpop.f32.mrb[11].mxu0  ;;  %v7466_v45 = vpop.f32.mrb[11].mxu1 }
 0x13f   : > { %v8800_v33 = vadd.f32 %v7394_v39, %v7393_v43  ;;  %v8802_v47 = vadd.f32 %v7466_v45, %v7465_v27 }
 0x143   : > { %v7396_v40 = vpop.f32.mrb[12].mxu0  ;;  %v7468_v44 = vpop.f32.mrb[12].mxu1 }
 0x144   : > { %v7397_v31 = vpop.f32.mrb[13].mxu0  ;;  %v7469_v41 = vpop.f32.mrb[13].mxu1 }
 0x145   : > { %v8804_v48 = vadd.f32 %v7397_v31, %v7396_v40  ;;  %v7399_v42 = vpop.f32.mrb[14].mxu0  ;;  %v8806_v21 = vadd.f32 %v7469_v41, %v7468_v44  ;;  %v7471_v25 = vpop.f32.mrb[14].mxu1 }
 0x146   : > { %v7400_v51 = vpop.f32.mrb[15].mxu0  ;;  %v7472_v46 = vpop.f32.mrb[15].mxu1 }
 0x147   : > { %v8808_v61 = vadd.f32 %v7400_v51, %v7399_v42  ;;  %v8810_v23 = vadd.f32 %v7472_v46, %v7471_v25 }
 0x14b   : > { %v7402_v43 = vpop.f32.mrb[16].mxu0  ;;  %v7490_v39 = vpop.f32.mrb[16].mxu1 }
 0x14c   : > { %v7403_v27 = vpop.f32.mrb[17].mxu0  ;;  %v7491_v45 = vpop.f32.mrb[17].mxu1 }
 0x14d   : > { %v8812_v36 = vadd.f32 %v7403_v27, %v7402_v43  ;;  %v7492_v38 = vadd.f32 %v7491_v45, %v7490_v39  ;;  %v7405_v17 = vpop.f32.mrb[18].mxu0  ;;  %v7493_v40 = vpop.f32.mrb[18].mxu1 }
 0x14e   : > { %v7406_v31 = vpop.f32.mrb[19].mxu0  ;;  %v7494_v19 = vpop.f32.mrb[19].mxu1 }
 0x14f   : > { %v1240_v44 = vadd.f32 %v7492_v38, %v7380_v49  ;;  %v8814_v41 = vadd.f32 %v7406_v31, %v7405_v17  ;;  %v7495_v32 = vadd.f32 %v7494_v19, %v7493_v40  ;;  %v13277_v17 = vmov 0  }
 0x151   : > { %v1243_v34 = vadd.f32 %v7495_v32, %v7383_v57 }
 0x153   : > { %v2339_v42 = vpack.c.bf16 %v1243_v34, %v1240_v44  ;;  %v7408_v51 = vpop.f32.mrb[20].mxu0  ;;  %v7496_v25 = vpop.f32.mrb[20].mxu1 }
 0x154   : > { %v7409_v46 = vpop.f32.mrb[21].mxu0  ;;  %v7497_v13 = vpop.f32.mrb[21].mxu1 }
 0x155   : > { %v8816_v15 = vadd.f32 %v7409_v46, %v7408_v51  ;;  %v7498_v28 = vadd.f32 %v7497_v13, %v7496_v25  ;;  %v7411_v43 = vpop.f32.mrb[22].mxu0  ;;  %v7499_v27 = vpop.f32.mrb[22].mxu1  ;;  %6956 = vmatmul.mubr.msk.bf16.vlgmr.msra.gmra.mrb[80].mxu1 %vm1486_vm0, %v2339_v42  ;;  %6972 = vmatmul.mubr.msk.bf16.vlgmr.msra.gmra.mrb[80].mxu0 %vm1486_vm0, %v2339_v42 }
 0x156   : > { %v7412_v39 = vpop.f32.mrb[23].mxu0  ;;  %v7500_v38 = vpop.f32.mrb[23].mxu1  ;;  %2469 = vmatprep.mubr.bf16.mxu1 %v13277_v17  ;;  %2662 = vmatprep.mubr.bf16.mxu0 %v13277_v17 }
 0x157   : > { %v1248_v19 = vadd.f32 %v7498_v28, %v7386_v35  ;;  %v8822_v32 = vadd.f32 %v7412_v39, %v7411_v43  ;;  %v7501_v34 = vadd.f32 %v7500_v38, %v7499_v27 }
 0x159   : > { %v1251_v49 = vadd.f32 %v7501_v34, %v7389_v53 }
 0x15b   : > { %v2340_v57 = vpack.c.bf16 %v1251_v49, %v1248_v19  ;;  %v7414_v45 = vpop.f32.mrb[24].mxu0  ;;  %v7502_v13 = vpop.f32.mrb[24].mxu1 }
 0x15c   : > { %v7415_v40 = vpop.f32.mrb[25].mxu0  ;;  %v7503_v31 = vpop.f32.mrb[25].mxu1 }
 0x15d   : > { %v8824_v44 = vadd.f32 %v7415_v40, %v7414_v45  ;;  %v7504_v51 = vadd.f32 %v7503_v31, %v7502_v13  ;;  %v7417_v42 = vpop.f32.mrb[26].mxu0  ;;  %v7505_v25 = vpop.f32.mrb[26].mxu1  ;;  %6957 = vmatmul.mubr.msk.bf16.gmra.mrb[84].mxu1 %vm1486_vm0, %v2340_v57  ;;  %6973 = vmatmul.mubr.msk.bf16.gmra.mrb[84].mxu0 %vm1486_vm0, %v2340_v57 }
 0x15e   : > { %v7418_v46 = vpop.f32.mrb[27].mxu0  ;;  %v7506_v28 = vpop.f32.mrb[27].mxu1  ;;  %2479 = vmatprep.mubr.bf16.mxu1 %v13277_v17  ;;  %2672 = vmatprep.mubr.bf16.mxu0 %v13277_v17 }
 0x15f   : > { %v1256_v35 = vadd.f32 %v7504_v51, %v8796_v37  ;;  %v8831_v53 = vadd.f32 %v7418_v46, %v7417_v42  ;;  %v7507_v43 = vadd.f32 %v7506_v28, %v7505_v25 }
 0x161   : > { %v1259_v27 = vadd.f32 %v7507_v43, %v8800_v33 }
 0x163   : > { %v2341_v39 = vpack.c.bf16 %v1259_v27, %v1256_v35  ;;  %v7420_v38 = vpop.f32.mrb[28].mxu0  ;;  %v7508_v19 = vpop.f32.mrb[28].mxu1 }
 0x164   : > { %v7421_v34 = vpop.f32.mrb[29].mxu0  ;;  %v7509_v49 = vpop.f32.mrb[29].mxu1 }
 0x165   : > { %v8834_v45 = vadd.f32 %v7421_v34, %v7420_v38  ;;  %v7510_v57 = vadd.f32 %v7509_v49, %v7508_v19  ;;  %v7423_v13 = vpop.f32.mrb[30].mxu0  ;;  %v7511_v40 = vpop.f32.mrb[30].mxu1  ;;  %6958 = vmatmul.mubr.msk.bf16.gmra.mrb[88].mxu1 %vm1486_vm0, %v2341_v39  ;;  %6974 = vmatmul.mubr.msk.bf16.gmra.mrb[88].mxu0 %vm1486_vm0, %v2341_v39 }
 0x166   : > { %v7424_v37 = vpop.f32.mrb[31].mxu0  ;;  %v7512_v31 = vpop.f32.mrb[31].mxu1  ;;  %2489 = vmatprep.mubr.bf16.mxu1 %v13277_v17  ;;  %2682 = vmatprep.mubr.bf16.mxu0 %v13277_v17 }
 0x167   : > { %v1264_v33 = vadd.f32 %v7510_v57, %v8804_v48  ;;  %v8841_v51 = vadd.f32 %v7424_v37, %v7423_v13  ;;  %v7513_v42 = vadd.f32 %v7512_v31, %v7511_v40 }
 0x169   : > { %v1267_v25 = vadd.f32 %v7513_v42, %v8808_v61 }
 0x16b   : > { %v2342_v46 = vpack.c.bf16 %v1267_v25, %v1264_v33  ;;  %v7426_v28 = vpop.f32.mrb[32].mxu0  ;;  %v7514_v35 = vpop.f32.mrb[32].mxu1 }
 0x16c   : > { %v7427_v43 = vpop.f32.mrb[33].mxu0  ;;  %v7515_v27 = vpop.f32.mrb[33].mxu1 }
 0x16d   : > { %v8844_v38 = vadd.f32 %v7427_v43, %v7426_v28  ;;  %v7516_v39 = vadd.f32 %v7515_v27, %v7514_v35  ;;  %v7429_v19 = vpop.f32.mrb[34].mxu0  ;;  %v7517_v34 = vpop.f32.mrb[34].mxu1  ;;  %6959 = vmatmul.mubr.msk.bf16.gmra.mrb[92].mxu1 %vm1486_vm0, %v2342_v46  ;;  %6975 = vmatmul.mubr.msk.bf16.gmra.mrb[92].mxu0 %vm1486_vm0, %v2342_v46 }
 0x16e   : > { %v7430_v48 = vpop.f32.mrb[35].mxu0  ;;  %v7518_v49 = vpop.f32.mrb[35].mxu1  ;;  %2499 = vmatprep.mubr.bf16.mxu1 %v13277_v17  ;;  %2692 = vmatprep.mubr.bf16.mxu0 %v13277_v17 }
 0x16f   : > { %v1272_v61 = vadd.f32 %v7516_v39, %v8812_v36  ;;  %v8851_v57 = vadd.f32 %v7430_v48, %v7429_v19  ;;  %v7519_v13 = vadd.f32 %v7518_v49, %v7517_v34 }
 0x171   : > { %v1275_v40 = vadd.f32 %v7519_v13, %v8814_v41 }
 0x173   : > { %v2343_v37 = vpack.c.bf16 %v1275_v40, %v1272_v61  ;;  %v7432_v31 = vpop.f32.mrb[36].mxu0  ;;  %v7520_v33 = vpop.f32.mrb[36].mxu1 }
 0x174   : > { %v7433_v42 = vpop.f32.mrb[37].mxu0  ;;  %v7521_v25 = vpop.f32.mrb[37].mxu1 }
 0x175   : > { %v8854_v28 = vadd.f32 %v7433_v42, %v7432_v31  ;;  %v7522_v46 = vadd.f32 %v7521_v25, %v7520_v33  ;;  %v7435_v35 = vpop.f32.mrb[38].mxu0  ;;  %v7523_v43 = vpop.f32.mrb[38].mxu1  ;;  %6960 = vmatmul.mubr.msk.bf16.gmra.mrb[96].mxu1 %vm1486_vm0, %v2343_v37  ;;  %6976 = vmatmul.mubr.msk.bf16.gmra.mrb[96].mxu0 %vm1486_vm0, %v2343_v37 }
 0x176   : > { %v7436_v36 = vpop.f32.mrb[39].mxu0  ;;  %v7524_v27 = vpop.f32.mrb[39].mxu1  ;;  %2509 = vmatprep.mubr.bf16.mxu1 %v13277_v17  ;;  %2702 = vmatprep.mubr.bf16.mxu0 %v13277_v17 }
 0x177   : > { %v1280_v41 = vadd.f32 %v7522_v46, %v8816_v15  ;;  %v8861_v39 = vadd.f32 %v7436_v36, %v7435_v35  ;;  %v7525_v19 = vadd.f32 %v7524_v27, %v7523_v43 }
 0x179   : > { %v1283_v34 = vadd.f32 %v7525_v19, %v8822_v32 }
 0x17b   : > { %v2344_v48 = vpack.c.bf16 %v1283_v34, %v1280_v41  ;;  %v7438_v49 = vpop.f32.mrb[40].mxu0  ;;  %v7526_v61 = vpop.f32.mrb[40].mxu1 }
 0x17c   : > { %v7439_v13 = vpop.f32.mrb[41].mxu0  ;;  %v7527_v40 = vpop.f32.mrb[41].mxu1 }
 0x17d   : > { %v8864_v31 = vadd.f32 %v7439_v13, %v7438_v49  ;;  %v7528_v37 = vadd.f32 %v7527_v40, %v7526_v61  ;;  %v7441_v33 = vpop.f32.mrb[42].mxu0  ;;  %v7529_v42 = vpop.f32.mrb[42].mxu1  ;;  %6961 = vmatmul.mubr.msk.bf16.gmra.mrb[100].mxu1 %vm1486_vm0, %v2344_v48  ;;  %6977 = vmatmul.mubr.msk.bf16.gmra.mrb[100].mxu0 %vm1486_vm0, %v2344_v48 }
 0x17e   : > { %v7442_v15 = vpop.f32.mrb[43].mxu0  ;;  %v7530_v25 = vpop.f32.mrb[43].mxu1  ;;  %2519 = vmatprep.mubr.bf16.mxu1 %v13277_v17  ;;  %2712 = vmatprep.mubr.bf16.mxu0 %v13277_v17 }
 0x17f   : > { %v1288_v32 = vadd.f32 %v7528_v37, %v8824_v44  ;;  %v8871_v46 = vadd.f32 %v7442_v15, %v7441_v33  ;;  %v7531_v35 = vadd.f32 %v7530_v25, %v7529_v42 }
 0x181   : > { %v1291_v43 = vadd.f32 %v7531_v35, %v8831_v53 }
 0x183   : > { %v2345_v36 = vpack.c.bf16 %v1291_v43, %v1288_v32  ;;  %v7444_v27 = vpop.f32.mrb[44].mxu0  ;;  %v7532_v41 = vpop.f32.mrb[44].mxu1 }
 0x184   : > { %v7445_v19 = vpop.f32.mrb[45].mxu0  ;;  %v7533_v34 = vpop.f32.mrb[45].mxu1 }
 0x185   : > { %v8874_v49 = vadd.f32 %v7445_v19, %v7444_v27  ;;  %v7534_v48 = vadd.f32 %v7533_v34, %v7532_v41  ;;  %v7447_v61 = vpop.f32.mrb[46].mxu0  ;;  %v7535_v13 = vpop.f32.mrb[46].mxu1  ;;  %6962 = vmatmul.mubr.msk.bf16.gmra.mrb[104].mxu1 %vm1486_vm0, %v2345_v36  ;;  %6978 = vmatmul.mubr.msk.bf16.gmra.mrb[104].mxu0 %vm1486_vm0, %v2345_v36 }
 0x186   : > { %v7448_v44 = vpop.f32.mrb[47].mxu0  ;;  %v7536_v40 = vpop.f32.mrb[47].mxu1  ;;  %2529 = vmatprep.mubr.bf16.mxu1 %v13277_v17  ;;  %2722 = vmatprep.mubr.bf16.mxu0 %v13277_v17 }
 0x187   : > { %v1296_v53 = vadd.f32 %v7534_v48, %v8834_v45  ;;  %v8881_v37 = vadd.f32 %v7448_v44, %v7447_v61  ;;  %v7537_v33 = vadd.f32 %v7536_v40, %v7535_v13 }
 0x189   : > { %v1299_v42 = vadd.f32 %v7537_v33, %v8841_v51 }
 0x18b   : > { %v2346_v15 = vpack.c.bf16 %v1299_v42, %v1296_v53  ;;  %v7538_v25 = vpop.f32.mrb[48].mxu1  ;;  %v8884_v32 = vpop.f32.mrb[48].mxu0 }
 0x18c   : > { %v7539_v35 = vpop.f32.mrb[49].mxu1  ;;  %v8886_v43 = vpop.f32.mrb[49].mxu0  ;;  %v1703_v36 = vsel %vm1696_vm1, %v8884_v32, -inf }
 0x18d   : > { %v7540_v27 = vadd.f32 %v7539_v35, %v7538_v25  ;;  %v7541_v41 = vpop.f32.mrb[50].mxu1  ;;  %1704 = vmax.xlane.f32.xlu1 %v1703_v36  ;;  %v8890_v45 = vpop.f32.mrb[50].mxu0  ;;  %6963 = vmatmul.mubr.msk.bf16.gmra.mrb[108].mxu1 %vm1486_vm0, %v2346_v15  ;;  %v1697_v51 = vsel %vm1696_vm1, %v8886_v43, -inf }
 0x18e   : > { %6979 = vmatmul.mubr.msk.bf16.gmra.mrb[108].mxu0 %vm1486_vm0, %v2346_v15  ;;  %v7542_v19 = vpop.f32.mrb[51].mxu1  ;;  %1698 = vmax.xlane.f32.xlu0 %v1697_v51  ;;  %v8896_v34 = vpop.f32.mrb[51].mxu0  ;;  %v1706_v13 = vsel %vm1696_vm1, %v8890_v45, -inf }
 0x18f   : > { %v1304_v48 = vadd.f32 %v7540_v27, %v8844_v38  ;;  %v7543_v61 = vadd.f32 %v7542_v19, %v7541_v41  ;;  %2539 = vmatprep.mubr.bf16.mxu1 %v13277_v17  ;;  %2732 = vmatprep.mubr.bf16.mxu0 %v13277_v17  ;;  %v1700_v40 = vsel %vm1696_vm1, %v8896_v34, -inf }
 0x191   : > { %v1307_v44 = vadd.f32 %v7543_v61, %v8851_v57  ;;  %1707 = vmax.xlane.f32.xlu1 %v1706_v13 }
 0x192   : > { %1701 = vmax.xlane.f32.xlu0 %v1700_v40 }
 0x193   : > { %v2347_v53 = vpack.c.bf16 %v1307_v44, %v1304_v48  ;;  %v7544_v33 = vpop.f32.mrb[52].mxu1  ;;  %v8906_v42 = vpop.f32.mrb[52].mxu0 }
 0x194   : > { %v7545_v38 = vpop.f32.mrb[53].mxu1  ;;  %v8908_v15 = vpop.f32.mrb[53].mxu0  ;;  %v1715_v25 = vsel %vm1696_vm1, %v8906_v42, -inf }
 0x195   : > { %v7546_v35 = vadd.f32 %v7545_v38, %v7544_v33  ;;  %v7547_v36 = vpop.f32.mrb[54].mxu1  ;;  %v8912_v27 = vpop.f32.mrb[54].mxu0  ;;  %6964 = vmatmul.mubr.msk.bf16.gmra.mrb[112].mxu1 %vm1486_vm0, %v2347_v53  ;;  %v1709_v13 = vsel %vm1696_vm1, %v8908_v15, -inf }
 0x196   : > { %6980 = vmatmul.mubr.msk.bf16.gmra.mrb[112].mxu0 %vm1486_vm0, %v2347_v53  ;;  %v7548_v57 = vpop.f32.mrb[55].mxu1  ;;  %1716 = vmax.xlane.f32.xlu0 %v1715_v25  ;;  %v8916_v41 = vpop.f32.mrb[55].mxu0  ;;  %v1718_v51 = vsel %vm1696_vm1, %v8912_v27, -inf }
 0x197   : > { %v1312_v19 = vadd.f32 %v7546_v35, %v8854_v28  ;;  %v7549_v48 = vadd.f32 %v7548_v57, %v7547_v36  ;;  %1719 = vmax.xlane.f32.xlu1 %v1718_v51  ;;  %2549 = vmatprep.mubr.bf16.mxu1 %v13277_v17  ;;  %v1712_v44 = vsel %vm1696_vm1, %v8916_v41, -inf }
 0x198   : > { %2742 = vmatprep.mubr.bf16.mxu0 %v13277_v17 }
 0x199   : > { %v1315_v61 = vadd.f32 %v7549_v48, %v8861_v39 }
 0x19a   : > { %1710 = vmax.xlane.f32.xlu0 %v1709_v13 }
 0x19b   : > { %v2348_v40 = vpack.c.bf16 %v1315_v61, %v1312_v19  ;;  %v7550_v53 = vpop.f32.mrb[56].mxu1  ;;  %1713 = vmax.xlane.f32.xlu1 %v1712_v44  ;;  %v8928_v33 = vpop.f32.mrb[56].mxu0 }
 0x19c   : > { %v7551_v28 = vpop.f32.mrb[57].mxu1  ;;  %v8930_v38 = vpop.f32.mrb[57].mxu0  ;;  %v1727_v25 = vsel %vm1696_vm1, %v8928_v33, -inf }
 0x19d   : > { %v7552_v35 = vadd.f32 %v7551_v28, %v7550_v53  ;;  %v7553_v39 = vpop.f32.mrb[58].mxu1  ;;  %v8934_v36 = vpop.f32.mrb[58].mxu0  ;;  %6965 = vmatmul.mubr.msk.bf16.gmra.mrb[116].mxu1 %vm1486_vm0, %v2348_v40  ;;  %v1721_v44 = vsel %vm1696_vm1, %v8930_v38, -inf }
 0x19e   : > { %6981 = vmatmul.mubr.msk.bf16.gmra.mrb[116].mxu0 %vm1486_vm0, %v2348_v40  ;;  %v7554_v57 = vpop.f32.mrb[59].mxu1  ;;  %1728 = vmax.xlane.f32.xlu0 %v1727_v25  ;;  %v8938_v51 = vpop.f32.mrb[59].mxu0  ;;  %v1730_v19 = vsel %vm1696_vm1, %v8934_v36, -inf }
 0x19f   : > { %v1320_v48 = vadd.f32 %v7552_v35, %v8864_v31  ;;  %v7555_v61 = vadd.f32 %v7554_v57, %v7553_v39  ;;  %1731 = vmax.xlane.f32.xlu1 %v1730_v19  ;;  %2559 = vmatprep.mubr.bf16.mxu1 %v13277_v17  ;;  %v1724_v40 = vsel %vm1696_vm1, %v8938_v51, -inf }
 0x1a0   : > { %2752 = vmatprep.mubr.bf16.mxu0 %v13277_v17 }
 0x1a1   : > { %v1323_v13 = vadd.f32 %v7555_v61, %v8871_v46 }
 0x1a2   : > { %1722 = vmax.xlane.f32.xlu0 %v1721_v44 }
 0x1a3   : > { %v2349_v53 = vpack.c.bf16 %v1323_v13, %v1320_v48  ;;  %v7556_v28 = vpop.f32.mrb[60].mxu1  ;;  %1725 = vmax.xlane.f32.xlu1 %v1724_v40  ;;  %v8950_v25 = vpop.f32.mrb[60].mxu0 }
 0x1a4   : > { %v7557_v31 = vpop.f32.mrb[61].mxu1  ;;  %v8952_v35 = vpop.f32.mrb[61].mxu0  ;;  %v1739_v39 = vsel %vm1696_vm1, %v8950_v25, -inf }
 0x1a5   : > { %v7558_v57 = vadd.f32 %v7557_v31, %v7556_v28  ;;  %v7559_v46 = vpop.f32.mrb[62].mxu1  ;;  %v8956_v19 = vpop.f32.mrb[62].mxu0  ;;  %6966 = vmatmul.mubr.msk.bf16.gmra.mrb[120].mxu1 %vm1486_vm0, %v2349_v53 }
 0x1a6   : > { %6982 = vmatmul.mubr.msk.bf16.gmra.mrb[120].mxu0 %vm1486_vm0, %v2349_v53  ;;  %v7560_v61 = vpop.f32.mrb[63].mxu1  ;;  %1740 = vmax.xlane.f32.xlu0 %v1739_v39  ;;  %v8960_v48 = vpop.f32.mrb[63].mxu0  ;;  %v1742_v13 = vsel %vm1696_vm1, %v8956_v19, -inf  ;;  %v1733_v53 = vsel %vm1696_vm1, %v8952_v35, -inf }
 0x1a7   : > { %v1328_v44 = vadd.f32 %v7558_v57, %v8874_v49  ;;  %v7561_v40 = vadd.f32 %v7560_v61, %v7559_v46  ;;  %1743 = vmax.xlane.f32.xlu1 %v1742_v13  ;;  %2569 = vmatprep.mubr.bf16.mxu1 %v13277_v17  ;;  %v1736_v31 = vsel %vm1696_vm1, %v8960_v48, -inf }
 0x1a8   : > { %2762 = vmatprep.mubr.bf16.mxu0 %v13277_v17 }
 0x1a9   : > { %v1331_v28 = vadd.f32 %v7561_v40, %v8881_v37 }
 0x1aa   : > { %1734 = vmax.xlane.f32.xlu0 %v1733_v53 }
 0x1ab   : > { %v2350_v39 = vpack.c.bf16 %v1331_v28, %v1328_v44  ;;  %1737 = vmax.xlane.f32.xlu1 %v1736_v31  ;;  %v8972_v30 = vpop.f32.mrb[64].mxu0  ;;  %v7562_v49 = vpop.f32.mrb[64].mxu1 }
 0x1ac   : > { %v8974_v57 = vpop.f32.mrb[65].mxu0  ;;  %v1751_v46 = vsel %vm1696_vm1, %v8972_v30, -inf  ;;  %v7563_v61 = vpop.f32.mrb[65].mxu1 }
 0x1ad   : > { %v8978_v13 = vpop.f32.mrb[66].mxu0  ;;  %6967 = vmatmul.mubr.msk.bf16.gmra.mrb[124].mxu1 %vm1486_vm0, %v2350_v39  ;;  %v7564_v37 = vadd.f32 %v7563_v61, %v7562_v49  ;;  %v7565_v40 = vpop.f32.mrb[66].mxu1  ;;  %v1745_v49 = vsel %vm1696_vm1, %v8974_v57, -inf }
 0x1ae   : > { %6983 = vmatmul.mubr.msk.bf16.gmra.mrb[124].mxu0 %vm1486_vm0, %v2350_v39  ;;  %1752 = vmax.xlane.f32.xlu0 %v1751_v46  ;;  %v8982_v44 = vpop.f32.mrb[67].mxu0  ;;  %v1754_v28 = vsel %vm1696_vm1, %v8978_v13, -inf  ;;  %v7566_v53 = vpop.f32.mrb[67].mxu1 }
 0x1af   : > { %1755 = vmax.xlane.f32.xlu1 %v1754_v28  ;;  %v1336_v31 = vadd.f32 %v7564_v37, %v8788_v0  ;;  %v7567_v9 = vadd.f32 %v7566_v53, %v7565_v40  ;;  %2579 = vmatprep.mubr.bf16.mxu1 %v13277_v17  ;;  %v1748_v46 = vsel %vm1696_vm1, %v8982_v44, -inf }
 0x1b0   : > { %2772 = vmatprep.mubr.bf16.mxu0 %v13277_v17 }
 0x1b1   : > { %v1339_v39 = vadd.f32 %v7567_v9, %v8790_v63 }
 0x1b2   : > { %1746 = vmax.xlane.f32.xlu0 %v1745_v49 }
 0x1b3   : > { %1749 = vmax.xlane.f32.xlu1 %v1748_v46  ;;  %v8994_v61 = vpop.f32.mrb[68].mxu0  ;;  %v2351_v28 = vpack.c.bf16 %v1339_v39, %v1336_v31  ;;  %v7568_v11 = vpop.f32.mrb[68].mxu1 }
 0x1b4   : > { %v8996_v0 = vpop.f32.mrb[69].mxu0  ;;  %v1763_v37 = vsel %vm1696_vm1, %v8994_v61, -inf  ;;  %v7569_v40 = vpop.f32.mrb[69].mxu1 }
 0x1b5   : > { %v9000_v53 = vpop.f32.mrb[70].mxu0  ;;  %v7570_v24 = vadd.f32 %v7569_v40, %v7568_v11  ;;  %v7571_v26 = vpop.f32.mrb[70].mxu1  ;;  %6968 = vmatmul.mubr.msk.bf16.gmra.mrb[128].mxu1 %vm1486_vm0, %v2351_v28  ;;  %v1757_v11 = vsel %vm1696_vm1, %v8996_v0, -inf }
 0x1b6   : > { %1764 = vmax.xlane.f32.xlu0 %v1763_v37  ;;  %v9003_v9 = vpop.f32.mrb[71].mxu0  ;;  %v1766_v63 = vsel %vm1696_vm1, %v9000_v53, -inf  ;;  %6984 = vmatmul.mubr.msk.bf16.gmra.mrb[128].mxu0 %vm1486_vm0, %v2351_v28  ;;  %v7572_v31 = vpop.f32.mrb[71].mxu1 }
 0x1b7   : > { %1767 = vmax.xlane.f32.xlu1 %v1766_v63  ;;  %v1344_v49 = vadd.f32 %v7570_v24, %v8792_v29  ;;  %v7573_v39 = vadd.f32 %v7572_v31, %v7571_v26  ;;  %2589 = vmatprep.mubr.bf16.mxu1 %v13277_v17  ;;  %v1760_v37 = vsel %vm1696_vm1, %v9003_v9, -inf }
 0x1b8   : > { %2782 = vmatprep.mubr.bf16.mxu0 %v13277_v17 }
 0x1b9   : > { %v1347_v46 = vadd.f32 %v7573_v39, %v8794_v59 }
 0x1ba   : > { %1758 = vmax.xlane.f32.xlu0 %v1757_v11 }
 0x1bb   : > { %1761 = vmax.xlane.f32.xlu1 %v1760_v37  ;;  %v9016_v28 = vpop.f32.mrb[72].mxu0  ;;  %v2352_v40 = vpack.c.bf16 %v1347_v46, %v1344_v49  ;;  %v7574_v63 = vpop.f32.mrb[72].mxu1 }
 0x1bc   : > { %v9018_v24 = vpop.f32.mrb[73].mxu0  ;;  %v1775_v26 = vsel %vm1696_vm1, %v9016_v28, -inf  ;;  %v7575_v29 = vpop.f32.mrb[73].mxu1 }
 0x1bd   : > { %v9022_v31 = vpop.f32.mrb[74].mxu0  ;;  %v7576_v5 = vadd.f32 %v7575_v29, %v7574_v63  ;;  %v7577_v7 = vpop.f32.mrb[74].mxu1  ;;  %6969 = vmatmul.mubr.msk.bf16.gmra.mrb[132].mxu1 %vm1486_vm0, %v2352_v40  ;;  %v1769_v37 = vsel %vm1696_vm1, %v9018_v24, -inf }
 0x1be   : > { %1776 = vmax.xlane.f32.xlu0 %v1775_v26  ;;  %v9025_v59 = vpop.f32.mrb[75].mxu0  ;;  %v1778_v39 = vsel %vm1696_vm1, %v9022_v31, -inf  ;;  %6985 = vmatmul.mubr.msk.bf16.gmra.mrb[132].mxu0 %vm1486_vm0, %v2352_v40  ;;  %v7578_v49 = vpop.f32.mrb[75].mxu1 }
 0x1bf   : > { %1779 = vmax.xlane.f32.xlu1 %v1778_v39  ;;  %v1352_v11 = vadd.f32 %v7576_v5, %v8798_v55  ;;  %v7579_v46 = vadd.f32 %v7578_v49, %v7577_v7  ;;  %2599 = vmatprep.mubr.bf16.mxu1 %v13277_v17  ;;  %v1772_v26 = vsel %vm1696_vm1, %v9025_v59, -inf }
 0x1c0   : > { %2792 = vmatprep.mubr.bf16.mxu0 %v13277_v17 }
 0x1c1   : > { %v1355_v63 = vadd.f32 %v7579_v46, %v8802_v47 }
 0x1c2   : > { %1770 = vmax.xlane.f32.xlu0 %v1769_v37 }
 0x1c3   : > { %1773 = vmax.xlane.f32.xlu1 %v1772_v26  ;;  %v9038_v40 = vpop.f32.mrb[76].mxu0  ;;  %v2353_v29 = vpack.c.bf16 %v1355_v63, %v1352_v11  ;;  %v7580_v39 = vpop.f32.mrb[76].mxu1 }
 0x1c4   : > { %v9040_v5 = vpop.f32.mrb[77].mxu0  ;;  %v7581_v7 = vpop.f32.mrb[77].mxu1  ;;  %v1787_v26 = vsel %vm1696_vm1, %v9038_v40, -inf }
 0x1c5   : > { %v9042_v55 = vpop.f32.mrb[78].mxu0  ;;  %v1781_v49 = vsel %vm1696_vm1, %v9040_v5, -inf  ;;  %v7582_v20 = vadd.f32 %v7581_v7, %v7580_v39  ;;  %v7583_v22 = vpop.f32.mrb[78].mxu1  ;;  %6970 = vmatmul.mubr.msk.bf16.gmra.mrb[136].mxu1 %vm1486_vm0, %v2353_v29 }
 0x1c6   : > { %1782 = vmax.xlane.f32.xlu0 %v1781_v49  ;;  %v9047_v47 = vpop.f32.mrb[79].mxu0  ;;  %6986 = vmatmul.mubr.msk.bf16.gmra.mrb[136].mxu0 %vm1486_vm0, %v2353_v29  ;;  %v7584_v46 = vpop.f32.mrb[79].mxu1  ;;  %v1790_v29 = vsel %vm1696_vm1, %v9042_v55, -inf }
 0x1c7   : > { %v1784_v11 = vsel %vm1696_vm1, %v9047_v47, -inf  ;;  %v1360_v37 = vadd.f32 %v7582_v20, %v8806_v21  ;;  %v7585_v63 = vadd.f32 %v7584_v46, %v7583_v22  ;;  %2609 = vmatprep.mubr.bf16.mxu1 %v13277_v17  ;;  %2802 = vmatprep.mubr.bf16.mxu0 %v13277_v17  ;;  %v1793_v20 = vlaneseq }
 0x1c8   : > { %1785 = vmax.xlane.f32.xlu1 %v1784_v11 }
 0x1c9   : > { %v1363_v39 = vadd.f32 %v7585_v63, %v8810_v23  ;;  %v9062_v21 = vand.u32 127, %v1793_v20 }
 0x1ca   : > { %1788 = vmax.xlane.f32.xlu0 %v1787_v26 }
 0x1cb   : > { %v2354_v7 = vpack.c.bf16 %v1363_v39, %v1360_v37 }
 0x1cc   : > { %1791 = vmax.xlane.f32.xlu1 %v1790_v29 }
 0x1cd   : > { %6971 = vmatmul.mubr.msk.bf16.gmra.mrb[140].mxu1 %vm1486_vm0, %v2354_v7 }
 0x1ce   : > { %6987 = vmatmul.mubr.msk.bf16.gmra.mrb[140].mxu0 %vm1486_vm0, %v2354_v7 }
 0x21a   : > { %v1705_v22 = vpop.xlane.xlu1 %1704 }
 0x21b   : > { %vm1797_vm2 = vcmp.ge.f32.partialorder %v8884_v32, %v1705_v22  ;;  %v1699_v17 = vpop.xlane.xlu0 %1698 }
 0x21c   : > { %v1829_v49 = vsel %vm1797_vm2, %v9062_v21, 4  ;;  %vm1795_vm3 = vcmp.ge.f32.partialorder %v8886_v43, %v1699_v17 }
 0x21d   : > { %v9068_v23 = vsel %vm1696_vm1, %v1829_v49, 2147483647  ;;  %v1827_v46 = vsel %vm1795_vm3, %v9062_v21, 4 }
 0x21e   : > { %v9072_v11 = vsel %vm1696_vm1, %v1827_v46, 2147483647  ;;  %v1708_v37 = vpop.xlane.xlu1 %1707  ;;  %v1891_v63 = vshra.s32 %v9068_v23, 16 }
 0x21f   : > { %vm1798_vm4 = vcmp.ge.f32.partialorder %v8890_v45, %v1708_v37  ;;  %v1702_v26 = vpop.xlane.xlu0 %1701  ;;  %v1861_v43 = vshra.s32 %v9072_v11, 16 }
 0x220   : > { %v1830_v32 = vsel %vm1798_vm4, %v9062_v21, 4  ;;  %vm1796_vm5 = vcmp.ge.f32.partialorder %v8896_v34, %v1702_v26  ;;  %v9078_v39 = vcvt.s32.f32 %v1891_v63 }
 0x221   : > { %v9082_v29 = vsel %vm1696_vm1, %v1830_v32, 2147483647  ;;  %v1828_v7 = vsel %vm1796_vm5, %v9062_v21, 4  ;;  %v9091_v17 = vcvt.s32.f32 %v1861_v43 }
 0x222   : > { %v9086_v20 = vsel %vm1696_vm1, %v1828_v7, 2147483647  ;;  %1894 = vmin.xlane.f32.xlu0 %v9078_v39  ;;  %v1906_v45 = vshra.s32 %v9082_v29, 16 }
 0x223   : > { %v1717_v22 = vpop.xlane.xlu0 %1716  ;;  %v1876_v46 = vshra.s32 %v9086_v20, 16 }
 0x224   : > { %vm1801_vm6 = vcmp.ge.f32.partialorder %v8906_v42, %v1717_v22  ;;  %v1720_v34 = vpop.xlane.xlu1 %1719  ;;  %v9093_v49 = vcvt.s32.f32 %v1906_v45 }
 0x225   : > { %v1833_v37 = vsel %vm1801_vm6, %v9062_v21, 4  ;;  %vm1802_vm7 = vcmp.ge.f32.partialorder %v8912_v27, %v1720_v34  ;;  %v9111_v27 = vcvt.s32.f32 %v1876_v46 }
 0x226   : > { %v9099_v63 = vsel %vm1696_vm1, %v1833_v37, 2147483647  ;;  %v1834_v26 = vsel %vm1802_vm7, %v9062_v21, 4  ;;  %1864 = vmin.xlane.f32.xlu0 %v9091_v17  ;;  %1909 = vmin.xlane.f32.xlu1 %v9093_v49 }
 0x227   : > { %v9105_v42 = vsel %vm1696_vm1, %v1834_v26, 2147483647  ;;  %v1711_v32 = vpop.xlane.xlu0 %1710  ;;  %v1951_v43 = vshra.s32 %v9099_v63, 16 }
 0x228   : > { %vm1799_vm8 = vcmp.ge.f32.partialorder %v8908_v15, %v1711_v32  ;;  %v1714_v7 = vpop.xlane.xlu1 %1713  ;;  %v9109_v45 = vpop.f32.mrb[80].mxu1  ;;  %v1966_v22 = vshra.s32 %v9105_v42, 16 }
 0x229   : > { %13278 = vst [vmem:[#allocation69_spill] sm:$0xff] %v9109_v45  ;;  %v1831_v34 = vsel %vm1799_vm8, %v9062_v21, 4  ;;  %vm1800_vm9 = vcmp.ge.f32.partialorder %v8916_v41, %v1714_v7  ;;  %v9116_v37 = vpop.f32.mrb[80].mxu0  ;;  %v9118_v26 = vpop.f32.mrb[81].mxu1  ;;  %v9120_v1 = vcvt.s32.f32 %v1951_v43 }
 0x22a   : > { %13279 = vst [vmem:[#allocation70_spill] sm:$0xff] %v9116_v37  ;;  %13280 = vst [vmem:[#allocation71_spill] sm:$0xff] %v9118_v26  ;;  %v9123_v3 = vsel %vm1696_vm1, %v1831_v34, 2147483647  ;;  %v1832_v15 = vsel %vm1800_vm9, %v9062_v21, 4  ;;  %v9126_v32 = vpop.f32.mrb[81].mxu0  ;;  %1879 = vmin.xlane.f32.xlu1 %v9111_v27  ;;  %v9142_v18 = vcvt.s32.f32 %v1966_v22 }
 0x22b   : > { %13281 = vst [vmem:[#allocation72_spill] sm:$0xff] %v9126_v32  ;;  %v9129_v46 = vpop.f32.mrb[82].mxu1  ;;  %v9132_v16 = vsel %vm1696_vm1, %v1832_v15, 2147483647  ;;  %v9134_v41 = vpop.f32.mrb[82].mxu0  ;;  %1954 = vmin.xlane.f32.xlu0 %v9120_v1  ;;  %v1921_v60 = vshra.s32 %v9123_v3, 16 }
 0x22c   : > { %13282 = vst [vmem:[#allocation73_spill] sm:$0xff] %v9129_v46  ;;  %13283 = vst [vmem:[#allocation74_spill] sm:$0xff] %v9134_v41  ;;  %v1729_v7 = vpop.xlane.xlu0 %1728  ;;  %v9138_v43 = vpop.f32.mrb[83].mxu1  ;;  %v1936_v62 = vshra.s32 %v9132_v16, 16 }
 0x22d   : > { %vm1805_vm10 = vcmp.ge.f32.partialorder %v8928_v33, %v1729_v7  ;;  %13284 = vst [vmem:[#allocation75_spill] sm:$0xff] %v9138_v43  ;;  %v9140_v34 = vpop.f32.mrb[83].mxu0  ;;  %v1732_v12 = vpop.xlane.xlu1 %1731  ;;  %v9152_v33 = vcvt.s32.f32 %v1921_v60 }
 0x22e   : > { %13285 = vst [vmem:[#allocation76_spill] sm:$0xff] %v9140_v34  ;;  %v1837_v15 = vsel %vm1805_vm10, %v9062_v21, 4  ;;  %vm1806_vm11 = vcmp.ge.f32.partialorder %v8934_v36, %v1732_v12  ;;  %1969 = vmin.xlane.f32.xlu1 %v9142_v18  ;;  %v9165_v12 = vcvt.s32.f32 %v1936_v62 }
 0x22f   : > { %v9148_v14 = vsel %vm1696_vm1, %v1837_v15, 2147483647  ;;  %v1838_v7 = vsel %vm1806_vm11, %v9062_v21, 4  ;;  %1924 = vmin.xlane.f32.xlu0 %v9152_v33 }
 0x230   : > { %v1723_v22 = vpop.xlane.xlu0 %1722  ;;  %v2011_v56 = vshra.s32 %v9148_v14, 16  ;;  %v9157_v58 = vsel %vm1696_vm1, %v1838_v7, 2147483647  ;;  %v9161_v15 = vpop.f32.mrb[84].mxu1 }
 0x231   : > { %vm1803_vm12 = vcmp.ge.f32.partialorder %v8930_v38, %v1723_v22  ;;  %13286 = vst [vmem:[#allocation77_spill] sm:$0xff] %v9161_v15  ;;  %v9163_v8 = vpop.f32.mrb[84].mxu0  ;;  %v1726_v36 = vpop.xlane.xlu1 %1725  ;;  %v2026_v62 = vshra.s32 %v9157_v58, 16 }
 0x232   : > { %13287 = vst [vmem:[#allocation78_spill] sm:$0xff] %v9163_v8  ;;  %v1835_v60 = vsel %vm1803_vm12, %v9062_v21, 4  ;;  %v9168_v10 = vpop.f32.mrb[85].mxu1  ;;  %v9170_v52 = vcvt.s32.f32 %v2011_v56  ;;  %vm1804_vm13 = vcmp.ge.f32.partialorder %v8938_v51, %v1726_v36  ;;  %v9176_v38 = vpop.f32.mrb[85].mxu0  ;;  %1939 = vmin.xlane.f32.xlu1 %v9165_v12 }
 0x233   : > { %13288 = vst [vmem:[#allocation79_spill] sm:$0xff] %v9168_v10  ;;  %v9173_v7 = vsel %vm1696_vm1, %v1835_v60, 2147483647  ;;  %13289 = vst [vmem:[#allocation80_spill] sm:$0xff] %v9176_v38  ;;  %v9179_v22 = vpop.f32.mrb[86].mxu1  ;;  %v1836_v54 = vsel %vm1804_vm13, %v9062_v21, 4  ;;  %v9195_v50 = vcvt.s32.f32 %v2026_v62 }
 0x234   : > { %13290 = vst [vmem:[#allocation81_spill] sm:$0xff] %v9179_v22  ;;  %v9183_v4 = vpop.f32.mrb[86].mxu0  ;;  %v1741_v6 = vpop.xlane.xlu0 %1740  ;;  %v1981_v56 = vshra.s32 %v9173_v7, 16  ;;  %v9187_v60 = vsel %vm1696_vm1, %v1836_v54, 2147483647  ;;  %2014 = vmin.xlane.f32.xlu0 %v9170_v52 }
 0x235   : > { %13291 = vst [vmem:[#allocation82_spill] sm:$0xff] %v9183_v4  ;;  %vm1809_vm14 = vcmp.ge.f32.partialorder %v8950_v25, %v1741_v6  ;;  %v9191_v51 = vpop.f32.mrb[87].mxu1  ;;  %v9193_v36 = vpop.f32.mrb[87].mxu0  ;;  %v1996_v6 = vshra.s32 %v9187_v60, 16 }
 0x236   : > { %13292 = vst [vmem:[#allocation83_spill] sm:$0xff] %v9191_v51  ;;  %13293 = vst [vmem:[#allocation84_spill] sm:$0xff] %v9193_v36  ;;  %v1841_v2 = vsel %vm1809_vm14, %v9062_v21, 4  ;;  %v1744_v22 = vpop.xlane.xlu1 %1743  ;;  %v9198_v4 = vcvt.s32.f32 %v1981_v56  ;;  %2029 = vmin.xlane.f32.xlu1 %v9195_v50 }
 0x237   : > { %v9201_v38 = vsel %vm1696_vm1, %v1841_v2, 2147483647  ;;  %vm1810_vm15 = vcmp.ge.f32.partialorder %v8956_v19, %v1744_v22  ;;  %v9217_v19 = vcvt.s32.f32 %v1996_v6 }
 0x238   : > { %v1842_v54 = vsel %vm1810_vm15, %v9062_v21, 4  ;;  %v1735_v25 = vpop.xlane.xlu0 %1734  ;;  %v2071_v62 = vshra.s32 %v9201_v38, 16  ;;  %1984 = vmin.xlane.f32.xlu0 %v9198_v4  ;;  %v9213_v2 = vpop.f32.mrb[88].mxu1 }
 0x239   : > { %v9209_v36 = vsel %vm1696_vm1, %v1842_v54, 2147483647  ;;  %vm1807_vm0 = vcmp.ge.f32.partialorder %v8952_v35, %v1735_v25  ;;  %13294 = vst [vmem:[#allocation85_spill] sm:$0xff] %v9213_v2  ;;  %v9215_v56 = vpop.f32.mrb[88].mxu0  ;;  %v9220_v10 = vpop.f32.mrb[89].mxu1 }
 0x23a   : > { %13295 = vst [vmem:[#allocation86_spill] sm:$0xff] %v9215_v56  ;;  %v1839_v22 = vsel %vm1807_vm0, %v9062_v21, 4  ;;  %v1738_v51 = vpop.xlane.xlu1 %1737  ;;  %13296 = vst [vmem:[#allocation87_spill] sm:$0xff] %v9220_v10  ;;  %v9222_v8 = vcvt.s32.f32 %v2071_v62  ;;  %v9228_v35 = vpop.f32.mrb[89].mxu0  ;;  %1999 = vmin.xlane.f32.xlu1 %v9217_v19  ;;  %v2086_v6 = vshra.s32 %v9209_v36, 16 }
 0x23b   : > { %v9225_v54 = vsel %vm1696_vm1, %v1839_v22, 2147483647  ;;  %vm1808_vm2 = vcmp.ge.f32.partialorder %v8960_v48, %v1738_v51  ;;  %13297 = vst [vmem:[#allocation88_spill] sm:$0xff] %v9228_v35  ;;  %v9231_v25 = vpop.f32.mrb[90].mxu1  ;;  %v9235_v2 = vpop.f32.mrb[90].mxu0 }
 0x23c   : > { %13298 = vst [vmem:[#allocation89_spill] sm:$0xff] %v9231_v25  ;;  %v1840_v56 = vsel %vm1808_vm2, %v9062_v21, 4  ;;  %13299 = vst [vmem:[#allocation90_spill] sm:$0xff] %v9235_v2  ;;  %v1753_v10 = vpop.xlane.xlu0 %1752  ;;  %v2041_v62 = vshra.s32 %v9225_v54, 16  ;;  %2074 = vmin.xlane.f32.xlu0 %v9222_v8  ;;  %v9243_v48 = vpop.f32.mrb[91].mxu1  ;;  %v9247_v25 = vcvt.s32.f32 %v2086_v6 }
 0x23d   : > { %v9239_v22 = vsel %vm1696_vm1, %v1840_v56, 2147483647  ;;  %vm1813_vm3 = vcmp.ge.f32.partialorder %v8972_v30, %v1753_v10  ;;  %13300 = vst [vmem:[#allocation91_spill] sm:$0xff] %v9243_v48  ;;  %v9245_v51 = vpop.f32.mrb[91].mxu0 }
 0x23e   : > { %13301 = vst [vmem:[#allocation92_spill] sm:$0xff] %v9245_v51  ;;  %v1845_v35 = vsel %vm1813_vm3, %v9062_v21, 4  ;;  %v1756_v15 = vpop.xlane.xlu1 %1755  ;;  %v9250_v2 = vcvt.s32.f32 %v2041_v62  ;;  %2089 = vmin.xlane.f32.xlu1 %v9247_v25  ;;  %v2056_v10 = vshra.s32 %v9239_v22, 16 }
 0x23f   : > { %v9253_v34 = vsel %vm1696_vm1, %v1845_v35, 2147483647  ;;  %vm1814_vm4 = vcmp.ge.f32.partialorder %v8978_v13, %v1756_v15 }
 0x240   : > { %v1846_v30 = vsel %vm1814_vm4, %v9062_v21, 4  ;;  %v1747_v56 = vpop.xlane.xlu0 %1746  ;;  %v2131_v6 = vshra.s32 %v9253_v34, 16  ;;  %2044 = vmin.xlane.f32.xlu0 %v9250_v2  ;;  %v9265_v35 = vpop.f32.mrb[92].mxu1  ;;  %v9269_v13 = vcvt.s32.f32 %v2056_v10 }
 0x241   : > { %v9261_v51 = vsel %vm1696_vm1, %v1846_v30, 2147483647  ;;  %vm1811_vm5 = vcmp.ge.f32.partialorder %v8974_v57, %v1747_v56  ;;  %13302 = vst [vmem:[#allocation93_spill] sm:$0xff] %v9265_v35  ;;  %v9267_v62 = vpop.f32.mrb[92].mxu0  ;;  %v9272_v43 = vpop.f32.mrb[93].mxu1 }
 0x242   : > { %13303 = vst [vmem:[#allocation94_spill] sm:$0xff] %v9267_v62  ;;  %v1843_v15 = vsel %vm1811_vm5, %v9062_v21, 4  ;;  %v1750_v48 = vpop.xlane.xlu1 %1749  ;;  %13304 = vst [vmem:[#allocation95_spill] sm:$0xff] %v9272_v43  ;;  %v9274_v41 = vcvt.s32.f32 %v2131_v6  ;;  %v9280_v57 = vpop.f32.mrb[93].mxu0  ;;  %2059 = vmin.xlane.f32.xlu1 %v9269_v13  ;;  %v2146_v10 = vshra.s32 %v9261_v51, 16 }
 0x243   : > { %v9277_v30 = vsel %vm1696_vm1, %v1843_v15, 2147483647  ;;  %vm1812_vm6 = vcmp.ge.f32.partialorder %v8982_v44, %v1750_v48  ;;  %13305 = vst [vmem:[#allocation96_spill] sm:$0xff] %v9280_v57  ;;  %v9283_v56 = vpop.f32.mrb[94].mxu1  ;;  %v9287_v35 = vpop.f32.mrb[94].mxu0 }
 0x244   : > { %13306 = vst [vmem:[#allocation97_spill] sm:$0xff] %v9283_v56  ;;  %v1844_v62 = vsel %vm1812_vm6, %v9062_v21, 4  ;;  %13307 = vst [vmem:[#allocation98_spill] sm:$0xff] %v9287_v35  ;;  %v1765_v43 = vpop.xlane.xlu0 %1764  ;;  %v2101_v6 = vshra.s32 %v9277_v30, 16  ;;  %2134 = vmin.xlane.f32.xlu0 %v9274_v41  ;;  %v9295_v44 = vpop.f32.mrb[95].mxu1  ;;  %v9299_v56 = vcvt.s32.f32 %v2146_v10 }
 0x245   : > { %v9291_v15 = vsel %vm1696_vm1, %v1844_v62, 2147483647  ;;  %vm1817_vm7 = vcmp.ge.f32.partialorder %v8994_v61, %v1765_v43  ;;  %13308 = vst [vmem:[#allocation99_spill] sm:$0xff] %v9295_v44  ;;  %v9297_v48 = vpop.f32.mrb[95].mxu0 }
 0x246   : > { %13309 = vst [vmem:[#allocation100_spill] sm:$0xff] %v9297_v48  ;;  %v1849_v57 = vsel %vm1817_vm7, %v9062_v21, 4  ;;  %v1768_v46 = vpop.xlane.xlu1 %1767  ;;  %v9302_v35 = vcvt.s32.f32 %v2101_v6  ;;  %2149 = vmin.xlane.f32.xlu1 %v9299_v56  ;;  %v2116_v61 = vshra.s32 %v9291_v15, 16 }
 0x247   : > { %v9305_v32 = vsel %vm1696_vm1, %v1849_v57, 2147483647  ;;  %vm1818_vm8 = vcmp.ge.f32.partialorder %v9000_v53, %v1768_v46 }
 0x248   : > { %v1850_v43 = vsel %vm1818_vm8, %v9062_v21, 4  ;;  %v1759_v62 = vpop.xlane.xlu0 %1758  ;;  %v2191_v10 = vshra.s32 %v9305_v32, 16  ;;  %2104 = vmin.xlane.f32.xlu0 %v9302_v35  ;;  %v9317_v57 = vpop.f32.mrb[96].mxu1  ;;  %v9321_v53 = vcvt.s32.f32 %v2116_v61 }
 0x249   : > { %v9313_v48 = vsel %vm1696_vm1, %v1850_v43, 2147483647  ;;  %vm1815_vm9 = vcmp.ge.f32.partialorder %v8996_v0, %v1759_v62  ;;  %13310 = vst [vmem:[#allocation101_spill] sm:$0xff] %v9317_v57  ;;  %v9319_v6 = vpop.f32.mrb[96].mxu0  ;;  %v9324_v26 = vpop.f32.mrb[97].mxu1 }
 0x24a   : > { %13311 = vst [vmem:[#allocation102_spill] sm:$0xff] %v9319_v6  ;;  %v1847_v46 = vsel %vm1815_vm9, %v9062_v21, 4  ;;  %v1762_v44 = vpop.xlane.xlu1 %1761  ;;  %13312 = vst [vmem:[#allocation103_spill] sm:$0xff] %v9324_v26  ;;  %v9326_v37 = vcvt.s32.f32 %v2191_v10  ;;  %v9332_v0 = vpop.f32.mrb[97].mxu0  ;;  %2119 = vmin.xlane.f32.xlu1 %v9321_v53  ;;  %v2206_v61 = vshra.s32 %v9313_v48, 16 }
 0x24b   : > { %v9329_v43 = vsel %vm1696_vm1, %v1847_v46, 2147483647  ;;  %vm1816_vm10 = vcmp.ge.f32.partialorder %v9003_v9, %v1762_v44  ;;  %13314 = vst [vmem:[#allocation105_spill] sm:$0xff] %v9332_v0  ;;  %v9335_v62 = vpop.f32.mrb[98].mxu1  ;;  %v9339_v57 = vpop.f32.mrb[98].mxu0 }
 0x24c   : > { %13313 = vst [vmem:[#allocation104_spill] sm:$0xff] %v9329_v43  ;;  %13315 = vst [vmem:[#allocation106_spill] sm:$0xff] %v9335_v62  ;;  %v1848_v6 = vsel %vm1816_vm10, %v9062_v21, 4  ;;  %v1777_v26 = vpop.xlane.xlu0 %1776  ;;  %v2161_v10 = vshra.s32 %v9329_v43, 16  ;;  %2194 = vmin.xlane.f32.xlu0 %v9326_v37  ;;  %v9347_v9 = vpop.f32.mrb[99].mxu1  ;;  %v9351_v62 = vcvt.s32.f32 %v2206_v61 }
 0x24d   : > { %13316 = vst [vmem:[#allocation107_spill] sm:$0xff] %v9339_v57  ;;  %v9343_v46 = vsel %vm1696_vm1, %v1848_v6, 2147483647  ;;  %vm1821_vm11 = vcmp.ge.f32.partialorder %v9016_v28, %v1777_v26  ;;  %13318 = vst [vmem:[#allocation109_spill] sm:$0xff] %v9347_v9  ;;  %v9349_v44 = vpop.f32.mrb[99].mxu0 }
 0x24e   : > { %13317 = vst [vmem:[#allocation108_spill] sm:$0xff] %v9343_v46  ;;  %13319 = vst [vmem:[#allocation110_spill] sm:$0xff] %v9349_v44  ;;  %v1853_v0 = vsel %vm1821_vm11, %v9062_v21, 4  ;;  %v1780_v45 = vpop.xlane.xlu1 %1779  ;;  %v9354_v57 = vcvt.s32.f32 %v2161_v10  ;;  %2209 = vmin.xlane.f32.xlu1 %v9351_v62  ;;  %v2176_v28 = vshra.s32 %v9343_v46, 16 }
 0x24f   : > { %13320 = vst [vmem:[#allocation111_spill] sm:$0xff] %v9351_v62  ;;  %v9357_v43 = vsel %vm1696_vm1, %v1853_v0, 2147483647  ;;  %vm1822_vm12 = vcmp.ge.f32.partialorder %v9022_v31, %v1780_v45 }
 0x250   : > { %v1854_v26 = vsel %vm1822_vm12, %v9062_v21, 4  ;;  %v1771_v6 = vpop.xlane.xlu0 %1770  ;;  %v2251_v61 = vshra.s32 %v9357_v43, 16  ;;  %2164 = vmin.xlane.f32.xlu0 %v9354_v57  ;;  %v9369_v0 = vpop.f32.mrb[100].mxu1  ;;  %v9373_v31 = vcvt.s32.f32 %v2176_v28 }
 0x251   : > { %v9365_v44 = vsel %vm1696_vm1, %v1854_v26, 2147483647  ;;  %vm1819_vm13 = vcmp.ge.f32.partialorder %v9018_v24, %v1771_v6  ;;  %13321 = vst [vmem:[#allocation112_spill] sm:$0xff] %v9369_v0  ;;  %v9371_v10 = vpop.f32.mrb[100].mxu0  ;;  %v9376_v62 = vpop.f32.mrb[101].mxu1 }
 0x252   : > { %13322 = vst [vmem:[#allocation113_spill] sm:$0xff] %v9371_v10  ;;  %13323 = vst [vmem:[#allocation114_spill] sm:$0xff] %v9373_v31  ;;  %v1851_v45 = vsel %vm1819_vm13, %v9062_v21, 4  ;;  %v1774_v9 = vpop.xlane.xlu1 %1773  ;;  %v9378_v46 = vcvt.s32.f32 %v2251_v61  ;;  %v9384_v24 = vpop.f32.mrb[101].mxu0  ;;  %2179 = vmin.xlane.f32.xlu1 %v9373_v31  ;;  %v2266_v28 = vshra.s32 %v9365_v44, 16 }
 0x253   : > { %13324 = vst [vmem:[#allocation115_spill] sm:$0xff] %v9376_v62  ;;  %v9381_v26 = vsel %vm1696_vm1, %v1851_v45, 2147483647  ;;  %vm1820_vm14 = vcmp.ge.f32.partialorder %v9025_v59, %v1774_v9  ;;  %13326 = vst [vmem:[#allocation117_spill] sm:$0xff] %v9384_v24  ;;  %v9387_v6 = vpop.f32.mrb[102].mxu1  ;;  %v9391_v0 = vpop.f32.mrb[102].mxu0 }
 0x254   : > { %13325 = vst [vmem:[#allocation116_spill] sm:$0xff] %v9381_v26  ;;  %13327 = vst [vmem:[#allocation118_spill] sm:$0xff] %v9387_v6  ;;  %v1852_v10 = vsel %vm1820_vm14, %v9062_v21, 4  ;;  %v1783_v62 = vpop.xlane.xlu0 %1782  ;;  %v2221_v61 = vshra.s32 %v9381_v26, 16  ;;  %2254 = vmin.xlane.f32.xlu0 %v9378_v46  ;;  %v9399_v59 = vpop.f32.mrb[103].mxu1  ;;  %v9403_v6 = vcvt.s32.f32 %v2266_v28 }
 0x255   : > { %13328 = vst [vmem:[#allocation119_spill] sm:$0xff] %v9391_v0  ;;  %v9395_v45 = vsel %vm1696_vm1, %v1852_v10, 2147483647  ;;  %vm1823_vm15 = vcmp.ge.f32.partialorder %v9040_v5, %v1783_v62  ;;  %13330 = vst [vmem:[#allocation121_spill] sm:$0xff] %v9399_v59  ;;  %v9401_v9 = vpop.f32.mrb[103].mxu0 }
 0x256   : > { %13329 = vst [vmem:[#allocation120_spill] sm:$0xff] %v9395_v45  ;;  %13331 = vst [vmem:[#allocation122_spill] sm:$0xff] %v9401_v9  ;;  %v1855_v24 = vsel %vm1823_vm15, %v9062_v21, 4  ;;  %v1786_v31 = vpop.xlane.xlu1 %1785  ;;  %v9406_v0 = vcvt.s32.f32 %v2221_v61  ;;  %2269 = vmin.xlane.f32.xlu1 %v9403_v6  ;;  %v2236_v5 = vshra.s32 %v9395_v45, 16 }
 0x257   : > { %13332 = vst [vmem:[#allocation123_spill] sm:$0xff] %v9403_v6  ;;  %v9409_v26 = vsel %vm1696_vm1, %v1855_v24, 2147483647  ;;  %vm1824_vm0 = vcmp.ge.f32.partialorder %v9047_v47, %v1786_v31 }
 0x258   : > { %13333 = vst [vmem:[#allocation124_spill] sm:$0xff] %v9406_v0  ;;  %v1856_v62 = vsel %vm1824_vm0, %v9062_v21, 4  ;;  %v1789_v10 = vpop.xlane.xlu0 %1788  ;;  %v2281_v28 = vshra.s32 %v9409_v26, 16  ;;  %2224 = vmin.xlane.f32.xlu0 %v9406_v0  ;;  %v9421_v24 = vpop.f32.mrb[104].mxu1  ;;  %v9425_v47 = vcvt.s32.f32 %v2236_v5 }
 0x259   : > { %v9417_v9 = vsel %vm1696_vm1, %v1856_v62, 2147483647  ;;  %vm1825_vm2 = vcmp.ge.f32.partialorder %v9038_v40, %v1789_v10  ;;  %13334 = vst [vmem:[#allocation125_spill] sm:$0xff] %v9421_v24  ;;  %v9423_v61 = vpop.f32.mrb[104].mxu0  ;;  %v9428_v6 = vpop.f32.mrb[105].mxu1 }
 0x25a   : > { %13335 = vst [vmem:[#allocation126_spill] sm:$0xff] %v9423_v61  ;;  %v1857_v31 = vsel %vm1825_vm2, %v9062_v21, 4  ;;  %v1792_v59 = vpop.xlane.xlu1 %1791  ;;  %13336 = vst [vmem:[#allocation127_spill] sm:$0xff] %v9428_v6  ;;  %v9430_v45 = vcvt.s32.f32 %v2281_v28  ;;  %v9436_v0 = vpop.f32.mrb[105].mxu0  ;;  %2239 = vmin.xlane.f32.xlu1 %v9425_v47  ;;  %v2296_v5 = vshra.s32 %v9417_v9, 16 }
 0x25b   : > { %v9433_v62 = vsel %vm1696_vm1, %v1857_v31, 2147483647  ;;  %vm1826_vm3 = vcmp.ge.f32.partialorder %v9042_v55, %v1792_v59  ;;  %13337 = vst [vmem:[#allocation128_spill] sm:$0xff] %v9436_v0  ;;  %v9439_v40 = vpop.f32.mrb[106].mxu1  ;;  %v9443_v61 = vpop.f32.mrb[106].mxu0 }
 0x25c   : > { %13338 = vst [vmem:[#allocation129_spill] sm:$0xff] %v9439_v40  ;;  %v1858_v10 = vsel %vm1826_vm3, %v9062_v21, 4  ;;  %13339 = vst [vmem:[#allocation130_spill] sm:$0xff] %v9443_v61  ;;  %v9445_v6 = vpop.f32.mrb[107].mxu1  ;;  %v2311_v28 = vshra.s32 %v9433_v62, 16  ;;  %2284 = vmin.xlane.f32.xlu0 %v9430_v45  ;;  %v9452_v55 = vpop.f32.mrb[107].mxu0  ;;  %v9454_v59 = vcvt.s32.f32 %v2296_v5 }
 0x25d   : > { %13340 = vst [vmem:[#allocation131_spill] sm:$0xff] %v9445_v6  ;;  %v9449_v31 = vsel %vm1696_vm1, %v1858_v10, 2147483647  ;;  %13341 = vst [vmem:[#allocation132_spill] sm:$0xff] %v9452_v55 }
 0x25e   : > { %13342 = vst [vmem:[#allocation133_spill] sm:$0xff] %v9454_v59  ;;  %v9456_v40 = vcvt.s32.f32 %v2311_v28  ;;  %v2326_v0 = vshra.s32 %v9449_v31, 16  ;;  %2299 = vmin.xlane.f32.xlu1 %v9454_v59 }
 0x260   : > { %13343 = vst [vmem:[#allocation134_spill] sm:$0xff] %v9456_v40  ;;  %v9460_v21 = vcvt.s32.f32 %v2326_v0  ;;  %2314 = vmin.xlane.f32.xlu0 %v9456_v40  ;;  %v9463_v6 = vpop.f32.mrb[108].mxu1 }
 0x261   : > { %13345 = vst [vmem:[#allocation136_spill] sm:$0xff] %v9463_v6  ;;  %v9465_v10 = vpop.f32.mrb[108].mxu0  ;;  %v9467_v61 = vpop.f32.mrb[109].mxu1 }
 0x262   : > { %13344 = vst [vmem:[#allocation135_spill] sm:$0xff] %v9460_v21  ;;  %13346 = vst [vmem:[#allocation137_spill] sm:$0xff] %v9465_v10  ;;  %v9469_v24 = vpop.f32.mrb[109].mxu0  ;;  %2329 = vmin.xlane.f32.xlu1 %v9460_v21  ;;  %v9472_v5 = vpop.f32.mrb[110].mxu1 }
 0x263   : > { %13347 = vst [vmem:[#allocation138_spill] sm:$0xff] %v9467_v61  ;;  %13348 = vst [vmem:[#allocation139_spill] sm:$0xff] %v9469_v24  ;;  %v9474_v28 = vpop.f32.mrb[110].mxu0  ;;  %v9476_v55 = vpop.f32.mrb[111].mxu1 }
 0x264   : > { %13349 = vst [vmem:[#allocation140_spill] sm:$0xff] %v9472_v5  ;;  %13350 = vst [vmem:[#allocation141_spill] sm:$0xff] %v9474_v28  ;;  %v9478_v0 = vpop.f32.mrb[111].mxu0 }
 0x265   : > { %13351 = vst [vmem:[#allocation142_spill] sm:$0xff] %v9476_v55  ;;  %13352 = vst [vmem:[#allocation143_spill] sm:$0xff] %v9478_v0 }
 0x268   : > { %v9480_v59 = vpop.f32.mrb[112].mxu1 }
 0x269   : > { %13353 = vst [vmem:[#allocation144_spill] sm:$0xff] %v9480_v59  ;;  %v9482_v40 = vpop.f32.mrb[112].mxu0  ;;  %v9484_v6 = vpop.f32.mrb[113].mxu1 }
 0x26a   : > { %13354 = vst [vmem:[#allocation145_spill] sm:$0xff] %v9482_v40  ;;  %13355 = vst [vmem:[#allocation146_spill] sm:$0xff] %v9484_v6  ;;  %v9486_v10 = vpop.f32.mrb[113].mxu0  ;;  %v9488_v61 = vpop.f32.mrb[114].mxu1 }
 0x26b   : > { %13356 = vst [vmem:[#allocation147_spill] sm:$0xff] %v9486_v10  ;;  %13357 = vst [vmem:[#allocation148_spill] sm:$0xff] %v9488_v61  ;;  %v9490_v24 = vpop.f32.mrb[114].mxu0  ;;  %v9492_v21 = vpop.f32.mrb[115].mxu1 }
 0x26c   : > { %13358 = vst [vmem:[#allocation149_spill] sm:$0xff] %v9490_v24  ;;  %13359 = vst [vmem:[#allocation150_spill] sm:$0xff] %v9492_v21  ;;  %v9494_v5 = vpop.f32.mrb[115].mxu0 }
 0x26d   : > { %13360 = vst [vmem:[#allocation151_spill] sm:$0xff] %v9494_v5 }
 0x270   : > { %v9496_v28 = vpop.f32.mrb[116].mxu1 }
 0x271   : > { %13361 = vst [vmem:[#allocation152_spill] sm:$0xff] %v9496_v28  ;;  %v9498_v55 = vpop.f32.mrb[116].mxu0  ;;  %v9500_v0 = vpop.f32.mrb[117].mxu1 }
 0x272   : > { %13362 = vst [vmem:[#allocation153_spill] sm:$0xff] %v9498_v55  ;;  %13363 = vst [vmem:[#allocation154_spill] sm:$0xff] %v9500_v0  ;;  %v9502_v59 = vpop.f32.mrb[117].mxu0  ;;  %v9504_v40 = vpop.f32.mrb[118].mxu1 }
 0x273   : > { %13364 = vst [vmem:[#allocation155_spill] sm:$0xff] %v9502_v59  ;;  %13365 = vst [vmem:[#allocation156_spill] sm:$0xff] %v9504_v40  ;;  %v9506_v6 = vpop.f32.mrb[118].mxu0  ;;  %v9508_v10 = vpop.f32.mrb[119].mxu1 }
 0x274   : > { %13366 = vst [vmem:[#allocation157_spill] sm:$0xff] %v9506_v6  ;;  %13367 = vst [vmem:[#allocation158_spill] sm:$0xff] %v9508_v10  ;;  %v9510_v61 = vpop.f32.mrb[119].mxu0 }
 0x275   : > { %13368 = vst [vmem:[#allocation159_spill] sm:$0xff] %v9510_v61 }
 0x278   : > { %v9512_v24 = vpop.f32.mrb[120].mxu1 }
 0x279   : > { %13369 = vst [vmem:[#allocation160_spill] sm:$0xff] %v9512_v24  ;;  %v9514_v21 = vpop.f32.mrb[120].mxu0  ;;  %v9516_v5 = vpop.f32.mrb[121].mxu1 }
 0x27a   : > { %13370 = vst [vmem:[#allocation161_spill] sm:$0xff] %v9514_v21  ;;  %13371 = vst [vmem:[#allocation162_spill] sm:$0xff] %v9516_v5  ;;  %v9518_v28 = vpop.f32.mrb[121].mxu0  ;;  %v9520_v55 = vpop.f32.mrb[122].mxu1 }
 0x27b   : > { %13372 = vst [vmem:[#allocation163_spill] sm:$0xff] %v9518_v28  ;;  %13373 = vst [vmem:[#allocation164_spill] sm:$0xff] %v9520_v55  ;;  %v9522_v0 = vpop.f32.mrb[122].mxu0  ;;  %v9524_v59 = vpop.f32.mrb[123].mxu1 }
 0x27c   : > { %13374 = vst [vmem:[#allocation165_spill] sm:$0xff] %v9522_v0  ;;  %13375 = vst [vmem:[#allocation166_spill] sm:$0xff] %v9524_v59  ;;  %v9526_v40 = vpop.f32.mrb[123].mxu0 }
 0x27d   : > { %13376 = vst [vmem:[#allocation167_spill] sm:$0xff] %v9526_v40 }
 0x280   : > { %v9528_v6 = vpop.f32.mrb[124].mxu1 }
 0x281   : > { %13377 = vst [vmem:[#allocation168_spill] sm:$0xff] %v9528_v6  ;;  %v9530_v10 = vpop.f32.mrb[124].mxu0  ;;  %v9532_v61 = vpop.f32.mrb[125].mxu1 }
 0x282   : > { %13378 = vst [vmem:[#allocation169_spill] sm:$0xff] %v9530_v10  ;;  %13379 = vst [vmem:[#allocation170_spill] sm:$0xff] %v9532_v61  ;;  %v9534_v24 = vpop.f32.mrb[125].mxu0  ;;  %v9536_v21 = vpop.f32.mrb[126].mxu1 }
 0x283   : > { %13380 = vst [vmem:[#allocation171_spill] sm:$0xff] %v9534_v24  ;;  %13381 = vst [vmem:[#allocation172_spill] sm:$0xff] %v9536_v21  ;;  %v9538_v5 = vpop.f32.mrb[126].mxu0  ;;  %v9540_v28 = vpop.f32.mrb[127].mxu1 }
 0x284   : > { %13382 = vst [vmem:[#allocation173_spill] sm:$0xff] %v9538_v5  ;;  %13383 = vst [vmem:[#allocation174_spill] sm:$0xff] %v9540_v28  ;;  %v9542_v55 = vpop.f32.mrb[127].mxu0 }
 0x285   : > { %13384 = vst [vmem:[#allocation175_spill] sm:$0xff] %v9542_v55 }
 0x288   : > { %v9544_v0 = vpop.f32.mrb[128].mxu1 }
 0x289   : > { %13385 = vst [vmem:[#allocation176_spill] sm:$0xff] %v9544_v0  ;;  %v9546_v59 = vpop.f32.mrb[128].mxu0  ;;  %v9548_v40 = vpop.f32.mrb[129].mxu1 }
 0x28a   : > { %13386 = vst [vmem:[#allocation177_spill] sm:$0xff] %v9546_v59  ;;  %13387 = vst [vmem:[#allocation178_spill] sm:$0xff] %v9548_v40  ;;  %v9550_v6 = vpop.f32.mrb[129].mxu0  ;;  %v9552_v10 = vpop.f32.mrb[130].mxu1 }
 0x28b   : > { %13388 = vst [vmem:[#allocation179_spill] sm:$0xff] %v9550_v6  ;;  %13389 = vst [vmem:[#allocation180_spill] sm:$0xff] %v9552_v10  ;;  %v9554_v61 = vpop.f32.mrb[130].mxu0  ;;  %v9556_v24 = vpop.f32.mrb[131].mxu1 }
 0x28c   : > { %13390 = vst [vmem:[#allocation181_spill] sm:$0xff] %v9554_v61  ;;  %13391 = vst [vmem:[#allocation182_spill] sm:$0xff] %v9556_v24  ;;  %v9558_v21 = vpop.f32.mrb[131].mxu0 }
 0x28d   : > { %13392 = vst [vmem:[#allocation183_spill] sm:$0xff] %v9558_v21 }
 0x290   : > { %v9560_v5 = vpop.f32.mrb[132].mxu1 }
 0x291   : > { %13393 = vst [vmem:[#allocation184_spill] sm:$0xff] %v9560_v5  ;;  %v9562_v28 = vpop.f32.mrb[132].mxu0  ;;  %v9564_v55 = vpop.f32.mrb[133].mxu1 }
 0x292   : > { %13394 = vst [vmem:[#allocation185_spill] sm:$0xff] %v9562_v28  ;;  %13395 = vst [vmem:[#allocation186_spill] sm:$0xff] %v9564_v55  ;;  %v9566_v0 = vpop.f32.mrb[133].mxu0  ;;  %v9568_v59 = vpop.f32.mrb[134].mxu1 }
 0x293   : > { %13396 = vst [vmem:[#allocation187_spill] sm:$0xff] %v9566_v0  ;;  %13397 = vst [vmem:[#allocation188_spill] sm:$0xff] %v9568_v59  ;;  %v9570_v40 = vpop.f32.mrb[134].mxu0  ;;  %v9572_v6 = vpop.f32.mrb[135].mxu1 }
 0x294   : > { %13398 = vst [vmem:[#allocation189_spill] sm:$0xff] %v9570_v40  ;;  %13399 = vst [vmem:[#allocation190_spill] sm:$0xff] %v9572_v6  ;;  %v9574_v10 = vpop.f32.mrb[135].mxu0 }
 0x295   : > { %13400 = vst [vmem:[#allocation191_spill] sm:$0xff] %v9574_v10 }
 0x298   : > { %v9576_v61 = vpop.f32.mrb[136].mxu1 }
 0x299   : > { %13401 = vst [vmem:[#allocation192_spill] sm:$0xff] %v9576_v61  ;;  %v9578_v24 = vpop.f32.mrb[136].mxu0  ;;  %v9580_v21 = vpop.f32.mrb[137].mxu1 }
 0x29a   : > { %13402 = vst [vmem:[#allocation193_spill] sm:$0xff] %v9578_v24  ;;  %13403 = vst [vmem:[#allocation194_spill] sm:$0xff] %v9580_v21  ;;  %v9582_v5 = vpop.f32.mrb[137].mxu0  ;;  %v9584_v28 = vpop.f32.mrb[138].mxu1 }
 0x29b   : > { %13404 = vst [vmem:[#allocation195_spill] sm:$0xff] %v9582_v5  ;;  %13405 = vst [vmem:[#allocation196_spill] sm:$0xff] %v9584_v28  ;;  %v9586_v55 = vpop.f32.mrb[138].mxu0  ;;  %v9588_v0 = vpop.f32.mrb[139].mxu1 }
 0x29c   : > { %13406 = vst [vmem:[#allocation197_spill] sm:$0xff] %v9586_v55  ;;  %13407 = vst [vmem:[#allocation198_spill] sm:$0xff] %v9588_v0  ;;  %v9590_v59 = vpop.f32.mrb[139].mxu0  ;;  %v1890_v0 = vand.u32 65535, %v9068_v23  ;;  %v1875_v23 = vand.u32 65535, %v9086_v20 }
 0x29d   : > { %13408 = vst [vmem:[#allocation199_spill] sm:$0xff] %v9590_v59 }
 0x29e   : > { %v1892_v59 = vcvt.s32.f32 %v1890_v0 }
 0x2a0   : > { %v9592_v40 = vpop.f32.mrb[140].mxu1 }
 0x2a1   : > { %13409 = vst [vmem:[#allocation200_spill] sm:$0xff] %v9592_v40  ;;  %v9594_v6 = vpop.f32.mrb[140].mxu0  ;;  %v9596_v10 = vpop.f32.mrb[141].mxu1  ;;  %v1860_v40 = vand.u32 65535, %v9072_v11  ;;  %v1950_v11 = vand.u32 65535, %v9099_v63 }
 0x2a2   : > { %13410 = vst [vmem:[#allocation201_spill] sm:$0xff] %v9594_v6  ;;  %v9598_v61 = vpop.f32.mrb[141].mxu0  ;;  %v9600_v24 = vpop.f32.mrb[142].mxu1  ;;  %v1905_v6 = vand.u32 65535, %v9082_v29 }
 0x2a3   : > { %13411 = vst [vmem:[#allocation202_spill] sm:$0xff] %v9598_v61  ;;  %13412 = vst [vmem:[#allocation203_spill] sm:$0xff] %v9600_v24  ;;  %v9602_v21 = vpop.f32.mrb[142].mxu0  ;;  %v9604_v5 = vpop.f32.mrb[143].mxu1  ;;  %v1952_v20 = vcvt.s32.f32 %v1950_v11  ;;  %v2010_v11 = vand.u32 65535, %v9148_v14  ;;  %v1980_v14 = vand.u32 65535, %v9173_v7 }
 0x2a4   : > { %13413 = vst [vmem:[#allocation204_spill] sm:$0xff] %v9602_v21  ;;  %13414 = vst [vmem:[#allocation205_spill] sm:$0xff] %v9604_v5  ;;  %v9606_v28 = vpop.f32.mrb[143].mxu0  ;;  %v1862_v5 = vcvt.s32.f32 %v1860_v40  ;;  %v1965_v40 = vand.u32 65535, %v9105_v42  ;;  %v1935_v42 = vand.u32 65535, %v9132_v16  ;;  %v2070_v7 = vand.u32 65535, %v9201_v38 }
 0x2a5   : > { %13415 = vst [vmem:[#allocation206_spill] sm:$0xff] %v9606_v28  ;;  %v1907_v28 = vcvt.s32.f32 %v1905_v6  ;;  %v2040_v38 = vand.u32 65535, %v9225_v54  ;;  %v2130_v54 = vand.u32 65535, %v9253_v34  ;;  %v2100_v34 = vand.u32 65535, %v9277_v30 }
 0x2a6   : > { %v2190_v30 = vand.u32 65535, %v9305_v32 }
 0x2af   : > { %v9609_v55 = vpop.xlane.xlu0 %1894 }
 0x2b0   : > { %vm1896_vm1 = vcmp.eq.f32.partialorder %v9078_v39, %v9609_v55 }
 0x2b1   : > { %v1897_v61 = vsel %vm1896_vm1, %v1892_v59, inf  ;;  %v1877_v59 = vcvt.s32.f32 %v1875_v23 }
 0x2b2   : > { %1898 = vmin.xlane.f32.xlu0 %v1897_v61 }
 0x2b3   : > { %v9615_v24 = vpop.xlane.xlu0 %1864  ;;  %v9617_v21 = vpop.xlane.xlu1 %1909 }
 0x2b4   : > { %vm1866_vm4 = vcmp.eq.f32.partialorder %v9091_v17, %v9615_v24  ;;  %vm1911_vm5 = vcmp.eq.f32.partialorder %v9093_v49, %v9617_v21  ;;  %v1920_v49 = vand.u32 65535, %v9123_v3 }
 0x2b5   : > { %v1867_v29 = vsel %vm1866_vm4, %v1862_v5, inf  ;;  %v1912_v39 = vsel %vm1911_vm5, %v1907_v28, inf  ;;  %v1967_v28 = vcvt.s32.f32 %v1965_v40 }
 0x2b6   : > { %1868 = vmin.xlane.f32.xlu0 %v1867_v29  ;;  %1913 = vmin.xlane.f32.xlu1 %v1912_v39  ;;  %v1922_v23 = vcvt.s32.f32 %v1920_v49  ;;  %v1937_v29 = vcvt.s32.f32 %v1935_v42  ;;  %v2025_v39 = vand.u32 65535, %v9157_v58  ;;  %v1995_v58 = vand.u32 65535, %v9187_v60 }
 0x2b7   : > { %v9625_v61 = vpop.xlane.xlu1 %1879  ;;  %v1982_v49 = vcvt.s32.f32 %v1980_v14  ;;  %v2085_v60 = vand.u32 65535, %v9209_v36  ;;  %v2055_v36 = vand.u32 65535, %v9239_v22  ;;  %v2145_v22 = vand.u32 65535, %v9261_v51 }
 0x2b8   : > { %v9628_v6 = vpop.xlane.xlu0 %1954  ;;  %vm1881_vm6 = vcmp.eq.f32.partialorder %v9111_v27, %v9625_v61  ;;  %v2132_v14 = vcvt.s32.f32 %v2130_v54  ;;  %v2115_v51 = vand.u32 65535, %v9291_v15  ;;  %v2205_v15 = vand.u32 65535, %v9313_v48 }
 0x2b9   : > { %v1882_v17 = vsel %vm1881_vm6, %v1877_v59, inf  ;;  %vm1956_vm7 = vcmp.eq.f32.partialorder %v9120_v1, %v9628_v6  ;;  %v2012_v59 = vcvt.s32.f32 %v2010_v11  ;;  %v2087_v11 = vcvt.s32.f32 %v2085_v60  ;;  %v13416_v60 = vld [vmem:[#allocation104_spill] sm:$0xff] }
 0x2ba   : > { %1883 = vmin.xlane.f32.xlu1 %v1882_v17  ;;  %v1957_v63 = vsel %vm1956_vm7, %v1952_v20, inf  ;;  %v2027_v20 = vcvt.s32.f32 %v2025_v39  ;;  %v2160_v32 = vand.u32 65535, %v13416_v60  ;;  %v2295_v60 = vand.u32 65535, %v9417_v9 }
 0x2bb   : > { %1958 = vmin.xlane.f32.xlu0 %v1957_v63  ;;  %v9635_v5 = vpop.xlane.xlu1 %1969  ;;  %v2325_v9 = vand.u32 65535, %v9449_v31 }
 0x2bc   : > { %vm1971_vm8 = vcmp.eq.f32.partialorder %v9142_v18, %v9635_v5  ;;  %v9640_v0 = vpop.xlane.xlu0 %1924 }
 0x2bd   : > { %v1972_v27 = vsel %vm1971_vm8, %v1967_v28, inf  ;;  %vm1926_vm9 = vcmp.eq.f32.partialorder %v9152_v33, %v9640_v0  ;;  %v1997_v28 = vcvt.s32.f32 %v1995_v58 }
 0x2be   : > { %1973 = vmin.xlane.f32.xlu1 %v1972_v27  ;;  %v1927_v1 = vsel %vm1926_vm9, %v1922_v23, inf  ;;  %v2072_v27 = vcvt.s32.f32 %v2070_v7  ;;  %v2117_v7 = vcvt.s32.f32 %v2115_v51  ;;  %v13421_v51 = vld [vmem:[#allocation120_spill] sm:$0xff] }
 0x2bf   : > { %v9645_v3 = vpop.xlane.xlu1 %1939  ;;  %1928 = vmin.xlane.f32.xlu0 %v1927_v1 }
 0x2c0   : > { %vm1941_vm10 = vcmp.eq.f32.partialorder %v9165_v12, %v9645_v3 }
 0x2c1   : > { %v9650_v16 = vpop.xlane.xlu0 %2014  ;;  %v1942_v18 = vsel %vm1941_vm10, %v1937_v29, inf  ;;  %v2042_v29 = vcvt.s32.f32 %v2040_v38  ;;  %v13417_v38 = vld [vmem:[#allocation108_spill] sm:$0xff] }
 0x2c2   : > { %1943 = vmin.xlane.f32.xlu1 %v1942_v18  ;;  %vm2016_vm11 = vcmp.eq.f32.partialorder %v9170_v52, %v9650_v16  ;;  %v2057_v18 = vcvt.s32.f32 %v2055_v36  ;;  %v2175_v48 = vand.u32 65535, %v13417_v38  ;;  %v2162_v36 = vcvt.s32.f32 %v2160_v32 }
 0x2c3   : > { %v2017_v33 = vsel %vm2016_vm11, %v2012_v59, inf  ;;  %v9655_v40 = vpop.xlane.xlu1 %2029 }
 0x2c4   : > { %2018 = vmin.xlane.f32.xlu0 %v2017_v33  ;;  %vm2031_vm12 = vcmp.eq.f32.partialorder %v9195_v50, %v9655_v40  ;;  %v2177_v54 = vcvt.s32.f32 %v2175_v48 }
 0x2c5   : > { %v9660_v12 = vpop.xlane.xlu0 %1984  ;;  %v2032_v17 = vsel %vm2031_vm12, %v2027_v20, inf  ;;  %v2147_v20 = vcvt.s32.f32 %v2145_v22 }
 0x2c6   : > { %2033 = vmin.xlane.f32.xlu1 %v2032_v17  ;;  %vm1986_vm13 = vcmp.eq.f32.partialorder %v9198_v4, %v9660_v12  ;;  %v2102_v17 = vcvt.s32.f32 %v2100_v34  ;;  %v13420_v34 = vld [vmem:[#allocation116_spill] sm:$0xff] }
 0x2c7   : > { %v1987_v52 = vsel %vm1986_vm13, %v1982_v49, inf  ;;  %v9665_v63 = vpop.xlane.xlu1 %1999 }
 0x2c8   : > { %1988 = vmin.xlane.f32.xlu0 %v1987_v52  ;;  %vm2001_vm14 = vcmp.eq.f32.partialorder %v9217_v19, %v9665_v63 }
 0x2c9   : > { %v9670_v50 = vpop.xlane.xlu0 %2074  ;;  %v2002_v42 = vsel %vm2001_vm14, %v1997_v28, inf  ;;  %v2192_v28 = vcvt.s32.f32 %v2190_v30 }
 0x2ca   : > { %2003 = vmin.xlane.f32.xlu1 %v2002_v42  ;;  %vm2076_vm15 = vcmp.eq.f32.partialorder %v9222_v8, %v9670_v50 }
 0x2cb   : > { %v2077_v4 = vsel %vm2076_vm15, %v2072_v27, inf  ;;  %v9675_v23 = vpop.xlane.xlu1 %2089  ;;  %v2207_v27 = vcvt.s32.f32 %v2205_v15  ;;  %v13423_v15 = vld [vmem:[#allocation124_spill] sm:$0xff] }
 0x2cc   : > { %2078 = vmin.xlane.f32.xlu0 %v2077_v4  ;;  %vm2091_vm0 = vcmp.eq.f32.partialorder %v9247_v25, %v9675_v23  ;;  %v13418_v4 = vld [vmem:[#allocation111_spill] sm:$0xff] }
 0x2cd   : > { %v9680_v19 = vpop.xlane.xlu0 %2044  ;;  %v2092_v1 = vsel %vm2091_vm0, %v2087_v11, inf }
 0x2ce   : > { %2093 = vmin.xlane.f32.xlu1 %v2092_v1  ;;  %vm2046_vm2 = vcmp.eq.f32.partialorder %v9250_v2, %v9680_v19  ;;  %v2250_v1 = vand.u32 65535, %v9357_v43  ;;  %v2220_v43 = vand.u32 65535, %v13420_v34  ;;  %v9786_v34 = vld [vmem:[%s13043_s5 + $0x3] ss:$0 sm:$0xff] }
 0x2cf   : > { %v2047_v8 = vsel %vm2046_vm2, %v2042_v29, inf  ;;  %v9685_v39 = vpop.xlane.xlu1 %2059 }
 0x2d0   : > { %2048 = vmin.xlane.f32.xlu0 %v2047_v8  ;;  %vm2061_vm3 = vcmp.eq.f32.partialorder %v9269_v13, %v9685_v39  ;;  %v2265_v8 = vand.u32 65535, %v9365_v44  ;;  %v2235_v44 = vand.u32 65535, %v13421_v51 }
 0x2d1   : > { %v9690_v25 = vpop.xlane.xlu0 %2134  ;;  %v2062_v59 = vsel %vm2061_vm3, %v2057_v18, inf  ;;  %v13419_v18 = vld [vmem:[#allocation114_spill] sm:$0xff] }
 0x2d2   : > { %2063 = vmin.xlane.f32.xlu1 %v2062_v59  ;;  %vm2136_vm1 = vcmp.eq.f32.partialorder %v9274_v41, %v9690_v25 }
 0x2d3   : > { %v2137_v2 = vsel %vm2136_vm1, %v2132_v14, inf  ;;  %v9695_v33 = vpop.xlane.xlu1 %2149  ;;  %v2252_v14 = vcvt.s32.f32 %v2250_v1 }
 0x2d4   : > { %2138 = vmin.xlane.f32.xlu0 %v2137_v2  ;;  %vm2151_vm4 = vcmp.eq.f32.partialorder %v9299_v56, %v9695_v33 }
 0x2d5   : > { %v9700_v13 = vpop.xlane.xlu0 %2104  ;;  %v2152_v58 = vsel %vm2151_vm4, %v2147_v20, inf  ;;  %v2267_v20 = vcvt.s32.f32 %v2265_v8  ;;  %v13426_v8 = vld [vmem:[#allocation135_spill] sm:$0xff] }
 0x2d6   : > { %2153 = vmin.xlane.f32.xlu1 %v2152_v58  ;;  %vm2106_vm5 = vcmp.eq.f32.partialorder %v9302_v35, %v9700_v13  ;;  %v13422_v58 = vld [vmem:[#allocation123_spill] sm:$0xff] }
 0x2d7   : > { %v2107_v41 = vsel %vm2106_vm5, %v2102_v17, inf  ;;  %v9705_v49 = vpop.xlane.xlu1 %2119 }
 0x2d8   : > { %2108 = vmin.xlane.f32.xlu0 %v2107_v41  ;;  %vm2121_vm6 = vcmp.eq.f32.partialorder %v9321_v53, %v9705_v49  ;;  %v2222_v41 = vcvt.s32.f32 %v2220_v43  ;;  %v13427_v43 = vld [vmem:[#allocation69_spill] sm:$0xff] }
 0x2d9   : > { %v9710_v56 = vpop.xlane.xlu0 %2194  ;;  %v2122_v52 = vsel %vm2121_vm6, %v2117_v7, inf  ;;  %v2280_v7 = vand.u32 65535, %v9409_v26  ;;  %v2310_v26 = vand.u32 65535, %v9433_v62  ;;  %v13425_v62 = vld [vmem:[#allocation134_spill] sm:$0xff] }
 0x2da   : > { %2123 = vmin.xlane.f32.xlu1 %v2122_v52  ;;  %vm2196_vm7 = vcmp.eq.f32.partialorder %v9326_v37, %v9710_v56 }
 0x2db   : > { %v2197_v35 = vsel %vm2196_vm7, %v2192_v28, inf  ;;  %v9715_v42 = vpop.xlane.xlu1 %2209  ;;  %v2237_v28 = vcvt.s32.f32 %v2235_v44  ;;  %v2312_v1 = vcvt.s32.f32 %v2310_v26  ;;  %v13429_v44 = vld [vmem:[#allocation71_spill] sm:$0xff] }
 0x2dc   : > { %2198 = vmin.xlane.f32.xlu0 %v2197_v35  ;;  %vm2211_vm8 = vcmp.eq.f32.partialorder %v13418_v4, %v9715_v42  ;;  %v2297_v4 = vcvt.s32.f32 %v2295_v60  ;;  %v13433_v60 = vld [vmem:[#allocation75_spill] sm:$0xff] }
 0x2dd   : > { %v9720_v53 = vpop.xlane.xlu0 %2164  ;;  %v2212_v11 = vsel %vm2211_vm8, %v2207_v27, inf  ;;  %v2282_v27 = vcvt.s32.f32 %v2280_v7  ;;  %v13431_v7 = vld [vmem:[#allocation73_spill] sm:$0xff] }
 0x2de   : > { %2213 = vmin.xlane.f32.xlu1 %v2212_v11  ;;  %vm2166_vm9 = vcmp.eq.f32.partialorder %v9354_v57, %v9720_v53  ;;  %v13424_v11 = vld [vmem:[#allocation133_spill] sm:$0xff] }
 0x2df   : > { %v2167_v37 = vsel %vm2166_vm9, %v2162_v36, inf  ;;  %v9725_v29 = vpop.xlane.xlu1 %2179 }
 0x2e0   : > { %2168 = vmin.xlane.f32.xlu0 %v2167_v37  ;;  %vm2181_vm10 = vcmp.eq.f32.partialorder %v13419_v18, %v9725_v29  ;;  %v9771_v18 = vld [vmem:[%s13043_s5] ss:$0 sm:$0xff] }
 0x2e1   : > { %v9730_v22 = vpop.xlane.xlu0 %2254  ;;  %v2182_v59 = vsel %vm2181_vm10, %v2177_v54, inf  ;;  %v2327_v54 = vcvt.s32.f32 %v2325_v9  ;;  %v13437_v9 = vld [vmem:[#allocation78_spill] sm:$0xff] }
 0x2e2   : > { %2183 = vmin.xlane.f32.xlu1 %v2182_v59  ;;  %vm2256_vm11 = vcmp.eq.f32.partialorder %v9378_v46, %v9730_v22  ;;  %v9776_v59 = vld [vmem:[%s13043_s5 + $0x2] ss:$0 sm:$0xff] }
 0x2e3   : > { %v2257_v57 = vsel %vm2256_vm11, %v2252_v14, inf  ;;  %v9735_v2 = vpop.xlane.xlu1 %2269  ;;  %v9781_v14 = vld [vmem:[%s13043_s5 + $0x1] ss:$0 sm:$0xff] }
 0x2e4   : > { %2258 = vmin.xlane.f32.xlu0 %v2257_v57  ;;  %vm2271_vm12 = vcmp.eq.f32.partialorder %v13422_v58, %v9735_v2  ;;  %v9790_v57 = vadd.f32 %v9771_v18, %v13427_v43  ;;  %v9798_v58 = vadd.f32 %v9781_v14, %v13429_v44 }
 0x2e5   : > { %v9740_v17 = vpop.xlane.xlu0 %2224  ;;  %v2272_v30 = vsel %vm2271_vm12, %v2267_v20, inf  ;;  %v13428_v20 = vld [vmem:[#allocation70_spill] sm:$0xff] }
 0x2e6   : > { %2273 = vmin.xlane.f32.xlu1 %v2272_v30  ;;  %vm2226_vm13 = vcmp.eq.f32.partialorder %v13423_v15, %v9740_v17  ;;  %v9794_v51 = vadd.f32 %v9776_v59, %v13428_v20  ;;  %v13430_v30 = vld [vmem:[#allocation72_spill] sm:$0xff]  ;;  %v9806_v15 = vadd.f32 %v9771_v18, %v13431_v7  ;;  %v13442_v20 = vld [vmem:[#allocation83_spill] sm:$0xff] }
 0x2e7   : > { %v2227_v46 = vsel %vm2226_vm13, %v2222_v41, inf  ;;  %v9745_v52 = vpop.xlane.xlu1 %2239  ;;  %v9802_v41 = vadd.f32 %v9786_v34, %v13430_v30  ;;  %v9846_v44 = vadd.f32 %v9781_v14, %v13442_v20  ;;  %v13443_v30 = vld [vmem:[#allocation84_spill] sm:$0xff] }
 0x2e8   : > { %2228 = vmin.xlane.f32.xlu0 %v2227_v46  ;;  %vm2241_vm14 = vcmp.eq.f32.partialorder %v9425_v47, %v9745_v52  ;;  %v13432_v46 = vld [vmem:[#allocation74_spill] sm:$0xff]  ;;  %v9850_v7 = vadd.f32 %v9786_v34, %v13443_v30 }
 0x2e9   : > { %v9750_v32 = vpop.xlane.xlu0 %2284  ;;  %v2242_v35 = vsel %vm2241_vm14, %v2237_v28, inf  ;;  %v9810_v28 = vadd.f32 %v9776_v59, %v13432_v46  ;;  %v13444_v46 = vld [vmem:[#allocation85_spill] sm:$0xff]  ;;  %v13454_v30 = vld [vmem:[#allocation90_spill] sm:$0xff] }
 0x2ea   : > { %2243 = vmin.xlane.f32.xlu1 %v2242_v35  ;;  %vm2286_vm15 = vcmp.eq.f32.partialorder %v9430_v45, %v9750_v32  ;;  %v9814_v35 = vadd.f32 %v9781_v14, %v13433_v60  ;;  %v9854_v60 = vadd.f32 %v9771_v18, %v13444_v46  ;;  %v9874_v46 = vadd.f32 %v9776_v59, %v13454_v30 }
 0x2eb   : > { %v2287_v38 = vsel %vm2286_vm15, %v2282_v27, inf  ;;  %v9755_v48 = vpop.xlane.xlu1 %2299  ;;  %v13434_v27 = vld [vmem:[#allocation76_spill] sm:$0xff] }
 0x2ec   : > { %2288 = vmin.xlane.f32.xlu0 %v2287_v38  ;;  %vm2301_vm0 = vcmp.eq.f32.partialorder %v13424_v11, %v9755_v48  ;;  %v9818_v26 = vadd.f32 %v9786_v34, %v13434_v27  ;;  %v13436_v38 = vld [vmem:[#allocation77_spill] sm:$0xff]  ;;  %v9826_v11 = vadd.f32 %v9776_v59, %v13437_v9  ;;  %13445 = vst [vmem:[#allocation108_spill] sm:$0xff] %v9854_v60  ;;  %v13446_v27 = vld [vmem:[#allocation86_spill] sm:$0xff]  ;;  %v13448_v9 = vld [vmem:[#allocation87_spill] sm:$0xff] }
 0x2ed   : > { %v9760_v47 = vpop.xlane.xlu0 %2314  ;;  %v2302_v36 = vsel %vm2301_vm0, %v2297_v4, inf  ;;  %v9822_v4 = vadd.f32 %v9771_v18, %v13436_v38  ;;  %v9858_v38 = vadd.f32 %v9776_v59, %v13446_v27  ;;  %13455 = vst [vmem:[#allocation123_spill] sm:$0xff] %v9874_v46  ;;  %v13456_v60 = vld [vmem:[#allocation91_spill] sm:$0xff]  ;;  %v13466_v46 = vld [vmem:[#allocation96_spill] sm:$0xff] }
 0x2ee   : > { %2303 = vmin.xlane.f32.xlu1 %v2302_v36  ;;  %vm2316_vm2 = vcmp.eq.f32.partialorder %v13425_v62, %v9760_v47  ;;  %13435 = vst [vmem:[#allocation104_spill] sm:$0xff] %v9818_v26  ;;  %v13438_v36 = vld [vmem:[#allocation79_spill] sm:$0xff]  ;;  %v13439_v62 = vld [vmem:[#allocation80_spill] sm:$0xff]  ;;  %v9878_v27 = vadd.f32 %v9781_v14, %v13456_v60  ;;  %v9898_v60 = vadd.f32 %v9786_v34, %v13466_v46 }
 0x2ef   : > { %v2317_v37 = vsel %vm2316_vm2, %v2312_v1, inf  ;;  %v9764_v45 = vpop.xlane.xlu1 %2329  ;;  %v9830_v1 = vadd.f32 %v9781_v14, %v13438_v36  ;;  %13447 = vst [vmem:[#allocation111_spill] sm:$0xff] %v9858_v38  ;;  %v9862_v36 = vadd.f32 %v9781_v14, %v13448_v9  ;;  %v13458_v38 = vld [vmem:[#allocation92_spill] sm:$0xff] }
 0x2f0   : > { %2318 = vmin.xlane.f32.xlu0 %v2317_v37  ;;  %vm2331_vm3 = vcmp.eq.f32.partialorder %v13426_v8, %v9764_v45  ;;  %v9834_v37 = vadd.f32 %v9786_v34, %v13439_v62  ;;  %v13450_v62 = vld [vmem:[#allocation88_spill] sm:$0xff]  ;;  %13457 = vst [vmem:[#allocation124_spill] sm:$0xff] %v9878_v27  ;;  %v9882_v9 = vadd.f32 %v9786_v34, %v13458_v38  ;;  %13467 = vst [vmem:[#allocation70_spill] sm:$0xff] %v9898_v60  ;;  %v13468_v27 = vld [vmem:[#allocation97_spill] sm:$0xff] }
 0x2f1   : > { %v2332_v31 = vsel %vm2331_vm3, %v2327_v54, inf  ;;  %v13440_v54 = vld [vmem:[#allocation81_spill] sm:$0xff]  ;;  %13449 = vst [vmem:[#allocation114_spill] sm:$0xff] %v9862_v36  ;;  %v9902_v38 = vadd.f32 %v9771_v18, %v13468_v27  ;;  %v13478_v60 = vld [vmem:[#allocation102_spill] sm:$0xff] }
 0x2f2   : > { %2333 = vmin.xlane.f32.xlu1 %v2332_v31  ;;  %v9838_v8 = vadd.f32 %v9771_v18, %v13440_v54  ;;  %v13441_v31 = vld [vmem:[#allocation82_spill] sm:$0xff]  ;;  %v9866_v54 = vadd.f32 %v9786_v34, %v13450_v62  ;;  %13459 = vst [vmem:[#allocation133_spill] sm:$0xff] %v9882_v9  ;;  %v13460_v36 = vld [vmem:[#allocation93_spill] sm:$0xff]  ;;  %v9922_v27 = vadd.f32 %v9776_v59, %v13478_v60 }
 0x2f3   : > { %v9842_v43 = vadd.f32 %v9776_v59, %v13441_v31  ;;  %v13452_v31 = vld [vmem:[#allocation89_spill] sm:$0xff]  ;;  %v9886_v62 = vadd.f32 %v9771_v18, %v13460_v36  ;;  %13469 = vst [vmem:[#allocation71_spill] sm:$0xff] %v9902_v38  ;;  %v13470_v9 = vld [vmem:[#allocation98_spill] sm:$0xff]  ;;  %v13480_v38 = vld [vmem:[#allocation103_spill] sm:$0xff] }
 0x2f4   : > { %13451 = vst [vmem:[#allocation116_spill] sm:$0xff] %v9866_v54  ;;  %v9870_v20 = vadd.f32 %v9771_v18, %v13452_v31  ;;  %v13462_v54 = vld [vmem:[#allocation94_spill] sm:$0xff]  ;;  %v9906_v36 = vadd.f32 %v9776_v59, %v13470_v9  ;;  %13479 = vst [vmem:[#allocation76_spill] sm:$0xff] %v9922_v27  ;;  %v9926_v9 = vadd.f32 %v9781_v14, %v13480_v38 }
 0x2f5   : > { %13461 = vst [vmem:[#allocation134_spill] sm:$0xff] %v9886_v62  ;;  %v9890_v31 = vadd.f32 %v9776_v59, %v13462_v54  ;;  %v13472_v62 = vld [vmem:[#allocation99_spill] sm:$0xff]  ;;  %v13490_v27 = vld [vmem:[#allocation110_spill] sm:$0xff] }
 0x2f6   : > { %13453 = vst [vmem:[#allocation120_spill] sm:$0xff] %v9870_v20  ;;  %v13464_v20 = vld [vmem:[#allocation95_spill] sm:$0xff]  ;;  %13471 = vst [vmem:[#allocation72_spill] sm:$0xff] %v9906_v36  ;;  %v9910_v54 = vadd.f32 %v9781_v14, %v13472_v62  ;;  %v13482_v36 = vld [vmem:[#allocation105_spill] sm:$0xff]  ;;  %v9946_v38 = vadd.f32 %v9786_v34, %v13490_v27 }
 0x2f7   : > { %13463 = vst [vmem:[#allocation135_spill] sm:$0xff] %v9890_v31  ;;  %v9894_v30 = vadd.f32 %v9781_v14, %v13464_v20  ;;  %v13474_v31 = vld [vmem:[#allocation100_spill] sm:$0xff]  ;;  %13481 = vst [vmem:[#allocation77_spill] sm:$0xff] %v9926_v9  ;;  %v9930_v62 = vadd.f32 %v9786_v34, %v13482_v36 }
 0x2f8   : > { %13473 = vst [vmem:[#allocation73_spill] sm:$0xff] %v9910_v54  ;;  %v9914_v20 = vadd.f32 %v9786_v34, %v13474_v31  ;;  %v13484_v54 = vld [vmem:[#allocation106_spill] sm:$0xff]  ;;  %13491 = vst [vmem:[#allocation82_spill] sm:$0xff] %v9946_v38  ;;  %v13492_v9 = vld [vmem:[#allocation112_spill] sm:$0xff] }
 0x2f9   : > { %13465 = vst [vmem:[#allocation69_spill] sm:$0xff] %v9894_v30  ;;  %v13476_v30 = vld [vmem:[#allocation101_spill] sm:$0xff]  ;;  %13483 = vst [vmem:[#allocation78_spill] sm:$0xff] %v9930_v62  ;;  %v9934_v31 = vadd.f32 %v9771_v18, %v13484_v54  ;;  %v9950_v36 = vadd.f32 %v9771_v18, %v13492_v9  ;;  %v13502_v38 = vld [vmem:[#allocation119_spill] sm:$0xff] }
 0x2fa   : > { %13475 = vst [vmem:[#allocation74_spill] sm:$0xff] %v9914_v20  ;;  %v9918_v46 = vadd.f32 %v9771_v18, %v13476_v30  ;;  %v13486_v20 = vld [vmem:[#allocation107_spill] sm:$0xff]  ;;  %v13494_v62 = vld [vmem:[#allocation113_spill] sm:$0xff]  ;;  %v9970_v9 = vadd.f32 %v9776_v59, %v13502_v38 }
 0x2fb   : > { %13485 = vst [vmem:[#allocation79_spill] sm:$0xff] %v9934_v31  ;;  %v9938_v30 = vadd.f32 %v9776_v59, %v13486_v20  ;;  %13493 = vst [vmem:[#allocation83_spill] sm:$0xff] %v9950_v36  ;;  %v9954_v54 = vadd.f32 %v9776_v59, %v13494_v62  ;;  %v13496_v31 = vld [vmem:[#allocation115_spill] sm:$0xff]  ;;  %v13504_v36 = vld [vmem:[#allocation121_spill] sm:$0xff] }
 0x2fc   : > { %13477 = vst [vmem:[#allocation75_spill] sm:$0xff] %v9918_v46  ;;  %v13488_v46 = vld [vmem:[#allocation109_spill] sm:$0xff]  ;;  %v9958_v20 = vadd.f32 %v9781_v14, %v13496_v31  ;;  %13503 = vst [vmem:[#allocation88_spill] sm:$0xff] %v9970_v9  ;;  %v9974_v62 = vadd.f32 %v9781_v14, %v13504_v36  ;;  %v13514_v9 = vld [vmem:[#allocation128_spill] sm:$0xff] }
 0x2fd   : > { %13487 = vst [vmem:[#allocation80_spill] sm:$0xff] %v9938_v30  ;;  %v9942_v60 = vadd.f32 %v9781_v14, %v13488_v46  ;;  %13495 = vst [vmem:[#allocation84_spill] sm:$0xff] %v9954_v54  ;;  %v13498_v30 = vld [vmem:[#allocation117_spill] sm:$0xff]  ;;  %v13506_v54 = vld [vmem:[#allocation122_spill] sm:$0xff]  ;;  %v9994_v36 = vadd.f32 %v9786_v34, %v13514_v9 }
 0x2fe   : > { %13497 = vst [vmem:[#allocation85_spill] sm:$0xff] %v9958_v20  ;;  %v9962_v46 = vadd.f32 %v9786_v34, %v13498_v30  ;;  %13505 = vst [vmem:[#allocation89_spill] sm:$0xff] %v9974_v62  ;;  %v9978_v31 = vadd.f32 %v9786_v34, %v13506_v54  ;;  %v13508_v20 = vld [vmem:[#allocation125_spill] sm:$0xff] }
 0x2ff   : > { %13489 = vst [vmem:[#allocation81_spill] sm:$0xff] %v9942_v60  ;;  %v13500_v60 = vld [vmem:[#allocation118_spill] sm:$0xff]  ;;  %v9982_v30 = vadd.f32 %v9771_v18, %v13508_v20  ;;  %13515 = vst [vmem:[#allocation94_spill] sm:$0xff] %v9994_v36  ;;  %v13516_v62 = vld [vmem:[#allocation129_spill] sm:$0xff] }
 0x300   : > { %13499 = vst [vmem:[#allocation86_spill] sm:$0xff] %v9962_v46  ;;  %v9966_v27 = vadd.f32 %v9771_v18, %v13500_v60  ;;  %13507 = vst [vmem:[#allocation90_spill] sm:$0xff] %v9978_v31  ;;  %v13510_v46 = vld [vmem:[#allocation126_spill] sm:$0xff]  ;;  %v9998_v54 = vadd.f32 %v9771_v18, %v13516_v62  ;;  %v13526_v36 = vld [vmem:[#allocation137_spill] sm:$0xff] }
 0x301   : > { %13509 = vst [vmem:[#allocation91_spill] sm:$0xff] %v9982_v30  ;;  %v9986_v60 = vadd.f32 %v9776_v59, %v13510_v46  ;;  %v13518_v31 = vld [vmem:[#allocation130_spill] sm:$0xff]  ;;  %v13520_v30 = vld [vmem:[#allocation131_spill] sm:$0xff]  ;;  %v10018_v62 = vadd.f32 %v9776_v59, %v13526_v36 }
 0x302   : > { %13501 = vst [vmem:[#allocation87_spill] sm:$0xff] %v9966_v27  ;;  %v13512_v27 = vld [vmem:[#allocation127_spill] sm:$0xff]  ;;  %13517 = vst [vmem:[#allocation95_spill] sm:$0xff] %v9998_v54  ;;  %v10002_v20 = vadd.f32 %v9776_v59, %v13518_v31  ;;  %v10006_v46 = vadd.f32 %v9781_v14, %v13520_v30  ;;  %v13528_v54 = vld [vmem:[#allocation138_spill] sm:$0xff] }
 0x303   : > { %13511 = vst [vmem:[#allocation92_spill] sm:$0xff] %v9986_v60  ;;  %v9990_v38 = vadd.f32 %v9781_v14, %v13512_v27  ;;  %v13522_v60 = vld [vmem:[#allocation132_spill] sm:$0xff]  ;;  %13527 = vst [vmem:[#allocation100_spill] sm:$0xff] %v10018_v62  ;;  %v10022_v31 = vadd.f32 %v9781_v14, %v13528_v54  ;;  %v13538_v62 = vld [vmem:[#allocation143_spill] sm:$0xff] }
 0x304   : > { %13519 = vst [vmem:[#allocation96_spill] sm:$0xff] %v10002_v20  ;;  %13521 = vst [vmem:[#allocation97_spill] sm:$0xff] %v10006_v46  ;;  %v10010_v27 = vadd.f32 %v9786_v34, %v13522_v60  ;;  %v13530_v20 = vld [vmem:[#allocation139_spill] sm:$0xff]  ;;  %v13532_v46 = vld [vmem:[#allocation140_spill] sm:$0xff]  ;;  %v10042_v54 = vadd.f32 %v9786_v34, %v13538_v62 }
 0x305   : > { %13513 = vst [vmem:[#allocation93_spill] sm:$0xff] %v9990_v38  ;;  %v13524_v38 = vld [vmem:[#allocation136_spill] sm:$0xff]  ;;  %13529 = vst [vmem:[#allocation101_spill] sm:$0xff] %v10022_v31  ;;  %v10026_v30 = vadd.f32 %v9786_v34, %v13530_v20  ;;  %v10030_v60 = vadd.f32 %v9771_v18, %v13532_v46 }
 0x306   : > { %13523 = vst [vmem:[#allocation98_spill] sm:$0xff] %v10010_v27  ;;  %v10014_v9 = vadd.f32 %v9771_v18, %v13524_v38  ;;  %v13534_v27 = vld [vmem:[#allocation141_spill] sm:$0xff]  ;;  %13539 = vst [vmem:[#allocation107_spill] sm:$0xff] %v10042_v54  ;;  %v13540_v31 = vld [vmem:[#allocation144_spill] sm:$0xff] }
 0x307   : > { %13531 = vst [vmem:[#allocation102_spill] sm:$0xff] %v10026_v30  ;;  %13533 = vst [vmem:[#allocation103_spill] sm:$0xff] %v10030_v60  ;;  %v10034_v38 = vadd.f32 %v9776_v59, %v13534_v27  ;;  %v10046_v20 = vadd.f32 %v9771_v18, %v13540_v31  ;;  %v13542_v30 = vld [vmem:[#allocation145_spill] sm:$0xff]  ;;  %v13544_v60 = vld [vmem:[#allocation146_spill] sm:$0xff] }
 0x308   : > { %13525 = vst [vmem:[#allocation99_spill] sm:$0xff] %v10014_v9  ;;  %v13536_v9 = vld [vmem:[#allocation142_spill] sm:$0xff]  ;;  %v10050_v46 = vadd.f32 %v9776_v59, %v13542_v30  ;;  %v10054_v27 = vadd.f32 %v9781_v14, %v13544_v60  ;;  %v13550_v54 = vld [vmem:[#allocation149_spill] sm:$0xff] }
 0x309   : > { %13535 = vst [vmem:[#allocation105_spill] sm:$0xff] %v10034_v38  ;;  %v10038_v36 = vadd.f32 %v9781_v14, %v13536_v9  ;;  %13541 = vst [vmem:[#allocation109_spill] sm:$0xff] %v10046_v20  ;;  %v13546_v38 = vld [vmem:[#allocation147_spill] sm:$0xff]  ;;  %v10066_v31 = vadd.f32 %v9776_v59, %v13550_v54  ;;  %v13552_v20 = vld [vmem:[#allocation150_spill] sm:$0xff] }
 0x30a   : > { %13543 = vst [vmem:[#allocation110_spill] sm:$0xff] %v10050_v46  ;;  %13545 = vst [vmem:[#allocation112_spill] sm:$0xff] %v10054_v27  ;;  %v10058_v9 = vadd.f32 %v9786_v34, %v13546_v38  ;;  %v10070_v30 = vadd.f32 %v9781_v14, %v13552_v20  ;;  %v13554_v46 = vld [vmem:[#allocation151_spill] sm:$0xff]  ;;  %v13556_v27 = vld [vmem:[#allocation152_spill] sm:$0xff] }
 0x30b   : > { %13537 = vst [vmem:[#allocation106_spill] sm:$0xff] %v10038_v36  ;;  %v13548_v36 = vld [vmem:[#allocation148_spill] sm:$0xff]  ;;  %13551 = vst [vmem:[#allocation117_spill] sm:$0xff] %v10066_v31  ;;  %v10074_v60 = vadd.f32 %v9786_v34, %v13554_v46  ;;  %v10078_v38 = vadd.f32 %v9771_v18, %v13556_v27  ;;  %v13562_v31 = vld [vmem:[#allocation155_spill] sm:$0xff] }
 0x30c   : > { %13547 = vst [vmem:[#allocation113_spill] sm:$0xff] %v10058_v9  ;;  %v10062_v62 = vadd.f32 %v9771_v18, %v13548_v36  ;;  %13553 = vst [vmem:[#allocation118_spill] sm:$0xff] %v10070_v30  ;;  %v13558_v9 = vld [vmem:[#allocation153_spill] sm:$0xff]  ;;  %v10090_v20 = vadd.f32 %v9786_v34, %v13562_v31  ;;  %v13564_v30 = vld [vmem:[#allocation156_spill] sm:$0xff] }
 0x30d   : > { %13555 = vst [vmem:[#allocation119_spill] sm:$0xff] %v10074_v60  ;;  %13557 = vst [vmem:[#allocation121_spill] sm:$0xff] %v10078_v38  ;;  %v10082_v36 = vadd.f32 %v9776_v59, %v13558_v9  ;;  %v10094_v46 = vadd.f32 %v9771_v18, %v13564_v30  ;;  %v13566_v60 = vld [vmem:[#allocation157_spill] sm:$0xff]  ;;  %v13568_v38 = vld [vmem:[#allocation158_spill] sm:$0xff] }
 0x30e   : > { %13549 = vst [vmem:[#allocation115_spill] sm:$0xff] %v10062_v62  ;;  %v13560_v62 = vld [vmem:[#allocation154_spill] sm:$0xff]  ;;  %13563 = vst [vmem:[#allocation126_spill] sm:$0xff] %v10090_v20  ;;  %v10098_v27 = vadd.f32 %v9776_v59, %v13566_v60  ;;  %v10102_v9 = vadd.f32 %v9781_v14, %v13568_v38  ;;  %v13574_v20 = vld [vmem:[#allocation161_spill] sm:$0xff] }
 0x30f   : > { %13559 = vst [vmem:[#allocation122_spill] sm:$0xff] %v10082_v36  ;;  %v10086_v54 = vadd.f32 %v9781_v14, %v13560_v62  ;;  %13565 = vst [vmem:[#allocation127_spill] sm:$0xff] %v10094_v46  ;;  %v13570_v36 = vld [vmem:[#allocation159_spill] sm:$0xff]  ;;  %v10114_v30 = vadd.f32 %v9776_v59, %v13574_v20  ;;  %v13576_v46 = vld [vmem:[#allocation162_spill] sm:$0xff] }
 0x310   : > { %13567 = vst [vmem:[#allocation128_spill] sm:$0xff] %v10098_v27  ;;  %13569 = vst [vmem:[#allocation129_spill] sm:$0xff] %v10102_v9  ;;  %v10106_v62 = vadd.f32 %v9786_v34, %v13570_v36  ;;  %v10118_v60 = vadd.f32 %v9781_v14, %v13576_v46  ;;  %v13578_v27 = vld [vmem:[#allocation163_spill] sm:$0xff]  ;;  %v13580_v9 = vld [vmem:[#allocation164_spill] sm:$0xff] }
 0x311   : > { %13561 = vst [vmem:[#allocation125_spill] sm:$0xff] %v10086_v54  ;;  %v13572_v54 = vld [vmem:[#allocation160_spill] sm:$0xff]  ;;  %13575 = vst [vmem:[#allocation132_spill] sm:$0xff] %v10114_v30  ;;  %v10122_v38 = vadd.f32 %v9786_v34, %v13578_v27  ;;  %v10126_v36 = vadd.f32 %v9771_v18, %v13580_v9  ;;  %v13586_v30 = vld [vmem:[#allocation167_spill] sm:$0xff] }
 0x312   : > { %13571 = vst [vmem:[#allocation130_spill] sm:$0xff] %v10106_v62  ;;  %v10110_v31 = vadd.f32 %v9771_v18, %v13572_v54  ;;  %13577 = vst [vmem:[#allocation136_spill] sm:$0xff] %v10118_v60  ;;  %v13582_v62 = vld [vmem:[#allocation165_spill] sm:$0xff]  ;;  %v10138_v46 = vadd.f32 %v9786_v34, %v13586_v30  ;;  %v13588_v60 = vld [vmem:[#allocation168_spill] sm:$0xff] }
 0x313   : > { %13579 = vst [vmem:[#allocation137_spill] sm:$0xff] %v10122_v38  ;;  %13581 = vst [vmem:[#allocation138_spill] sm:$0xff] %v10126_v36  ;;  %v10130_v54 = vadd.f32 %v9776_v59, %v13582_v62  ;;  %v10142_v27 = vadd.f32 %v9771_v18, %v13588_v60  ;;  %v13590_v38 = vld [vmem:[#allocation169_spill] sm:$0xff]  ;;  %v13592_v36 = vld [vmem:[#allocation170_spill] sm:$0xff] }
 0x314   : > { %13573 = vst [vmem:[#allocation131_spill] sm:$0xff] %v10110_v31  ;;  %v13584_v31 = vld [vmem:[#allocation166_spill] sm:$0xff]  ;;  %13587 = vst [vmem:[#allocation141_spill] sm:$0xff] %v10138_v46  ;;  %v10146_v9 = vadd.f32 %v9776_v59, %v13590_v38  ;;  %v10150_v62 = vadd.f32 %v9781_v14, %v13592_v36  ;;  %v13598_v46 = vld [vmem:[#allocation173_spill] sm:$0xff] }
 0x315   : > { %13583 = vst [vmem:[#allocation139_spill] sm:$0xff] %v10130_v54  ;;  %v10134_v20 = vadd.f32 %v9781_v14, %v13584_v31  ;;  %13589 = vst [vmem:[#allocation142_spill] sm:$0xff] %v10142_v27  ;;  %v13594_v54 = vld [vmem:[#allocation171_spill] sm:$0xff]  ;;  %v10162_v60 = vadd.f32 %v9776_v59, %v13598_v46  ;;  %v13600_v27 = vld [vmem:[#allocation174_spill] sm:$0xff] }
 0x316   : > { %13591 = vst [vmem:[#allocation143_spill] sm:$0xff] %v10146_v9  ;;  %13593 = vst [vmem:[#allocation144_spill] sm:$0xff] %v10150_v62  ;;  %v10154_v31 = vadd.f32 %v9786_v34, %v13594_v54  ;;  %v10166_v38 = vadd.f32 %v9781_v14, %v13600_v27  ;;  %v13602_v9 = vld [vmem:[#allocation175_spill] sm:$0xff]  ;;  %v13604_v62 = vld [vmem:[#allocation176_spill] sm:$0xff] }
 0x317   : > { %13585 = vst [vmem:[#allocation140_spill] sm:$0xff] %v10134_v20  ;;  %v13596_v20 = vld [vmem:[#allocation172_spill] sm:$0xff]  ;;  %13599 = vst [vmem:[#allocation147_spill] sm:$0xff] %v10162_v60  ;;  %v10170_v36 = vadd.f32 %v9786_v34, %v13602_v9  ;;  %v10174_v54 = vadd.f32 %v9771_v18, %v13604_v62  ;;  %v13610_v60 = vld [vmem:[#allocation179_spill] sm:$0xff] }
 0x318   : > { %13595 = vst [vmem:[#allocation145_spill] sm:$0xff] %v10154_v31  ;;  %v10158_v30 = vadd.f32 %v9771_v18, %v13596_v20  ;;  %13601 = vst [vmem:[#allocation148_spill] sm:$0xff] %v10166_v38  ;;  %v13606_v31 = vld [vmem:[#allocation177_spill] sm:$0xff]  ;;  %v10186_v27 = vadd.f32 %v9786_v34, %v13610_v60  ;;  %v13612_v38 = vld [vmem:[#allocation180_spill] sm:$0xff] }
 0x319   : > { %13603 = vst [vmem:[#allocation149_spill] sm:$0xff] %v10170_v36  ;;  %13605 = vst [vmem:[#allocation150_spill] sm:$0xff] %v10174_v54  ;;  %v10178_v20 = vadd.f32 %v9776_v59, %v13606_v31  ;;  %v10190_v9 = vadd.f32 %v9771_v18, %v13612_v38  ;;  %v13614_v36 = vld [vmem:[#allocation181_spill] sm:$0xff]  ;;  %v13616_v54 = vld [vmem:[#allocation182_spill] sm:$0xff] }
 0x31a   : > { %13597 = vst [vmem:[#allocation146_spill] sm:$0xff] %v10158_v30  ;;  %v13608_v30 = vld [vmem:[#allocation178_spill] sm:$0xff]  ;;  %13611 = vst [vmem:[#allocation153_spill] sm:$0xff] %v10186_v27  ;;  %v10194_v62 = vadd.f32 %v9776_v59, %v13614_v36  ;;  %v10198_v31 = vadd.f32 %v9781_v14, %v13616_v54  ;;  %v13622_v27 = vld [vmem:[#allocation185_spill] sm:$0xff] }
 0x31b   : > { %13607 = vst [vmem:[#allocation151_spill] sm:$0xff] %v10178_v20  ;;  %v10182_v46 = vadd.f32 %v9781_v14, %v13608_v30  ;;  %13613 = vst [vmem:[#allocation154_spill] sm:$0xff] %v10190_v9  ;;  %v13618_v20 = vld [vmem:[#allocation183_spill] sm:$0xff]  ;;  %v10210_v38 = vadd.f32 %v9776_v59, %v13622_v27  ;;  %v13624_v9 = vld [vmem:[#allocation186_spill] sm:$0xff] }
 0x31c   : > { %13615 = vst [vmem:[#allocation155_spill] sm:$0xff] %v10194_v62  ;;  %13617 = vst [vmem:[#allocation156_spill] sm:$0xff] %v10198_v31  ;;  %v10202_v30 = vadd.f32 %v9786_v34, %v13618_v20  ;;  %v10214_v36 = vadd.f32 %v9781_v14, %v13624_v9  ;;  %v13626_v62 = vld [vmem:[#allocation187_spill] sm:$0xff]  ;;  %v13628_v31 = vld [vmem:[#allocation188_spill] sm:$0xff] }
 0x31d   : > { %13609 = vst [vmem:[#allocation152_spill] sm:$0xff] %v10182_v46  ;;  %v13620_v46 = vld [vmem:[#allocation184_spill] sm:$0xff]  ;;  %13623 = vst [vmem:[#allocation159_spill] sm:$0xff] %v10210_v38  ;;  %v10218_v54 = vadd.f32 %v9786_v34, %v13626_v62  ;;  %v10222_v20 = vadd.f32 %v9771_v18, %v13628_v31  ;;  %v13634_v38 = vld [vmem:[#allocation191_spill] sm:$0xff] }
 0x31e   : > { %13619 = vst [vmem:[#allocation157_spill] sm:$0xff] %v10202_v30  ;;  %v10206_v60 = vadd.f32 %v9771_v18, %v13620_v46  ;;  %13625 = vst [vmem:[#allocation160_spill] sm:$0xff] %v10214_v36  ;;  %v13630_v30 = vld [vmem:[#allocation189_spill] sm:$0xff]  ;;  %v10234_v9 = vadd.f32 %v9786_v34, %v13634_v38  ;;  %v13636_v36 = vld [vmem:[#allocation192_spill] sm:$0xff] }
 0x31f   : > { %13627 = vst [vmem:[#allocation161_spill] sm:$0xff] %v10218_v54  ;;  %13629 = vst [vmem:[#allocation162_spill] sm:$0xff] %v10222_v20  ;;  %v10226_v46 = vadd.f32 %v9776_v59, %v13630_v30  ;;  %v10238_v62 = vadd.f32 %v9771_v18, %v13636_v36  ;;  %v13638_v54 = vld [vmem:[#allocation193_spill] sm:$0xff]  ;;  %v1901_v20 = vcvt.f32.s32 %v9609_v55  ;;  %v1871_v30 = vcvt.f32.s32 %v9615_v24 }
 0x320   : > { %13621 = vst [vmem:[#allocation158_spill] sm:$0xff] %v10206_v60  ;;  %v13632_v60 = vld [vmem:[#allocation190_spill] sm:$0xff]  ;;  %13635 = vst [vmem:[#allocation165_spill] sm:$0xff] %v10234_v9  ;;  %v10242_v31 = vadd.f32 %v9776_v59, %v13638_v54  ;;  %v1916_v9 = vcvt.f32.s32 %v9617_v21  ;;  %v1886_v36 = vcvt.f32.s32 %v9625_v61  ;;  %v13644_v54 = vld [vmem:[#allocation196_spill] sm:$0xff]  ;;  %v1976_v24 = vcvt.f32.s32 %v9635_v5 }
 0x321   : > { %13631 = vst [vmem:[#allocation163_spill] sm:$0xff] %v10226_v46  ;;  %v10230_v27 = vadd.f32 %v9781_v14, %v13632_v60  ;;  %13637 = vst [vmem:[#allocation166_spill] sm:$0xff] %v10238_v62  ;;  %v13640_v46 = vld [vmem:[#allocation194_spill] sm:$0xff]  ;;  %v1961_v62 = vcvt.f32.s32 %v9628_v6  ;;  %v1931_v55 = vcvt.f32.s32 %v9640_v0  ;;  %v13650_v6 = vld [vmem:[#allocation199_spill] sm:$0xff]  ;;  %v1902_v0 = vshll.u32 %v1901_v20, 16 }
 0x322   : > { %13639 = vst [vmem:[#allocation167_spill] sm:$0xff] %v10242_v31  ;;  %v10248_v60 = vadd.f32 %v9781_v14, %v13640_v46  ;;  %v10259_v31 = vadd.f32 %v9771_v18, %v13644_v54  ;;  %v1946_v46 = vcvt.f32.s32 %v9645_v3  ;;  %v13648_v21 = vld [vmem:[#allocation198_spill] sm:$0xff]  ;;  %v10275_v54 = vadd.f32 %v9786_v34, %v13650_v6 }
 0x323   : > { %13633 = vst [vmem:[#allocation164_spill] sm:$0xff] %v10230_v27  ;;  %v13642_v27 = vld [vmem:[#allocation195_spill] sm:$0xff]  ;;  %v10271_v61 = vadd.f32 %v9781_v14, %v13648_v21  ;;  %v10281_v3 = vshll.u32 %v1871_v30, 16  ;;  %v10291_v21 = vshll.u32 %v1916_v9, 16  ;;  %v10300_v20 = vshll.u32 %v1931_v55, 16 }
 0x324   : > { %13641 = vst [vmem:[#allocation168_spill] sm:$0xff] %v10248_v60  ;;  %v10252_v38 = vadd.f32 %v9786_v34, %v13642_v27  ;;  %13645 = vst [vmem:[#allocation170_spill] sm:$0xff] %v10259_v31  ;;  %v2021_v60 = vcvt.f32.s32 %v9650_v16  ;;  %v13646_v27 = vld [vmem:[#allocation197_spill] sm:$0xff]  ;;  %v13652_v31 = vld [vmem:[#allocation200_spill] sm:$0xff]  ;;  %v10295_v34 = vshll.u32 %v1961_v62, 16  ;;  %v10302_v30 = vshll.u32 %v1946_v46, 16 }
 0x325   : > { %13649 = vst [vmem:[#allocation172_spill] sm:$0xff] %v10271_v61  ;;  %13651 = vst [vmem:[#allocation173_spill] sm:$0xff] %v10275_v54  ;;  %v10279_v5 = vadd.f32 %v9771_v18, %v13652_v31  ;;  %v13654_v16 = vld [vmem:[#allocation201_spill] sm:$0xff]  ;;  %v2036_v18 = vcvt.f32.s32 %v9655_v40  ;;  %v10298_v31 = vshll.u32 %v1976_v24, 16  ;;  %v1991_v6 = vcvt.f32.s32 %v9660_v12 }
 0x326   : > { %13643 = vst [vmem:[#allocation169_spill] sm:$0xff] %v10252_v38  ;;  %v10267_v38 = vadd.f32 %v9776_v59, %v13646_v27  ;;  %v10285_v26 = vadd.f32 %v9776_v59, %v13654_v16  ;;  %v10289_v27 = vadd.f32 %v9781_v14, %v9596_v10  ;;  %v10304_v59 = vshll.u32 %v2021_v60, 16 }
 0x327   : > { %13653 = vst [vmem:[#allocation174_spill] sm:$0xff] %v10279_v5  ;;  %v2006_v10 = vcvt.f32.s32 %v9665_v63  ;;  %v2081_v14 = vcvt.f32.s32 %v9670_v50  ;;  %v2096_v9 = vcvt.f32.s32 %v9675_v23  ;;  %v2051_v62 = vcvt.f32.s32 %v9680_v19 }
 0x328   : > { %13647 = vst [vmem:[#allocation171_spill] sm:$0xff] %v10267_v38  ;;  %13655 = vst [vmem:[#allocation175_spill] sm:$0xff] %v10285_v26  ;;  %v10293_v38 = vshll.u32 %v1886_v36, 16  ;;  %v2066_v40 = vcvt.f32.s32 %v9685_v39  ;;  %v2141_v36 = vcvt.f32.s32 %v9690_v25  ;;  %v2156_v24 = vcvt.f32.s32 %v9695_v33 }
 0x329   : > { %13656 = vst [vmem:[#allocation176_spill] sm:$0xff] %v10289_v27  ;;  %v10314_v55 = vshll.u32 %v2036_v18, 16  ;;  %v2111_v60 = vcvt.f32.s32 %v9700_v13  ;;  %v2126_v12 = vcvt.f32.s32 %v9705_v49  ;;  %v2201_v63 = vcvt.f32.s32 %v9710_v56 }
 0x32a   : > { %v2216_v50 = vcvt.f32.s32 %v9715_v42  ;;  %v2171_v23 = vcvt.f32.s32 %v9720_v53  ;;  %v2186_v19 = vcvt.f32.s32 %v9725_v29  ;;  %v2261_v39 = vcvt.f32.s32 %v9730_v22 }
 0x32b   : > { %v10323_v46 = vshll.u32 %v1991_v6, 16  ;;  %v10325_v25 = vshll.u32 %v2006_v10, 16  ;;  %v10327_v33 = vshll.u32 %v2081_v14, 16  ;;  %v10329_v16 = vshll.u32 %v2096_v9, 16 }
 0x32c   : > { %v10331_v13 = vshll.u32 %v2051_v62, 16  ;;  %v10333_v49 = vshll.u32 %v2066_v40, 16  ;;  %v10335_v56 = vshll.u32 %v2141_v36, 16  ;;  %v10337_v42 = vshll.u32 %v2156_v24, 16 }
 0x32d   : > { %v10339_v29 = vshll.u32 %v2111_v60, 16  ;;  %v10341_v22 = vshll.u32 %v2126_v12, 16  ;;  %v10343_v18 = vshll.u32 %v2201_v63, 16  ;;  %v10345_v10 = vshll.u32 %v2216_v50, 16 }
 0x32e   : > { %v10347_v14 = vshll.u32 %v2171_v23, 16  ;;  %v10349_v9 = vshll.u32 %v2186_v19, 16  ;;  %v10351_v62 = vshll.u32 %v2261_v39, 16  ;;  %v2276_v40 = vcvt.f32.s32 %v9735_v2 }
 0x32f   : > { %v2231_v36 = vcvt.f32.s32 %v9740_v17  ;;  %v2246_v24 = vcvt.f32.s32 %v9745_v52  ;;  %v2291_v12 = vcvt.f32.s32 %v9750_v32  ;;  %v2306_v63 = vcvt.f32.s32 %v9755_v48 }
 0x330   : > { %13657 = vst [vmem:[#allocation177_spill] sm:$0xff] %v10351_v62  ;;  %v2321_v50 = vcvt.f32.s32 %v9760_v47  ;;  %v2336_v23 = vcvt.f32.s32 %v9764_v45  ;;  %v13190_v2 = vmov 0.0  }
 0x331   : > { %v10372_v54 = vshll.u32 %v2246_v24, 16  ;;  %v10374_v61 = vshll.u32 %v2291_v12, 16  ;;  %v13658_v12 = vmov 0.0  }
 0x33f   : > { %v1899_v53 = vpop.xlane.xlu0 %1898 }
 0x340   : > { %v1900_v6 = vcvt.f32.s32 %v1899_v53 }
 0x342   : > { %v1903_v60 = vadd.s32 %v1902_v0, %v1900_v6  ;;  %v10368_v6 = vshll.u32 %v2276_v40, 16 }
 0x343   : > { %v1869_v53 = vpop.xlane.xlu0 %1868  ;;  %v1914_v19 = vpop.xlane.xlu1 %1913 }
 0x344   : > { %vm2815_vm1 = vcmp.eq.s32.totalorder %v1903_v60, 0  ;;  %vm3012_vm4 = vcmp.eq.s32.totalorder %v1903_v60, 1  ;;  %vm3209_vm5 = vcmp.eq.s32.totalorder %v1903_v60, 2  ;;  %vm3406_vm6 = vcmp.eq.s32.totalorder %v1903_v60, 3 }
 0x345   : > { %v6990_v17 = vsel %vm2815_vm1, 1.0, %v13190_v2  ;;  %v7023_v52 = vsel %vm3012_vm4, 1.0, %v13190_v2  ;;  %v7056_v0 = vsel %vm3209_vm5, 1.0, %v13190_v2  ;;  %v7089_v32 = vsel %vm3406_vm6, 1.0, %v13190_v2 }
 0x346   : > { %v2948_v48 = vmul.f32 %v6990_v17, %v9822_v4  ;;  %v3145_v47 = vmul.f32 %v7023_v52, %v9830_v1  ;;  %v3342_v45 = vmul.f32 %v7056_v0, %v9826_v11  ;;  %v3539_v39 = vmul.f32 %v7089_v32, %v9834_v37 }
 0x347   : > { %v10370_v60 = vshll.u32 %v2231_v36, 16  ;;  %v1870_v26 = vcvt.f32.s32 %v1869_v53  ;;  %v1915_v27 = vcvt.f32.s32 %v1914_v19  ;;  %v1884_v5 = vpop.xlane.xlu1 %1883  ;;  %v10376_v17 = vshll.u32 %v2306_v63, 16 }
 0x348   : > { %v3177_v2 = vadd.f32 %v3145_v47, %v2948_v48  ;;  %v1885_v62 = vcvt.f32.s32 %v1884_v5  ;;  %v1959_v4 = vpop.xlane.xlu0 %1958  ;;  %v10378_v1 = vshll.u32 %v2321_v50, 16  ;;  %v10380_v11 = vshll.u32 %v2336_v23, 16 }
 0x349   : > { %v1873_v37 = vadd.s32 %v10281_v3, %v1870_v26  ;;  %v1918_v36 = vadd.s32 %v10291_v21, %v1915_v27  ;;  %v1960_v53 = vcvt.f32.s32 %v1959_v4 }
 0x34a   : > { %v3374_v40 = vadd.f32 %v3342_v45, %v3177_v2  ;;  %v1888_v24 = vadd.s32 %v10293_v38, %v1885_v62 }
 0x34b   : > { %vm2813_vm7 = vcmp.eq.s32.totalorder %v1873_v37, 0  ;;  %vm3010_vm8 = vcmp.eq.s32.totalorder %v1873_v37, 1  ;;  %vm3207_vm9 = vcmp.eq.s32.totalorder %v1873_v37, 2  ;;  %vm3404_vm10 = vcmp.eq.s32.totalorder %v1873_v37, 3  ;;  %v1974_v62 = vpop.xlane.xlu1 %1973 }
 0x34c   : > { %v3571_v5 = vadd.f32 %v3539_v39, %v3374_v40  ;;  %v6988_v63 = vsel %vm2813_vm7, 1.0, %v13658_v12  ;;  %v7021_v50 = vsel %vm3010_vm8, 1.0, %v13658_v12  ;;  %v7054_v23 = vsel %vm3207_vm9, 1.0, %v13658_v12  ;;  %v10403_v32 = vpop.xlane.xlu0 %1928 }
 0x34d   : > { %v2946_v26 = vmul.f32 %v6988_v63, %v9790_v57  ;;  %v3143_v3 = vmul.f32 %v7021_v50, %v9798_v58  ;;  %v3340_v27 = vmul.f32 %v7054_v23, %v9794_v51  ;;  %v7087_v38 = vsel %vm3404_vm10, 1.0, %v13658_v12 }
 0x34e   : > { %3604 = vst [vmem:[%s10393_s29 + $0x10] sm:$0xff] %v3571_v5  ;;  %v3537_v21 = vmul.f32 %v7087_v38, %v9802_v41  ;;  %vm2816_vm11 = vcmp.eq.s32.totalorder %v1918_v36, 0  ;;  %vm3013_vm12 = vcmp.eq.s32.totalorder %v1918_v36, 1  ;;  %vm3210_vm13 = vcmp.eq.s32.totalorder %v1918_v36, 2  ;;  %v13661_v38 = vld [vmem:[#allocation69_spill] sm:$0xff] }
 0x34f   : > { %v3175_v19 = vadd.f32 %v3143_v3, %v2946_v26  ;;  %v6991_v2 = vsel %vm2816_vm11, 1.0, %v13658_v12  ;;  %v7024_v57 = vsel %vm3013_vm12, 1.0, %v13658_v12  ;;  %v7057_v58 = vsel %vm3210_vm13, 1.0, %v13658_v12  ;;  %v1944_v5 = vpop.xlane.xlu1 %1943 }
 0x350   : > { %v2949_v51 = vmul.f32 %v6991_v2, %v9838_v8  ;;  %v3146_v52 = vmul.f32 %v7024_v57, %v9846_v44  ;;  %v3343_v0 = vmul.f32 %v7057_v58, %v9842_v43  ;;  %vm3407_vm14 = vcmp.eq.s32.totalorder %v1918_v36, 3  ;;  %v13662_v2 = vld [vmem:[#allocation135_spill] sm:$0xff] }
 0x351   : > { %v3372_v41 = vadd.f32 %v3340_v27, %v3175_v19  ;;  %v7090_v48 = vsel %vm3407_vm14, 1.0, %v13658_v12  ;;  %vm2814_vm15 = vcmp.eq.s32.totalorder %v1888_v24, 0  ;;  %vm3011_vm0 = vcmp.eq.s32.totalorder %v1888_v24, 1 }
 0x352   : > { %v3178_v47 = vadd.f32 %v3146_v52, %v2949_v51  ;;  %v3540_v45 = vmul.f32 %v7090_v48, %v9850_v7  ;;  %v6989_v39 = vsel %vm2814_vm15, 1.0, %v13658_v12  ;;  %v7022_v8 = vsel %vm3011_vm0, 1.0, %v13658_v12 }
 0x353   : > { %v3569_v4 = vadd.f32 %v3537_v21, %v3372_v41  ;;  %v2947_v44 = vmul.f32 %v6989_v39, %v9806_v15  ;;  %v3144_v43 = vmul.f32 %v7022_v8, %v9814_v35  ;;  %vm3208_vm2 = vcmp.eq.s32.totalorder %v1888_v24, 2  ;;  %v13659_v15 = vld [vmem:[#allocation104_spill] sm:$0xff]  ;;  %v10417_v35 = vpop.xlane.xlu0 %2018 }
 0x354   : > { %v3375_v37 = vadd.f32 %v3343_v0, %v3178_v47  ;;  %v7055_v40 = vsel %vm3208_vm2, 1.0, %v13658_v12  ;;  %vm3405_vm3 = vcmp.eq.s32.totalorder %v1888_v24, 3  ;;  %v1963_v36 = vadd.s32 %v10295_v34, %v1960_v53  ;;  %v13660_v53 = vld [vmem:[#allocation134_spill] sm:$0xff] }
 0x355   : > { %3602 = vst [vmem:[%s10393_s29] sm:$0xff] %v3569_v4  ;;  %v3176_v7 = vadd.f32 %v3144_v43, %v2947_v44  ;;  %v3341_v63 = vmul.f32 %v7055_v40, %v9810_v28  ;;  %v7088_v50 = vsel %vm3405_vm3, 1.0, %v13658_v12  ;;  %v1975_v23 = vcvt.f32.s32 %v1974_v62  ;;  %v13663_v0 = vld [vmem:[#allocation70_spill] sm:$0xff]  ;;  %v13664_v43 = vld [vmem:[#allocation71_spill] sm:$0xff]  ;;  %v13665_v40 = vld [vmem:[#allocation73_spill] sm:$0xff] }
 0x356   : > { %v3572_v26 = vadd.f32 %v3540_v45, %v3375_v37  ;;  %v3538_v3 = vmul.f32 %v7088_v50, %v13659_v15  ;;  %vm2819_vm1 = vcmp.eq.s32.totalorder %v1963_v36, 0  ;;  %vm3016_vm4 = vcmp.eq.s32.totalorder %v1963_v36, 1  ;;  %v2034_v45 = vpop.xlane.xlu1 %2033  ;;  %v13667_v50 = vld [vmem:[#allocation74_spill] sm:$0xff] }
 0x357   : > { %v3373_v27 = vadd.f32 %v3341_v63, %v3176_v7  ;;  %v6994_v24 = vsel %vm2819_vm1, 1.0, %v13658_v12  ;;  %v7027_v34 = vsel %vm3016_vm4, 1.0, %v13658_v12  ;;  %vm3213_vm5 = vcmp.eq.s32.totalorder %v1963_v36, 2  ;;  %v1989_v44 = vpop.xlane.xlu0 %1988 }
 0x358   : > { %3605 = vst [vmem:[%s10393_s29 + $0x18] sm:$0xff] %v3572_v26  ;;  %v2952_v28 = vmul.f32 %v6994_v24, %v13660_v53  ;;  %v3149_v21 = vmul.f32 %v7027_v34, %v13661_v38  ;;  %v7060_v62 = vsel %vm3213_vm5, 1.0, %v13658_v12  ;;  %vm3410_vm6 = vcmp.eq.s32.totalorder %v1963_v36, 3  ;;  %v13666_v36 = vld [vmem:[#allocation72_spill] sm:$0xff] }
 0x359   : > { %v3570_v19 = vadd.f32 %v3538_v3, %v3373_v27  ;;  %v3346_v57 = vmul.f32 %v7060_v62, %v13662_v2  ;;  %v7093_v58 = vsel %vm3410_vm6, 1.0, %v13658_v12  ;;  %v1978_v51 = vadd.s32 %v10298_v31, %v1975_v23  ;;  %v13670_v2 = vld [vmem:[#allocation111_spill] sm:$0xff] }
 0x35a   : > { %v3181_v52 = vadd.f32 %v3149_v21, %v2952_v28  ;;  %v3543_v41 = vmul.f32 %v7093_v58, %v13663_v0  ;;  %v1930_v48 = vcvt.f32.s32 %v10403_v32  ;;  %v1945_v47 = vcvt.f32.s32 %v1944_v5  ;;  %v10443_v53 = vpop.xlane.xlu1 %2003  ;;  %v13668_v21 = vld [vmem:[#allocation108_spill] sm:$0xff] }
 0x35b   : > { %3603 = vst [vmem:[%s10393_s29 + $0x8] sm:$0xff] %v3570_v19  ;;  %vm2820_vm7 = vcmp.eq.s32.totalorder %v1978_v51, 0  ;;  %vm3017_vm8 = vcmp.eq.s32.totalorder %v1978_v51, 1  ;;  %vm3214_vm9 = vcmp.eq.s32.totalorder %v1978_v51, 2  ;;  %vm3411_vm10 = vcmp.eq.s32.totalorder %v1978_v51, 3 }
 0x35c   : > { %v3378_v39 = vadd.f32 %v3346_v57, %v3181_v52  ;;  %v6995_v8 = vsel %vm2820_vm7, 1.0, %v13658_v12  ;;  %v7028_v4 = vsel %vm3017_vm8, 1.0, %v13658_v12  ;;  %v7061_v31 = vsel %vm3214_vm9, 1.0, %v13658_v12  ;;  %v13671_v52 = vld [vmem:[#allocation116_spill] sm:$0xff] }
 0x35d   : > { %v2953_v37 = vmul.f32 %v6995_v8, %v13664_v43  ;;  %v3150_v32 = vmul.f32 %v7028_v4, %v13665_v40  ;;  %v3347_v5 = vmul.f32 %v7061_v31, %v13666_v36  ;;  %v7094_v7 = vsel %vm3411_vm10, 1.0, %v13658_v12  ;;  %v13673_v8 = vld [vmem:[#allocation124_spill] sm:$0xff]  ;;  %v13674_v43 = vld [vmem:[#allocation123_spill] sm:$0xff]  ;;  %v10462_v36 = vpop.xlane.xlu0 %2078 }
 0x35e   : > { %v3575_v63 = vadd.f32 %v3543_v41, %v3378_v39  ;;  %v3544_v23 = vmul.f32 %v7094_v7, %v13667_v50  ;;  %v1933_v26 = vadd.s32 %v10300_v20, %v1930_v48  ;;  %v1948_v15 = vadd.s32 %v10302_v30, %v1945_v47 }
 0x35f   : > { %v3182_v3 = vadd.f32 %v3150_v32, %v2953_v37  ;;  %v2020_v27 = vcvt.f32.s32 %v10417_v35  ;;  %v2035_v24 = vcvt.f32.s32 %v2034_v45  ;;  %v1990_v34 = vcvt.f32.s32 %v1989_v44  ;;  %v13669_v35 = vld [vmem:[#allocation114_spill] sm:$0xff]  ;;  %v13672_v45 = vld [vmem:[#allocation120_spill] sm:$0xff] }
 0x360   : > { %3608 = vst [vmem:[%s10393_s29 + $0x30] sm:$0xff] %v3575_v63  ;;  %vm2817_vm11 = vcmp.eq.s32.totalorder %v1933_v26, 0  ;;  %vm3014_vm12 = vcmp.eq.s32.totalorder %v1933_v26, 1  ;;  %vm3211_vm13 = vcmp.eq.s32.totalorder %v1933_v26, 2  ;;  %vm3408_vm14 = vcmp.eq.s32.totalorder %v1933_v26, 3  ;;  %v13675_v63 = vld [vmem:[#allocation133_spill] sm:$0xff] }
 0x361   : > { %v3379_v28 = vadd.f32 %v3347_v5, %v3182_v3  ;;  %v6992_v38 = vsel %vm2817_vm11, 1.0, %v13658_v12  ;;  %v7025_v20 = vsel %vm3014_vm12, 1.0, %v13658_v12  ;;  %v7058_v30 = vsel %vm3211_vm13, 1.0, %v13658_v12  ;;  %v10464_v5 = vpop.xlane.xlu1 %2093 }
 0x362   : > { %v2950_v62 = vmul.f32 %v6992_v38, %v13668_v21  ;;  %v3147_v19 = vmul.f32 %v7025_v20, %v13669_v35  ;;  %v3344_v57 = vmul.f32 %v7058_v30, %v13670_v2  ;;  %v7091_v58 = vsel %vm3408_vm14, 1.0, %v13658_v12  ;;  %v13676_v38 = vld [vmem:[#allocation83_spill] sm:$0xff]  ;;  %v13677_v30 = vld [vmem:[#allocation85_spill] sm:$0xff]  ;;  %v13679_v35 = vld [vmem:[#allocation86_spill] sm:$0xff] }
 0x363   : > { %v3576_v51 = vadd.f32 %v3544_v23, %v3379_v28  ;;  %v3541_v0 = vmul.f32 %v7091_v58, %v13671_v52  ;;  %vm2818_vm15 = vcmp.eq.s32.totalorder %v1948_v15, 0  ;;  %vm3015_vm0 = vcmp.eq.s32.totalorder %v1948_v15, 1  ;;  %v10480_v58 = vpop.xlane.xlu0 %2048  ;;  %v13680_v52 = vld [vmem:[#allocation87_spill] sm:$0xff] }
 0x364   : > { %v3179_v41 = vadd.f32 %v3147_v19, %v2950_v62  ;;  %v6993_v48 = vsel %vm2818_vm15, 1.0, %v13658_v12  ;;  %v7026_v47 = vsel %vm3015_vm0, 1.0, %v13658_v12  ;;  %vm3212_vm2 = vcmp.eq.s32.totalorder %v1948_v15, 2 }
 0x365   : > { %3609 = vst [vmem:[%s10393_s29 + $0x38] sm:$0xff] %v3576_v51  ;;  %v2951_v39 = vmul.f32 %v6993_v48, %v13672_v45  ;;  %v3148_v4 = vmul.f32 %v7026_v47, %v13673_v8  ;;  %v7059_v31 = vsel %vm3212_vm2, 1.0, %v13658_v12  ;;  %vm3409_vm3 = vcmp.eq.s32.totalorder %v1948_v15, 3  ;;  %v10482_v51 = vpop.xlane.xlu1 %2063 }
 0x366   : > { %v3376_v44 = vadd.f32 %v3344_v57, %v3179_v41  ;;  %v3345_v37 = vmul.f32 %v7059_v31, %v13674_v43  ;;  %v7092_v40 = vsel %vm3409_vm3, 1.0, %v13658_v12  ;;  %v2023_v32 = vadd.s32 %v10304_v59, %v2020_v27  ;;  %v13681_v41 = vld [vmem:[#allocation89_spill] sm:$0xff] }
 0x367   : > { %v3180_v7 = vadd.f32 %v3148_v4, %v2951_v39  ;;  %v3542_v50 = vmul.f32 %v7092_v40, %v13675_v63  ;;  %v2038_v23 = vadd.s32 %v10314_v55, %v2035_v24  ;;  %v1993_v26 = vadd.s32 %v10323_v46, %v1990_v34  ;;  %v13678_v55 = vld [vmem:[#allocation84_spill] sm:$0xff] }
 0x368   : > { %v3573_v15 = vadd.f32 %v3541_v0, %v3376_v44  ;;  %vm2823_vm1 = vcmp.eq.s32.totalorder %v2023_v32, 0  ;;  %vm3020_vm4 = vcmp.eq.s32.totalorder %v2023_v32, 1  ;;  %vm3217_vm5 = vcmp.eq.s32.totalorder %v2023_v32, 2  ;;  %v13682_v4 = vld [vmem:[#allocation88_spill] sm:$0xff]  ;;  %v13683_v44 = vld [vmem:[#allocation90_spill] sm:$0xff] }
 0x369   : > { %v3377_v3 = vadd.f32 %v3345_v37, %v3180_v7  ;;  %v6998_v28 = vsel %vm2823_vm1, 1.0, %v13658_v12  ;;  %v7031_v59 = vsel %vm3020_vm4, 1.0, %v13658_v12  ;;  %v7064_v27 = vsel %vm3217_vm5, 1.0, %v13658_v12 }
 0x36a   : > { %3606 = vst [vmem:[%s10393_s29 + $0x20] sm:$0xff] %v3573_v15  ;;  %v2956_v20 = vmul.f32 %v6998_v28, %v13676_v38  ;;  %v3153_v21 = vmul.f32 %v7031_v59, %v13677_v30  ;;  %v3350_v24 = vmul.f32 %v7064_v27, %v13678_v55  ;;  %vm3414_vm6 = vcmp.eq.s32.totalorder %v2023_v32, 3  ;;  %v13684_v32 = vld [vmem:[#allocation75_spill] sm:$0xff]  ;;  %v13685_v15 = vld [vmem:[#allocation77_spill] sm:$0xff]  ;;  %v13686_v28 = vld [vmem:[#allocation76_spill] sm:$0xff]  ;;  %v10502_v30 = vpop.xlane.xlu1 %2153 }
 0x36b   : > { %v3574_v46 = vadd.f32 %v3542_v50, %v3377_v3  ;;  %v7097_v34 = vsel %vm3414_vm6, 1.0, %v13658_v12  ;;  %vm2824_vm7 = vcmp.eq.s32.totalorder %v2038_v23, 0  ;;  %vm3021_vm8 = vcmp.eq.s32.totalorder %v2038_v23, 1  ;;  %v13687_v55 = vld [vmem:[#allocation78_spill] sm:$0xff] }
 0x36c   : > { %v3185_v62 = vadd.f32 %v3153_v21, %v2956_v20  ;;  %v3547_v19 = vmul.f32 %v7097_v34, %v13679_v35  ;;  %v6999_v2 = vsel %vm2824_vm7, 1.0, %v13658_v12  ;;  %v7032_v57 = vsel %vm3021_vm8, 1.0, %v13658_v12  ;;  %v10500_v20 = vpop.xlane.xlu0 %2138 }
 0x36d   : > { %3607 = vst [vmem:[%s10393_s29 + $0x28] sm:$0xff] %v3574_v46  ;;  %v2957_v0 = vmul.f32 %v6999_v2, %v13680_v52  ;;  %v3154_v48 = vmul.f32 %v7032_v57, %v13681_v41  ;;  %vm3218_vm9 = vcmp.eq.s32.totalorder %v2038_v23, 2  ;;  %vm3415_vm10 = vcmp.eq.s32.totalorder %v2038_v23, 3 }
 0x36e   : > { %v3382_v47 = vadd.f32 %v3350_v24, %v3185_v62  ;;  %v7065_v45 = vsel %vm3218_vm9, 1.0, %v13658_v12  ;;  %v7098_v39 = vsel %vm3415_vm10, 1.0, %v13658_v12  ;;  %vm2821_vm11 = vcmp.eq.s32.totalorder %v1993_v26, 0 }
 0x36f   : > { %v3186_v8 = vadd.f32 %v3154_v48, %v2957_v0  ;;  %v3351_v31 = vmul.f32 %v7065_v45, %v13682_v4  ;;  %v3548_v43 = vmul.f32 %v7098_v39, %v13683_v44  ;;  %v6996_v37 = vsel %vm2821_vm11, 1.0, %v13658_v12  ;;  %v13690_v48 = vld [vmem:[#allocation80_spill] sm:$0xff] }
 0x370   : > { %v3579_v40 = vadd.f32 %v3547_v19, %v3382_v47  ;;  %v2954_v7 = vmul.f32 %v6996_v37, %v13684_v32  ;;  %vm3018_vm12 = vcmp.eq.s32.totalorder %v1993_v26, 1  ;;  %vm3215_vm13 = vcmp.eq.s32.totalorder %v1993_v26, 2 }
 0x371   : > { %v3383_v63 = vadd.f32 %v3351_v31, %v3186_v8  ;;  %v7029_v50 = vsel %vm3018_vm12, 1.0, %v13658_v12  ;;  %v7062_v23 = vsel %vm3215_vm13, 1.0, %v13658_v12  ;;  %vm3412_vm14 = vcmp.eq.s32.totalorder %v1993_v26, 3  ;;  %v13691_v8 = vld [vmem:[#allocation82_spill] sm:$0xff] }
 0x372   : > { %3612 = vst [vmem:[%s10393_s29 + $0x50] sm:$0xff] %v3579_v40  ;;  %v3151_v3 = vmul.f32 %v7029_v50, %v13685_v15  ;;  %v3348_v59 = vmul.f32 %v7062_v23, %v13686_v28  ;;  %v7095_v27 = vsel %vm3412_vm14, 1.0, %v13658_v12  ;;  %v2005_v38 = vcvt.f32.s32 %v10443_v53  ;;  %v13693_v40 = vld [vmem:[#allocation101_spill] sm:$0xff]  ;;  %v13694_v50 = vld [vmem:[#allocation100_spill] sm:$0xff]  ;;  %v13695_v28 = vld [vmem:[#allocation102_spill] sm:$0xff] }
 0x373   : > { %v3580_v21 = vadd.f32 %v3548_v43, %v3383_v63  ;;  %v3545_v24 = vmul.f32 %v7095_v27, %v13687_v55  ;;  %v2080_v46 = vcvt.f32.s32 %v10462_v36  ;;  %v2095_v26 = vcvt.f32.s32 %v10464_v5  ;;  %v13692_v43 = vld [vmem:[#allocation99_spill] sm:$0xff] }
 0x374   : > { %v3183_v34 = vadd.f32 %v3151_v3, %v2954_v7  ;;  %v2008_v62 = vadd.s32 %v10325_v25, %v2005_v38  ;;  %v2050_v35 = vcvt.f32.s32 %v10480_v58  ;;  %v2065_v19 = vcvt.f32.s32 %v10482_v51 }
 0x375   : > { %3613 = vst [vmem:[%s10393_s29 + $0x58] sm:$0xff] %v3580_v21  ;;  %v2083_v53 = vadd.s32 %v10327_v33, %v2080_v46  ;;  %v2098_v2 = vadd.s32 %v10329_v16, %v2095_v26  ;;  %v2140_v57 = vcvt.f32.s32 %v10500_v20  ;;  %v2155_v52 = vcvt.f32.s32 %v10502_v30  ;;  %v13688_v33 = vld [vmem:[#allocation79_spill] sm:$0xff]  ;;  %v13689_v16 = vld [vmem:[#allocation81_spill] sm:$0xff]  ;;  %v13697_v46 = vld [vmem:[#allocation106_spill] sm:$0xff] }
 0x376   : > { %v3380_v0 = vadd.f32 %v3348_v59, %v3183_v34  ;;  %vm2822_vm15 = vcmp.eq.s32.totalorder %v2008_v62, 0  ;;  %vm3019_vm0 = vcmp.eq.s32.totalorder %v2008_v62, 1  ;;  %vm3216_vm2 = vcmp.eq.s32.totalorder %v2008_v62, 2  ;;  %v13696_v20 = vld [vmem:[#allocation103_spill] sm:$0xff] }
 0x377   : > { %v6997_v25 = vsel %vm2822_vm15, 1.0, %v13658_v12  ;;  %v7030_v36 = vsel %vm3019_vm0, 1.0, %v13658_v12  ;;  %v7063_v5 = vsel %vm3216_vm2, 1.0, %v13658_v12  ;;  %vm3413_vm3 = vcmp.eq.s32.totalorder %v2008_v62, 3  ;;  %v13698_v62 = vld [vmem:[#allocation105_spill] sm:$0xff] }
 0x378   : > { %v3577_v58 = vadd.f32 %v3545_v24, %v3380_v0  ;;  %v2955_v51 = vmul.f32 %v6997_v25, %v13688_v33  ;;  %v3152_v41 = vmul.f32 %v7030_v36, %v13689_v16  ;;  %v3349_v47 = vmul.f32 %v7063_v5, %v13690_v48  ;;  %v13699_v33 = vld [vmem:[#allocation107_spill] sm:$0xff] }
 0x379   : > { %v7096_v45 = vsel %vm3413_vm3, 1.0, %v13658_v12  ;;  %vm2827_vm1 = vcmp.eq.s32.totalorder %v2083_v53, 0  ;;  %vm3024_vm4 = vcmp.eq.s32.totalorder %v2083_v53, 1  ;;  %vm3221_vm5 = vcmp.eq.s32.totalorder %v2083_v53, 2 }
 0x37a   : > { %3610 = vst [vmem:[%s10393_s29 + $0x40] sm:$0xff] %v3577_v58  ;;  %v3184_v39 = vadd.f32 %v3152_v41, %v2955_v51  ;;  %v3546_v4 = vmul.f32 %v7096_v45, %v13691_v8  ;;  %v7002_v31 = vsel %vm2827_vm1, 1.0, %v13658_v12  ;;  %v7035_v44 = vsel %vm3024_vm4, 1.0, %v13658_v12 }
 0x37b   : > { %v2960_v37 = vmul.f32 %v7002_v31, %v13692_v43  ;;  %v3157_v32 = vmul.f32 %v7035_v44, %v13693_v40  ;;  %v7068_v7 = vsel %vm3221_vm5, 1.0, %v13658_v12  ;;  %vm3418_vm6 = vcmp.eq.s32.totalorder %v2083_v53, 3  ;;  %v13704_v40 = vld [vmem:[#allocation95_spill] sm:$0xff] }
 0x37c   : > { %v3381_v63 = vadd.f32 %v3349_v47, %v3184_v39  ;;  %v3354_v23 = vmul.f32 %v7068_v7, %v13694_v50  ;;  %v7101_v15 = vsel %vm3418_vm6, 1.0, %v13658_v12  ;;  %vm2828_vm7 = vcmp.eq.s32.totalorder %v2098_v2, 0  ;;  %v13701_v47 = vld [vmem:[#allocation93_spill] sm:$0xff] }
 0x37d   : > { %v3189_v3 = vadd.f32 %v3157_v32, %v2960_v37  ;;  %v3551_v59 = vmul.f32 %v7101_v15, %v13695_v28  ;;  %v7003_v27 = vsel %vm2828_vm7, 1.0, %v13658_v12  ;;  %vm3025_vm8 = vcmp.eq.s32.totalorder %v2098_v2, 1  ;;  %v13705_v7 = vld [vmem:[#allocation97_spill] sm:$0xff] }
 0x37e   : > { %v3578_v38 = vadd.f32 %v3546_v4, %v3381_v63  ;;  %v2961_v21 = vmul.f32 %v7003_v27, %v13696_v20  ;;  %v7036_v55 = vsel %vm3025_vm8, 1.0, %v13658_v12  ;;  %vm3222_vm9 = vcmp.eq.s32.totalorder %v2098_v2, 2  ;;  %v13703_v4 = vld [vmem:[#allocation94_spill] sm:$0xff] }
 0x37f   : > { %v3386_v24 = vadd.f32 %v3354_v23, %v3189_v3  ;;  %v3158_v26 = vmul.f32 %v7036_v55, %v13697_v46  ;;  %v7069_v34 = vsel %vm3222_vm9, 1.0, %v13658_v12  ;;  %vm3419_vm10 = vcmp.eq.s32.totalorder %v2098_v2, 3  ;;  %v2124_v23 = vpop.xlane.xlu1 %2123  ;;  %v13706_v3 = vld [vmem:[#allocation96_spill] sm:$0xff]  ;;  %v13708_v46 = vld [vmem:[#allocation121_spill] sm:$0xff] }
 0x380   : > { %3611 = vst [vmem:[%s10393_s29 + $0x48] sm:$0xff] %v3578_v38  ;;  %v3355_v53 = vmul.f32 %v7069_v34, %v13698_v62  ;;  %v7102_v0 = vsel %vm3419_vm10, 1.0, %v13658_v12  ;;  %v2053_v25 = vadd.s32 %v10331_v13, %v2050_v35  ;;  %v2068_v36 = vadd.s32 %v10333_v49, %v2065_v19  ;;  %v10548_v49 = vpop.xlane.xlu0 %2108  ;;  %v13700_v35 = vld [vmem:[#allocation91_spill] sm:$0xff]  ;;  %v13707_v38 = vld [vmem:[#allocation98_spill] sm:$0xff] }
 0x381   : > { %v3583_v5 = vadd.f32 %v3551_v59, %v3386_v24  ;;  %v3190_v58 = vadd.f32 %v3158_v26, %v2961_v21  ;;  %v3552_v51 = vmul.f32 %v7102_v0, %v13699_v33  ;;  %v2143_v16 = vadd.s32 %v10335_v56, %v2140_v57  ;;  %v13702_v56 = vld [vmem:[#allocation92_spill] sm:$0xff] }
 0x382   : > { %vm2825_vm11 = vcmp.eq.s32.totalorder %v2053_v25, 0  ;;  %vm3022_vm12 = vcmp.eq.s32.totalorder %v2053_v25, 1  ;;  %vm3219_vm13 = vcmp.eq.s32.totalorder %v2053_v25, 2  ;;  %vm3416_vm14 = vcmp.eq.s32.totalorder %v2053_v25, 3 }
 0x383   : > { %3616 = vst [vmem:[%s10393_s29 + $0x70] sm:$0xff] %v3583_v5  ;;  %v3387_v2 = vadd.f32 %v3355_v53, %v3190_v58  ;;  %v7000_v41 = vsel %vm2825_vm11, 1.0, %v13658_v12  ;;  %v7033_v48 = vsel %vm3022_vm12, 1.0, %v13658_v12  ;;  %v7066_v13 = vsel %vm3219_vm13, 1.0, %v13658_v12  ;;  %v13709_v53 = vld [vmem:[#allocation125_spill] sm:$0xff] }
 0x384   : > { %v2958_v19 = vmul.f32 %v7000_v41, %v13700_v35  ;;  %v3155_v45 = vmul.f32 %v7033_v48, %v13701_v47  ;;  %v3352_v57 = vmul.f32 %v7066_v13, %v13702_v56  ;;  %v7099_v39 = vsel %vm3416_vm14, 1.0, %v13658_v12  ;;  %v10565_v55 = vpop.xlane.xlu0 %2198  ;;  %v13711_v48 = vld [vmem:[#allocation126_spill] sm:$0xff]  ;;  %v13713_v56 = vld [vmem:[#allocation129_spill] sm:$0xff] }
 0x385   : > { %v3584_v8 = vadd.f32 %v3552_v51, %v3387_v2  ;;  %v3549_v31 = vmul.f32 %v7099_v39, %v13703_v4  ;;  %vm2826_vm15 = vcmp.eq.s32.totalorder %v2068_v36, 0  ;;  %vm3023_vm0 = vcmp.eq.s32.totalorder %v2068_v36, 1  ;;  %v13714_v39 = vld [vmem:[#allocation128_spill] sm:$0xff] }
 0x386   : > { %v3187_v44 = vadd.f32 %v3155_v45, %v2958_v19  ;;  %v7001_v43 = vsel %vm2826_vm15, 1.0, %v13658_v12  ;;  %v7034_v37 = vsel %vm3023_vm0, 1.0, %v13658_v12  ;;  %vm3220_vm2 = vcmp.eq.s32.totalorder %v2068_v36, 2  ;;  %v2214_v19 = vpop.xlane.xlu1 %2213 }
 0x387   : > { %3617 = vst [vmem:[%s10393_s29 + $0x78] sm:$0xff] %v3584_v8  ;;  %v2959_v32 = vmul.f32 %v7001_v43, %v13704_v40  ;;  %v3156_v63 = vmul.f32 %v7034_v37, %v13705_v7  ;;  %v7067_v50 = vsel %vm3220_vm2, 1.0, %v13658_v12  ;;  %vm3417_vm3 = vcmp.eq.s32.totalorder %v2068_v36, 3  ;;  %v13710_v36 = vld [vmem:[#allocation122_spill] sm:$0xff] }
 0x388   : > { %v3384_v15 = vadd.f32 %v3352_v57, %v3187_v44  ;;  %v3353_v28 = vmul.f32 %v7067_v50, %v13706_v3  ;;  %v7100_v59 = vsel %vm3417_vm3, 1.0, %v13658_v12  ;;  %vm2831_vm1 = vcmp.eq.s32.totalorder %v2143_v16, 0  ;;  %v13715_v44 = vld [vmem:[#allocation130_spill] sm:$0xff] }
 0x389   : > { %v3188_v27 = vadd.f32 %v3156_v63, %v2959_v32  ;;  %v3550_v20 = vmul.f32 %v7100_v59, %v13707_v38  ;;  %v7006_v21 = vsel %vm2831_vm1, 1.0, %v13658_v12  ;;  %vm3028_vm4 = vcmp.eq.s32.totalorder %v2143_v16, 1 }
 0x38a   : > { %v3581_v24 = vadd.f32 %v3549_v31, %v3384_v15  ;;  %v2964_v26 = vmul.f32 %v7006_v21, %v13708_v46  ;;  %v7039_v34 = vsel %vm3028_vm4, 1.0, %v13658_v12  ;;  %vm3225_vm5 = vcmp.eq.s32.totalorder %v2143_v16, 2  ;;  %v13719_v46 = vld [vmem:[#allocation113_spill] sm:$0xff] }
 0x38b   : > { %v3385_v62 = vadd.f32 %v3353_v28, %v3188_v27  ;;  %v3161_v0 = vmul.f32 %v7039_v34, %v13709_v53  ;;  %v7072_v25 = vsel %vm3225_vm5, 1.0, %v13658_v12  ;;  %vm3422_vm6 = vcmp.eq.s32.totalorder %v2143_v16, 3  ;;  %v13716_v28 = vld [vmem:[#allocation109_spill] sm:$0xff]  ;;  %v13717_v27 = vld [vmem:[#allocation112_spill] sm:$0xff] }
 0x38c   : > { %3614 = vst [vmem:[%s10393_s29 + $0x60] sm:$0xff] %v3581_v24  ;;  %v3358_v5 = vmul.f32 %v7072_v25, %v13710_v36  ;;  %v7105_v58 = vsel %vm3422_vm6, 1.0, %v13658_v12  ;;  %v2158_v33 = vadd.s32 %v10337_v42, %v2155_v52  ;;  %v2110_v51 = vcvt.f32.s32 %v10548_v49  ;;  %v2169_v52 = vpop.xlane.xlu0 %2168  ;;  %v13712_v49 = vld [vmem:[#allocation127_spill] sm:$0xff]  ;;  %v13721_v36 = vld [vmem:[#allocation118_spill] sm:$0xff] }
 0x38d   : > { %v3582_v2 = vadd.f32 %v3550_v20, %v3385_v62  ;;  %v3193_v41 = vadd.f32 %v3161_v0, %v2964_v26  ;;  %v3555_v13 = vmul.f32 %v7105_v58, %v13711_v48  ;;  %v2125_v35 = vcvt.f32.s32 %v2124_v23  ;;  %v10592_v23 = vpop.xlane.xlu1 %2183  ;;  %v13718_v20 = vld [vmem:[#allocation110_spill] sm:$0xff]  ;;  %v13720_v0 = vld [vmem:[#allocation115_spill] sm:$0xff] }
 0x38e   : > { %vm2832_vm7 = vcmp.eq.s32.totalorder %v2158_v33, 0  ;;  %vm3029_vm8 = vcmp.eq.s32.totalorder %v2158_v33, 1  ;;  %vm3226_vm9 = vcmp.eq.s32.totalorder %v2158_v33, 2  ;;  %vm3423_vm10 = vcmp.eq.s32.totalorder %v2158_v33, 3 }
 0x38f   : > { %3615 = vst [vmem:[%s10393_s29 + $0x68] sm:$0xff] %v3582_v2  ;;  %v3390_v16 = vadd.f32 %v3358_v5, %v3193_v41  ;;  %v7007_v47 = vsel %vm2832_vm7, 1.0, %v13658_v12  ;;  %v7040_v30 = vsel %vm3029_vm8, 1.0, %v13658_v12  ;;  %v7073_v42 = vsel %vm3226_vm9, 1.0, %v13658_v12 }
 0x390   : > { %v2965_v45 = vmul.f32 %v7007_v47, %v13712_v49  ;;  %v3162_v57 = vmul.f32 %v7040_v30, %v13713_v56  ;;  %v3359_v8 = vmul.f32 %v7073_v42, %v13714_v39  ;;  %v7106_v4 = vsel %vm3423_vm10, 1.0, %v13658_v12 }
 0x391   : > { %v3587_v31 = vadd.f32 %v3555_v13, %v3390_v16  ;;  %v3556_v43 = vmul.f32 %v7106_v4, %v13715_v44  ;;  %v2113_v37 = vadd.s32 %v10339_v29, %v2110_v51  ;;  %v2128_v40 = vadd.s32 %v10341_v22, %v2125_v35  ;;  %v13722_v51 = vld [vmem:[#allocation117_spill] sm:$0xff]  ;;  %v10611_v13 = vpop.xlane.xlu0 %2258  ;;  %v10613_v35 = vpop.xlane.xlu1 %2273  ;;  %v13723_v16 = vld [vmem:[#allocation119_spill] sm:$0xff] }
 0x392   : > { %v3194_v32 = vadd.f32 %v3162_v57, %v2965_v45  ;;  %v2200_v7 = vcvt.f32.s32 %v10565_v55  ;;  %v2215_v63 = vcvt.f32.s32 %v2214_v19  ;;  %v2170_v50 = vcvt.f32.s32 %v2169_v52  ;;  %v13724_v57 = vld [vmem:[#allocation142_spill] sm:$0xff] }
 0x393   : > { %3620 = vst [vmem:[%s10393_s29 + $0x90] sm:$0xff] %v3587_v31  ;;  %vm2829_vm11 = vcmp.eq.s32.totalorder %v2113_v37, 0  ;;  %vm3026_vm12 = vcmp.eq.s32.totalorder %v2113_v37, 1  ;;  %vm3223_vm13 = vcmp.eq.s32.totalorder %v2113_v37, 2  ;;  %vm3420_vm14 = vcmp.eq.s32.totalorder %v2113_v37, 3  ;;  %v13727_v37 = vld [vmem:[#allocation145_spill] sm:$0xff] }
 0x394   : > { %v3391_v15 = vadd.f32 %v3359_v8, %v3194_v32  ;;  %v7004_v3 = vsel %vm2829_vm11, 1.0, %v13658_v12  ;;  %v7037_v29 = vsel %vm3026_vm12, 1.0, %v13658_v12  ;;  %v7070_v22 = vsel %vm3223_vm13, 1.0, %v13658_v12  ;;  %v13725_v8 = vld [vmem:[#allocation144_spill] sm:$0xff] }
 0x395   : > { %v2962_v59 = vmul.f32 %v7004_v3, %v13716_v28  ;;  %v3159_v38 = vmul.f32 %v7037_v29, %v13717_v27  ;;  %v3356_v21 = vmul.f32 %v7070_v22, %v13718_v20  ;;  %v7103_v55 = vsel %vm3420_vm14, 1.0, %v13658_v12  ;;  %v13729_v29 = vld [vmem:[#allocation148_spill] sm:$0xff]  ;;  %v13730_v20 = vld [vmem:[#allocation147_spill] sm:$0xff] }
 0x396   : > { %v3588_v24 = vadd.f32 %v3556_v43, %v3391_v15  ;;  %v3553_v26 = vmul.f32 %v7103_v55, %v13719_v46  ;;  %vm2830_vm15 = vcmp.eq.s32.totalorder %v2128_v40, 0  ;;  %vm3027_vm0 = vcmp.eq.s32.totalorder %v2128_v40, 1  ;;  %v13728_v15 = vld [vmem:[#allocation146_spill] sm:$0xff]  ;;  %v13731_v55 = vld [vmem:[#allocation149_spill] sm:$0xff] }
 0x397   : > { %v3191_v34 = vadd.f32 %v3159_v38, %v2962_v59  ;;  %v7005_v62 = vsel %vm2830_vm15, 1.0, %v13658_v12  ;;  %v7038_v53 = vsel %vm3027_vm0, 1.0, %v13658_v12  ;;  %vm3224_vm2 = vcmp.eq.s32.totalorder %v2128_v40, 2 }
 0x398   : > { %3621 = vst [vmem:[%s10393_s29 + $0x98] sm:$0xff] %v3588_v24  ;;  %v2963_v25 = vmul.f32 %v7005_v62, %v13720_v0  ;;  %v3160_v5 = vmul.f32 %v7038_v53, %v13721_v36  ;;  %v7071_v58 = vsel %vm3224_vm2, 1.0, %v13658_v12  ;;  %vm3421_vm3 = vcmp.eq.s32.totalorder %v2128_v40, 3  ;;  %v13733_v36 = vld [vmem:[#allocation136_spill] sm:$0xff] }
 0x399   : > { %v3388_v33 = vadd.f32 %v3356_v21, %v3191_v34  ;;  %v3357_v2 = vmul.f32 %v7071_v58, %v13722_v51  ;;  %v7104_v41 = vsel %vm3421_vm3, 1.0, %v13658_v12  ;;  %v2203_v48 = vadd.s32 %v10343_v18, %v2200_v7  ;;  %v13732_v34 = vld [vmem:[#allocation131_spill] sm:$0xff]  ;;  %v13734_v58 = vld [vmem:[#allocation132_spill] sm:$0xff] }
 0x39a   : > { %v3192_v19 = vadd.f32 %v3160_v5, %v2963_v25  ;;  %v3554_v47 = vmul.f32 %v7104_v41, %v13723_v16  ;;  %v2218_v30 = vadd.s32 %v10345_v10, %v2215_v63  ;;  %v2173_v42 = vadd.s32 %v10347_v14, %v2170_v50  ;;  %v13726_v10 = vld [vmem:[#allocation143_spill] sm:$0xff]  ;;  %v10629_v63 = vpop.xlane.xlu0 %2228  ;;  %v10631_v50 = vpop.xlane.xlu1 %2243  ;;  %v13735_v16 = vld [vmem:[#allocation137_spill] sm:$0xff] }
 0x39b   : > { %v3585_v52 = vadd.f32 %v3553_v26, %v3388_v33  ;;  %vm2835_vm1 = vcmp.eq.s32.totalorder %v2203_v48, 0  ;;  %vm3032_vm4 = vcmp.eq.s32.totalorder %v2203_v48, 1  ;;  %vm3229_vm5 = vcmp.eq.s32.totalorder %v2203_v48, 2 }
 0x39c   : > { %v3389_v49 = vadd.f32 %v3357_v2, %v3192_v19  ;;  %v7010_v45 = vsel %vm2835_vm1, 1.0, %v13658_v12  ;;  %v7043_v18 = vsel %vm3032_vm4, 1.0, %v13658_v12  ;;  %v7076_v56 = vsel %vm3229_vm5, 1.0, %v13658_v12 }
 0x39d   : > { %3618 = vst [vmem:[%s10393_s29 + $0x80] sm:$0xff] %v3585_v52  ;;  %v2968_v39 = vmul.f32 %v7010_v45, %v13724_v57  ;;  %v3165_v4 = vmul.f32 %v7043_v18, %v13725_v8  ;;  %v3362_v31 = vmul.f32 %v7076_v56, %v13726_v10  ;;  %vm3426_vm6 = vcmp.eq.s32.totalorder %v2203_v48, 3 }
 0x39e   : > { %v3586_v14 = vadd.f32 %v3554_v47, %v3389_v49  ;;  %v7109_v44 = vsel %vm3426_vm6, 1.0, %v13658_v12  ;;  %vm2836_vm7 = vcmp.eq.s32.totalorder %v2218_v30, 0  ;;  %vm3033_vm8 = vcmp.eq.s32.totalorder %v2218_v30, 1  ;;  %v10649_v41 = vpop.xlane.xlu0 %2288  ;;  %v10651_v48 = vpop.xlane.xlu1 %2303 }
 0x39f   : > { %v3197_v43 = vadd.f32 %v3165_v4, %v2968_v39  ;;  %v3559_v40 = vmul.f32 %v7109_v44, %v13727_v37  ;;  %v7011_v32 = vsel %vm2836_vm7, 1.0, %v13658_v12  ;;  %v7044_v7 = vsel %vm3033_vm8, 1.0, %v13658_v12 }
 0x3a0   : > { %3619 = vst [vmem:[%s10393_s29 + $0x88] sm:$0xff] %v3586_v14  ;;  %v2969_v3 = vmul.f32 %v7011_v32, %v13728_v15  ;;  %v3166_v22 = vmul.f32 %v7044_v7, %v13729_v29  ;;  %vm3230_vm9 = vcmp.eq.s32.totalorder %v2218_v30, 2  ;;  %vm3427_vm10 = vcmp.eq.s32.totalorder %v2218_v30, 3  ;;  %v13740_v7 = vld [vmem:[#allocation141_spill] sm:$0xff] }
 0x3a1   : > { %v3394_v28 = vadd.f32 %v3362_v31, %v3197_v43  ;;  %v7077_v59 = vsel %vm3230_vm9, 1.0, %v13658_v12  ;;  %v7110_v27 = vsel %vm3427_vm10, 1.0, %v13658_v12  ;;  %vm2833_vm11 = vcmp.eq.s32.totalorder %v2173_v42, 0  ;;  %v13737_v31 = vld [vmem:[#allocation138_spill] sm:$0xff]  ;;  %v13739_v43 = vld [vmem:[#allocation139_spill] sm:$0xff] }
 0x3a2   : > { %v3198_v38 = vadd.f32 %v3166_v22, %v2969_v3  ;;  %v3363_v21 = vmul.f32 %v7077_v59, %v13730_v20  ;;  %v3560_v24 = vmul.f32 %v7110_v27, %v13731_v55  ;;  %v7008_v46 = vsel %vm2833_vm11, 1.0, %v13658_v12  ;;  %v13741_v3 = vld [vmem:[#allocation158_spill] sm:$0xff]  ;;  %v13742_v22 = vld [vmem:[#allocation160_spill] sm:$0xff] }
 0x3a3   : > { %v3591_v26 = vadd.f32 %v3559_v40, %v3394_v28  ;;  %v2966_v62 = vmul.f32 %v7008_v46, %v13732_v34  ;;  %vm3030_vm12 = vcmp.eq.s32.totalorder %v2173_v42, 1  ;;  %vm3227_vm13 = vcmp.eq.s32.totalorder %v2173_v42, 2 }
 0x3a4   : > { %v3395_v53 = vadd.f32 %v3363_v21, %v3198_v38  ;;  %v7041_v0 = vsel %vm3030_vm12, 1.0, %v13658_v12  ;;  %v7074_v25 = vsel %vm3227_vm13, 1.0, %v13658_v12  ;;  %vm3424_vm14 = vcmp.eq.s32.totalorder %v2173_v42, 3  ;;  %v13743_v38 = vld [vmem:[#allocation159_spill] sm:$0xff] }
 0x3a5   : > { %3624 = vst [vmem:[%s10393_s29 + $0xb0] sm:$0xff] %v3591_v26  ;;  %v3163_v5 = vmul.f32 %v7041_v0, %v13733_v36  ;;  %v3360_v33 = vmul.f32 %v7074_v25, %v13734_v58  ;;  %v7107_v51 = vsel %vm3424_vm14, 1.0, %v13658_v12  ;;  %v2185_v2 = vcvt.f32.s32 %v10592_v23  ;;  %v13736_v23 = vld [vmem:[#allocation177_spill] sm:$0xff]  ;;  %v13746_v36 = vld [vmem:[#allocation164_spill] sm:$0xff] }
 0x3a6   : > { %v3592_v19 = vadd.f32 %v3560_v24, %v3395_v53  ;;  %v3557_v47 = vmul.f32 %v7107_v51, %v13735_v16  ;;  %v2260_v30 = vcvt.f32.s32 %v10611_v13  ;;  %v2275_v42 = vcvt.f32.s32 %v10613_v35  ;;  %v13744_v24 = vld [vmem:[#allocation161_spill] sm:$0xff] }
 0x3a7   : > { %v3195_v52 = vadd.f32 %v3163_v5, %v2966_v62  ;;  %v2188_v49 = vadd.s32 %v10349_v9, %v2185_v2  ;;  %v2230_v45 = vcvt.f32.s32 %v10629_v63  ;;  %v2245_v18 = vcvt.f32.s32 %v10631_v50  ;;  %v13745_v62 = vld [vmem:[#allocation162_spill] sm:$0xff] }
 0x3a8   : > { %3625 = vst [vmem:[%s10393_s29 + $0xb8] sm:$0xff] %v3592_v19  ;;  %v2263_v56 = vadd.s32 %v13736_v23, %v2260_v30  ;;  %v2278_v57 = vadd.s32 %v10368_v6, %v2275_v42  ;;  %v2290_v39 = vcvt.f32.s32 %v10649_v41  ;;  %v2305_v8 = vcvt.f32.s32 %v10651_v48  ;;  %v13738_v6 = vld [vmem:[#allocation140_spill] sm:$0xff]  ;;  %v13748_v30 = vld [vmem:[#allocation165_spill] sm:$0xff] }
 0x3a9   : > { %v3392_v4 = vadd.f32 %v3360_v33, %v3195_v52  ;;  %vm2834_vm15 = vcmp.eq.s32.totalorder %v2188_v49, 0  ;;  %vm3031_vm0 = vcmp.eq.s32.totalorder %v2188_v49, 1  ;;  %vm3228_vm2 = vcmp.eq.s32.totalorder %v2188_v49, 2  ;;  %v13747_v33 = vld [vmem:[#allocation163_spill] sm:$0xff] }
 0x3aa   : > { %v7009_v9 = vsel %vm2834_vm15, 1.0, %v13658_v12  ;;  %v7042_v13 = vsel %vm3031_vm0, 1.0, %v13658_v12  ;;  %v7075_v35 = vsel %vm3228_vm2, 1.0, %v13658_v12  ;;  %vm3425_vm3 = vcmp.eq.s32.totalorder %v2188_v49, 3 }
 0x3ab   : > { %v3589_v10 = vadd.f32 %v3557_v47, %v3392_v4  ;;  %v2967_v14 = vmul.f32 %v7009_v9, %v13737_v31  ;;  %v3164_v44 = vmul.f32 %v7042_v13, %v13738_v6  ;;  %v3361_v37 = vmul.f32 %v7075_v35, %v13739_v43  ;;  %v13751_v4 = vld [vmem:[#allocation151_spill] sm:$0xff]  ;;  %v13752_v13 = vld [vmem:[#allocation153_spill] sm:$0xff]  ;;  %v13753_v6 = vld [vmem:[#allocation154_spill] sm:$0xff] }
 0x3ac   : > { %v7108_v40 = vsel %vm3425_vm3, 1.0, %v13658_v12  ;;  %vm2839_vm1 = vcmp.eq.s32.totalorder %v2263_v56, 0  ;;  %vm3036_vm4 = vcmp.eq.s32.totalorder %v2263_v56, 1  ;;  %vm3233_vm5 = vcmp.eq.s32.totalorder %v2263_v56, 2  ;;  %v13754_v43 = vld [vmem:[#allocation156_spill] sm:$0xff] }
 0x3ad   : > { %3622 = vst [vmem:[%s10393_s29 + $0xa0] sm:$0xff] %v3589_v10  ;;  %v3196_v32 = vadd.f32 %v3164_v44, %v2967_v14  ;;  %v3558_v63 = vmul.f32 %v7108_v40, %v13740_v7  ;;  %v7014_v50 = vsel %vm2839_vm1, 1.0, %v13658_v12  ;;  %v7047_v15 = vsel %vm3036_vm4, 1.0, %v13658_v12  ;;  %v13755_v7 = vld [vmem:[#allocation155_spill] sm:$0xff] }
 0x3ae   : > { %v2972_v29 = vmul.f32 %v7014_v50, %v13741_v3  ;;  %v3169_v28 = vmul.f32 %v7047_v15, %v13742_v22  ;;  %v7080_v59 = vsel %vm3233_vm5, 1.0, %v13658_v12  ;;  %vm3430_vm6 = vcmp.eq.s32.totalorder %v2263_v56, 3  ;;  %v13756_v3 = vld [vmem:[#allocation157_spill] sm:$0xff] }
 0x3af   : > { %v3393_v27 = vadd.f32 %v3361_v37, %v3196_v32  ;;  %v3366_v20 = vmul.f32 %v7080_v59, %v13743_v38  ;;  %v7113_v21 = vsel %vm3430_vm6, 1.0, %v13658_v12  ;;  %vm2840_vm7 = vcmp.eq.s32.totalorder %v2278_v57, 0 }
 0x3b0   : > { %v3201_v55 = vadd.f32 %v3169_v28, %v2972_v29  ;;  %v3563_v46 = vmul.f32 %v7113_v21, %v13744_v24  ;;  %v7015_v26 = vsel %vm2840_vm7, 1.0, %v13658_v12  ;;  %vm3037_vm8 = vcmp.eq.s32.totalorder %v2278_v57, 1  ;;  %v2319_v28 = vpop.xlane.xlu0 %2318  ;;  %v2334_v21 = vpop.xlane.xlu1 %2333  ;;  %v13758_v24 = vld [vmem:[#allocation168_spill] sm:$0xff] }
 0x3b1   : > { %v3590_v34 = vadd.f32 %v3558_v63, %v3393_v27  ;;  %v2973_v53 = vmul.f32 %v7015_v26, %v13745_v62  ;;  %v7048_v0 = vsel %vm3037_vm8, 1.0, %v13658_v12  ;;  %vm3234_vm9 = vcmp.eq.s32.totalorder %v2278_v57, 2  ;;  %v13757_v27 = vld [vmem:[#allocation166_spill] sm:$0xff] }
 0x3b2   : > { %v3398_v25 = vadd.f32 %v3366_v20, %v3201_v55  ;;  %v3170_v5 = vmul.f32 %v7048_v0, %v13746_v36  ;;  %v7081_v58 = vsel %vm3234_vm9, 1.0, %v13658_v12  ;;  %vm3431_vm10 = vcmp.eq.s32.totalorder %v2278_v57, 3 }
 0x3b3   : > { %3623 = vst [vmem:[%s10393_s29 + $0xa8] sm:$0xff] %v3590_v34  ;;  %v3367_v51 = vmul.f32 %v7081_v58, %v13747_v33  ;;  %v7114_v2 = vsel %vm3431_vm10, 1.0, %v13658_v12  ;;  %v2233_v41 = vadd.s32 %v10370_v60, %v2230_v45  ;;  %v2248_v19 = vadd.s32 %v10372_v54, %v2245_v18  ;;  %v13749_v54 = vld [vmem:[#allocation150_spill] sm:$0xff]  ;;  %v13750_v18 = vld [vmem:[#allocation152_spill] sm:$0xff]  ;;  %v13759_v34 = vld [vmem:[#allocation167_spill] sm:$0xff] }
 0x3b4   : > { %v3595_v16 = vadd.f32 %v3563_v46, %v3398_v25  ;;  %v3202_v47 = vadd.f32 %v3170_v5, %v2973_v53  ;;  %v3564_v42 = vmul.f32 %v7114_v2, %v13748_v30  ;;  %v2293_v52 = vadd.s32 %v10374_v61, %v2290_v39  ;;  %v13760_v58 = vld [vmem:[#allocation169_spill] sm:$0xff]  ;;  %v13763_v30 = vld [vmem:[#allocation171_spill] sm:$0xff] }
 0x3b5   : > { %vm2837_vm11 = vcmp.eq.s32.totalorder %v2233_v41, 0  ;;  %vm3034_vm12 = vcmp.eq.s32.totalorder %v2233_v41, 1  ;;  %vm3231_vm13 = vcmp.eq.s32.totalorder %v2233_v41, 2  ;;  %vm3428_vm14 = vcmp.eq.s32.totalorder %v2233_v41, 3 }
 0x3b6   : > { %3628 = vst [vmem:[%s10393_s29 + $0xd0] sm:$0xff] %v3595_v16  ;;  %v3399_v49 = vadd.f32 %v3367_v51, %v3202_v47  ;;  %v7012_v23 = vsel %vm2837_vm11, 1.0, %v13658_v12  ;;  %v7045_v56 = vsel %vm3034_vm12, 1.0, %v13658_v12  ;;  %v7078_v60 = vsel %vm3231_vm13, 1.0, %v13658_v12  ;;  %v13761_v16 = vld [vmem:[#allocation170_spill] sm:$0xff] }
 0x3b7   : > { %v2970_v45 = vmul.f32 %v7012_v23, %v13749_v54  ;;  %v3167_v57 = vmul.f32 %v7045_v56, %v13750_v18  ;;  %v3364_v9 = vmul.f32 %v7078_v60, %v13751_v4  ;;  %v7111_v61 = vsel %vm3428_vm14, 1.0, %v13658_v12  ;;  %v13764_v23 = vld [vmem:[#allocation202_spill] sm:$0xff]  ;;  %v13765_v54 = vld [vmem:[#allocation173_spill] sm:$0xff]  ;;  %v13766_v4 = vld [vmem:[#allocation203_spill] sm:$0xff] }
 0x3b8   : > { %v3596_v39 = vadd.f32 %v3564_v42, %v3399_v49  ;;  %v3561_v35 = vmul.f32 %v7111_v61, %v13752_v13  ;;  %vm2838_vm15 = vcmp.eq.s32.totalorder %v2248_v19, 0  ;;  %vm3035_vm0 = vcmp.eq.s32.totalorder %v2248_v19, 1  ;;  %v8073_v49 = vld [vmem:[%s13043_s5 + $0x3] ss:$0 sm:$0xff]  ;;  %v8075_v61 = vld [vmem:[%s13043_s5 + $0x2] ss:$0 sm:$0xff] }
 0x3b9   : > { %v3199_v10 = vadd.f32 %v3167_v57, %v2970_v45  ;;  %v7013_v31 = vsel %vm2838_vm15, 1.0, %v13658_v12  ;;  %v7046_v14 = vsel %vm3035_vm0, 1.0, %v13658_v12  ;;  %vm3232_vm2 = vcmp.eq.s32.totalorder %v2248_v19, 2  ;;  %v8074_v57 = vld [vmem:[%s13043_s5] ss:$0 sm:$0xff] }
 0x3ba   : > { %3629 = vst [vmem:[%s10393_s29 + $0xd8] sm:$0xff] %v3596_v39  ;;  %v2971_v44 = vmul.f32 %v7013_v31, %v13753_v6  ;;  %v3168_v37 = vmul.f32 %v7046_v14, %v13754_v43  ;;  %v7079_v40 = vsel %vm3232_vm2, 1.0, %v13658_v12  ;;  %vm3429_vm3 = vcmp.eq.s32.totalorder %v2248_v19, 3  ;;  %v13767_v39 = vld [vmem:[#allocation204_spill] sm:$0xff]  ;;  %v13768_v43 = vld [vmem:[#allocation205_spill] sm:$0xff] }
 0x3bb   : > { %v3396_v32 = vadd.f32 %v3364_v9, %v3199_v10  ;;  %v3365_v63 = vmul.f32 %v7079_v40, %v13755_v7  ;;  %v7112_v50 = vsel %vm3429_vm3, 1.0, %v13658_v12  ;;  %vm2841_vm1 = vcmp.eq.s32.totalorder %v2293_v52, 0 }
 0x3bc   : > { %v3200_v15 = vadd.f32 %v3168_v37, %v2971_v44  ;;  %v3562_v29 = vmul.f32 %v7112_v50, %v13756_v3  ;;  %v7016_v22 = vsel %vm2841_vm1, 1.0, %v13658_v12  ;;  %vm3038_vm4 = vcmp.eq.s32.totalorder %v2293_v52, 1  ;;  %v8076_v44 = vld [vmem:[%s13043_s5 + $0x1] ss:$0 sm:$0xff] }
 0x3bd   : > { %v3593_v59 = vadd.f32 %v3561_v35, %v3396_v32  ;;  %v2974_v38 = vmul.f32 %v7016_v22, %v13757_v27  ;;  %v7049_v20 = vsel %vm3038_vm4, 1.0, %v13658_v12  ;;  %vm3235_vm5 = vcmp.eq.s32.totalorder %v2293_v52, 2  ;;  %v13770_v32 = vld [vmem:[#allocation176_spill] sm:$0xff] }
 0x3be   : > { %v3397_v55 = vadd.f32 %v3365_v63, %v3200_v15  ;;  %v3171_v46 = vmul.f32 %v7049_v20, %v13758_v24  ;;  %v7082_v26 = vsel %vm3235_vm5, 1.0, %v13658_v12  ;;  %vm3432_vm6 = vcmp.eq.s32.totalorder %v2293_v52, 3  ;;  %v13771_v63 = vld [vmem:[#allocation175_spill] sm:$0xff]  ;;  %v13772_v24 = vld [vmem:[#allocation206_spill] sm:$0xff] }
 0x3bf   : > { %3626 = vst [vmem:[%s10393_s29 + $0xc0] sm:$0xff] %v3593_v59  ;;  %v3368_v62 = vmul.f32 %v7082_v26, %v13759_v34  ;;  %v7115_v53 = vsel %vm3432_vm6, 1.0, %v13658_v12  ;;  %v2308_v0 = vadd.s32 %v10376_v17, %v2305_v8  ;;  %v2320_v25 = vcvt.f32.s32 %v2319_v28  ;;  %v13762_v8 = vld [vmem:[#allocation172_spill] sm:$0xff] }
 0x3c0   : > { %v3594_v36 = vadd.f32 %v3562_v29, %v3397_v55  ;;  %v3203_v5 = vadd.f32 %v3171_v46, %v2974_v38  ;;  %v3565_v33 = vmul.f32 %v7115_v53, %v13760_v58  ;;  %v2335_v51 = vcvt.f32.s32 %v2334_v21 }
 0x3c1   : > { %vm2842_vm7 = vcmp.eq.s32.totalorder %v2308_v0, 0  ;;  %vm3039_vm8 = vcmp.eq.s32.totalorder %v2308_v0, 1  ;;  %vm3236_vm9 = vcmp.eq.s32.totalorder %v2308_v0, 2  ;;  %vm3433_vm10 = vcmp.eq.s32.totalorder %v2308_v0, 3 }
 0x3c2   : > { %3627 = vst [vmem:[%s10393_s29 + $0xc8] sm:$0xff] %v3594_v36  ;;  %v3400_v2 = vadd.f32 %v3368_v62, %v3203_v5  ;;  %v7017_v41 = vsel %vm2842_vm7, 1.0, %v13658_v12  ;;  %v7050_v19 = vsel %vm3039_vm8, 1.0, %v13658_v12  ;;  %v7083_v48 = vsel %vm3236_vm9, 1.0, %v13658_v12 }
 0x3c3   : > { %v2975_v17 = vmul.f32 %v7017_v41, %v13761_v16  ;;  %v3172_v47 = vmul.f32 %v7050_v19, %v13762_v8  ;;  %v3369_v42 = vmul.f32 %v7083_v48, %v13763_v30  ;;  %v7116_v52 = vsel %vm3433_vm10, 1.0, %v13658_v12 }
 0x3c4   : > { %v3535_v56 = vadd.f32 %v8073_v49, %v13764_v23  ;;  %v3597_v60 = vadd.f32 %v3565_v33, %v3400_v2  ;;  %v3566_v45 = vmul.f32 %v7116_v52, %v13765_v54  ;;  %v2323_v18 = vadd.s32 %v10378_v1, %v2320_v25 }
 0x3c5   : > { %v2945_v9 = vadd.f32 %v8074_v57, %v13766_v4  ;;  %v3339_v13 = vadd.f32 %v8075_v61, %v13767_v39  ;;  %v3204_v35 = vadd.f32 %v3172_v47, %v2975_v17  ;;  %v2338_v10 = vadd.s32 %v10380_v11, %v2335_v51  ;;  %v13769_v11 = vld [vmem:[#allocation174_spill] sm:$0xff] }
 0x3c6   : > { %3630 = vst [vmem:[%s10393_s29 + $0xe0] sm:$0xff] %v3597_v60  ;;  %vm2843_vm11 = vcmp.eq.s32.totalorder %v2323_v18, 0  ;;  %vm3040_vm12 = vcmp.eq.s32.totalorder %v2323_v18, 1  ;;  %vm3237_vm13 = vcmp.eq.s32.totalorder %v2323_v18, 2  ;;  %vm3434_vm14 = vcmp.eq.s32.totalorder %v2323_v18, 3 }
 0x3c7   : > { %v3401_v1 = vadd.f32 %v3369_v42, %v3204_v35  ;;  %v7018_v31 = vsel %vm2843_vm11, 1.0, %v13658_v12  ;;  %v7051_v14 = vsel %vm3040_vm12, 1.0, %v13658_v12  ;;  %v7084_v6 = vsel %vm3237_vm13, 1.0, %v13658_v12 }
 0x3c8   : > { %v3142_v37 = vadd.f32 %v8076_v44, %v13768_v43  ;;  %v2976_v40 = vmul.f32 %v7018_v31, %v13769_v11  ;;  %v3173_v7 = vmul.f32 %v7051_v14, %v13770_v32  ;;  %v3370_v50 = vmul.f32 %v7084_v6, %v13771_v63 }
 0x3c9   : > { %v3598_v15 = vadd.f32 %v3566_v45, %v3401_v1  ;;  %v7117_v3 = vsel %vm3434_vm14, 1.0, %v13658_v12  ;;  %vm2844_vm15 = vcmp.eq.s32.totalorder %v2338_v10, 0  ;;  %vm3041_vm0 = vcmp.eq.s32.totalorder %v2338_v10, 1 }
 0x3ca   : > { %v3205_v29 = vadd.f32 %v3173_v7, %v2976_v40  ;;  %v7019_v22 = vsel %vm2844_vm15, 1.0, %v13658_v12  ;;  %v7052_v28 = vsel %vm3041_vm0, 1.0, %v13658_v12  ;;  %vm3238_vm2 = vcmp.eq.s32.totalorder %v2338_v10, 2 }
 0x3cb   : > { %3631 = vst [vmem:[%s10393_s29 + $0xe8] sm:$0xff] %v3598_v15  ;;  %v2977_v59 = vmul.f32 %v7019_v22, %v2945_v9  ;;  %v3174_v27 = vmul.f32 %v7052_v28, %v3142_v37  ;;  %v7085_v38 = vsel %vm3238_vm2, 1.0, %v13658_v12  ;;  %vm3435_vm3 = vcmp.eq.s32.totalorder %v2338_v10, 3 }
 0x3cc   : > { %v3402_v20 = vadd.f32 %v3370_v50, %v3205_v29  ;;  %v3567_v21 = vmul.f32 %v7117_v3, %v3535_v56  ;;  %v7118_v55 = vsel %vm3435_vm3, 1.0, %v13658_v12  ;;  %v3536_v46 = vadd.f32 %v8073_v49, %v13772_v24 }
 0x3cd   : > { %v3206_v26 = vadd.f32 %v3174_v27, %v2977_v59  ;;  %v3371_v34 = vmul.f32 %v7085_v38, %v3339_v13 }
 0x3ce   : > { %v3599_v62 = vadd.f32 %v3567_v21, %v3402_v20  ;;  %v3568_v0 = vmul.f32 %v7118_v55, %v3536_v46 }
 0x3cf   : > { %v3403_v53 = vadd.f32 %v3371_v34, %v3206_v26 }
 0x3d0   : > { %3632 = vst [vmem:[%s10393_s29 + $0xf0] sm:$0xff] %v3599_v62 }
 0x3d1   : > { %v3600_v25 = vadd.f32 %v3568_v0, %v3403_v53 }
 0x3d3   : > { %3633 = vst [vmem:[%s10393_s29 + $0xf8] sm:$0xff] %v3600_v25 }
 0x3d4 PF: > { %p7120_p8 = scmp.ne.s32.totalorder %s8193_s14, 1 }
 0x3d6   : > { %3637 = sbr.rel (%p7120_p8) target bundleno = 1916 (0x77c), region = 64 }
 0x3dd   : > { %v3654_v36 = vld [vmem:[#allocation2 + $0x80] sm:$0xff]  ;;  %v3655_v5 = vld [vmem:[#allocation2 + $0x88] sm:$0xff]  ;;  %v13773_v33 = vld [vmem:[#allocation7_spill] sm:$0xff]  ;;  %s10884_s30 = scalar_lea.vmem [#allocation2], %s8304_s24  ;;  %vm4650_vm1 = vcmask 31744  }
 0x3de   : > { %v3638_v58 = vld [vmem:[#allocation2] sm:$0xff]  ;;  %v13775_v2 = vld [vmem:[#allocation55_spill] sm:$0xff]  ;;  %v3710_v48 = vpack.c.bf16 %v3655_v5, %v3654_v36  ;;  %v3639_v16 = vld [vmem:[#allocation2 + $0x8] sm:$0xff] }
 0x3df   : > { %v13774_v51 = vld [vmem:[#allocation5_spill] sm:$0xff]  ;;  %v3656_v17 = vld [vmem:[#allocation2 + $0x90] sm:$0xff]  ;;  %v3657_v8 = vld [vmem:[#allocation2 + $0x98] sm:$0xff]  ;;  %v3702_v47 = vpack.c.bf16 %v3639_v16, %v3638_v58 }
 0x3e0   : > { %v7122_v12 = vcombine.high %v13774_v51, %v13773_v33  ;;  %v13776_v41 = vld [vmem:[#allocation53_spill] sm:$0xff]  ;;  %v3711_v30 = vpack.c.bf16 %v3657_v8, %v3656_v17  ;;  %v3640_v42 = vld [vmem:[#allocation2 + $0x10] sm:$0xff]  ;;  %v3641_v52 = vld [vmem:[#allocation2 + $0x18] sm:$0xff]  ;;  %7603 = vmatprep.subr.bf16.mxu0 %v3710_v48  ;;  %7949 = vmatprep.subr.bf16.mxu1 %v3710_v48  ;;  %v7121_v0 = vcombine.low %v13774_v51, %v13773_v33 }
 0x3e1   : > { %v7170_v19 = vcombine.high %v13776_v41, %v13775_v2  ;;  %v3658_v49 = vld [vmem:[#allocation2 + $0xa0] sm:$0xff]  ;;  %v3659_v23 = vld [vmem:[#allocation2 + $0xa8] sm:$0xff]  ;;  %7604 = vmatpush3.bf16.msra.mxu0 %v3702_v47  ;;  %7957 = vmatpush3.bf16.msra.mxu1 %v3702_v47  ;;  %v3703_v56 = vpack.c.bf16 %v3641_v52, %v3640_v42  ;;  %v3660_v18 = vld [vmem:[#allocation2 + $0xb0] sm:$0xff]  ;;  %v7169_v25 = vcombine.low %v13776_v41, %v13775_v2 }
 0x3e2   : > { %4135 = vmatprep.mubr.bf16.mxu0 %v7122_v12  ;;  %7605 = vmatprep.subr.bf16.mxu0 %v3711_v30  ;;  %v3712_v60 = vpack.c.bf16 %v3659_v23, %v3658_v49  ;;  %v3642_v54 = vld [vmem:[#allocation2 + $0x20] sm:$0xff]  ;;  %v3643_v45 = vld [vmem:[#allocation2 + $0x28] sm:$0xff]  ;;  %v3661_v57 = vld [vmem:[#allocation2 + $0xb8] sm:$0xff] }
 0x3e3   : > { %4231 = vmatprep.mubr.bf16.mxu1 %v7170_v19  ;;  %7950 = vmatprep.subr.bf16.mxu1 %v3711_v30  ;;  %v3704_v4 = vpack.c.bf16 %v3643_v45, %v3642_v54  ;;  %v3713_v9 = vpack.c.bf16 %v3661_v57, %v3660_v18  ;;  %v3644_v61 = vld [vmem:[#allocation2 + $0x30] sm:$0xff]  ;;  %v3645_v39 = vld [vmem:[#allocation2 + $0x38] sm:$0xff]  ;;  %v3662_v13 = vld [vmem:[#allocation2 + $0xc0] sm:$0xff] }
 0x3e4   : > { %v3663_v35 = vld [vmem:[#allocation2 + $0xc8] sm:$0xff]  ;;  %v3705_v10 = vpack.c.bf16 %v3645_v39, %v3644_v61  ;;  %v3646_v31 = vld [vmem:[#allocation2 + $0x40] sm:$0xff]  ;;  %v3664_v6 = vld [vmem:[#allocation2 + $0xd0] sm:$0xff] }
 0x3e5   : > { %7606 = vmatpush3.bf16.msra.mxu0 %v3703_v56  ;;  %7958 = vmatpush3.bf16.msra.mxu1 %v3703_v56  ;;  %v3714_v1 = vpack.c.bf16 %v3663_v35, %v3662_v13  ;;  %v3647_v14 = vld [vmem:[#allocation2 + $0x48] sm:$0xff]  ;;  %v3665_v44 = vld [vmem:[#allocation2 + $0xd8] sm:$0xff]  ;;  %v3648_v11 = vld [vmem:[#allocation2 + $0x50] sm:$0xff] }
 0x3e6   : > { %7607 = vmatprep.subr.bf16.mxu0 %v3712_v60  ;;  %7951 = vmatprep.subr.bf16.mxu1 %v3712_v60  ;;  %v3706_v43 = vpack.c.bf16 %v3647_v14, %v3646_v31  ;;  %v3715_v37 = vpack.c.bf16 %v3665_v44, %v3664_v6  ;;  %v3649_v40 = vld [vmem:[#allocation2 + $0x58] sm:$0xff]  ;;  %v3666_v32 = vld [vmem:[#allocation2 + $0xe0] sm:$0xff]  ;;  %v3667_v7 = vld [vmem:[#allocation2 + $0xe8] sm:$0xff] }
 0x3e7   : > { %v3707_v63 = vpack.c.bf16 %v3649_v40, %v3648_v11  ;;  %v3650_v50 = vld [vmem:[#allocation2 + $0x60] sm:$0xff]  ;;  %v3716_v15 = vpack.c.bf16 %v3667_v7, %v3666_v32  ;;  %v3651_v3 = vld [vmem:[#allocation2 + $0x68] sm:$0xff]  ;;  %v3668_v29 = vld [vmem:[#allocation2 + $0xf0] sm:$0xff] }
 0x3e8   : > { %v3669_v22 = vld [vmem:[#allocation2 + $0xf8] sm:$0xff]  ;;  %v3652_v28 = vld [vmem:[#allocation2 + $0x70] sm:$0xff]  ;;  %v3708_v59 = vpack.c.bf16 %v3651_v3, %v3650_v50  ;;  %v3686_v20 = vld [vmem:[#allocation2 + $0x180] sm:$0xff] }
 0x3e9   : > { %7608 = vmatpush3.bf16.msra.mxu0 %v3704_v4  ;;  %7959 = vmatpush3.bf16.msra.mxu1 %v3704_v4  ;;  %v3653_v27 = vld [vmem:[#allocation2 + $0x78] sm:$0xff]  ;;  %v3717_v38 = vpack.c.bf16 %v3669_v22, %v3668_v29  ;;  %v3687_v21 = vld [vmem:[#allocation2 + $0x188] sm:$0xff]  ;;  %v8077_v46 = vld [vmem:[%s13044_s6] sm:$0xff]  }
 0x3ea   : > { %7609 = vmatprep.subr.bf16.mxu0 %v3713_v9  ;;  %7952 = vmatprep.subr.bf16.mxu1 %v3713_v9  ;;  %v3709_v55 = vpack.c.bf16 %v3653_v27, %v3652_v28  ;;  %v3726_v24 = vpack.c.bf16 %v3687_v21, %v3686_v20  ;;  %v3670_v26 = vld [vmem:[#allocation2 + $0x100] sm:$0xff]  ;;  %v3671_v34 = vld [vmem:[#allocation2 + $0x108] sm:$0xff]  ;;  %v3688_v62 = vld [vmem:[#allocation2 + $0x190] sm:$0xff] }
 0x3eb   : > { %v3689_v53 = vld [vmem:[#allocation2 + $0x198] sm:$0xff]  ;;  %v3718_v36 = vpack.c.bf16 %v3671_v34, %v3670_v26  ;;  %v3672_v58 = vld [vmem:[#allocation2 + $0x110] sm:$0xff]  ;;  %v13778_v48 = vld [vmem:[#allocation9_spill] sm:$0xff] }
 0x3ec   : > { %v3727_v5 = vpack.c.bf16 %v3689_v53, %v3688_v62  ;;  %v3673_v12 = vld [vmem:[#allocation2 + $0x118] sm:$0xff]  ;;  %v13777_v19 = vld [vmem:[#allocation11_spill] sm:$0xff]  ;;  %v13780_v8 = vld [vmem:[#allocation57_spill] sm:$0xff] }
 0x3ed   : > { %7610 = vmatpush3.bf16.msra.mxu0 %v3705_v10  ;;  %7960 = vmatpush3.bf16.msra.mxu1 %v3705_v10  ;;  %v7126_v16 = vcombine.high %v13778_v48, %v13777_v19  ;;  %v13779_v17 = vld [vmem:[#allocation59_spill] sm:$0xff]  ;;  %v3690_v30 = vld [vmem:[#allocation2 + $0x1a0] sm:$0xff]  ;;  %v3691_v42 = vld [vmem:[#allocation2 + $0x1a8] sm:$0xff]  ;;  %v3719_v2 = vpack.c.bf16 %v3673_v12, %v3672_v58  ;;  %v7125_v60 = vcombine.low %v13778_v48, %v13777_v19 }
 0x3ee   : > { %7611 = vmatprep.subr.bf16.mxu0 %v3714_v1  ;;  %7953 = vmatprep.subr.bf16.mxu1 %v3714_v1  ;;  %v7174_v47 = vcombine.high %v13780_v8, %v13779_v17  ;;  %v8078_v33 = vld [vmem:[%s13044_s6 + $0x8] sm:$0xff]   ;;  %v3674_v51 = vld [vmem:[#allocation2 + $0x120] sm:$0xff]  ;;  %v3692_v52 = vld [vmem:[#allocation2 + $0x1b0] sm:$0xff]  ;;  %v3728_v23 = vpack.c.bf16 %v3691_v42, %v3690_v30  ;;  %v7173_v54 = vcombine.low %v13780_v8, %v13779_v17 }
 0x3ef   : > { %v3675_v41 = vld [vmem:[#allocation2 + $0x128] sm:$0xff]  ;;  %v3693_v49 = vld [vmem:[#allocation2 + $0x1b8] sm:$0xff]  ;;  %v8079_v56 = vld [vmem:[%s13044_s6 + $0x10] sm:$0xff]  }
 0x3f0   : > { %v3676_v45 = vld [vmem:[#allocation2 + $0x130] sm:$0xff]  ;;  %v3677_v18 = vld [vmem:[#allocation2 + $0x138] sm:$0xff]  ;;  %v3720_v57 = vpack.c.bf16 %v3675_v41, %v3674_v51  ;;  %v13782_v9 = vld [vmem:[#allocation13_spill] sm:$0xff]  ;;  %v3729_v35 = vpack.c.bf16 %v3693_v49, %v3692_v52 }
 0x3f1   : > { %7612 = vmatpush3.bf16.msra.mxu0 %v3706_v43  ;;  %7961 = vmatpush3.bf16.msra.mxu1 %v3706_v43  ;;  %v13781_v4 = vld [vmem:[#allocation15_spill] sm:$0xff]  ;;  %v3694_v39 = vld [vmem:[#allocation2 + $0x1c0] sm:$0xff]  ;;  %v3695_v13 = vld [vmem:[#allocation2 + $0x1c8] sm:$0xff]  ;;  %v3721_v43 = vpack.c.bf16 %v3677_v18, %v3676_v45 }
 0x3f2   : > { %7613 = vmatprep.subr.bf16.mxu0 %v3715_v37  ;;  %7954 = vmatprep.subr.bf16.mxu1 %v3715_v37  ;;  %v7130_v61 = vcombine.high %v13782_v9, %v13781_v4  ;;  %v13783_v10 = vld [vmem:[#allocation63_spill] sm:$0xff]  ;;  %v13784_v1 = vld [vmem:[#allocation61_spill] sm:$0xff]  ;;  %v3679_v6 = vld [vmem:[#allocation2 + $0x148] sm:$0xff]  ;;  %v3730_v40 = vpack.c.bf16 %v3695_v13, %v3694_v39  ;;  %v7129_v32 = vcombine.low %v13782_v9, %v13781_v4 }
 0x3f3   : > { %v7178_v31 = vcombine.high %v13784_v1, %v13783_v10  ;;  %v3678_v14 = vld [vmem:[#allocation2 + $0x140] sm:$0xff]  ;;  %v8080_v44 = vld [vmem:[%s13044_s6 + $0x18] sm:$0xff]   ;;  %v3696_v37 = vld [vmem:[#allocation2 + $0x1d0] sm:$0xff]  ;;  %v7177_v7 = vcombine.low %v13784_v1, %v13783_v10 }
 0x3f4   : > { %v3697_v11 = vld [vmem:[#allocation2 + $0x1d8] sm:$0xff]  ;;  %v13785_v50 = vld [vmem:[#allocation19_spill] sm:$0xff]  ;;  %v13788_v27 = vld [vmem:[#allocation65_spill] sm:$0xff] }
 0x3f5   : > { %7614 = vmatpush3.bf16.msra.mxu0 %v3707_v63  ;;  %7962 = vmatpush3.bf16.msra.mxu1 %v3707_v63  ;;  %v3722_v63 = vpack.c.bf16 %v3679_v6, %v3678_v14  ;;  %v3731_v29 = vpack.c.bf16 %v3697_v11, %v3696_v37  ;;  %v3680_v22 = vld [vmem:[#allocation2 + $0x150] sm:$0xff]  ;;  %v3681_v28 = vld [vmem:[#allocation2 + $0x158] sm:$0xff]  ;;  %v3698_v20 = vld [vmem:[#allocation2 + $0x1e0] sm:$0xff] }
 0x3f6   : > { %7615 = vmatprep.subr.bf16.mxu0 %v3716_v15  ;;  %7955 = vmatprep.subr.bf16.mxu1 %v3716_v15  ;;  %v13786_v15 = vld [vmem:[#allocation17_spill] sm:$0xff]  ;;  %v3699_v21 = vld [vmem:[#allocation2 + $0x1e8] sm:$0xff]  ;;  %v3700_v53 = vld [vmem:[#allocation2 + $0x1f0] sm:$0xff] }
 0x3f7   : > { %v7134_v3 = vcombine.high %v13786_v15, %v13785_v50  ;;  %v3732_v26 = vpack.c.bf16 %v3699_v21, %v3698_v20  ;;  %v3682_v34 = vld [vmem:[#allocation2 + $0x160] sm:$0xff]  ;;  %v3683_v62 = vld [vmem:[#allocation2 + $0x168] sm:$0xff]  ;;  %v13789_v58 = vld [vmem:[#allocation23_spill] sm:$0xff] }
 0x3f8   : > { %v13790_v12 = vld [vmem:[#allocation21_spill] sm:$0xff]  ;;  %v3685_v17 = vld [vmem:[#allocation2 + $0x178] sm:$0xff]  ;;  %v8083_v42 = vld [vmem:[%s13044_s6 + $0x30] sm:$0xff]  }
 0x3f9   : > { %7616 = vmatpush3.bf16.msra.mxu0 %v3708_v59  ;;  %7963 = vmatpush3.bf16.msra.mxu1 %v3708_v59  ;;  %v13787_v59 = vld [vmem:[#allocation67_spill] sm:$0xff]  ;;  %v7138_v19 = vcombine.high %v13790_v12, %v13789_v58  ;;  %v13791_v8 = vld [vmem:[#allocation8_spill] sm:$0xff]  ;;  %v7137_v51 = vcombine.low %v13790_v12, %v13789_v58  ;;  %v13794_v52 = vld [vmem:[#allocation25_spill] sm:$0xff] }
 0x3fa   : > { %7617 = vmatprep.subr.bf16.mxu0 %v3717_v38  ;;  %7956 = vmatprep.subr.bf16.mxu1 %v3717_v38  ;;  %v7182_v38 = vcombine.high %v13788_v27, %v13787_v59  ;;  %v13793_v41 = vld [vmem:[#allocation27_spill] sm:$0xff]  ;;  %v13798_v4 = vld [vmem:[#allocation29_spill] sm:$0xff]  ;;  %v13800_v39 = vld [vmem:[#allocation14_spill] sm:$0xff] }
 0x3fb   : > { %v7142_v49 = vcombine.high %v13794_v52, %v13793_v41  ;;  %v7141_v45 = vcombine.low %v13794_v52, %v13793_v41  ;;  %v13801_v1 = vld [vmem:[#allocation35_spill] sm:$0xff]  ;;  %v13803_v6 = vld [vmem:[#allocation20_spill] sm:$0xff]  ;;  %v3739_v52 = vld [vmem:[%s10884_s30 + $0x20] sm:$0xff] }
 0x3fc   : > { %v13819_v12 = vld [vmem:[#allocation36_spill] sm:$0xff] }
 0x3fd   : > { %7618 = vmatpush3.bf16.msra.mxu0 %v3709_v55  ;;  %7964 = vmatpush3.bf16.msra.mxu1 %v3709_v55  ;;  %v8081_v55 = vld [vmem:[%s13044_s6 + $0x20] sm:$0xff]   ;;  %v3738_v41 = vld [vmem:[%s10884_s30 + $0x18] sm:$0xff] }
 0x3fe   : > { %7715 = vmatprep.subr.bf16.mxu1 %v3726_v24  ;;  %7885 = vmatprep.subr.bf16.mxu0 %v8077_v46  ;;  %v3723_v24 = vpack.c.bf16 %v3681_v28, %v3680_v22  ;;  %v13809_v22 = vld [vmem:[#allocation43_spill] sm:$0xff]  ;;  %v13810_v28 = vld [vmem:[#allocation41_spill] sm:$0xff] }
 0x3ff   : > { %v7157_v21 = vcombine.low %v13810_v28, %v13809_v22 }
 0x400   : > { %4136 = vmatmul.mubr.bf16.vlgmr.msra.gmra.mrb[0].mxu0 %v7121_v0  ;;  %4232 = vmatmul.mubr.bf16.vlgmr.msra.gmra.mrb[0].mxu1 %v7169_v25  ;;  %v3701_v0 = vld [vmem:[#allocation2 + $0x1f8] sm:$0xff]  ;;  %v7133_v25 = vcombine.low %v13786_v15, %v13785_v50  ;;  %v13808_v50 = vld [vmem:[#allocation22_spill] sm:$0xff] }
 0x401   : > { %7716 = vmatpush3.bf16.msra.mxu1 %v3718_v36  ;;  %7886 = vmatpush3.bf16.msra.mxu0 %v8077_v46  ;;  %v8082_v46 = vld [vmem:[%s13044_s6 + $0x28] sm:$0xff]   ;;  %v7181_v36 = vcombine.low %v13788_v27, %v13787_v59  ;;  %v3733_v48 = vpack.c.bf16 %v3701_v0, %v3700_v53  ;;  %v7158_v59 = vcombine.high %v13810_v28, %v13809_v22  ;;  %v13811_v27 = vld [vmem:[#allocation28_spill] sm:$0xff]  ;;  %v3745_v28 = vld [vmem:[%s10884_s30 + $0x50] sm:$0xff] }
 0x402   : > { %7717 = vmatprep.subr.bf16.mxu1 %v3727_v5  ;;  %4143 = vmatprep.mubr.bf16.mxu0 %v7126_v16  ;;  %v3724_v5 = vpack.c.bf16 %v3683_v62, %v3682_v34  ;;  %v3684_v16 = vld [vmem:[#allocation2 + $0x170] sm:$0xff]  ;;  %v13815_v34 = vld [vmem:[#allocation32_spill] sm:$0xff]  ;;  %v13816_v62 = vld [vmem:[#allocation30_spill] sm:$0xff] }
 0x403   : > { %4239 = vmatprep.mubr.bf16.mxu1 %v7174_v47  ;;  %7887 = vmatprep.subr.bf16.mxu0 %v8078_v33  ;;  %v13792_v47 = vld [vmem:[#allocation6_spill] sm:$0xff]  ;;  %v7148_v53 = vcombine.high %v13816_v62, %v13815_v34 }
 0x404   : > { %v7124_v30 = vcombine.high %v13792_v47, %v13791_v8  ;;  %v8108_v22 = vld [vmem:[%s13045_s7 + $0x6c] ss:$16 sps:$4 sm:$0xff]  }
 0x405   : > { %7718 = vmatpush3.bf16.msra.mxu1 %v3719_v2  ;;  %7888 = vmatpush3.bf16.msra.mxu0 %v8078_v33  ;;  %v3725_v33 = vpack.c.bf16 %v3685_v17, %v3684_v16  ;;  %v7123_v2 = vcombine.low %v13792_v47, %v13791_v8  ;;  %v3735_v16 = vld [vmem:[%s10884_s30] sm:$0xff]  ;;  %v3736_v17 = vld [vmem:[%s10884_s30 + $0x8] sm:$0xff] }
 0x406   : > { %7719 = vmatprep.subr.bf16.mxu1 %v3728_v23  ;;  %7889 = vmatprep.subr.bf16.mxu0 %v8079_v56  ;;  %v13795_v23 = vld [vmem:[#allocation12_spill] sm:$0xff] }
 0x408   : > { %4144 = vmatmul.mubr.bf16.gmra.mrb[4].mxu0 %v7125_v60  ;;  %4240 = vmatmul.mubr.bf16.gmra.mrb[4].mxu1 %v7173_v54  ;;  %v8084_v54 = vld [vmem:[%s13044_s6 + $0x38] sm:$0xff]  }
 0x409   : > { %7720 = vmatpush3.bf16.msra.mxu1 %v3720_v57  ;;  %4151 = vmatprep.mubr.bf16.mxu0 %v7130_v61  ;;  %v13797_v57 = vld [vmem:[#allocation31_spill] sm:$0xff]  ;;  %v13799_v61 = vld [vmem:[#allocation16_spill] sm:$0xff] }
 0x40a   : > { %7721 = vmatprep.subr.bf16.mxu1 %v3729_v35  ;;  %4247 = vmatprep.mubr.bf16.mxu1 %v7178_v31  ;;  %v7146_v9 = vcombine.high %v13798_v4, %v13797_v57  ;;  %v7132_v13 = vcombine.high %v13800_v39, %v13799_v61  ;;  %v7145_v35 = vcombine.low %v13798_v4, %v13797_v57  ;;  %v13802_v31 = vld [vmem:[#allocation33_spill] sm:$0xff]  ;;  %v13824_v57 = vld [vmem:[#allocation42_spill] sm:$0xff] }
 0x40b   : > { %7890 = vmatpush3.bf16.msra.mxu0 %v8079_v56  ;;  %v13796_v56 = vld [vmem:[#allocation10_spill] sm:$0xff]  ;;  %v7131_v10 = vcombine.low %v13800_v39, %v13799_v61  ;;  %v7150_v14 = vcombine.high %v13802_v31, %v13801_v1  ;;  %v7149_v37 = vcombine.low %v13802_v31, %v13801_v1  ;;  %v8091_v39 = vld [vmem:[%s13045_s7 + $0x20] ss:$16 sps:$4 sm:$0xff]   ;;  %v3742_v1 = vld [vmem:[%s10884_s30 + $0x38] sm:$0xff] }
 0x40c   : > { %7891 = vmatprep.subr.bf16.mxu0 %v8080_v44  ;;  %v7128_v60 = vcombine.high %v13796_v56, %v13795_v23  ;;  %v7127_v18 = vcombine.low %v13796_v56, %v13795_v23  ;;  %v8087_v23 = vld [vmem:[%s13045_s7 + $0x4] ss:$16 sps:$4 sm:$0xff]   ;;  %v8090_v56 = vld [vmem:[%s13045_s7 + $0xc] ss:$16 sps:$4 sm:$0xff]   ;;  %v8088_v61 = vld [vmem:[%s13045_s7 + $0x8] ss:$16 sps:$4 sm:$0xff]  }
 0x40d   : > { %7722 = vmatpush3.bf16.msra.mxu1 %v3721_v43  ;;  %v3743_v31 = vld [vmem:[%s10884_s30 + $0x40] sm:$0xff] }
 0x40e   : > { %7723 = vmatprep.subr.bf16.mxu1 %v3730_v40  ;;  %v13805_v40 = vld [vmem:[#allocation39_spill] sm:$0xff] }
 0x40f   : > { %7892 = vmatpush3.bf16.msra.mxu0 %v8080_v44  ;;  %v13804_v44 = vld [vmem:[#allocation18_spill] sm:$0xff] }
 0x410   : > { %4152 = vmatmul.mubr.bf16.gmra.mrb[8].mxu0 %v7129_v32  ;;  %4248 = vmatmul.mubr.bf16.gmra.mrb[8].mxu1 %v7177_v7  ;;  %v7136_v43 = vcombine.high %v13804_v44, %v13803_v6  ;;  %v7135_v11 = vcombine.low %v13804_v44, %v13803_v6  ;;  %v13806_v32 = vld [vmem:[#allocation37_spill] sm:$0xff]  ;;  %v8094_v6 = vld [vmem:[%s13045_s7 + $0x28] ss:$16 sps:$4 sm:$0xff]  }
 0x411   : > { %7724 = vmatpush3.bf16.msra.mxu1 %v3722_v63  ;;  %4159 = vmatprep.mubr.bf16.mxu0 %v7134_v3  ;;  %v7154_v7 = vcombine.high %v13806_v32, %v13805_v40  ;;  %v13807_v63 = vld [vmem:[#allocation24_spill] sm:$0xff]  ;;  %v7153_v3 = vcombine.low %v13806_v32, %v13805_v40  ;;  %v8099_v44 = vld [vmem:[%s13045_s7 + $0x44] ss:$16 sps:$4 sm:$0xff]   ;;  %v8097_v40 = vld [vmem:[%s13045_s7 + $0x40] ss:$16 sps:$4 sm:$0xff]  }
 0x412   : > { %7725 = vmatprep.subr.bf16.mxu1 %v3731_v29  ;;  %4255 = vmatprep.mubr.bf16.mxu1 %v7182_v38  ;;  %v7140_v15 = vcombine.high %v13808_v50, %v13807_v63  ;;  %v7139_v29 = vcombine.low %v13808_v50, %v13807_v63  ;;  %v13812_v38 = vld [vmem:[#allocation26_spill] sm:$0xff]  ;;  %v13825_v32 = vld [vmem:[#allocation48_spill] sm:$0xff] }
 0x413   : > { %7893 = vmatprep.subr.bf16.mxu0 %v8081_v55  ;;  %v7144_v20 = vcombine.high %v13812_v38, %v13811_v27 }
 0x414   : > { %7894 = vmatpush3.bf16.msra.mxu0 %v8081_v55  ;;  %v7143_v55 = vcombine.low %v13812_v38, %v13811_v27  ;;  %v3747_v27 = vld [vmem:[%s10884_s30 + $0x60] sm:$0xff]  ;;  %v3748_v38 = vld [vmem:[%s10884_s30 + $0x68] sm:$0xff] }
 0x415   : > { %7726 = vmatpush3.bf16.msra.mxu1 %v3723_v24  ;;  %7895 = vmatprep.subr.bf16.mxu0 %v8082_v46  ;;  %v13813_v24 = vld [vmem:[#allocation47_spill] sm:$0xff] }
 0x416   : > { %7727 = vmatprep.subr.bf16.mxu1 %v3732_v26 }
 0x418   : > { %4160 = vmatmul.mubr.bf16.gmra.mrb[12].mxu0 %v7133_v25  ;;  %4256 = vmatmul.mubr.bf16.gmra.mrb[12].mxu1 %v7181_v36  ;;  %v7147_v25 = vcombine.low %v13816_v62, %v13815_v34  ;;  %v13817_v36 = vld [vmem:[#allocation51_spill] sm:$0xff]  ;;  %v13827_v34 = vld [vmem:[#allocation52_spill] sm:$0xff]  ;;  %v13828_v62 = vld [vmem:[#allocation50_spill] sm:$0xff] }
 0x419   : > { %7728 = vmatpush3.bf16.msra.mxu1 %v3724_v5  ;;  %4167 = vmatprep.mubr.bf16.mxu0 %v7138_v19  ;;  %v13818_v5 = vld [vmem:[#allocation49_spill] sm:$0xff]  ;;  %v13820_v19 = vld [vmem:[#allocation34_spill] sm:$0xff] }
 0x41a   : > { %7729 = vmatprep.subr.bf16.mxu1 %v3733_v48  ;;  %4296 = vmatprep.mubr.bf16.mxu1 %v7124_v30  ;;  %v7166_v58 = vcombine.high %v13818_v5, %v13817_v36  ;;  %v7152_v48 = vcombine.high %v13820_v19, %v13819_v12  ;;  %v7165_v8 = vcombine.low %v13818_v5, %v13817_v36  ;;  %v13821_v30 = vld [vmem:[#allocation40_spill] sm:$0xff]  ;;  %v8115_v36 = vld [vmem:[%s13045_s7 + $0xa0] ss:$16 sps:$4 sm:$0xff]   ;;  %v8117_v5 = vld [vmem:[%s13045_s7 + $0xa4] ss:$16 sps:$4 sm:$0xff]  }
 0x41b   : > { %7896 = vmatpush3.bf16.msra.mxu0 %v8082_v46  ;;  %v13814_v46 = vld [vmem:[#allocation45_spill] sm:$0xff]  ;;  %v7151_v47 = vcombine.low %v13820_v19, %v13819_v12  ;;  %v3749_v12 = vld [vmem:[%s10884_s30 + $0x70] sm:$0xff]  ;;  %v3750_v19 = vld [vmem:[%s10884_s30 + $0x78] sm:$0xff] }
 0x41c   : > { %7897 = vmatprep.subr.bf16.mxu0 %v8083_v42  ;;  %v7162_v26 = vcombine.high %v13814_v46, %v13813_v24  ;;  %v7161_v0 = vcombine.low %v13814_v46, %v13813_v24 }
 0x41d   : > { %7730 = vmatpush3.bf16.msra.mxu1 %v3725_v33 }
 0x41e   : > { %5501 = vmatprep.subr.bf16.mxu1 %v8087_v23  ;;  %v8129_v23 = vld [vmem:[%s13045_s7 + $0xe4] ss:$16 sps:$4 sm:$0xff]  }
 0x41f   : > { %7898 = vmatpush3.bf16.msra.mxu0 %v8083_v42  ;;  %v13822_v42 = vld [vmem:[#allocation38_spill] sm:$0xff] }
 0x420   : > { %4168 = vmatmul.mubr.bf16.gmra.mrb[16].mxu0 %v7137_v51  ;;  %4297 = vmatmul.mubr.bf16.vlgmr.msra.gmra.mrb[16].mxu1 %v7123_v2  ;;  %v7156_v33 = vcombine.high %v13822_v42, %v13821_v30  ;;  %v3767_v51 = vpack.c.bf16 %v3736_v17, %v3735_v16  ;;  %v3737_v2 = vld [vmem:[%s10884_s30 + $0x10] sm:$0xff]  ;;  %v3752_v16 = vld [vmem:[%s10884_s30 + $0x88] sm:$0xff] }
 0x421   : > { %4175 = vmatprep.mubr.bf16.mxu0 %v7142_v49  ;;  %4304 = vmatprep.mubr.bf16.mxu1 %v7128_v60  ;;  %v3740_v49 = vld [vmem:[%s10884_s30 + $0x28] sm:$0xff]  ;;  %v7155_v60 = vcombine.low %v13822_v42, %v13821_v30  ;;  %v7167_v30 = vcombine.low %v13828_v62, %v13827_v34  ;;  %v3774_v42 = vpack.c.bf16 %v3750_v19, %v3749_v12 }
 0x422   : > { %7899 = vmatprep.subr.bf16.mxu0 %v8084_v54  ;;  %v8118_v17 = vld [vmem:[%s13045_s7 + $0xa8] ss:$16 sps:$4 sm:$0xff]  }
 0x423   : > { %7900 = vmatpush3.bf16.msra.mxu0 %v8084_v54  ;;  %v3768_v54 = vpack.c.bf16 %v3738_v41, %v3737_v2  ;;  %v13829_v2 = vld [vmem:[#allocation56_spill] sm:$0xff]  ;;  %v13830_v41 = vld [vmem:[#allocation54_spill] sm:$0xff] }
 0x424   : > { %5694 = vmatprep.subr.bf16.mxu0 %v8090_v56  ;;  %v8132_v56 = vld [vmem:[%s13045_s7 + $0xec] ss:$16 sps:$4 sm:$0xff]  }
 0x428   : > { %4176 = vmatmul.mubr.bf16.gmra.mrb[20].mxu0 %v7141_v45  ;;  %4305 = vmatmul.mubr.bf16.gmra.mrb[20].mxu1 %v7127_v18  ;;  %v8085_v45 = vld [vmem:[%s13045_s7] ss:$16 sps:$4 sm:$0xff]   ;;  %v13823_v18 = vld [vmem:[#allocation44_spill] sm:$0xff] }
 0x429   : > { %4183 = vmatprep.mubr.bf16.mxu0 %v7146_v9  ;;  %4312 = vmatprep.mubr.bf16.mxu1 %v7132_v13  ;;  %v7160_v4 = vcombine.high %v13824_v57, %v13823_v18  ;;  %v3769_v9 = vpack.c.bf16 %v3740_v49, %v3739_v52  ;;  %v8093_v13 = vld [vmem:[%s13045_s7 + $0x24] ss:$16 sps:$4 sm:$0xff]   ;;  %v7172_v52 = vcombine.high %v13830_v41, %v13829_v2  ;;  %v8124_v49 = vld [vmem:[%s13045_s7 + $0xc8] ss:$16 sps:$4 sm:$0xff]  }
 0x42a   : > { %5502 = vmatpush1.bf16.msra.mxu1 %v8085_v45  ;;  %v3754_v45 = vld [vmem:[%s10884_s30 + $0x98] sm:$0xff] }
 0x42b   : > { %5503 = vmatprep.subr.bf16.mxu1 %v8093_v13  ;;  %v13831_v13 = vld [vmem:[#allocation60_spill] sm:$0xff] }
 0x42e   : > { %5504 = vmatpush1.bf16.msra.mxu1 %v8091_v39 }
 0x42f   : > { %5505 = vmatprep.subr.bf16.mxu1 %v8099_v44 }
 0x430   : > { %4184 = vmatmul.mubr.bf16.gmra.mrb[24].mxu0 %v7145_v35  ;;  %4313 = vmatmul.mubr.bf16.gmra.mrb[24].mxu1 %v7131_v10  ;;  %v8096_v35 = vld [vmem:[%s13045_s7 + $0x2c] ss:$16 sps:$4 sm:$0xff]   ;;  %v3741_v10 = vld [vmem:[%s10884_s30 + $0x30] sm:$0xff] }
 0x431   : > { %4191 = vmatprep.mubr.bf16.mxu0 %v7150_v14  ;;  %4320 = vmatprep.mubr.bf16.mxu1 %v7136_v43  ;;  %v3744_v14 = vld [vmem:[%s10884_s30 + $0x48] sm:$0xff] }
 0x432   : > { %v8102_v43 = vld [vmem:[%s13045_s7 + $0x4c] ss:$16 sps:$4 sm:$0xff]   ;;  %v3771_v50 = vpack.c.bf16 %v3744_v14, %v3743_v31  ;;  %5506 = vmatpush1.bf16.msra.mxu1 %v8097_v40  ;;  %v3759_v14 = vld [vmem:[%s10884_s30 + $0xc0] sm:$0xff] }
 0x433   : > { %v3758_v31 = vld [vmem:[%s10884_s30 + $0xb8] sm:$0xff]  ;;  %v13834_v40 = vld [vmem:[#allocation62_spill] sm:$0xff] }
 0x438   : > { %4192 = vmatmul.mubr.bf16.gmra.mrb[28].mxu0 %v7149_v37  ;;  %4321 = vmatmul.mubr.bf16.gmra.mrb[28].mxu1 %v7135_v11  ;;  %v7159_v37 = vcombine.low %v13824_v57, %v13823_v18  ;;  %v3770_v11 = vpack.c.bf16 %v3742_v1, %v3741_v10  ;;  %v3755_v18 = vld [vmem:[%s10884_s30 + $0xa0] sm:$0xff]  ;;  %v3756_v57 = vld [vmem:[%s10884_s30 + $0xa8] sm:$0xff]  ;;  %v3757_v1 = vld [vmem:[%s10884_s30 + $0xb0] sm:$0xff] }
 0x439   : > { %4199 = vmatprep.mubr.bf16.mxu0 %v7154_v7  ;;  %4328 = vmatprep.mubr.bf16.mxu1 %v7140_v15  ;;  %v13826_v7 = vld [vmem:[#allocation46_spill] sm:$0xff]  ;;  %v3777_v39 = vpack.c.bf16 %v3756_v57, %v3755_v18  ;;  %v3778_v44 = vpack.c.bf16 %v3758_v31, %v3757_v1 }
 0x43a   : > { %v7164_v63 = vcombine.high %v13826_v7, %v13825_v32  ;;  %v8100_v15 = vld [vmem:[%s13045_s7 + $0x48] ss:$16 sps:$4 sm:$0xff]   ;;  %v7163_v24 = vcombine.low %v13826_v7, %v13825_v32  ;;  %v3761_v7 = vld [vmem:[%s10884_s30 + $0xd0] sm:$0xff] }
 0x440   : > { %4200 = vmatmul.mubr.bf16.gmra.mrb[32].mxu0 %v7153_v3  ;;  %4329 = vmatmul.mubr.bf16.gmra.mrb[32].mxu1 %v7139_v29  ;;  %v8103_v3 = vld [vmem:[%s13045_s7 + $0x60] ss:$16 sps:$4 sm:$0xff]   ;;  %v8105_v29 = vld [vmem:[%s13045_s7 + $0x64] ss:$16 sps:$4 sm:$0xff]  }
 0x441   : > { %4207 = vmatprep.mubr.bf16.mxu0 %v7158_v59  ;;  %4336 = vmatprep.mubr.bf16.mxu1 %v7144_v20  ;;  %v3746_v59 = vld [vmem:[%s10884_s30 + $0x58] sm:$0xff] }
 0x442   : > { %5507 = vmatprep.subr.bf16.mxu1 %v8105_v29  ;;  %v8106_v20 = vld [vmem:[%s13045_s7 + $0x68] ss:$16 sps:$4 sm:$0xff]   ;;  %v3772_v46 = vpack.c.bf16 %v3746_v59, %v3745_v28 }
 0x443   : > { %5508 = vmatpush1.bf16.msra.mxu1 %v8103_v3  ;;  %v13835_v28 = vld [vmem:[#allocation68_spill] sm:$0xff]  ;;  %v13836_v59 = vld [vmem:[#allocation66_spill] sm:$0xff] }
 0x448   : > { %4208 = vmatmul.mubr.bf16.gmra.mrb[36].mxu0 %v7157_v21  ;;  %4337 = vmatmul.mubr.bf16.gmra.mrb[36].mxu1 %v7143_v55  ;;  %v8111_v21 = vld [vmem:[%s13045_s7 + $0x84] ss:$16 sps:$4 sm:$0xff]   ;;  %v8114_v55 = vld [vmem:[%s13045_s7 + $0x8c] ss:$16 sps:$4 sm:$0xff]  }
 0x449   : > { %4215 = vmatprep.mubr.bf16.mxu0 %v7162_v26  ;;  %4344 = vmatprep.mubr.bf16.mxu1 %v7148_v53  ;;  %v8109_v26 = vld [vmem:[%s13045_s7 + $0x80] ss:$16 sps:$4 sm:$0xff]   ;;  %v7168_v53 = vcombine.high %v13828_v62, %v13827_v34 }
 0x44a   : > { %5509 = vmatprep.subr.bf16.mxu1 %v8111_v21 }
 0x44b   : > { %5510 = vmatpush1.bf16.msra.mxu1 %v8109_v26 }
 0x44c   : > { %5511 = vmatprep.subr.bf16.mxu1 %v8117_v5 }
 0x44f   : > { %5512 = vmatpush1.bf16.msra.mxu1 %v8115_v36 }
 0x450   : > { %4216 = vmatmul.mubr.bf16.gmra.mrb[40].mxu0 %v7161_v0  ;;  %4345 = vmatmul.mubr.bf16.gmra.mrb[40].mxu1 %v7147_v25  ;;  %v3773_v0 = vpack.c.bf16 %v3748_v38, %v3747_v27  ;;  %v8112_v25 = vld [vmem:[%s13045_s7 + $0x88] ss:$16 sps:$4 sm:$0xff]   ;;  %v7184_v27 = vcombine.high %v13836_v59, %v13835_v28  ;;  %v3765_v38 = vld [vmem:[%s10884_s30 + $0xf0] sm:$0xff] }
 0x451   : > { %4223 = vmatprep.mubr.bf16.mxu0 %v7166_v58  ;;  %4352 = vmatprep.mubr.bf16.mxu1 %v7152_v48  ;;  %v8120_v58 = vld [vmem:[%s13045_s7 + $0xac] ss:$16 sps:$4 sm:$0xff]   ;;  %v3751_v48 = vld [vmem:[%s10884_s30 + $0x80] sm:$0xff] }
 0x458   : > { %4224 = vmatmul.mubr.bf16.gmra.mrb[44].mxu0 %v7165_v8  ;;  %4353 = vmatmul.mubr.bf16.gmra.mrb[44].mxu1 %v7151_v47  ;;  %v8123_v8 = vld [vmem:[%s13045_s7 + $0xc4] ss:$16 sps:$4 sm:$0xff]   ;;  %v8126_v47 = vld [vmem:[%s13045_s7 + $0xcc] ss:$16 sps:$4 sm:$0xff]  }
 0x459   : > { %4360 = vmatprep.mubr.bf16.mxu1 %v7156_v33  ;;  %7901 = vmatprep.mubr.bf16.mxu0 %v3767_v51  ;;  %v8121_v33 = vld [vmem:[%s13045_s7 + $0xc0] ss:$16 sps:$4 sm:$0xff]   ;;  %v3775_v51 = vpack.c.bf16 %v3752_v16, %v3751_v48 }
 0x45a   : > { %5513 = vmatprep.subr.bf16.mxu1 %v8123_v8 }
 0x45b   : > { %5514 = vmatpush1.bf16.msra.mxu1 %v8121_v33 }
 0x45c   : > { %5515 = vmatprep.subr.bf16.mxu1 %v8129_v23 }
 0x460   : > { %4361 = vmatmul.mubr.bf16.gmra.mrb[48].mxu1 %v7155_v60  ;;  %7902 = vmatmul.mubr.bf16.vlgmr.msra.gmra.mrb[48].mxu0 %v3768_v54  ;;  %v8127_v60 = vld [vmem:[%s13045_s7 + $0xe0] ss:$16 sps:$4 sm:$0xff]  }
 0x461   : > { %4368 = vmatprep.mubr.bf16.mxu1 %v7160_v4  ;;  %7905 = vmatprep.mubr.bf16.mxu0 %v3769_v9  ;;  %v3753_v54 = vld [vmem:[%s10884_s30 + $0x90] sm:$0xff]  ;;  %v8130_v4 = vld [vmem:[%s13045_s7 + $0xe8] ss:$16 sps:$4 sm:$0xff]  }
 0x462   : > { %5695 = vmatpush1.bf16.msra.mxu0 %v8088_v61  ;;  %5516 = vmatpush1.bf16.msra.mxu1 %v8127_v60  ;;  %v3776_v9 = vpack.c.bf16 %v3754_v45, %v3753_v54  ;;  %v7171_v61 = vcombine.low %v13830_v41, %v13829_v2 }
 0x463   : > { %5696 = vmatprep.subr.bf16.mxu0 %v8096_v35  ;;  %v13832_v35 = vld [vmem:[#allocation58_spill] sm:$0xff] }
 0x464   : > { %v7176_v10 = vcombine.high %v13832_v35, %v13831_v13 }
 0x466   : > { %5697 = vmatpush1.bf16.msra.mxu0 %v8094_v6  ;;  %v3760_v6 = vld [vmem:[%s10884_s30 + $0xc8] sm:$0xff] }
 0x467   : > { %5698 = vmatprep.subr.bf16.mxu0 %v8102_v43  ;;  %v7175_v43 = vcombine.low %v13832_v35, %v13831_v13 }
 0x468   : > { %4369 = vmatmul.mubr.bf16.gmra.mrb[52].mxu1 %v7159_v37  ;;  %7906 = vmatmul.mubr.bf16.gmra.mrb[52].mxu0 %v3770_v11  ;;  %v3779_v37 = vpack.c.bf16 %v3760_v6, %v3759_v14  ;;  %v13833_v11 = vld [vmem:[#allocation64_spill] sm:$0xff] }
 0x469   : > { %4376 = vmatprep.mubr.bf16.mxu1 %v7164_v63  ;;  %7909 = vmatprep.mubr.bf16.mxu0 %v3771_v50  ;;  %v7180_v32 = vcombine.high %v13834_v40, %v13833_v11  ;;  %v3762_v63 = vld [vmem:[%s10884_s30 + $0xd8] sm:$0xff]  ;;  %v3763_v50 = vld [vmem:[%s10884_s30 + $0xe0] sm:$0xff]  ;;  %v7179_v29 = vcombine.low %v13834_v40, %v13833_v11 }
 0x46a   : > { %5699 = vmatpush1.bf16.msra.mxu0 %v8100_v15  ;;  %v3764_v15 = vld [vmem:[%s10884_s30 + $0xe8] sm:$0xff]  ;;  %v3780_v3 = vpack.c.bf16 %v3762_v63, %v3761_v7 }
 0x46b   : > { %5700 = vmatprep.subr.bf16.mxu0 %v8108_v22  ;;  %v3781_v22 = vpack.c.bf16 %v3764_v15, %v3763_v50 }
 0x46e   : > { %5701 = vmatpush1.bf16.msra.mxu0 %v8106_v20  ;;  %v3766_v20 = vld [vmem:[%s10884_s30 + $0xf8] sm:$0xff] }
 0x46f   : > { %5702 = vmatprep.subr.bf16.mxu0 %v8114_v55  ;;  %v3782_v21 = vpack.c.bf16 %v3766_v20, %v3765_v38  ;;  %v7183_v55 = vcombine.low %v13836_v59, %v13835_v28 }
 0x470   : > { %4377 = vmatmul.mubr.bf16.gmra.mrb[56].mxu1 %v7163_v24  ;;  %7910 = vmatmul.mubr.bf16.gmra.mrb[56].mxu0 %v3772_v46  ;;  %v8209_v24 = vmov 0  }
 0x471   : > { %4384 = vmatprep.mubr.bf16.mxu1 %v7168_v53  ;;  %7913 = vmatprep.mubr.bf16.mxu0 %v3773_v0 }
 0x472   : > { %5703 = vmatpush1.bf16.msra.mxu0 %v8112_v25 }
 0x473   : > { %5704 = vmatprep.subr.bf16.mxu0 %v8120_v58 }
 0x476   : > { %5705 = vmatpush1.bf16.msra.mxu0 %v8118_v17 }
 0x477   : > { %5706 = vmatprep.subr.bf16.mxu0 %v8126_v47 }
 0x478   : > { %4385 = vmatmul.mubr.bf16.gmra.mrb[60].mxu1 %v7167_v30  ;;  %7914 = vmatmul.mubr.bf16.gmra.mrb[60].mxu0 %v3774_v42 }
 0x479   : > { %7917 = vmatprep.mubr.bf16.mxu0 %v3775_v51  ;;  %4392 = vmatprep.mubr.bf16.mxu1 %v7172_v52 }
 0x47a   : > { %5707 = vmatpush1.bf16.msra.mxu0 %v8124_v49 }
 0x47b   : > { %5708 = vmatprep.subr.bf16.mxu0 %v8132_v56 }
 0x47e   : > { %5709 = vmatpush1.bf16.msra.mxu0 %v8130_v4 }
 0x480   : > { %7918 = vmatmul.mubr.bf16.gmra.mrb[64].mxu0 %v3776_v9  ;;  %4393 = vmatmul.mubr.bf16.gmra.mrb[64].mxu1 %v7171_v61 }
 0x481   : > { %7921 = vmatprep.mubr.bf16.mxu0 %v3777_v39  ;;  %4400 = vmatprep.mubr.bf16.mxu1 %v7176_v10 }
 0x488   : > { %7922 = vmatmul.mubr.bf16.gmra.mrb[68].mxu0 %v3778_v44  ;;  %4401 = vmatmul.mubr.bf16.gmra.mrb[68].mxu1 %v7175_v43 }
 0x489   : > { %7925 = vmatprep.mubr.bf16.mxu0 %v3779_v37  ;;  %4408 = vmatprep.mubr.bf16.mxu1 %v7180_v32 }
 0x490   : > { %7926 = vmatmul.mubr.bf16.gmra.mrb[72].mxu0 %v3780_v3  ;;  %4409 = vmatmul.mubr.bf16.gmra.mrb[72].mxu1 %v7179_v29 }
 0x491   : > { %7929 = vmatprep.mubr.bf16.mxu0 %v3781_v22  ;;  %4416 = vmatprep.mubr.bf16.mxu1 %v7184_v27 }
 0x498   : > { %7930 = vmatmul.mubr.bf16.gmra.mrb[76].mxu0 %v3782_v21  ;;  %4417 = vmatmul.mubr.bf16.gmra.mrb[76].mxu1 %v7183_v55 }
 0x499   : > { %5533 = vmatprep.mubr.bf16.mxu1 %v8209_v24  ;;  %5726 = vmatprep.mubr.bf16.mxu0 %v8209_v24 }
 0x4d3   : > { %v7619_v46 = vpop.f32.mrb[0].mxu0  ;;  %v7691_v26 = vpop.f32.mrb[0].mxu1 }
 0x4d4   : > { %v7620_v34 = vpop.f32.mrb[1].mxu0  ;;  %v7692_v62 = vpop.f32.mrb[1].mxu1 }
 0x4d5   : > { %v7621_v53 = vadd.f32 %v7620_v34, %v7619_v46  ;;  %v7622_v0 = vpop.f32.mrb[2].mxu0  ;;  %v11052_v25 = vadd.f32 %v7692_v62, %v7691_v26  ;;  %v7694_v36 = vpop.f32.mrb[2].mxu1 }
 0x4d6   : > { %v7623_v5 = vpop.f32.mrb[3].mxu0  ;;  %v7695_v58 = vpop.f32.mrb[3].mxu1 }
 0x4d7   : > { %v7624_v12 = vadd.f32 %v7623_v5, %v7622_v0  ;;  %v11054_v19 = vadd.f32 %v7695_v58, %v7694_v36 }
 0x4db   : > { %v7625_v48 = vpop.f32.mrb[4].mxu0  ;;  %v7697_v16 = vpop.f32.mrb[4].mxu1 }
 0x4dc   : > { %v7626_v17 = vpop.f32.mrb[5].mxu0  ;;  %v7698_v8 = vpop.f32.mrb[5].mxu1 }
 0x4dd   : > { %v7627_v47 = vadd.f32 %v7626_v17, %v7625_v48  ;;  %v7628_v30 = vpop.f32.mrb[6].mxu0  ;;  %v11056_v42 = vadd.f32 %v7698_v8, %v7697_v16  ;;  %v7700_v33 = vpop.f32.mrb[6].mxu1 }
 0x4de   : > { %v7629_v51 = vpop.f32.mrb[7].mxu0  ;;  %v7701_v2 = vpop.f32.mrb[7].mxu1 }
 0x4df   : > { %v7630_v41 = vadd.f32 %v7629_v51, %v7628_v30  ;;  %v11058_v52 = vadd.f32 %v7701_v2, %v7700_v33 }
 0x4e3   : > { %v7631_v49 = vpop.f32.mrb[8].mxu0  ;;  %v7703_v23 = vpop.f32.mrb[8].mxu1 }
 0x4e4   : > { %v7632_v56 = vpop.f32.mrb[9].mxu0  ;;  %v7704_v60 = vpop.f32.mrb[9].mxu1 }
 0x4e5   : > { %v11060_v54 = vadd.f32 %v7632_v56, %v7631_v49  ;;  %v7634_v45 = vpop.f32.mrb[10].mxu0  ;;  %v11062_v18 = vadd.f32 %v7704_v60, %v7703_v23  ;;  %v7706_v57 = vpop.f32.mrb[10].mxu1 }
 0x4e6   : > { %v7635_v4 = vpop.f32.mrb[11].mxu0  ;;  %v7707_v9 = vpop.f32.mrb[11].mxu1 }
 0x4e7   : > { %v11064_v61 = vadd.f32 %v7635_v4, %v7634_v45  ;;  %v11066_v39 = vadd.f32 %v7707_v9, %v7706_v57 }
 0x4eb   : > { %v7637_v13 = vpop.f32.mrb[12].mxu0  ;;  %v7709_v35 = vpop.f32.mrb[12].mxu1 }
 0x4ec   : > { %v7638_v10 = vpop.f32.mrb[13].mxu0  ;;  %v7710_v1 = vpop.f32.mrb[13].mxu1 }
 0x4ed   : > { %v11068_v31 = vadd.f32 %v7638_v10, %v7637_v13  ;;  %v7640_v14 = vpop.f32.mrb[14].mxu0  ;;  %v11070_v6 = vadd.f32 %v7710_v1, %v7709_v35  ;;  %v7712_v44 = vpop.f32.mrb[14].mxu1 }
 0x4ee   : > { %v7641_v43 = vpop.f32.mrb[15].mxu0  ;;  %v7713_v37 = vpop.f32.mrb[15].mxu1 }
 0x4ef   : > { %v11072_v11 = vadd.f32 %v7641_v43, %v7640_v14  ;;  %v11074_v40 = vadd.f32 %v7713_v37, %v7712_v44 }
 0x4f3   : > { %v7643_v32 = vpop.f32.mrb[16].mxu0  ;;  %v7731_v7 = vpop.f32.mrb[16].mxu1 }
 0x4f4   : > { %v7644_v63 = vpop.f32.mrb[17].mxu0  ;;  %v7732_v50 = vpop.f32.mrb[17].mxu1 }
 0x4f5   : > { %v11076_v15 = vadd.f32 %v7644_v63, %v7643_v32  ;;  %v7733_v3 = vadd.f32 %v7732_v50, %v7731_v7  ;;  %v7646_v29 = vpop.f32.mrb[18].mxu0  ;;  %v7734_v22 = vpop.f32.mrb[18].mxu1 }
 0x4f6   : > { %v7647_v28 = vpop.f32.mrb[19].mxu0  ;;  %v7735_v59 = vpop.f32.mrb[19].mxu1 }
 0x4f7   : > { %v4299_v27 = vadd.f32 %v7733_v3, %v7621_v53  ;;  %v11078_v38 = vadd.f32 %v7647_v28, %v7646_v29  ;;  %v7736_v20 = vadd.f32 %v7735_v59, %v7734_v22 }
 0x4f9   : > { %v4302_v21 = vadd.f32 %v7736_v20, %v7624_v12 }
 0x4fb   : > { %v5293_v55 = vpack.c.bf16 %v4302_v21, %v4299_v27  ;;  %v7649_v46 = vpop.f32.mrb[20].mxu0  ;;  %v7737_v26 = vpop.f32.mrb[20].mxu1 }
 0x4fc   : > { %v7650_v34 = vpop.f32.mrb[21].mxu0  ;;  %v7738_v62 = vpop.f32.mrb[21].mxu1 }
 0x4fd   : > { %v11080_v0 = vadd.f32 %v7650_v34, %v7649_v46  ;;  %v7739_v36 = vadd.f32 %v7738_v62, %v7737_v26  ;;  %v7652_v5 = vpop.f32.mrb[22].mxu0  ;;  %v7740_v58 = vpop.f32.mrb[22].mxu1  ;;  %5534 = vmatmul.mubr.bf16.vlgmr.msra.gmra.mrb[80].mxu1 %v5293_v55  ;;  %5727 = vmatmul.mubr.bf16.vlgmr.msra.gmra.mrb[80].mxu0 %v5293_v55 }
 0x4fe   : > { %v7653_v48 = vpop.f32.mrb[23].mxu0  ;;  %v7741_v16 = vpop.f32.mrb[23].mxu1  ;;  %5543 = vmatprep.mubr.bf16.mxu1 %v8209_v24  ;;  %5736 = vmatprep.mubr.bf16.mxu0 %v8209_v24 }
 0x4ff   : > { %v4307_v53 = vadd.f32 %v7739_v36, %v7627_v47  ;;  %v11084_v12 = vadd.f32 %v7653_v48, %v7652_v5  ;;  %v7742_v17 = vadd.f32 %v7741_v16, %v7740_v58 }
 0x501   : > { %v4310_v8 = vadd.f32 %v7742_v17, %v7630_v41 }
 0x503   : > { %v7655_v30 = vpop.f32.mrb[24].mxu0  ;;  %v7743_v33 = vpop.f32.mrb[24].mxu1  ;;  %v5294_v51 = vpack.c.bf16 %v4310_v8, %v4307_v53 }
 0x504   : > { %v7656_v2 = vpop.f32.mrb[25].mxu0  ;;  %v7744_v49 = vpop.f32.mrb[25].mxu1 }
 0x505   : > { %v11086_v23 = vadd.f32 %v7656_v2, %v7655_v30  ;;  %v7745_v56 = vadd.f32 %v7744_v49, %v7743_v33  ;;  %v7658_v60 = vpop.f32.mrb[26].mxu0  ;;  %v7746_v45 = vpop.f32.mrb[26].mxu1  ;;  %5544 = vmatmul.mubr.bf16.gmra.mrb[84].mxu1 %v5294_v51  ;;  %5737 = vmatmul.mubr.bf16.gmra.mrb[84].mxu0 %v5294_v51 }
 0x506   : > { %v7659_v57 = vpop.f32.mrb[27].mxu0  ;;  %v7747_v4 = vpop.f32.mrb[27].mxu1  ;;  %5553 = vmatprep.mubr.bf16.mxu1 %v8209_v24  ;;  %5746 = vmatprep.mubr.bf16.mxu0 %v8209_v24 }
 0x507   : > { %v4315_v47 = vadd.f32 %v7745_v56, %v11060_v54  ;;  %v11091_v41 = vadd.f32 %v7659_v57, %v7658_v60  ;;  %v7748_v9 = vadd.f32 %v7747_v4, %v7746_v45 }
 0x509   : > { %v4318_v13 = vadd.f32 %v7748_v9, %v11064_v61 }
 0x50b   : > { %v7661_v35 = vpop.f32.mrb[28].mxu0  ;;  %v7749_v10 = vpop.f32.mrb[28].mxu1  ;;  %v5295_v1 = vpack.c.bf16 %v4318_v13, %v4315_v47 }
 0x50c   : > { %v7662_v14 = vpop.f32.mrb[29].mxu0  ;;  %v7750_v44 = vpop.f32.mrb[29].mxu1 }
 0x50d   : > { %v11094_v43 = vadd.f32 %v7662_v14, %v7661_v35  ;;  %v7751_v37 = vadd.f32 %v7750_v44, %v7749_v10  ;;  %v7664_v32 = vpop.f32.mrb[30].mxu0  ;;  %v7752_v7 = vpop.f32.mrb[30].mxu1  ;;  %5554 = vmatmul.mubr.bf16.gmra.mrb[88].mxu1 %v5295_v1  ;;  %5747 = vmatmul.mubr.bf16.gmra.mrb[88].mxu0 %v5295_v1 }
 0x50e   : > { %v7665_v63 = vpop.f32.mrb[31].mxu0  ;;  %v7753_v50 = vpop.f32.mrb[31].mxu1  ;;  %5563 = vmatprep.mubr.bf16.mxu1 %v8209_v24  ;;  %5756 = vmatprep.mubr.bf16.mxu0 %v8209_v24 }
 0x50f   : > { %v4323_v54 = vadd.f32 %v7751_v37, %v11068_v31  ;;  %v11099_v61 = vadd.f32 %v7665_v63, %v7664_v32  ;;  %v7754_v3 = vadd.f32 %v7753_v50, %v7752_v7 }
 0x511   : > { %v4326_v29 = vadd.f32 %v7754_v3, %v11072_v11 }
 0x513   : > { %v7667_v22 = vpop.f32.mrb[32].mxu0  ;;  %v7755_v28 = vpop.f32.mrb[32].mxu1  ;;  %v5296_v59 = vpack.c.bf16 %v4326_v29, %v4323_v54 }
 0x514   : > { %v7668_v27 = vpop.f32.mrb[33].mxu0  ;;  %v7756_v20 = vpop.f32.mrb[33].mxu1 }
 0x515   : > { %v11102_v21 = vadd.f32 %v7668_v27, %v7667_v22  ;;  %v7757_v55 = vadd.f32 %v7756_v20, %v7755_v28  ;;  %v7670_v46 = vpop.f32.mrb[34].mxu0  ;;  %v7758_v26 = vpop.f32.mrb[34].mxu1  ;;  %5564 = vmatmul.mubr.bf16.gmra.mrb[92].mxu1 %v5296_v59  ;;  %5757 = vmatmul.mubr.bf16.gmra.mrb[92].mxu0 %v5296_v59 }
 0x516   : > { %v7671_v34 = vpop.f32.mrb[35].mxu0  ;;  %v7759_v62 = vpop.f32.mrb[35].mxu1  ;;  %5573 = vmatprep.mubr.bf16.mxu1 %v8209_v24  ;;  %5766 = vmatprep.mubr.bf16.mxu0 %v8209_v24 }
 0x517   : > { %v4331_v31 = vadd.f32 %v7757_v55, %v11076_v15  ;;  %v11107_v11 = vadd.f32 %v7671_v34, %v7670_v46  ;;  %v7760_v36 = vadd.f32 %v7759_v62, %v7758_v26 }
 0x519   : > { %v4334_v5 = vadd.f32 %v7760_v36, %v11078_v38 }
 0x51b   : > { %v7673_v58 = vpop.f32.mrb[36].mxu0  ;;  %v7761_v48 = vpop.f32.mrb[36].mxu1  ;;  %v5297_v16 = vpack.c.bf16 %v4334_v5, %v4331_v31 }
 0x51c   : > { %v7674_v53 = vpop.f32.mrb[37].mxu0  ;;  %v7762_v17 = vpop.f32.mrb[37].mxu1 }
 0x51d   : > { %v11110_v8 = vadd.f32 %v7674_v53, %v7673_v58  ;;  %v7763_v30 = vadd.f32 %v7762_v17, %v7761_v48  ;;  %v7676_v33 = vpop.f32.mrb[38].mxu0  ;;  %v7764_v51 = vpop.f32.mrb[38].mxu1  ;;  %5574 = vmatmul.mubr.bf16.gmra.mrb[96].mxu1 %v5297_v16  ;;  %5767 = vmatmul.mubr.bf16.gmra.mrb[96].mxu0 %v5297_v16 }
 0x51e   : > { %v7677_v2 = vpop.f32.mrb[39].mxu0  ;;  %v7765_v49 = vpop.f32.mrb[39].mxu1  ;;  %5583 = vmatprep.mubr.bf16.mxu1 %v8209_v24  ;;  %5776 = vmatprep.mubr.bf16.mxu0 %v8209_v24 }
 0x51f   : > { %v4339_v15 = vadd.f32 %v7763_v30, %v11080_v0  ;;  %v11115_v38 = vadd.f32 %v7677_v2, %v7676_v33  ;;  %v7766_v56 = vadd.f32 %v7765_v49, %v7764_v51 }
 0x521   : > { %v4342_v60 = vadd.f32 %v7766_v56, %v11084_v12 }
 0x523   : > { %v7679_v45 = vpop.f32.mrb[40].mxu0  ;;  %v7767_v57 = vpop.f32.mrb[40].mxu1  ;;  %v5298_v4 = vpack.c.bf16 %v4342_v60, %v4339_v15 }
 0x524   : > { %v7680_v47 = vpop.f32.mrb[41].mxu0  ;;  %v7768_v9 = vpop.f32.mrb[41].mxu1 }
 0x525   : > { %v11118_v13 = vadd.f32 %v7680_v47, %v7679_v45  ;;  %v7769_v35 = vadd.f32 %v7768_v9, %v7767_v57  ;;  %v7682_v10 = vpop.f32.mrb[42].mxu0  ;;  %v7770_v1 = vpop.f32.mrb[42].mxu1  ;;  %5584 = vmatmul.mubr.bf16.gmra.mrb[100].mxu1 %v5298_v4  ;;  %5777 = vmatmul.mubr.bf16.gmra.mrb[100].mxu0 %v5298_v4 }
 0x526   : > { %v7683_v14 = vpop.f32.mrb[43].mxu0  ;;  %v7771_v44 = vpop.f32.mrb[43].mxu1  ;;  %5593 = vmatprep.mubr.bf16.mxu1 %v8209_v24  ;;  %5786 = vmatprep.mubr.bf16.mxu0 %v8209_v24 }
 0x527   : > { %v4347_v0 = vadd.f32 %v7769_v35, %v11086_v23  ;;  %v11123_v12 = vadd.f32 %v7683_v14, %v7682_v10  ;;  %v7772_v37 = vadd.f32 %v7771_v44, %v7770_v1 }
 0x529   : > { %v4350_v32 = vadd.f32 %v7772_v37, %v11091_v41 }
 0x52b   : > { %v7685_v7 = vpop.f32.mrb[44].mxu0  ;;  %v7773_v63 = vpop.f32.mrb[44].mxu1  ;;  %v5299_v50 = vpack.c.bf16 %v4350_v32, %v4347_v0 }
 0x52c   : > { %v7686_v54 = vpop.f32.mrb[45].mxu0  ;;  %v7774_v3 = vpop.f32.mrb[45].mxu1 }
 0x52d   : > { %v11126_v29 = vadd.f32 %v7686_v54, %v7685_v7  ;;  %v7775_v22 = vadd.f32 %v7774_v3, %v7773_v63  ;;  %v7688_v28 = vpop.f32.mrb[46].mxu0  ;;  %v7776_v59 = vpop.f32.mrb[46].mxu1  ;;  %5594 = vmatmul.mubr.bf16.gmra.mrb[104].mxu1 %v5299_v50  ;;  %5787 = vmatmul.mubr.bf16.gmra.mrb[104].mxu0 %v5299_v50 }
 0x52e   : > { %v7689_v27 = vpop.f32.mrb[47].mxu0  ;;  %v7777_v20 = vpop.f32.mrb[47].mxu1  ;;  %5603 = vmatprep.mubr.bf16.mxu1 %v8209_v24  ;;  %5796 = vmatprep.mubr.bf16.mxu0 %v8209_v24 }
 0x52f   : > { %v4355_v23 = vadd.f32 %v7775_v22, %v11094_v43  ;;  %v11131_v41 = vadd.f32 %v7689_v27, %v7688_v28  ;;  %v7778_v55 = vadd.f32 %v7777_v20, %v7776_v59 }
 0x531   : > { %v4358_v46 = vadd.f32 %v7778_v55, %v11099_v61 }
 0x533   : > { %v7779_v26 = vpop.f32.mrb[48].mxu1  ;;  %v11134_v34 = vpop.f32.mrb[48].mxu0  ;;  %v5300_v62 = vpack.c.bf16 %v4358_v46, %v4355_v23 }
 0x534   : > { %v7780_v31 = vpop.f32.mrb[49].mxu1  ;;  %v11136_v36 = vpop.f32.mrb[49].mxu0  ;;  %v4657_v5 = vsel %vm4650_vm1, %v11134_v34, -inf }
 0x535   : > { %v7781_v58 = vadd.f32 %v7780_v31, %v7779_v26  ;;  %v7782_v48 = vpop.f32.mrb[50].mxu1  ;;  %4658 = vmax.xlane.f32.xlu1 %v4657_v5  ;;  %v11140_v43 = vpop.f32.mrb[50].mxu0  ;;  %5604 = vmatmul.mubr.bf16.gmra.mrb[108].mxu1 %v5300_v62  ;;  %v4651_v61 = vsel %vm4650_vm1, %v11136_v36, -inf }
 0x536   : > { %5797 = vmatmul.mubr.bf16.gmra.mrb[108].mxu0 %v5300_v62  ;;  %v7783_v16 = vpop.f32.mrb[51].mxu1  ;;  %4652 = vmax.xlane.f32.xlu0 %v4651_v61  ;;  %v11144_v53 = vpop.f32.mrb[51].mxu0  ;;  %v4660_v33 = vsel %vm4650_vm1, %v11140_v43, -inf }
 0x537   : > { %v4363_v17 = vadd.f32 %v7781_v58, %v11102_v21  ;;  %v7784_v30 = vadd.f32 %v7783_v16, %v7782_v48  ;;  %5613 = vmatprep.mubr.bf16.mxu1 %v8209_v24  ;;  %5806 = vmatprep.mubr.bf16.mxu0 %v8209_v24  ;;  %v4654_v2 = vsel %vm4650_vm1, %v11144_v53, -inf }
 0x539   : > { %v4366_v51 = vadd.f32 %v7784_v30, %v11107_v11  ;;  %4661 = vmax.xlane.f32.xlu1 %v4660_v33 }
 0x53a   : > { %4655 = vmax.xlane.f32.xlu0 %v4654_v2 }
 0x53b   : > { %v7785_v49 = vpop.f32.mrb[52].mxu1  ;;  %v11154_v15 = vpop.f32.mrb[52].mxu0  ;;  %v5301_v56 = vpack.c.bf16 %v4366_v51, %v4363_v17 }
 0x53c   : > { %v7786_v21 = vpop.f32.mrb[53].mxu1  ;;  %v11156_v60 = vpop.f32.mrb[53].mxu0  ;;  %v4669_v45 = vsel %vm4650_vm1, %v11154_v15, -inf }
 0x53d   : > { %v7787_v57 = vadd.f32 %v7786_v21, %v7785_v49  ;;  %v7788_v4 = vpop.f32.mrb[54].mxu1  ;;  %v11160_v47 = vpop.f32.mrb[54].mxu0  ;;  %5614 = vmatmul.mubr.bf16.gmra.mrb[112].mxu1 %v5301_v56  ;;  %v4663_v44 = vsel %vm4650_vm1, %v11156_v60, -inf }
 0x53e   : > { %5807 = vmatmul.mubr.bf16.gmra.mrb[112].mxu0 %v5301_v56  ;;  %v7789_v11 = vpop.f32.mrb[55].mxu1  ;;  %4670 = vmax.xlane.f32.xlu0 %v4669_v45  ;;  %v11162_v9 = vpop.f32.mrb[55].mxu0  ;;  %v4672_v35 = vsel %vm4650_vm1, %v11160_v47, -inf }
 0x53f   : > { %v4371_v10 = vadd.f32 %v7787_v57, %v11110_v8  ;;  %v7790_v1 = vadd.f32 %v7789_v11, %v7788_v4  ;;  %4673 = vmax.xlane.f32.xlu1 %v4672_v35  ;;  %5623 = vmatprep.mubr.bf16.mxu1 %v8209_v24  ;;  %v4666_v0 = vsel %vm4650_vm1, %v11162_v9, -inf }
 0x540   : > { %5816 = vmatprep.mubr.bf16.mxu0 %v8209_v24 }
 0x541   : > { %v4374_v14 = vadd.f32 %v7790_v1, %v11115_v38 }
 0x542   : > { %4664 = vmax.xlane.f32.xlu0 %v4663_v44 }
 0x543   : > { %v7791_v37 = vpop.f32.mrb[56].mxu1  ;;  %4667 = vmax.xlane.f32.xlu1 %v4666_v0  ;;  %v11174_v32 = vpop.f32.mrb[56].mxu0  ;;  %v5302_v8 = vpack.c.bf16 %v4374_v14, %v4371_v10 }
 0x544   : > { %v7792_v7 = vpop.f32.mrb[57].mxu1  ;;  %v11176_v63 = vpop.f32.mrb[57].mxu0  ;;  %v4681_v50 = vsel %vm4650_vm1, %v11174_v32, -inf }
 0x545   : > { %v7793_v54 = vadd.f32 %v7792_v7, %v7791_v37  ;;  %v7794_v38 = vpop.f32.mrb[58].mxu1  ;;  %v11180_v3 = vpop.f32.mrb[58].mxu0  ;;  %5624 = vmatmul.mubr.bf16.gmra.mrb[116].mxu1 %v5302_v8  ;;  %v4675_v55 = vsel %vm4650_vm1, %v11176_v63, -inf }
 0x546   : > { %5817 = vmatmul.mubr.bf16.gmra.mrb[116].mxu0 %v5302_v8  ;;  %v7795_v22 = vpop.f32.mrb[59].mxu1  ;;  %4682 = vmax.xlane.f32.xlu0 %v4681_v50  ;;  %v11182_v28 = vpop.f32.mrb[59].mxu0  ;;  %v4684_v59 = vsel %vm4650_vm1, %v11180_v3, -inf }
 0x547   : > { %v4379_v27 = vadd.f32 %v7793_v54, %v11118_v13  ;;  %v7796_v20 = vadd.f32 %v7795_v22, %v7794_v38  ;;  %4685 = vmax.xlane.f32.xlu1 %v4684_v59  ;;  %5633 = vmatprep.mubr.bf16.mxu1 %v8209_v24  ;;  %v4678_v46 = vsel %vm4650_vm1, %v11182_v28, -inf }
 0x548   : > { %5826 = vmatprep.mubr.bf16.mxu0 %v8209_v24 }
 0x549   : > { %v4382_v23 = vadd.f32 %v7796_v20, %v11123_v12 }
 0x54a   : > { %4676 = vmax.xlane.f32.xlu0 %v4675_v55 }
 0x54b   : > { %v7797_v26 = vpop.f32.mrb[60].mxu1  ;;  %4679 = vmax.xlane.f32.xlu1 %v4678_v46  ;;  %v11194_v62 = vpop.f32.mrb[60].mxu0  ;;  %v5303_v13 = vpack.c.bf16 %v4382_v23, %v4379_v27 }
 0x54c   : > { %v7798_v31 = vpop.f32.mrb[61].mxu1  ;;  %v11196_v5 = vpop.f32.mrb[61].mxu0  ;;  %v4693_v58 = vsel %vm4650_vm1, %v11194_v62, -inf }
 0x54d   : > { %v7799_v48 = vadd.f32 %v7798_v31, %v7797_v26  ;;  %v7800_v12 = vpop.f32.mrb[62].mxu1  ;;  %v11200_v61 = vpop.f32.mrb[62].mxu0  ;;  %5634 = vmatmul.mubr.bf16.gmra.mrb[120].mxu1 %v5303_v13  ;;  %v4687_v49 = vsel %vm4650_vm1, %v11196_v5, -inf }
 0x54e   : > { %5827 = vmatmul.mubr.bf16.gmra.mrb[120].mxu0 %v5303_v13  ;;  %v7801_v16 = vpop.f32.mrb[63].mxu1  ;;  %4694 = vmax.xlane.f32.xlu0 %v4693_v58  ;;  %v11202_v17 = vpop.f32.mrb[63].mxu0  ;;  %v4696_v30 = vsel %vm4650_vm1, %v11200_v61, -inf }
 0x54f   : > { %v4387_v33 = vadd.f32 %v7799_v48, %v11126_v29  ;;  %v7802_v51 = vadd.f32 %v7801_v16, %v7800_v12  ;;  %4697 = vmax.xlane.f32.xlu1 %v4696_v30  ;;  %5643 = vmatprep.mubr.bf16.mxu1 %v8209_v24  ;;  %v4690_v56 = vsel %vm4650_vm1, %v11202_v17, -inf }
 0x550   : > { %5836 = vmatprep.mubr.bf16.mxu0 %v8209_v24 }
 0x551   : > { %v4390_v2 = vadd.f32 %v7802_v51, %v11131_v41 }
 0x552   : > { %4688 = vmax.xlane.f32.xlu0 %v4687_v49 }
 0x553   : > { %4691 = vmax.xlane.f32.xlu1 %v4690_v56  ;;  %v11214_v21 = vpop.f32.mrb[64].mxu0  ;;  %v5304_v45 = vpack.c.bf16 %v4390_v2, %v4387_v33  ;;  %v7803_v29 = vpop.f32.mrb[64].mxu1 }
 0x554   : > { %v11216_v57 = vpop.f32.mrb[65].mxu0  ;;  %v4705_v4 = vsel %vm4650_vm1, %v11214_v21, -inf  ;;  %v7804_v11 = vpop.f32.mrb[65].mxu1 }
 0x555   : > { %v11220_v35 = vpop.f32.mrb[66].mxu0  ;;  %5644 = vmatmul.mubr.bf16.gmra.mrb[124].mxu1 %v5304_v45  ;;  %v7805_v41 = vadd.f32 %v7804_v11, %v7803_v29  ;;  %v7806_v10 = vpop.f32.mrb[66].mxu1  ;;  %v4699_v8 = vsel %vm4650_vm1, %v11216_v57, -inf }
 0x556   : > { %5837 = vmatmul.mubr.bf16.gmra.mrb[124].mxu0 %v5304_v45  ;;  %4706 = vmax.xlane.f32.xlu0 %v4705_v4  ;;  %v11222_v1 = vpop.f32.mrb[67].mxu0  ;;  %v4708_v14 = vsel %vm4650_vm1, %v11220_v35, -inf  ;;  %v7807_v44 = vpop.f32.mrb[67].mxu1 }
 0x557   : > { %4709 = vmax.xlane.f32.xlu1 %v4708_v14  ;;  %v4395_v0 = vadd.f32 %v7805_v41, %v11052_v25  ;;  %v7808_v37 = vadd.f32 %v7807_v44, %v7806_v10  ;;  %5653 = vmatprep.mubr.bf16.mxu1 %v8209_v24  ;;  %v4702_v50 = vsel %vm4650_vm1, %v11222_v1, -inf }
 0x558   : > { %5846 = vmatprep.mubr.bf16.mxu0 %v8209_v24 }
 0x559   : > { %v4398_v7 = vadd.f32 %v7808_v37, %v11054_v19 }
 0x55a   : > { %4700 = vmax.xlane.f32.xlu0 %v4699_v8 }
 0x55b   : > { %4703 = vmax.xlane.f32.xlu1 %v4702_v50  ;;  %v11234_v54 = vpop.f32.mrb[68].mxu0  ;;  %v7809_v38 = vpop.f32.mrb[68].mxu1  ;;  %v5305_v22 = vpack.c.bf16 %v4398_v7, %v4395_v0 }
 0x55c   : > { %v11236_v25 = vpop.f32.mrb[69].mxu0  ;;  %v4717_v59 = vsel %vm4650_vm1, %v11234_v54, -inf  ;;  %v7810_v27 = vpop.f32.mrb[69].mxu1 }
 0x55d   : > { %v11240_v20 = vpop.f32.mrb[70].mxu0  ;;  %v7811_v23 = vadd.f32 %v7810_v27, %v7809_v38  ;;  %v7812_v55 = vpop.f32.mrb[70].mxu1  ;;  %5654 = vmatmul.mubr.bf16.gmra.mrb[128].mxu1 %v5305_v22  ;;  %v4711_v58 = vsel %vm4650_vm1, %v11236_v25, -inf }
 0x55e   : > { %4718 = vmax.xlane.f32.xlu0 %v4717_v59  ;;  %v11242_v19 = vpop.f32.mrb[71].mxu0  ;;  %v4720_v46 = vsel %vm4650_vm1, %v11240_v20, -inf  ;;  %5847 = vmatmul.mubr.bf16.gmra.mrb[128].mxu0 %v5305_v22  ;;  %v7813_v26 = vpop.f32.mrb[71].mxu1 }
 0x55f   : > { %4721 = vmax.xlane.f32.xlu1 %v4720_v46  ;;  %v4403_v13 = vadd.f32 %v7811_v23, %v11056_v42  ;;  %v7814_v31 = vadd.f32 %v7813_v26, %v7812_v55  ;;  %5663 = vmatprep.mubr.bf16.mxu1 %v8209_v24  ;;  %v4714_v12 = vsel %vm4650_vm1, %v11242_v19, -inf }
 0x560   : > { %5856 = vmatprep.mubr.bf16.mxu0 %v8209_v24 }
 0x561   : > { %v4406_v48 = vadd.f32 %v7814_v31, %v11058_v52 }
 0x562   : > { %4712 = vmax.xlane.f32.xlu0 %v4711_v58 }
 0x563   : > { %4715 = vmax.xlane.f32.xlu1 %v4714_v12  ;;  %v11254_v16 = vpop.f32.mrb[72].mxu0  ;;  %v7815_v30 = vpop.f32.mrb[72].mxu1  ;;  %v5306_v33 = vpack.c.bf16 %v4406_v48, %v4403_v13 }
 0x564   : > { %v11256_v42 = vpop.f32.mrb[73].mxu0  ;;  %v4729_v51 = vsel %vm4650_vm1, %v11254_v16, -inf  ;;  %v7816_v2 = vpop.f32.mrb[73].mxu1 }
 0x565   : > { %v11260_v49 = vpop.f32.mrb[74].mxu0  ;;  %v7817_v56 = vadd.f32 %v7816_v2, %v7815_v30  ;;  %v7818_v45 = vpop.f32.mrb[74].mxu1  ;;  %5664 = vmatmul.mubr.bf16.gmra.mrb[132].mxu1 %v5306_v33  ;;  %v4723_v10 = vsel %vm4650_vm1, %v11256_v42, -inf }
 0x566   : > { %4730 = vmax.xlane.f32.xlu0 %v4729_v51  ;;  %v11262_v52 = vpop.f32.mrb[75].mxu0  ;;  %v4732_v29 = vsel %vm4650_vm1, %v11260_v49, -inf  ;;  %5857 = vmatmul.mubr.bf16.gmra.mrb[132].mxu0 %v5306_v33  ;;  %v7819_v4 = vpop.f32.mrb[75].mxu1 }
 0x567   : > { %4733 = vmax.xlane.f32.xlu1 %v4732_v29  ;;  %v4411_v11 = vadd.f32 %v7817_v56, %v11062_v18  ;;  %v7820_v41 = vadd.f32 %v7819_v4, %v7818_v45  ;;  %5673 = vmatprep.mubr.bf16.mxu1 %v8209_v24  ;;  %v4726_v44 = vsel %vm4650_vm1, %v11262_v52, -inf }
 0x568   : > { %5866 = vmatprep.mubr.bf16.mxu0 %v8209_v24 }
 0x569   : > { %v4414_v14 = vadd.f32 %v7820_v41, %v11066_v39 }
 0x56a   : > { %4724 = vmax.xlane.f32.xlu0 %v4723_v10 }
 0x56b   : > { %4727 = vmax.xlane.f32.xlu1 %v4726_v44  ;;  %v11274_v0 = vpop.f32.mrb[76].mxu0  ;;  %v7821_v37 = vpop.f32.mrb[76].mxu1  ;;  %v5307_v8 = vpack.c.bf16 %v4414_v14, %v4411_v11 }
 0x56c   : > { %v11276_v18 = vpop.f32.mrb[77].mxu0  ;;  %v7822_v7 = vpop.f32.mrb[77].mxu1  ;;  %v4741_v26 = vsel %vm4650_vm1, %v11274_v0, -inf }
 0x56d   : > { %v11278_v50 = vpop.f32.mrb[78].mxu0  ;;  %v4735_v38 = vsel %vm4650_vm1, %v11276_v18, -inf  ;;  %v7823_v22 = vadd.f32 %v7822_v7, %v7821_v37  ;;  %v7824_v59 = vpop.f32.mrb[78].mxu1  ;;  %5674 = vmatmul.mubr.bf16.gmra.mrb[136].mxu1 %v5307_v8 }
 0x56e   : > { %4736 = vmax.xlane.f32.xlu0 %v4735_v38  ;;  %v11282_v39 = vpop.f32.mrb[79].mxu0  ;;  %5867 = vmatmul.mubr.bf16.gmra.mrb[136].mxu0 %v5307_v8  ;;  %v7825_v27 = vpop.f32.mrb[79].mxu1  ;;  %v4744_v31 = vsel %vm4650_vm1, %v11278_v50, -inf }
 0x56f   : > { %v4738_v23 = vsel %vm4650_vm1, %v11282_v39, -inf  ;;  %v4419_v55 = vadd.f32 %v7823_v22, %v11070_v6  ;;  %v7826_v46 = vadd.f32 %v7825_v27, %v7824_v59  ;;  %5683 = vmatprep.mubr.bf16.mxu1 %v8209_v24  ;;  %5876 = vmatprep.mubr.bf16.mxu0 %v8209_v24  ;;  %v4747_v6 = vlaneseq }
 0x570   : > { %4739 = vmax.xlane.f32.xlu1 %v4738_v23 }
 0x571   : > { %v4422_v13 = vadd.f32 %v7826_v46, %v11074_v40  ;;  %v11294_v48 = vand.u32 127, %v4747_v6 }
 0x572   : > { %4742 = vmax.xlane.f32.xlu0 %v4741_v26 }
 0x573   : > { %v5308_v58 = vpack.c.bf16 %v4422_v13, %v4419_v55 }
 0x574   : > { %4745 = vmax.xlane.f32.xlu1 %v4744_v31 }
 0x575   : > { %5684 = vmatmul.mubr.bf16.gmra.mrb[140].mxu1 %v5308_v58 }
 0x576   : > { %5877 = vmatmul.mubr.bf16.gmra.mrb[140].mxu0 %v5308_v58 }
 0x5c2   : > { %v4659_v12 = vpop.xlane.xlu1 %4658 }
 0x5c3   : > { %vm4751_vm4 = vcmp.ge.f32.partialorder %v11134_v34, %v4659_v12  ;;  %v4653_v24 = vpop.xlane.xlu0 %4652 }
 0x5c4   : > { %v4783_v30 = vsel %vm4751_vm4, %v11294_v48, 4  ;;  %vm4749_vm5 = vcmp.ge.f32.partialorder %v11136_v36, %v4653_v24 }
 0x5c5   : > { %v11300_v40 = vsel %vm4650_vm1, %v4783_v30, 2147483647  ;;  %v4781_v33 = vsel %vm4749_vm5, %v11294_v48, 4 }
 0x5c6   : > { %v11304_v51 = vsel %vm4650_vm1, %v4781_v33, 2147483647  ;;  %v4662_v2 = vpop.xlane.xlu1 %4661  ;;  %v4845_v56 = vshra.s32 %v11300_v40, 16 }
 0x5c7   : > { %vm4752_vm6 = vcmp.ge.f32.partialorder %v11140_v43, %v4662_v2  ;;  %v4656_v45 = vpop.xlane.xlu0 %4655  ;;  %v4815_v36 = vshra.s32 %v11304_v51, 16 }
 0x5c8   : > { %v4784_v34 = vsel %vm4752_vm6, %v11294_v48, 4  ;;  %vm4750_vm7 = vcmp.ge.f32.partialorder %v11144_v53, %v4656_v45  ;;  %v11310_v29 = vcvt.s32.f32 %v4845_v56 }
 0x5c9   : > { %v11314_v4 = vsel %vm4650_vm1, %v4784_v34, 2147483647  ;;  %v4782_v11 = vsel %vm4750_vm7, %v11294_v48, 4  ;;  %v11323_v14 = vcvt.s32.f32 %v4815_v36 }
 0x5ca   : > { %v11318_v41 = vsel %vm4650_vm1, %v4782_v11, 2147483647  ;;  %4848 = vmin.xlane.f32.xlu0 %v11310_v29  ;;  %v4860_v43 = vshra.s32 %v11314_v4, 16 }
 0x5cb   : > { %v4671_v10 = vpop.xlane.xlu0 %4670  ;;  %v4830_v37 = vshra.s32 %v11318_v41, 16 }
 0x5cc   : > { %vm4755_vm8 = vcmp.ge.f32.partialorder %v11154_v15, %v4671_v10  ;;  %v4674_v53 = vpop.xlane.xlu1 %4673  ;;  %v11325_v44 = vcvt.s32.f32 %v4860_v43 }
 0x5cd   : > { %v4787_v8 = vsel %vm4755_vm8, %v11294_v48, 4  ;;  %vm4756_vm9 = vcmp.ge.f32.partialorder %v11160_v47, %v4674_v53  ;;  %v11343_v47 = vcvt.s32.f32 %v4830_v37 }
 0x5ce   : > { %v11331_v7 = vsel %vm4650_vm1, %v4787_v8, 2147483647  ;;  %v4788_v38 = vsel %vm4756_vm9, %v11294_v48, 4  ;;  %4818 = vmin.xlane.f32.xlu0 %v11323_v14  ;;  %4863 = vmin.xlane.f32.xlu1 %v11325_v44 }
 0x5cf   : > { %v11337_v15 = vsel %vm4650_vm1, %v4788_v38, 2147483647  ;;  %v4665_v22 = vpop.xlane.xlu0 %4664  ;;  %v4905_v59 = vshra.s32 %v11331_v7, 16 }
 0x5d0   : > { %vm4753_vm10 = vcmp.ge.f32.partialorder %v11156_v60, %v4665_v22  ;;  %v4668_v27 = vpop.xlane.xlu1 %4667  ;;  %v11341_v23 = vpop.f32.mrb[80].mxu1  ;;  %v4920_v55 = vshra.s32 %v11337_v15, 16 }
 0x5d1   : > { %13837 = vst [vmem:[#allocation207_spill] sm:$0xff] %v11341_v23  ;;  %v4785_v46 = vsel %vm4753_vm10, %v11294_v48, 4  ;;  %vm4754_vm11 = vcmp.ge.f32.partialorder %v11162_v9, %v4668_v27  ;;  %v11348_v26 = vpop.f32.mrb[80].mxu0  ;;  %v11350_v13 = vpop.f32.mrb[81].mxu1  ;;  %v11352_v31 = vcvt.s32.f32 %v4905_v59 }
 0x5d2   : > { %13838 = vst [vmem:[#allocation208_spill] sm:$0xff] %v11348_v26  ;;  %13839 = vst [vmem:[#allocation209_spill] sm:$0xff] %v11350_v13  ;;  %v11355_v58 = vsel %vm4650_vm1, %v4785_v46, 2147483647  ;;  %v4786_v60 = vsel %vm4754_vm11, %v11294_v48, 4  ;;  %v11358_v6 = vpop.f32.mrb[81].mxu0  ;;  %4833 = vmin.xlane.f32.xlu1 %v11343_v47  ;;  %v11374_v56 = vcvt.s32.f32 %v4920_v55 }
 0x5d3   : > { %13840 = vst [vmem:[#allocation210_spill] sm:$0xff] %v11358_v6  ;;  %v11361_v12 = vpop.f32.mrb[82].mxu1  ;;  %v11364_v24 = vsel %vm4650_vm1, %v4786_v60, 2147483647  ;;  %v11366_v9 = vpop.f32.mrb[82].mxu0  ;;  %4908 = vmin.xlane.f32.xlu0 %v11352_v31  ;;  %v4875_v45 = vshra.s32 %v11355_v58, 16 }
 0x5d4   : > { %13841 = vst [vmem:[#allocation211_spill] sm:$0xff] %v11361_v12  ;;  %13842 = vst [vmem:[#allocation212_spill] sm:$0xff] %v11366_v9  ;;  %v4683_v30 = vpop.xlane.xlu0 %4682  ;;  %v11370_v33 = vpop.f32.mrb[83].mxu1  ;;  %v4890_v34 = vshra.s32 %v11364_v24, 16 }
 0x5d5   : > { %vm4759_vm12 = vcmp.ge.f32.partialorder %v11174_v32, %v4683_v30  ;;  %13843 = vst [vmem:[#allocation213_spill] sm:$0xff] %v11370_v33  ;;  %v11372_v2 = vpop.f32.mrb[83].mxu0  ;;  %v4686_v11 = vpop.xlane.xlu1 %4685  ;;  %v11384_v32 = vcvt.s32.f32 %v4875_v45 }
 0x5d6   : > { %13844 = vst [vmem:[#allocation214_spill] sm:$0xff] %v11372_v2  ;;  %v4791_v36 = vsel %vm4759_vm12, %v11294_v48, 4  ;;  %vm4760_vm13 = vcmp.ge.f32.partialorder %v11180_v3, %v4686_v11  ;;  %4923 = vmin.xlane.f32.xlu1 %v11374_v56  ;;  %v11397_v3 = vcvt.s32.f32 %v4890_v34 }
 0x5d7   : > { %v11380_v43 = vsel %vm4650_vm1, %v4791_v36, 2147483647  ;;  %v4792_v10 = vsel %vm4760_vm13, %v11294_v48, 4  ;;  %4878 = vmin.xlane.f32.xlu0 %v11384_v32 }
 0x5d8   : > { %v4677_v53 = vpop.xlane.xlu0 %4676  ;;  %v4965_v37 = vshra.s32 %v11380_v43, 16  ;;  %v11389_v8 = vsel %vm4650_vm1, %v4792_v10, 2147483647  ;;  %v11393_v38 = vpop.f32.mrb[84].mxu1 }
 0x5d9   : > { %vm4757_vm14 = vcmp.ge.f32.partialorder %v11176_v63, %v4677_v53  ;;  %13845 = vst [vmem:[#allocation215_spill] sm:$0xff] %v11393_v38  ;;  %v11395_v22 = vpop.f32.mrb[84].mxu0  ;;  %v4680_v27 = vpop.xlane.xlu1 %4679  ;;  %v4980_v45 = vshra.s32 %v11389_v8, 16 }
 0x5da   : > { %13846 = vst [vmem:[#allocation216_spill] sm:$0xff] %v11395_v22  ;;  %v4789_v59 = vsel %vm4757_vm14, %v11294_v48, 4  ;;  %v11400_v55 = vpop.f32.mrb[85].mxu1  ;;  %v11402_v46 = vcvt.s32.f32 %v4965_v37  ;;  %vm4758_vm15 = vcmp.ge.f32.partialorder %v11182_v28, %v4680_v27  ;;  %v11408_v63 = vpop.f32.mrb[85].mxu0  ;;  %4893 = vmin.xlane.f32.xlu1 %v11397_v3 }
 0x5db   : > { %13847 = vst [vmem:[#allocation217_spill] sm:$0xff] %v11400_v55  ;;  %v11405_v60 = vsel %vm4650_vm1, %v4789_v59, 2147483647  ;;  %13848 = vst [vmem:[#allocation218_spill] sm:$0xff] %v11408_v63  ;;  %v11411_v30 = vpop.f32.mrb[86].mxu1  ;;  %v4790_v34 = vsel %vm4758_vm15, %v11294_v48, 4  ;;  %v11427_v59 = vcvt.s32.f32 %v4980_v45 }
 0x5dc   : > { %13849 = vst [vmem:[#allocation219_spill] sm:$0xff] %v11411_v30  ;;  %v11415_v36 = vpop.f32.mrb[86].mxu0  ;;  %v4695_v11 = vpop.xlane.xlu0 %4694  ;;  %v4935_v10 = vshra.s32 %v11405_v60, 16  ;;  %v11419_v53 = vsel %vm4650_vm1, %v4790_v34, 2147483647  ;;  %4968 = vmin.xlane.f32.xlu0 %v11402_v46 }
 0x5dd   : > { %13850 = vst [vmem:[#allocation220_spill] sm:$0xff] %v11415_v36  ;;  %vm4763_vm0 = vcmp.ge.f32.partialorder %v11194_v62, %v4695_v11  ;;  %v11423_v28 = vpop.f32.mrb[87].mxu1  ;;  %v11425_v37 = vpop.f32.mrb[87].mxu0  ;;  %v4950_v62 = vshra.s32 %v11419_v53, 16 }
 0x5de   : > { %13851 = vst [vmem:[#allocation221_spill] sm:$0xff] %v11423_v28  ;;  %13852 = vst [vmem:[#allocation222_spill] sm:$0xff] %v11425_v37  ;;  %v4795_v27 = vsel %vm4763_vm0, %v11294_v48, 4  ;;  %v4698_v30 = vpop.xlane.xlu1 %4697  ;;  %v11430_v36 = vcvt.s32.f32 %v4935_v10  ;;  %4983 = vmin.xlane.f32.xlu1 %v11427_v59 }
 0x5df   : > { %v11433_v63 = vsel %vm4650_vm1, %v4795_v27, 2147483647  ;;  %vm4764_vm2 = vcmp.ge.f32.partialorder %v11200_v61, %v4698_v30  ;;  %v11449_v61 = vcvt.s32.f32 %v4950_v62 }
 0x5e0   : > { %v4796_v34 = vsel %vm4764_vm2, %v11294_v48, 4  ;;  %v4689_v11 = vpop.xlane.xlu0 %4688  ;;  %v5025_v45 = vshra.s32 %v11433_v63, 16  ;;  %4938 = vmin.xlane.f32.xlu0 %v11430_v36  ;;  %v11445_v10 = vpop.f32.mrb[88].mxu1 }
 0x5e1   : > { %v11441_v37 = vsel %vm4650_vm1, %v4796_v34, 2147483647  ;;  %vm4761_vm3 = vcmp.ge.f32.partialorder %v11196_v5, %v4689_v11  ;;  %13853 = vst [vmem:[#allocation223_spill] sm:$0xff] %v11445_v10  ;;  %v11447_v27 = vpop.f32.mrb[88].mxu0  ;;  %v11452_v55 = vpop.f32.mrb[89].mxu1 }
 0x5e2   : > { %13854 = vst [vmem:[#allocation224_spill] sm:$0xff] %v11447_v27  ;;  %v4793_v30 = vsel %vm4761_vm3, %v11294_v48, 4  ;;  %v4692_v28 = vpop.xlane.xlu1 %4691  ;;  %13855 = vst [vmem:[#allocation225_spill] sm:$0xff] %v11452_v55  ;;  %v11454_v22 = vcvt.s32.f32 %v5025_v45  ;;  %v11460_v5 = vpop.f32.mrb[89].mxu0  ;;  %4953 = vmin.xlane.f32.xlu1 %v11449_v61  ;;  %v5040_v62 = vshra.s32 %v11441_v37, 16 }
 0x5e3   : > { %v11457_v34 = vsel %vm4650_vm1, %v4793_v30, 2147483647  ;;  %vm4762_vm4 = vcmp.ge.f32.partialorder %v11202_v17, %v4692_v28  ;;  %13856 = vst [vmem:[#allocation226_spill] sm:$0xff] %v11460_v5  ;;  %v11463_v11 = vpop.f32.mrb[90].mxu1  ;;  %v11467_v10 = vpop.f32.mrb[90].mxu0 }
 0x5e4   : > { %13857 = vst [vmem:[#allocation227_spill] sm:$0xff] %v11463_v11  ;;  %v4794_v27 = vsel %vm4762_vm4, %v11294_v48, 4  ;;  %13858 = vst [vmem:[#allocation228_spill] sm:$0xff] %v11467_v10  ;;  %v4707_v55 = vpop.xlane.xlu0 %4706  ;;  %v4995_v45 = vshra.s32 %v11457_v34, 16  ;;  %5028 = vmin.xlane.f32.xlu0 %v11454_v22  ;;  %v11475_v17 = vpop.f32.mrb[91].mxu1  ;;  %v11479_v11 = vcvt.s32.f32 %v5040_v62 }
 0x5e5   : > { %v11471_v30 = vsel %vm4650_vm1, %v4794_v27, 2147483647  ;;  %vm4767_vm5 = vcmp.ge.f32.partialorder %v11214_v21, %v4707_v55  ;;  %13859 = vst [vmem:[#allocation229_spill] sm:$0xff] %v11475_v17  ;;  %v11477_v28 = vpop.f32.mrb[91].mxu0 }
 0x5e6   : > { %13860 = vst [vmem:[#allocation230_spill] sm:$0xff] %v11477_v28  ;;  %v4799_v5 = vsel %vm4767_vm5, %v11294_v48, 4  ;;  %v4710_v38 = vpop.xlane.xlu1 %4709  ;;  %v11482_v10 = vcvt.s32.f32 %v4995_v45  ;;  %5043 = vmin.xlane.f32.xlu1 %v11479_v11  ;;  %v5010_v21 = vshra.s32 %v11471_v30, 16 }
 0x5e7   : > { %v11485_v2 = vsel %vm4650_vm1, %v4799_v5, 2147483647  ;;  %vm4768_vm6 = vcmp.ge.f32.partialorder %v11220_v35, %v4710_v38 }
 0x5e8   : > { %v4800_v55 = vsel %vm4768_vm6, %v11294_v48, 4  ;;  %v4701_v27 = vpop.xlane.xlu0 %4700  ;;  %v5085_v62 = vshra.s32 %v11485_v2, 16  ;;  %4998 = vmin.xlane.f32.xlu0 %v11482_v10  ;;  %v11497_v5 = vpop.f32.mrb[92].mxu1  ;;  %v11501_v35 = vcvt.s32.f32 %v5010_v21 }
 0x5e9   : > { %v11493_v28 = vsel %vm4650_vm1, %v4800_v55, 2147483647  ;;  %vm4765_vm7 = vcmp.ge.f32.partialorder %v11216_v57, %v4701_v27  ;;  %13861 = vst [vmem:[#allocation231_spill] sm:$0xff] %v11497_v5  ;;  %v11499_v45 = vpop.f32.mrb[92].mxu0  ;;  %v11504_v33 = vpop.f32.mrb[93].mxu1 }
 0x5ea   : > { %13862 = vst [vmem:[#allocation232_spill] sm:$0xff] %v11499_v45  ;;  %v4797_v38 = vsel %vm4765_vm7, %v11294_v48, 4  ;;  %v4704_v17 = vpop.xlane.xlu1 %4703  ;;  %13863 = vst [vmem:[#allocation233_spill] sm:$0xff] %v11504_v33  ;;  %v11506_v9 = vcvt.s32.f32 %v5085_v62  ;;  %v11512_v57 = vpop.f32.mrb[93].mxu0  ;;  %5013 = vmin.xlane.f32.xlu1 %v11501_v35  ;;  %v5100_v21 = vshra.s32 %v11493_v28, 16 }
 0x5eb   : > { %v11509_v55 = vsel %vm4650_vm1, %v4797_v38, 2147483647  ;;  %vm4766_vm8 = vcmp.ge.f32.partialorder %v11222_v1, %v4704_v17  ;;  %13864 = vst [vmem:[#allocation234_spill] sm:$0xff] %v11512_v57  ;;  %v11515_v27 = vpop.f32.mrb[94].mxu1  ;;  %v11519_v5 = vpop.f32.mrb[94].mxu0 }
 0x5ec   : > { %13865 = vst [vmem:[#allocation235_spill] sm:$0xff] %v11515_v27  ;;  %v4798_v45 = vsel %vm4766_vm8, %v11294_v48, 4  ;;  %13866 = vst [vmem:[#allocation236_spill] sm:$0xff] %v11519_v5  ;;  %v4719_v33 = vpop.xlane.xlu0 %4718  ;;  %v5055_v62 = vshra.s32 %v11509_v55, 16  ;;  %5088 = vmin.xlane.f32.xlu0 %v11506_v9  ;;  %v11527_v1 = vpop.f32.mrb[95].mxu1  ;;  %v11531_v27 = vcvt.s32.f32 %v5100_v21 }
 0x5ed   : > { %v11523_v38 = vsel %vm4650_vm1, %v4798_v45, 2147483647  ;;  %vm4771_vm9 = vcmp.ge.f32.partialorder %v11234_v54, %v4719_v33  ;;  %13867 = vst [vmem:[#allocation237_spill] sm:$0xff] %v11527_v1  ;;  %v11529_v17 = vpop.f32.mrb[95].mxu0 }
 0x5ee   : > { %13868 = vst [vmem:[#allocation238_spill] sm:$0xff] %v11529_v17  ;;  %v4803_v57 = vsel %vm4771_vm9, %v11294_v48, 4  ;;  %v4722_v12 = vpop.xlane.xlu1 %4721  ;;  %v11534_v5 = vcvt.s32.f32 %v5055_v62  ;;  %5103 = vmin.xlane.f32.xlu1 %v11531_v27  ;;  %v5070_v54 = vshra.s32 %v11523_v38, 16 }
 0x5ef   : > { %v11537_v6 = vsel %vm4650_vm1, %v4803_v57, 2147483647  ;;  %vm4772_vm10 = vcmp.ge.f32.partialorder %v11240_v20, %v4722_v12 }
 0x5f0   : > { %v4804_v33 = vsel %vm4772_vm10, %v11294_v48, 4  ;;  %v4713_v45 = vpop.xlane.xlu0 %4712  ;;  %v5145_v21 = vshra.s32 %v11537_v6, 16  ;;  %5058 = vmin.xlane.f32.xlu0 %v11534_v5  ;;  %v11549_v57 = vpop.f32.mrb[96].mxu1  ;;  %v11553_v20 = vcvt.s32.f32 %v5070_v54 }
 0x5f1   : > { %v11545_v17 = vsel %vm4650_vm1, %v4804_v33, 2147483647  ;;  %vm4769_vm11 = vcmp.ge.f32.partialorder %v11236_v25, %v4713_v45  ;;  %13869 = vst [vmem:[#allocation239_spill] sm:$0xff] %v11549_v57  ;;  %v11551_v62 = vpop.f32.mrb[96].mxu0  ;;  %v11556_v13 = vpop.f32.mrb[97].mxu1 }
 0x5f2   : > { %13870 = vst [vmem:[#allocation240_spill] sm:$0xff] %v11551_v62  ;;  %v4801_v12 = vsel %vm4769_vm11, %v11294_v48, 4  ;;  %v4716_v1 = vpop.xlane.xlu1 %4715  ;;  %13871 = vst [vmem:[#allocation241_spill] sm:$0xff] %v11556_v13  ;;  %v11558_v26 = vcvt.s32.f32 %v5145_v21  ;;  %v11564_v25 = vpop.f32.mrb[97].mxu0  ;;  %5073 = vmin.xlane.f32.xlu1 %v11553_v20  ;;  %v5160_v54 = vshra.s32 %v11545_v17, 16 }
 0x5f3   : > { %v11561_v33 = vsel %vm4650_vm1, %v4801_v12, 2147483647  ;;  %vm4770_vm12 = vcmp.ge.f32.partialorder %v11242_v19, %v4716_v1  ;;  %13873 = vst [vmem:[#allocation243_spill] sm:$0xff] %v11564_v25  ;;  %v11567_v45 = vpop.f32.mrb[98].mxu1  ;;  %v11571_v57 = vpop.f32.mrb[98].mxu0 }
 0x5f4   : > { %13872 = vst [vmem:[#allocation242_spill] sm:$0xff] %v11561_v33  ;;  %13874 = vst [vmem:[#allocation244_spill] sm:$0xff] %v11567_v45  ;;  %v4802_v62 = vsel %vm4770_vm12, %v11294_v48, 4  ;;  %v4731_v13 = vpop.xlane.xlu0 %4730  ;;  %v5115_v21 = vshra.s32 %v11561_v33, 16  ;;  %5148 = vmin.xlane.f32.xlu0 %v11558_v26  ;;  %v11579_v19 = vpop.f32.mrb[99].mxu1  ;;  %v11583_v45 = vcvt.s32.f32 %v5160_v54 }
 0x5f5   : > { %13875 = vst [vmem:[#allocation245_spill] sm:$0xff] %v11571_v57  ;;  %v11575_v12 = vsel %vm4650_vm1, %v4802_v62, 2147483647  ;;  %vm4775_vm13 = vcmp.ge.f32.partialorder %v11254_v16, %v4731_v13  ;;  %13877 = vst [vmem:[#allocation247_spill] sm:$0xff] %v11579_v19  ;;  %v11581_v1 = vpop.f32.mrb[99].mxu0 }
 0x5f6   : > { %13876 = vst [vmem:[#allocation246_spill] sm:$0xff] %v11575_v12  ;;  %13878 = vst [vmem:[#allocation248_spill] sm:$0xff] %v11581_v1  ;;  %v4807_v25 = vsel %vm4775_vm13, %v11294_v48, 4  ;;  %v4734_v23 = vpop.xlane.xlu1 %4733  ;;  %v11586_v57 = vcvt.s32.f32 %v5115_v21  ;;  %5163 = vmin.xlane.f32.xlu1 %v11583_v45  ;;  %v5130_v16 = vshra.s32 %v11575_v12, 16 }
 0x5f7   : > { %13879 = vst [vmem:[#allocation249_spill] sm:$0xff] %v11583_v45  ;;  %v11589_v33 = vsel %vm4650_vm1, %v4807_v25, 2147483647  ;;  %vm4776_vm14 = vcmp.ge.f32.partialorder %v11260_v49, %v4734_v23 }
 0x5f8   : > { %v4808_v13 = vsel %vm4776_vm14, %v11294_v48, 4  ;;  %v4725_v62 = vpop.xlane.xlu0 %4724  ;;  %v5205_v54 = vshra.s32 %v11589_v33, 16  ;;  %5118 = vmin.xlane.f32.xlu0 %v11586_v57  ;;  %v11601_v25 = vpop.f32.mrb[100].mxu1  ;;  %v11605_v49 = vcvt.s32.f32 %v5130_v16 }
 0x5f9   : > { %v11597_v1 = vsel %vm4650_vm1, %v4808_v13, 2147483647  ;;  %vm4773_vm15 = vcmp.ge.f32.partialorder %v11256_v42, %v4725_v62  ;;  %13880 = vst [vmem:[#allocation250_spill] sm:$0xff] %v11601_v25  ;;  %v11603_v21 = vpop.f32.mrb[100].mxu0  ;;  %v11608_v45 = vpop.f32.mrb[101].mxu1 }
 0x5fa   : > { %13881 = vst [vmem:[#allocation251_spill] sm:$0xff] %v11603_v21  ;;  %13882 = vst [vmem:[#allocation252_spill] sm:$0xff] %v11605_v49  ;;  %v4805_v23 = vsel %vm4773_vm15, %v11294_v48, 4  ;;  %v4728_v19 = vpop.xlane.xlu1 %4727  ;;  %v11610_v12 = vcvt.s32.f32 %v5205_v54  ;;  %v11616_v42 = vpop.f32.mrb[101].mxu0  ;;  %5133 = vmin.xlane.f32.xlu1 %v11605_v49  ;;  %v5220_v16 = vshra.s32 %v11597_v1, 16 }
 0x5fb   : > { %13883 = vst [vmem:[#allocation253_spill] sm:$0xff] %v11608_v45  ;;  %v11613_v13 = vsel %vm4650_vm1, %v4805_v23, 2147483647  ;;  %vm4774_vm0 = vcmp.ge.f32.partialorder %v11262_v52, %v4728_v19  ;;  %13885 = vst [vmem:[#allocation255_spill] sm:$0xff] %v11616_v42  ;;  %v11619_v62 = vpop.f32.mrb[102].mxu1  ;;  %v11623_v25 = vpop.f32.mrb[102].mxu0 }
 0x5fc   : > { %13884 = vst [vmem:[#allocation254_spill] sm:$0xff] %v11613_v13  ;;  %13886 = vst [vmem:[#allocation256_spill] sm:$0xff] %v11619_v62  ;;  %v4806_v21 = vsel %vm4774_vm0, %v11294_v48, 4  ;;  %v4737_v45 = vpop.xlane.xlu0 %4736  ;;  %v5175_v54 = vshra.s32 %v11613_v13, 16  ;;  %5208 = vmin.xlane.f32.xlu0 %v11610_v12  ;;  %v11631_v52 = vpop.f32.mrb[103].mxu1  ;;  %v11635_v62 = vcvt.s32.f32 %v5220_v16 }
 0x5fd   : > { %13887 = vst [vmem:[#allocation257_spill] sm:$0xff] %v11623_v25  ;;  %v11627_v23 = vsel %vm4650_vm1, %v4806_v21, 2147483647  ;;  %vm4777_vm2 = vcmp.ge.f32.partialorder %v11276_v18, %v4737_v45  ;;  %13889 = vst [vmem:[#allocation259_spill] sm:$0xff] %v11631_v52  ;;  %v11633_v19 = vpop.f32.mrb[103].mxu0 }
 0x5fe   : > { %13888 = vst [vmem:[#allocation258_spill] sm:$0xff] %v11627_v23  ;;  %13890 = vst [vmem:[#allocation260_spill] sm:$0xff] %v11633_v19  ;;  %v4809_v42 = vsel %vm4777_vm2, %v11294_v48, 4  ;;  %v4740_v49 = vpop.xlane.xlu1 %4739  ;;  %v11638_v25 = vcvt.s32.f32 %v5175_v54  ;;  %5223 = vmin.xlane.f32.xlu1 %v11635_v62  ;;  %v5190_v18 = vshra.s32 %v11627_v23, 16 }
 0x5ff   : > { %13891 = vst [vmem:[#allocation261_spill] sm:$0xff] %v11635_v62  ;;  %v11641_v13 = vsel %vm4650_vm1, %v4809_v42, 2147483647  ;;  %vm4778_vm3 = vcmp.ge.f32.partialorder %v11282_v39, %v4740_v49 }
 0x600   : > { %13892 = vst [vmem:[#allocation262_spill] sm:$0xff] %v11638_v25  ;;  %v4810_v45 = vsel %vm4778_vm3, %v11294_v48, 4  ;;  %v4743_v21 = vpop.xlane.xlu0 %4742  ;;  %v5235_v16 = vshra.s32 %v11641_v13, 16  ;;  %5178 = vmin.xlane.f32.xlu0 %v11638_v25  ;;  %v11653_v42 = vpop.f32.mrb[104].mxu1  ;;  %v11657_v39 = vcvt.s32.f32 %v5190_v18 }
 0x601   : > { %v11649_v19 = vsel %vm4650_vm1, %v4810_v45, 2147483647  ;;  %vm4779_vm4 = vcmp.ge.f32.partialorder %v11274_v0, %v4743_v21  ;;  %13893 = vst [vmem:[#allocation263_spill] sm:$0xff] %v11653_v42  ;;  %v11655_v54 = vpop.f32.mrb[104].mxu0  ;;  %v11660_v62 = vpop.f32.mrb[105].mxu1 }
 0x602   : > { %13894 = vst [vmem:[#allocation264_spill] sm:$0xff] %v11655_v54  ;;  %v4811_v49 = vsel %vm4779_vm4, %v11294_v48, 4  ;;  %v4746_v52 = vpop.xlane.xlu1 %4745  ;;  %13895 = vst [vmem:[#allocation265_spill] sm:$0xff] %v11660_v62  ;;  %v11662_v23 = vcvt.s32.f32 %v5235_v16  ;;  %v11668_v25 = vpop.f32.mrb[105].mxu0  ;;  %5193 = vmin.xlane.f32.xlu1 %v11657_v39  ;;  %v5250_v18 = vshra.s32 %v11649_v19, 16 }
 0x603   : > { %v11665_v45 = vsel %vm4650_vm1, %v4811_v49, 2147483647  ;;  %vm4780_vm5 = vcmp.ge.f32.partialorder %v11278_v50, %v4746_v52  ;;  %13896 = vst [vmem:[#allocation266_spill] sm:$0xff] %v11668_v25  ;;  %v11671_v0 = vpop.f32.mrb[106].mxu1  ;;  %v11675_v54 = vpop.f32.mrb[106].mxu0 }
 0x604   : > { %13897 = vst [vmem:[#allocation267_spill] sm:$0xff] %v11671_v0  ;;  %v4812_v21 = vsel %vm4780_vm5, %v11294_v48, 4  ;;  %13898 = vst [vmem:[#allocation268_spill] sm:$0xff] %v11675_v54  ;;  %v11677_v62 = vpop.f32.mrb[107].mxu1  ;;  %v5265_v16 = vshra.s32 %v11665_v45, 16  ;;  %5238 = vmin.xlane.f32.xlu0 %v11662_v23  ;;  %v11684_v50 = vpop.f32.mrb[107].mxu0  ;;  %v11686_v52 = vcvt.s32.f32 %v5250_v18 }
 0x605   : > { %13899 = vst [vmem:[#allocation269_spill] sm:$0xff] %v11677_v62  ;;  %v11681_v49 = vsel %vm4650_vm1, %v4812_v21, 2147483647  ;;  %13900 = vst [vmem:[#allocation270_spill] sm:$0xff] %v11684_v50 }
 0x606   : > { %13901 = vst [vmem:[#allocation271_spill] sm:$0xff] %v11686_v52  ;;  %v11688_v0 = vcvt.s32.f32 %v5265_v16  ;;  %v5280_v25 = vshra.s32 %v11681_v49, 16  ;;  %5253 = vmin.xlane.f32.xlu1 %v11686_v52 }
 0x608   : > { %13902 = vst [vmem:[#allocation272_spill] sm:$0xff] %v11688_v0  ;;  %v11692_v48 = vcvt.s32.f32 %v5280_v25  ;;  %5268 = vmin.xlane.f32.xlu0 %v11688_v0  ;;  %v11695_v62 = vpop.f32.mrb[108].mxu1 }
 0x609   : > { %13904 = vst [vmem:[#allocation274_spill] sm:$0xff] %v11695_v62  ;;  %v11697_v21 = vpop.f32.mrb[108].mxu0  ;;  %v11699_v54 = vpop.f32.mrb[109].mxu1 }
 0x60a   : > { %13903 = vst [vmem:[#allocation273_spill] sm:$0xff] %v11692_v48  ;;  %13905 = vst [vmem:[#allocation275_spill] sm:$0xff] %v11697_v21  ;;  %v11701_v42 = vpop.f32.mrb[109].mxu0  ;;  %5283 = vmin.xlane.f32.xlu1 %v11692_v48  ;;  %v11704_v18 = vpop.f32.mrb[110].mxu1 }
 0x60b   : > { %13906 = vst [vmem:[#allocation276_spill] sm:$0xff] %v11699_v54  ;;  %13907 = vst [vmem:[#allocation277_spill] sm:$0xff] %v11701_v42  ;;  %v11706_v16 = vpop.f32.mrb[110].mxu0  ;;  %v11708_v50 = vpop.f32.mrb[111].mxu1 }
 0x60c   : > { %13908 = vst [vmem:[#allocation278_spill] sm:$0xff] %v11704_v18  ;;  %13909 = vst [vmem:[#allocation279_spill] sm:$0xff] %v11706_v16  ;;  %v11710_v25 = vpop.f32.mrb[111].mxu0 }
 0x60d   : > { %13910 = vst [vmem:[#allocation280_spill] sm:$0xff] %v11708_v50  ;;  %13911 = vst [vmem:[#allocation281_spill] sm:$0xff] %v11710_v25 }
 0x610   : > { %v11712_v52 = vpop.f32.mrb[112].mxu1 }
 0x611   : > { %13912 = vst [vmem:[#allocation282_spill] sm:$0xff] %v11712_v52  ;;  %v11714_v0 = vpop.f32.mrb[112].mxu0  ;;  %v11716_v62 = vpop.f32.mrb[113].mxu1 }
 0x612   : > { %13913 = vst [vmem:[#allocation283_spill] sm:$0xff] %v11714_v0  ;;  %13914 = vst [vmem:[#allocation284_spill] sm:$0xff] %v11716_v62  ;;  %v11718_v21 = vpop.f32.mrb[113].mxu0  ;;  %v11720_v54 = vpop.f32.mrb[114].mxu1 }
 0x613   : > { %13915 = vst [vmem:[#allocation285_spill] sm:$0xff] %v11718_v21  ;;  %13916 = vst [vmem:[#allocation286_spill] sm:$0xff] %v11720_v54  ;;  %v11722_v42 = vpop.f32.mrb[114].mxu0  ;;  %v11724_v48 = vpop.f32.mrb[115].mxu1 }
 0x614   : > { %13917 = vst [vmem:[#allocation287_spill] sm:$0xff] %v11722_v42  ;;  %13918 = vst [vmem:[#allocation288_spill] sm:$0xff] %v11724_v48  ;;  %v11726_v18 = vpop.f32.mrb[115].mxu0 }
 0x615   : > { %13919 = vst [vmem:[#allocation289_spill] sm:$0xff] %v11726_v18 }
 0x618   : > { %v11728_v16 = vpop.f32.mrb[116].mxu1 }
 0x619   : > { %13920 = vst [vmem:[#allocation290_spill] sm:$0xff] %v11728_v16  ;;  %v11730_v50 = vpop.f32.mrb[116].mxu0  ;;  %v11732_v25 = vpop.f32.mrb[117].mxu1 }
 0x61a   : > { %13921 = vst [vmem:[#allocation291_spill] sm:$0xff] %v11730_v50  ;;  %13922 = vst [vmem:[#allocation292_spill] sm:$0xff] %v11732_v25  ;;  %v11734_v52 = vpop.f32.mrb[117].mxu0  ;;  %v11736_v0 = vpop.f32.mrb[118].mxu1 }
 0x61b   : > { %13923 = vst [vmem:[#allocation293_spill] sm:$0xff] %v11734_v52  ;;  %13924 = vst [vmem:[#allocation294_spill] sm:$0xff] %v11736_v0  ;;  %v11738_v62 = vpop.f32.mrb[118].mxu0  ;;  %v11740_v21 = vpop.f32.mrb[119].mxu1 }
 0x61c   : > { %13925 = vst [vmem:[#allocation295_spill] sm:$0xff] %v11738_v62  ;;  %13926 = vst [vmem:[#allocation296_spill] sm:$0xff] %v11740_v21  ;;  %v11742_v54 = vpop.f32.mrb[119].mxu0 }
 0x61d   : > { %13927 = vst [vmem:[#allocation297_spill] sm:$0xff] %v11742_v54 }
 0x620   : > { %v11744_v42 = vpop.f32.mrb[120].mxu1 }
 0x621   : > { %13928 = vst [vmem:[#allocation298_spill] sm:$0xff] %v11744_v42  ;;  %v11746_v48 = vpop.f32.mrb[120].mxu0  ;;  %v11748_v18 = vpop.f32.mrb[121].mxu1 }
 0x622   : > { %13929 = vst [vmem:[#allocation299_spill] sm:$0xff] %v11746_v48  ;;  %13930 = vst [vmem:[#allocation300_spill] sm:$0xff] %v11748_v18  ;;  %v11750_v16 = vpop.f32.mrb[121].mxu0  ;;  %v11752_v50 = vpop.f32.mrb[122].mxu1 }
 0x623   : > { %13931 = vst [vmem:[#allocation301_spill] sm:$0xff] %v11750_v16  ;;  %13932 = vst [vmem:[#allocation302_spill] sm:$0xff] %v11752_v50  ;;  %v11754_v25 = vpop.f32.mrb[122].mxu0  ;;  %v11756_v52 = vpop.f32.mrb[123].mxu1 }
 0x624   : > { %13933 = vst [vmem:[#allocation303_spill] sm:$0xff] %v11754_v25  ;;  %13934 = vst [vmem:[#allocation304_spill] sm:$0xff] %v11756_v52  ;;  %v11758_v0 = vpop.f32.mrb[123].mxu0 }
 0x625   : > { %13935 = vst [vmem:[#allocation305_spill] sm:$0xff] %v11758_v0 }
 0x628   : > { %v11760_v62 = vpop.f32.mrb[124].mxu1 }
 0x629   : > { %13936 = vst [vmem:[#allocation306_spill] sm:$0xff] %v11760_v62  ;;  %v11762_v21 = vpop.f32.mrb[124].mxu0  ;;  %v11764_v54 = vpop.f32.mrb[125].mxu1 }
 0x62a   : > { %13937 = vst [vmem:[#allocation307_spill] sm:$0xff] %v11762_v21  ;;  %13938 = vst [vmem:[#allocation308_spill] sm:$0xff] %v11764_v54  ;;  %v11766_v42 = vpop.f32.mrb[125].mxu0  ;;  %v11768_v48 = vpop.f32.mrb[126].mxu1 }
 0x62b   : > { %13939 = vst [vmem:[#allocation309_spill] sm:$0xff] %v11766_v42  ;;  %13940 = vst [vmem:[#allocation310_spill] sm:$0xff] %v11768_v48  ;;  %v11770_v18 = vpop.f32.mrb[126].mxu0  ;;  %v11772_v16 = vpop.f32.mrb[127].mxu1 }
 0x62c   : > { %13941 = vst [vmem:[#allocation311_spill] sm:$0xff] %v11770_v18  ;;  %13942 = vst [vmem:[#allocation312_spill] sm:$0xff] %v11772_v16  ;;  %v11774_v50 = vpop.f32.mrb[127].mxu0 }
 0x62d   : > { %13943 = vst [vmem:[#allocation313_spill] sm:$0xff] %v11774_v50 }
 0x630   : > { %v11776_v25 = vpop.f32.mrb[128].mxu1 }
 0x631   : > { %13944 = vst [vmem:[#allocation314_spill] sm:$0xff] %v11776_v25  ;;  %v11778_v52 = vpop.f32.mrb[128].mxu0  ;;  %v11780_v0 = vpop.f32.mrb[129].mxu1 }
 0x632   : > { %13945 = vst [vmem:[#allocation315_spill] sm:$0xff] %v11778_v52  ;;  %13946 = vst [vmem:[#allocation316_spill] sm:$0xff] %v11780_v0  ;;  %v11782_v62 = vpop.f32.mrb[129].mxu0  ;;  %v11784_v21 = vpop.f32.mrb[130].mxu1 }
 0x633   : > { %13947 = vst [vmem:[#allocation317_spill] sm:$0xff] %v11782_v62  ;;  %13948 = vst [vmem:[#allocation318_spill] sm:$0xff] %v11784_v21  ;;  %v11786_v54 = vpop.f32.mrb[130].mxu0  ;;  %v11788_v42 = vpop.f32.mrb[131].mxu1 }
 0x634   : > { %13949 = vst [vmem:[#allocation319_spill] sm:$0xff] %v11786_v54  ;;  %13950 = vst [vmem:[#allocation320_spill] sm:$0xff] %v11788_v42  ;;  %v11790_v48 = vpop.f32.mrb[131].mxu0 }
 0x635   : > { %13951 = vst [vmem:[#allocation321_spill] sm:$0xff] %v11790_v48 }
 0x638   : > { %v11792_v18 = vpop.f32.mrb[132].mxu1 }
 0x639   : > { %13952 = vst [vmem:[#allocation322_spill] sm:$0xff] %v11792_v18  ;;  %v11794_v16 = vpop.f32.mrb[132].mxu0  ;;  %v11796_v50 = vpop.f32.mrb[133].mxu1 }
 0x63a   : > { %13953 = vst [vmem:[#allocation323_spill] sm:$0xff] %v11794_v16  ;;  %13954 = vst [vmem:[#allocation324_spill] sm:$0xff] %v11796_v50  ;;  %v11798_v25 = vpop.f32.mrb[133].mxu0  ;;  %v11800_v52 = vpop.f32.mrb[134].mxu1 }
 0x63b   : > { %13955 = vst [vmem:[#allocation325_spill] sm:$0xff] %v11798_v25  ;;  %13956 = vst [vmem:[#allocation326_spill] sm:$0xff] %v11800_v52  ;;  %v11802_v0 = vpop.f32.mrb[134].mxu0  ;;  %v11804_v62 = vpop.f32.mrb[135].mxu1 }
 0x63c   : > { %13957 = vst [vmem:[#allocation327_spill] sm:$0xff] %v11802_v0  ;;  %13958 = vst [vmem:[#allocation328_spill] sm:$0xff] %v11804_v62  ;;  %v11806_v21 = vpop.f32.mrb[135].mxu0 }
 0x63d   : > { %13959 = vst [vmem:[#allocation329_spill] sm:$0xff] %v11806_v21 }
 0x640   : > { %v11808_v54 = vpop.f32.mrb[136].mxu1 }
 0x641   : > { %13960 = vst [vmem:[#allocation330_spill] sm:$0xff] %v11808_v54  ;;  %v11810_v42 = vpop.f32.mrb[136].mxu0  ;;  %v11812_v48 = vpop.f32.mrb[137].mxu1 }
 0x642   : > { %13961 = vst [vmem:[#allocation331_spill] sm:$0xff] %v11810_v42  ;;  %13962 = vst [vmem:[#allocation332_spill] sm:$0xff] %v11812_v48  ;;  %v11814_v18 = vpop.f32.mrb[137].mxu0  ;;  %v11816_v16 = vpop.f32.mrb[138].mxu1 }
 0x643   : > { %13963 = vst [vmem:[#allocation333_spill] sm:$0xff] %v11814_v18  ;;  %13964 = vst [vmem:[#allocation334_spill] sm:$0xff] %v11816_v16  ;;  %v11818_v50 = vpop.f32.mrb[138].mxu0  ;;  %v11820_v25 = vpop.f32.mrb[139].mxu1 }
 0x644   : > { %13965 = vst [vmem:[#allocation335_spill] sm:$0xff] %v11818_v50  ;;  %13966 = vst [vmem:[#allocation336_spill] sm:$0xff] %v11820_v25  ;;  %v11822_v52 = vpop.f32.mrb[139].mxu0  ;;  %v4844_v25 = vand.u32 65535, %v11300_v40  ;;  %v4829_v40 = vand.u32 65535, %v11318_v41 }
 0x645   : > { %13967 = vst [vmem:[#allocation337_spill] sm:$0xff] %v11822_v52 }
 0x646   : > { %v4846_v52 = vcvt.s32.f32 %v4844_v25 }
 0x648   : > { %v11824_v0 = vpop.f32.mrb[140].mxu1 }
 0x649   : > { %13968 = vst [vmem:[#allocation338_spill] sm:$0xff] %v11824_v0  ;;  %v11826_v62 = vpop.f32.mrb[140].mxu0  ;;  %v11828_v21 = vpop.f32.mrb[141].mxu1  ;;  %v4814_v0 = vand.u32 65535, %v11304_v51  ;;  %v4904_v51 = vand.u32 65535, %v11331_v7 }
 0x64a   : > { %13969 = vst [vmem:[#allocation339_spill] sm:$0xff] %v11826_v62  ;;  %v11830_v54 = vpop.f32.mrb[141].mxu0  ;;  %v11832_v42 = vpop.f32.mrb[142].mxu1  ;;  %v4859_v62 = vand.u32 65535, %v11314_v4 }
 0x64b   : > { %13970 = vst [vmem:[#allocation340_spill] sm:$0xff] %v11830_v54  ;;  %13971 = vst [vmem:[#allocation341_spill] sm:$0xff] %v11832_v42  ;;  %v11834_v48 = vpop.f32.mrb[142].mxu0  ;;  %v11836_v18 = vpop.f32.mrb[143].mxu1  ;;  %v4906_v41 = vcvt.s32.f32 %v4904_v51  ;;  %v4964_v51 = vand.u32 65535, %v11380_v43  ;;  %v4934_v43 = vand.u32 65535, %v11405_v60 }
 0x64c   : > { %13972 = vst [vmem:[#allocation342_spill] sm:$0xff] %v11834_v48  ;;  %13973 = vst [vmem:[#allocation343_spill] sm:$0xff] %v11836_v18  ;;  %v11838_v16 = vpop.f32.mrb[143].mxu0  ;;  %v4816_v18 = vcvt.s32.f32 %v4814_v0  ;;  %v4919_v0 = vand.u32 65535, %v11337_v15  ;;  %v4889_v15 = vand.u32 65535, %v11364_v24  ;;  %v5024_v60 = vand.u32 65535, %v11433_v63 }
 0x64d   : > { %13974 = vst [vmem:[#allocation344_spill] sm:$0xff] %v11838_v16  ;;  %v4861_v16 = vcvt.s32.f32 %v4859_v62  ;;  %v4994_v63 = vand.u32 65535, %v11457_v34  ;;  %v5084_v34 = vand.u32 65535, %v11485_v2  ;;  %v5054_v2 = vand.u32 65535, %v11509_v55 }
 0x64e   : > { %v5144_v55 = vand.u32 65535, %v11537_v6 }
 0x657   : > { %v11841_v50 = vpop.xlane.xlu0 %4848 }
 0x658   : > { %vm4850_vm1 = vcmp.eq.f32.partialorder %v11310_v29, %v11841_v50 }
 0x659   : > { %v4851_v54 = vsel %vm4850_vm1, %v4846_v52, inf  ;;  %v4831_v52 = vcvt.s32.f32 %v4829_v40 }
 0x65a   : > { %4852 = vmin.xlane.f32.xlu0 %v4851_v54 }
 0x65b   : > { %v11847_v42 = vpop.xlane.xlu0 %4818  ;;  %v11849_v48 = vpop.xlane.xlu1 %4863 }
 0x65c   : > { %vm4820_vm6 = vcmp.eq.f32.partialorder %v11323_v14, %v11847_v42  ;;  %vm4865_vm7 = vcmp.eq.f32.partialorder %v11325_v44, %v11849_v48  ;;  %v4874_v44 = vand.u32 65535, %v11355_v58 }
 0x65d   : > { %v4821_v4 = vsel %vm4820_vm6, %v4816_v18, inf  ;;  %v4866_v29 = vsel %vm4865_vm7, %v4861_v16, inf  ;;  %v4921_v16 = vcvt.s32.f32 %v4919_v0 }
 0x65e   : > { %4822 = vmin.xlane.f32.xlu0 %v4821_v4  ;;  %4867 = vmin.xlane.f32.xlu1 %v4866_v29  ;;  %v4876_v40 = vcvt.s32.f32 %v4874_v44  ;;  %v4891_v4 = vcvt.s32.f32 %v4889_v15  ;;  %v4979_v29 = vand.u32 65535, %v11389_v8  ;;  %v4949_v8 = vand.u32 65535, %v11419_v53 }
 0x65f   : > { %v11857_v54 = vpop.xlane.xlu1 %4833  ;;  %v4936_v44 = vcvt.s32.f32 %v4934_v43  ;;  %v5039_v53 = vand.u32 65535, %v11441_v37  ;;  %v5009_v37 = vand.u32 65535, %v11471_v30  ;;  %v5099_v30 = vand.u32 65535, %v11493_v28 }
 0x660   : > { %v11860_v62 = vpop.xlane.xlu0 %4908  ;;  %vm4835_vm8 = vcmp.eq.f32.partialorder %v11343_v47, %v11857_v54  ;;  %v5086_v43 = vcvt.s32.f32 %v5084_v34  ;;  %v5069_v28 = vand.u32 65535, %v11523_v38  ;;  %v5159_v38 = vand.u32 65535, %v11545_v17 }
 0x661   : > { %v4836_v14 = vsel %vm4835_vm8, %v4831_v52, inf  ;;  %vm4910_vm9 = vcmp.eq.f32.partialorder %v11352_v31, %v11860_v62  ;;  %v4966_v52 = vcvt.s32.f32 %v4964_v51  ;;  %v5041_v51 = vcvt.s32.f32 %v5039_v53  ;;  %v13975_v53 = vld [vmem:[#allocation242_spill] sm:$0xff] }
 0x662   : > { %4837 = vmin.xlane.f32.xlu1 %v4836_v14  ;;  %v4911_v7 = vsel %vm4910_vm9, %v4906_v41, inf  ;;  %v4981_v41 = vcvt.s32.f32 %v4979_v29  ;;  %v5114_v6 = vand.u32 65535, %v13975_v53  ;;  %v5249_v53 = vand.u32 65535, %v11649_v19 }
 0x663   : > { %4912 = vmin.xlane.f32.xlu0 %v4911_v7  ;;  %v11867_v18 = vpop.xlane.xlu1 %4923  ;;  %v5279_v19 = vand.u32 65535, %v11681_v49 }
 0x664   : > { %vm4925_vm10 = vcmp.eq.f32.partialorder %v11374_v56, %v11867_v18  ;;  %v11872_v25 = vpop.xlane.xlu0 %4878 }
 0x665   : > { %v4926_v47 = vsel %vm4925_vm10, %v4921_v16, inf  ;;  %vm4880_vm11 = vcmp.eq.f32.partialorder %v11384_v32, %v11872_v25  ;;  %v4951_v16 = vcvt.s32.f32 %v4949_v8 }
 0x666   : > { %4927 = vmin.xlane.f32.xlu1 %v4926_v47  ;;  %v4881_v31 = vsel %vm4880_vm11, %v4876_v40, inf  ;;  %v5026_v47 = vcvt.s32.f32 %v5024_v60  ;;  %v5071_v60 = vcvt.s32.f32 %v5069_v28  ;;  %v13980_v28 = vld [vmem:[#allocation258_spill] sm:$0xff] }
 0x667   : > { %v11877_v58 = vpop.xlane.xlu1 %4893  ;;  %4882 = vmin.xlane.f32.xlu0 %v4881_v31 }
 0x668   : > { %vm4895_vm12 = vcmp.eq.f32.partialorder %v11397_v3, %v11877_v58 }
 0x669   : > { %v11882_v24 = vpop.xlane.xlu0 %4968  ;;  %v4896_v56 = vsel %vm4895_vm12, %v4891_v4, inf  ;;  %v4996_v4 = vcvt.s32.f32 %v4994_v63  ;;  %v13976_v63 = vld [vmem:[#allocation246_spill] sm:$0xff] }
 0x66a   : > { %4897 = vmin.xlane.f32.xlu1 %v4896_v56  ;;  %vm4970_vm13 = vcmp.eq.f32.partialorder %v11402_v46, %v11882_v24  ;;  %v5011_v56 = vcvt.s32.f32 %v5009_v37  ;;  %v5129_v17 = vand.u32 65535, %v13976_v63  ;;  %v5116_v37 = vcvt.s32.f32 %v5114_v6 }
 0x66b   : > { %v4971_v32 = vsel %vm4970_vm13, %v4966_v52, inf  ;;  %v11887_v0 = vpop.xlane.xlu1 %4983 }
 0x66c   : > { %4972 = vmin.xlane.f32.xlu0 %v4971_v32  ;;  %vm4985_vm14 = vcmp.eq.f32.partialorder %v11427_v59, %v11887_v0  ;;  %v5131_v34 = vcvt.s32.f32 %v5129_v17 }
 0x66d   : > { %v11892_v3 = vpop.xlane.xlu0 %4938  ;;  %v4986_v14 = vsel %vm4985_vm14, %v4981_v41, inf  ;;  %v5101_v41 = vcvt.s32.f32 %v5099_v30 }
 0x66e   : > { %4987 = vmin.xlane.f32.xlu1 %v4986_v14  ;;  %vm4940_vm15 = vcmp.eq.f32.partialorder %v11430_v36, %v11892_v3  ;;  %v5056_v14 = vcvt.s32.f32 %v5054_v2  ;;  %v13979_v2 = vld [vmem:[#allocation254_spill] sm:$0xff] }
 0x66f   : > { %v4941_v46 = vsel %vm4940_vm15, %v4936_v44, inf  ;;  %v11897_v7 = vpop.xlane.xlu1 %4953 }
 0x670   : > { %4942 = vmin.xlane.f32.xlu0 %v4941_v46  ;;  %vm4955_vm0 = vcmp.eq.f32.partialorder %v11449_v61, %v11897_v7 }
 0x671   : > { %v11902_v59 = vpop.xlane.xlu0 %5028  ;;  %v4956_v15 = vsel %vm4955_vm0, %v4951_v16, inf  ;;  %v5146_v16 = vcvt.s32.f32 %v5144_v55 }
 0x672   : > { %4957 = vmin.xlane.f32.xlu1 %v4956_v15  ;;  %vm5030_vm2 = vcmp.eq.f32.partialorder %v11454_v22, %v11902_v59 }
 0x673   : > { %v5031_v36 = vsel %vm5030_vm2, %v5026_v47, inf  ;;  %v11907_v40 = vpop.xlane.xlu1 %5043  ;;  %v5161_v47 = vcvt.s32.f32 %v5159_v38  ;;  %v13982_v38 = vld [vmem:[#allocation262_spill] sm:$0xff] }
 0x674   : > { %5032 = vmin.xlane.f32.xlu0 %v5031_v36  ;;  %vm5045_vm3 = vcmp.eq.f32.partialorder %v11479_v11, %v11907_v40  ;;  %v13977_v36 = vld [vmem:[#allocation249_spill] sm:$0xff] }
 0x675   : > { %v11912_v61 = vpop.xlane.xlu0 %4998  ;;  %v5046_v31 = vsel %vm5045_vm3, %v5041_v51, inf }
 0x676   : > { %5047 = vmin.xlane.f32.xlu1 %v5046_v31  ;;  %vm5000_vm4 = vcmp.eq.f32.partialorder %v11482_v10, %v11912_v61  ;;  %v5204_v31 = vand.u32 65535, %v11589_v33  ;;  %v5174_v33 = vand.u32 65535, %v13979_v2  ;;  %v12018_v2 = vld [vmem:[%s13046_s8 + $0x3] ss:$0 sm:$0xff] }
 0x677   : > { %v5001_v22 = vsel %vm5000_vm4, %v4996_v4, inf  ;;  %v11917_v29 = vpop.xlane.xlu1 %5013 }
 0x678   : > { %5002 = vmin.xlane.f32.xlu0 %v5001_v22  ;;  %vm5015_vm5 = vcmp.eq.f32.partialorder %v11501_v35, %v11917_v29  ;;  %v5219_v22 = vand.u32 65535, %v11597_v1  ;;  %v5189_v1 = vand.u32 65535, %v13980_v28 }
 0x679   : > { %v11922_v11 = vpop.xlane.xlu0 %5088  ;;  %v5016_v52 = vsel %vm5015_vm5, %v5011_v56, inf  ;;  %v13978_v56 = vld [vmem:[#allocation252_spill] sm:$0xff] }
 0x67a   : > { %5017 = vmin.xlane.f32.xlu1 %v5016_v52  ;;  %vm5090_vm1 = vcmp.eq.f32.partialorder %v11506_v9, %v11922_v11 }
 0x67b   : > { %v5091_v10 = vsel %vm5090_vm1, %v5086_v43, inf  ;;  %v11927_v32 = vpop.xlane.xlu1 %5103  ;;  %v5206_v43 = vcvt.s32.f32 %v5204_v31 }
 0x67c   : > { %5092 = vmin.xlane.f32.xlu0 %v5091_v10  ;;  %vm5105_vm6 = vcmp.eq.f32.partialorder %v11531_v27, %v11927_v32 }
 0x67d   : > { %v11932_v35 = vpop.xlane.xlu0 %5058  ;;  %v5106_v8 = vsel %vm5105_vm6, %v5101_v41, inf  ;;  %v5221_v41 = vcvt.s32.f32 %v5219_v22  ;;  %v13985_v22 = vld [vmem:[#allocation273_spill] sm:$0xff] }
 0x67e   : > { %5107 = vmin.xlane.f32.xlu1 %v5106_v8  ;;  %vm5060_vm7 = vcmp.eq.f32.partialorder %v11534_v5, %v11932_v35  ;;  %v13981_v8 = vld [vmem:[#allocation261_spill] sm:$0xff] }
 0x67f   : > { %v5061_v9 = vsel %vm5060_vm7, %v5056_v14, inf  ;;  %v11937_v44 = vpop.xlane.xlu1 %5073 }
 0x680   : > { %5062 = vmin.xlane.f32.xlu0 %v5061_v9  ;;  %vm5075_vm8 = vcmp.eq.f32.partialorder %v11553_v20, %v11937_v44  ;;  %v5176_v9 = vcvt.s32.f32 %v5174_v33  ;;  %v13986_v33 = vld [vmem:[#allocation207_spill] sm:$0xff] }
 0x681   : > { %v11942_v27 = vpop.xlane.xlu0 %5148  ;;  %v5076_v46 = vsel %vm5075_vm8, %v5071_v60, inf  ;;  %v5234_v60 = vand.u32 65535, %v11641_v13  ;;  %v5264_v13 = vand.u32 65535, %v11665_v45  ;;  %v13984_v45 = vld [vmem:[#allocation272_spill] sm:$0xff] }
 0x682   : > { %5077 = vmin.xlane.f32.xlu1 %v5076_v46  ;;  %vm5150_vm9 = vcmp.eq.f32.partialorder %v11558_v26, %v11942_v27 }
 0x683   : > { %v5151_v5 = vsel %vm5150_vm9, %v5146_v16, inf  ;;  %v11947_v15 = vpop.xlane.xlu1 %5163  ;;  %v5191_v16 = vcvt.s32.f32 %v5189_v1  ;;  %v5266_v31 = vcvt.s32.f32 %v5264_v13  ;;  %v13988_v1 = vld [vmem:[#allocation209_spill] sm:$0xff] }
 0x684   : > { %5152 = vmin.xlane.f32.xlu0 %v5151_v5  ;;  %vm5165_vm10 = vcmp.eq.f32.partialorder %v13977_v36, %v11947_v15  ;;  %v5251_v36 = vcvt.s32.f32 %v5249_v53  ;;  %v13992_v53 = vld [vmem:[#allocation213_spill] sm:$0xff] }
 0x685   : > { %v11952_v20 = vpop.xlane.xlu0 %5118  ;;  %v5166_v51 = vsel %vm5165_vm10, %v5161_v47, inf  ;;  %v5236_v47 = vcvt.s32.f32 %v5234_v60  ;;  %v13990_v60 = vld [vmem:[#allocation211_spill] sm:$0xff] }
 0x686   : > { %5167 = vmin.xlane.f32.xlu1 %v5166_v51  ;;  %vm5120_vm11 = vcmp.eq.f32.partialorder %v11586_v57, %v11952_v20  ;;  %v13983_v51 = vld [vmem:[#allocation271_spill] sm:$0xff] }
 0x687   : > { %v5121_v26 = vsel %vm5120_vm11, %v5116_v37, inf  ;;  %v11957_v4 = vpop.xlane.xlu1 %5133 }
 0x688   : > { %5122 = vmin.xlane.f32.xlu0 %v5121_v26  ;;  %vm5135_vm12 = vcmp.eq.f32.partialorder %v13978_v56, %v11957_v4  ;;  %v12003_v56 = vld [vmem:[%s13046_s8] ss:$0 sm:$0xff] }
 0x689   : > { %v11962_v30 = vpop.xlane.xlu0 %5208  ;;  %v5136_v52 = vsel %vm5135_vm12, %v5131_v34, inf  ;;  %v5281_v34 = vcvt.s32.f32 %v5279_v19  ;;  %v13996_v19 = vld [vmem:[#allocation216_spill] sm:$0xff] }
 0x68a   : > { %5137 = vmin.xlane.f32.xlu1 %v5136_v52  ;;  %vm5210_vm13 = vcmp.eq.f32.partialorder %v11610_v12, %v11962_v30  ;;  %v12008_v52 = vld [vmem:[%s13046_s8 + $0x2] ss:$0 sm:$0xff] }
 0x68b   : > { %v5211_v57 = vsel %vm5210_vm13, %v5206_v43, inf  ;;  %v11967_v10 = vpop.xlane.xlu1 %5223  ;;  %v12013_v43 = vld [vmem:[%s13046_s8 + $0x1] ss:$0 sm:$0xff] }
 0x68c   : > { %5212 = vmin.xlane.f32.xlu0 %v5211_v57  ;;  %vm5225_vm14 = vcmp.eq.f32.partialorder %v13981_v8, %v11967_v10  ;;  %v12022_v57 = vadd.f32 %v12003_v56, %v13986_v33  ;;  %v12030_v8 = vadd.f32 %v12013_v43, %v13988_v1 }
 0x68d   : > { %v11972_v14 = vpop.xlane.xlu0 %5178  ;;  %v5226_v55 = vsel %vm5225_vm14, %v5221_v41, inf  ;;  %v13987_v41 = vld [vmem:[#allocation208_spill] sm:$0xff] }
 0x68e   : > { %5227 = vmin.xlane.f32.xlu1 %v5226_v55  ;;  %vm5180_vm15 = vcmp.eq.f32.partialorder %v13982_v38, %v11972_v14  ;;  %v12026_v28 = vadd.f32 %v12008_v52, %v13987_v41  ;;  %v13989_v55 = vld [vmem:[#allocation210_spill] sm:$0xff]  ;;  %v12038_v38 = vadd.f32 %v12003_v56, %v13990_v60  ;;  %v14001_v41 = vld [vmem:[#allocation221_spill] sm:$0xff] }
 0x68f   : > { %v5181_v12 = vsel %vm5180_vm15, %v5176_v9, inf  ;;  %v11977_v46 = vpop.xlane.xlu1 %5193  ;;  %v12034_v9 = vadd.f32 %v12018_v2, %v13989_v55  ;;  %v12078_v1 = vadd.f32 %v12013_v43, %v14001_v41  ;;  %v14002_v55 = vld [vmem:[#allocation222_spill] sm:$0xff] }
 0x690   : > { %5182 = vmin.xlane.f32.xlu0 %v5181_v12  ;;  %vm5195_vm0 = vcmp.eq.f32.partialorder %v11657_v39, %v11977_v46  ;;  %v13991_v12 = vld [vmem:[#allocation212_spill] sm:$0xff]  ;;  %v12082_v60 = vadd.f32 %v12018_v2, %v14002_v55 }
 0x691   : > { %v11982_v6 = vpop.xlane.xlu0 %5238  ;;  %v5196_v5 = vsel %vm5195_vm0, %v5191_v16, inf  ;;  %v12042_v16 = vadd.f32 %v12008_v52, %v13991_v12  ;;  %v14003_v12 = vld [vmem:[#allocation223_spill] sm:$0xff]  ;;  %v14013_v55 = vld [vmem:[#allocation228_spill] sm:$0xff] }
 0x692   : > { %5197 = vmin.xlane.f32.xlu1 %v5196_v5  ;;  %vm5240_vm2 = vcmp.eq.f32.partialorder %v11662_v23, %v11982_v6  ;;  %v12046_v5 = vadd.f32 %v12013_v43, %v13992_v53  ;;  %v12086_v53 = vadd.f32 %v12003_v56, %v14003_v12  ;;  %v12106_v12 = vadd.f32 %v12008_v52, %v14013_v55 }
 0x693   : > { %v5241_v63 = vsel %vm5240_vm2, %v5236_v47, inf  ;;  %v11987_v17 = vpop.xlane.xlu1 %5253  ;;  %v13993_v47 = vld [vmem:[#allocation214_spill] sm:$0xff] }
 0x694   : > { %5242 = vmin.xlane.f32.xlu0 %v5241_v63  ;;  %vm5255_vm3 = vcmp.eq.f32.partialorder %v13983_v51, %v11987_v17  ;;  %v12050_v13 = vadd.f32 %v12018_v2, %v13993_v47  ;;  %v13995_v63 = vld [vmem:[#allocation215_spill] sm:$0xff]  ;;  %v12058_v51 = vadd.f32 %v12008_v52, %v13996_v19  ;;  %14004 = vst [vmem:[#allocation246_spill] sm:$0xff] %v12086_v53  ;;  %v14005_v47 = vld [vmem:[#allocation224_spill] sm:$0xff]  ;;  %v14007_v19 = vld [vmem:[#allocation225_spill] sm:$0xff] }
 0x695   : > { %v11992_v39 = vpop.xlane.xlu0 %5268  ;;  %v5256_v37 = vsel %vm5255_vm3, %v5251_v36, inf  ;;  %v12054_v36 = vadd.f32 %v12003_v56, %v13995_v63  ;;  %v12090_v63 = vadd.f32 %v12008_v52, %v14005_v47  ;;  %14014 = vst [vmem:[#allocation261_spill] sm:$0xff] %v12106_v12  ;;  %v14015_v53 = vld [vmem:[#allocation229_spill] sm:$0xff]  ;;  %v14025_v12 = vld [vmem:[#allocation234_spill] sm:$0xff] }
 0x696   : > { %5257 = vmin.xlane.f32.xlu1 %v5256_v37  ;;  %vm5270_vm4 = vcmp.eq.f32.partialorder %v13984_v45, %v11992_v39  ;;  %13994 = vst [vmem:[#allocation242_spill] sm:$0xff] %v12050_v13  ;;  %v13997_v37 = vld [vmem:[#allocation217_spill] sm:$0xff]  ;;  %v13998_v45 = vld [vmem:[#allocation218_spill] sm:$0xff]  ;;  %v12110_v47 = vadd.f32 %v12013_v43, %v14015_v53  ;;  %v12130_v53 = vadd.f32 %v12018_v2, %v14025_v12 }
 0x697   : > { %v5271_v26 = vsel %vm5270_vm4, %v5266_v31, inf  ;;  %v11996_v23 = vpop.xlane.xlu1 %5283  ;;  %v12062_v31 = vadd.f32 %v12013_v43, %v13997_v37  ;;  %14006 = vst [vmem:[#allocation249_spill] sm:$0xff] %v12090_v63  ;;  %v12094_v37 = vadd.f32 %v12013_v43, %v14007_v19  ;;  %v14017_v63 = vld [vmem:[#allocation230_spill] sm:$0xff] }
 0x698   : > { %5272 = vmin.xlane.f32.xlu0 %v5271_v26  ;;  %vm5285_vm5 = vcmp.eq.f32.partialorder %v13985_v22, %v11996_v23  ;;  %v12066_v26 = vadd.f32 %v12018_v2, %v13998_v45  ;;  %v14009_v45 = vld [vmem:[#allocation226_spill] sm:$0xff]  ;;  %14016 = vst [vmem:[#allocation262_spill] sm:$0xff] %v12110_v47  ;;  %v12114_v19 = vadd.f32 %v12018_v2, %v14017_v63  ;;  %14026 = vst [vmem:[#allocation208_spill] sm:$0xff] %v12130_v53  ;;  %v14027_v47 = vld [vmem:[#allocation235_spill] sm:$0xff] }
 0x699   : > { %v5286_v49 = vsel %vm5285_vm5, %v5281_v34, inf  ;;  %v13999_v34 = vld [vmem:[#allocation219_spill] sm:$0xff]  ;;  %14008 = vst [vmem:[#allocation252_spill] sm:$0xff] %v12094_v37  ;;  %v12134_v63 = vadd.f32 %v12003_v56, %v14027_v47  ;;  %v14037_v53 = vld [vmem:[#allocation240_spill] sm:$0xff] }
 0x69a   : > { %5287 = vmin.xlane.f32.xlu1 %v5286_v49  ;;  %v12070_v22 = vadd.f32 %v12003_v56, %v13999_v34  ;;  %v14000_v49 = vld [vmem:[#allocation220_spill] sm:$0xff]  ;;  %v12098_v34 = vadd.f32 %v12018_v2, %v14009_v45  ;;  %14018 = vst [vmem:[#allocation271_spill] sm:$0xff] %v12114_v19  ;;  %v14019_v37 = vld [vmem:[#allocation231_spill] sm:$0xff]  ;;  %v12154_v47 = vadd.f32 %v12008_v52, %v14037_v53 }
 0x69b   : > { %v12074_v33 = vadd.f32 %v12008_v52, %v14000_v49  ;;  %v14011_v49 = vld [vmem:[#allocation227_spill] sm:$0xff]  ;;  %v12118_v45 = vadd.f32 %v12003_v56, %v14019_v37  ;;  %14028 = vst [vmem:[#allocation209_spill] sm:$0xff] %v12134_v63  ;;  %v14029_v19 = vld [vmem:[#allocation236_spill] sm:$0xff]  ;;  %v14039_v63 = vld [vmem:[#allocation241_spill] sm:$0xff] }
 0x69c   : > { %14010 = vst [vmem:[#allocation254_spill] sm:$0xff] %v12098_v34  ;;  %v12102_v41 = vadd.f32 %v12003_v56, %v14011_v49  ;;  %v14021_v34 = vld [vmem:[#allocation232_spill] sm:$0xff]  ;;  %v12138_v37 = vadd.f32 %v12008_v52, %v14029_v19  ;;  %14038 = vst [vmem:[#allocation214_spill] sm:$0xff] %v12154_v47  ;;  %v12158_v19 = vadd.f32 %v12013_v43, %v14039_v63 }
 0x69d   : > { %14020 = vst [vmem:[#allocation272_spill] sm:$0xff] %v12118_v45  ;;  %v12122_v49 = vadd.f32 %v12008_v52, %v14021_v34  ;;  %v14031_v45 = vld [vmem:[#allocation237_spill] sm:$0xff]  ;;  %v14049_v47 = vld [vmem:[#allocation248_spill] sm:$0xff] }
 0x69e   : > { %14012 = vst [vmem:[#allocation258_spill] sm:$0xff] %v12102_v41  ;;  %v14023_v41 = vld [vmem:[#allocation233_spill] sm:$0xff]  ;;  %14030 = vst [vmem:[#allocation210_spill] sm:$0xff] %v12138_v37  ;;  %v12142_v34 = vadd.f32 %v12013_v43, %v14031_v45  ;;  %v14041_v37 = vld [vmem:[#allocation243_spill] sm:$0xff]  ;;  %v12178_v63 = vadd.f32 %v12018_v2, %v14049_v47 }
 0x69f   : > { %14022 = vst [vmem:[#allocation273_spill] sm:$0xff] %v12122_v49  ;;  %v12126_v55 = vadd.f32 %v12013_v43, %v14023_v41  ;;  %v14033_v49 = vld [vmem:[#allocation238_spill] sm:$0xff]  ;;  %14040 = vst [vmem:[#allocation215_spill] sm:$0xff] %v12158_v19  ;;  %v12162_v45 = vadd.f32 %v12018_v2, %v14041_v37 }
 0x6a0   : > { %14032 = vst [vmem:[#allocation211_spill] sm:$0xff] %v12142_v34  ;;  %v12146_v41 = vadd.f32 %v12018_v2, %v14033_v49  ;;  %v14043_v34 = vld [vmem:[#allocation244_spill] sm:$0xff]  ;;  %14050 = vst [vmem:[#allocation220_spill] sm:$0xff] %v12178_v63  ;;  %v14051_v19 = vld [vmem:[#allocation250_spill] sm:$0xff] }
 0x6a1   : > { %14024 = vst [vmem:[#allocation207_spill] sm:$0xff] %v12126_v55  ;;  %v14035_v55 = vld [vmem:[#allocation239_spill] sm:$0xff]  ;;  %14042 = vst [vmem:[#allocation216_spill] sm:$0xff] %v12162_v45  ;;  %v12166_v49 = vadd.f32 %v12003_v56, %v14043_v34  ;;  %v12182_v37 = vadd.f32 %v12003_v56, %v14051_v19  ;;  %v14061_v63 = vld [vmem:[#allocation257_spill] sm:$0xff] }
 0x6a2   : > { %14034 = vst [vmem:[#allocation212_spill] sm:$0xff] %v12146_v41  ;;  %v12150_v12 = vadd.f32 %v12003_v56, %v14035_v55  ;;  %v14045_v41 = vld [vmem:[#allocation245_spill] sm:$0xff]  ;;  %v14053_v45 = vld [vmem:[#allocation251_spill] sm:$0xff]  ;;  %v12202_v19 = vadd.f32 %v12008_v52, %v14061_v63 }
 0x6a3   : > { %14044 = vst [vmem:[#allocation217_spill] sm:$0xff] %v12166_v49  ;;  %v12170_v55 = vadd.f32 %v12008_v52, %v14045_v41  ;;  %14052 = vst [vmem:[#allocation221_spill] sm:$0xff] %v12182_v37  ;;  %v12186_v34 = vadd.f32 %v12008_v52, %v14053_v45  ;;  %v14055_v49 = vld [vmem:[#allocation253_spill] sm:$0xff]  ;;  %v14063_v37 = vld [vmem:[#allocation259_spill] sm:$0xff] }
 0x6a4   : > { %14036 = vst [vmem:[#allocation213_spill] sm:$0xff] %v12150_v12  ;;  %v14047_v12 = vld [vmem:[#allocation247_spill] sm:$0xff]  ;;  %v12190_v41 = vadd.f32 %v12013_v43, %v14055_v49  ;;  %14062 = vst [vmem:[#allocation226_spill] sm:$0xff] %v12202_v19  ;;  %v12206_v45 = vadd.f32 %v12013_v43, %v14063_v37  ;;  %v14073_v19 = vld [vmem:[#allocation266_spill] sm:$0xff] }
 0x6a5   : > { %14046 = vst [vmem:[#allocation218_spill] sm:$0xff] %v12170_v55  ;;  %v12174_v53 = vadd.f32 %v12013_v43, %v14047_v12  ;;  %14054 = vst [vmem:[#allocation222_spill] sm:$0xff] %v12186_v34  ;;  %v14057_v55 = vld [vmem:[#allocation255_spill] sm:$0xff]  ;;  %v14065_v34 = vld [vmem:[#allocation260_spill] sm:$0xff]  ;;  %v12226_v37 = vadd.f32 %v12018_v2, %v14073_v19 }
 0x6a6   : > { %14056 = vst [vmem:[#allocation223_spill] sm:$0xff] %v12190_v41  ;;  %v12194_v12 = vadd.f32 %v12018_v2, %v14057_v55  ;;  %14064 = vst [vmem:[#allocation227_spill] sm:$0xff] %v12206_v45  ;;  %v12210_v49 = vadd.f32 %v12018_v2, %v14065_v34  ;;  %v14067_v41 = vld [vmem:[#allocation263_spill] sm:$0xff] }
 0x6a7   : > { %14048 = vst [vmem:[#allocation219_spill] sm:$0xff] %v12174_v53  ;;  %v14059_v53 = vld [vmem:[#allocation256_spill] sm:$0xff]  ;;  %v12214_v55 = vadd.f32 %v12003_v56, %v14067_v41  ;;  %14074 = vst [vmem:[#allocation232_spill] sm:$0xff] %v12226_v37  ;;  %v14075_v45 = vld [vmem:[#allocation267_spill] sm:$0xff] }
 0x6a8   : > { %14058 = vst [vmem:[#allocation224_spill] sm:$0xff] %v12194_v12  ;;  %v12198_v47 = vadd.f32 %v12003_v56, %v14059_v53  ;;  %14066 = vst [vmem:[#allocation228_spill] sm:$0xff] %v12210_v49  ;;  %v14069_v12 = vld [vmem:[#allocation264_spill] sm:$0xff]  ;;  %v12230_v34 = vadd.f32 %v12003_v56, %v14075_v45  ;;  %v14085_v37 = vld [vmem:[#allocation275_spill] sm:$0xff] }
 0x6a9   : > { %14068 = vst [vmem:[#allocation229_spill] sm:$0xff] %v12214_v55  ;;  %v12218_v53 = vadd.f32 %v12008_v52, %v14069_v12  ;;  %v14077_v49 = vld [vmem:[#allocation268_spill] sm:$0xff]  ;;  %v14079_v55 = vld [vmem:[#allocation269_spill] sm:$0xff]  ;;  %v12250_v45 = vadd.f32 %v12008_v52, %v14085_v37 }
 0x6aa   : > { %14060 = vst [vmem:[#allocation225_spill] sm:$0xff] %v12198_v47  ;;  %v14071_v47 = vld [vmem:[#allocation265_spill] sm:$0xff]  ;;  %14076 = vst [vmem:[#allocation233_spill] sm:$0xff] %v12230_v34  ;;  %v12234_v41 = vadd.f32 %v12008_v52, %v14077_v49  ;;  %v12238_v12 = vadd.f32 %v12013_v43, %v14079_v55  ;;  %v14087_v34 = vld [vmem:[#allocation276_spill] sm:$0xff] }
 0x6ab   : > { %14070 = vst [vmem:[#allocation230_spill] sm:$0xff] %v12218_v53  ;;  %v12222_v63 = vadd.f32 %v12013_v43, %v14071_v47  ;;  %v14081_v53 = vld [vmem:[#allocation270_spill] sm:$0xff]  ;;  %14086 = vst [vmem:[#allocation238_spill] sm:$0xff] %v12250_v45  ;;  %v12254_v49 = vadd.f32 %v12013_v43, %v14087_v34  ;;  %v14097_v45 = vld [vmem:[#allocation281_spill] sm:$0xff] }
 0x6ac   : > { %14078 = vst [vmem:[#allocation234_spill] sm:$0xff] %v12234_v41  ;;  %14080 = vst [vmem:[#allocation235_spill] sm:$0xff] %v12238_v12  ;;  %v12242_v47 = vadd.f32 %v12018_v2, %v14081_v53  ;;  %v14089_v41 = vld [vmem:[#allocation277_spill] sm:$0xff]  ;;  %v14091_v12 = vld [vmem:[#allocation278_spill] sm:$0xff]  ;;  %v12274_v34 = vadd.f32 %v12018_v2, %v14097_v45 }
 0x6ad   : > { %14072 = vst [vmem:[#allocation231_spill] sm:$0xff] %v12222_v63  ;;  %v14083_v63 = vld [vmem:[#allocation274_spill] sm:$0xff]  ;;  %14088 = vst [vmem:[#allocation239_spill] sm:$0xff] %v12254_v49  ;;  %v12258_v55 = vadd.f32 %v12018_v2, %v14089_v41  ;;  %v12262_v53 = vadd.f32 %v12003_v56, %v14091_v12 }
 0x6ae   : > { %14082 = vst [vmem:[#allocation236_spill] sm:$0xff] %v12242_v47  ;;  %v12246_v19 = vadd.f32 %v12003_v56, %v14083_v63  ;;  %v14093_v47 = vld [vmem:[#allocation279_spill] sm:$0xff]  ;;  %14098 = vst [vmem:[#allocation245_spill] sm:$0xff] %v12274_v34  ;;  %v14099_v49 = vld [vmem:[#allocation282_spill] sm:$0xff] }
 0x6af   : > { %14090 = vst [vmem:[#allocation240_spill] sm:$0xff] %v12258_v55  ;;  %14092 = vst [vmem:[#allocation241_spill] sm:$0xff] %v12262_v53  ;;  %v12266_v63 = vadd.f32 %v12008_v52, %v14093_v47  ;;  %v12278_v41 = vadd.f32 %v12003_v56, %v14099_v49  ;;  %v14101_v55 = vld [vmem:[#allocation283_spill] sm:$0xff]  ;;  %v14103_v53 = vld [vmem:[#allocation284_spill] sm:$0xff] }
 0x6b0   : > { %14084 = vst [vmem:[#allocation237_spill] sm:$0xff] %v12246_v19  ;;  %v14095_v19 = vld [vmem:[#allocation280_spill] sm:$0xff]  ;;  %v12282_v12 = vadd.f32 %v12008_v52, %v14101_v55  ;;  %v12286_v47 = vadd.f32 %v12013_v43, %v14103_v53  ;;  %v14109_v34 = vld [vmem:[#allocation287_spill] sm:$0xff] }
 0x6b1   : > { %14094 = vst [vmem:[#allocation243_spill] sm:$0xff] %v12266_v63  ;;  %v12270_v37 = vadd.f32 %v12013_v43, %v14095_v19  ;;  %14100 = vst [vmem:[#allocation247_spill] sm:$0xff] %v12278_v41  ;;  %v14105_v63 = vld [vmem:[#allocation285_spill] sm:$0xff]  ;;  %v12298_v49 = vadd.f32 %v12008_v52, %v14109_v34  ;;  %v14111_v41 = vld [vmem:[#allocation288_spill] sm:$0xff] }
 0x6b2   : > { %14102 = vst [vmem:[#allocation248_spill] sm:$0xff] %v12282_v12  ;;  %14104 = vst [vmem:[#allocation250_spill] sm:$0xff] %v12286_v47  ;;  %v12290_v19 = vadd.f32 %v12018_v2, %v14105_v63  ;;  %v12302_v55 = vadd.f32 %v12013_v43, %v14111_v41  ;;  %v14113_v12 = vld [vmem:[#allocation289_spill] sm:$0xff]  ;;  %v14115_v47 = vld [vmem:[#allocation290_spill] sm:$0xff] }
 0x6b3   : > { %14096 = vst [vmem:[#allocation244_spill] sm:$0xff] %v12270_v37  ;;  %v14107_v37 = vld [vmem:[#allocation286_spill] sm:$0xff]  ;;  %14110 = vst [vmem:[#allocation255_spill] sm:$0xff] %v12298_v49  ;;  %v12306_v53 = vadd.f32 %v12018_v2, %v14113_v12  ;;  %v12310_v63 = vadd.f32 %v12003_v56, %v14115_v47  ;;  %v14121_v49 = vld [vmem:[#allocation293_spill] sm:$0xff] }
 0x6b4   : > { %14106 = vst [vmem:[#allocation251_spill] sm:$0xff] %v12290_v19  ;;  %v12294_v45 = vadd.f32 %v12003_v56, %v14107_v37  ;;  %14112 = vst [vmem:[#allocation256_spill] sm:$0xff] %v12302_v55  ;;  %v14117_v19 = vld [vmem:[#allocation291_spill] sm:$0xff]  ;;  %v12322_v41 = vadd.f32 %v12018_v2, %v14121_v49  ;;  %v14123_v55 = vld [vmem:[#allocation294_spill] sm:$0xff] }
 0x6b5   : > { %14114 = vst [vmem:[#allocation257_spill] sm:$0xff] %v12306_v53  ;;  %14116 = vst [vmem:[#allocation259_spill] sm:$0xff] %v12310_v63  ;;  %v12314_v37 = vadd.f32 %v12008_v52, %v14117_v19  ;;  %v12326_v12 = vadd.f32 %v12003_v56, %v14123_v55  ;;  %v14125_v53 = vld [vmem:[#allocation295_spill] sm:$0xff]  ;;  %v14127_v63 = vld [vmem:[#allocation296_spill] sm:$0xff] }
 0x6b6   : > { %14108 = vst [vmem:[#allocation253_spill] sm:$0xff] %v12294_v45  ;;  %v14119_v45 = vld [vmem:[#allocation292_spill] sm:$0xff]  ;;  %14122 = vst [vmem:[#allocation264_spill] sm:$0xff] %v12322_v41  ;;  %v12330_v47 = vadd.f32 %v12008_v52, %v14125_v53  ;;  %v12334_v19 = vadd.f32 %v12013_v43, %v14127_v63  ;;  %v14133_v41 = vld [vmem:[#allocation299_spill] sm:$0xff] }
 0x6b7   : > { %14118 = vst [vmem:[#allocation260_spill] sm:$0xff] %v12314_v37  ;;  %v12318_v34 = vadd.f32 %v12013_v43, %v14119_v45  ;;  %14124 = vst [vmem:[#allocation265_spill] sm:$0xff] %v12326_v12  ;;  %v14129_v37 = vld [vmem:[#allocation297_spill] sm:$0xff]  ;;  %v12346_v55 = vadd.f32 %v12008_v52, %v14133_v41  ;;  %v14135_v12 = vld [vmem:[#allocation300_spill] sm:$0xff] }
 0x6b8   : > { %14126 = vst [vmem:[#allocation266_spill] sm:$0xff] %v12330_v47  ;;  %14128 = vst [vmem:[#allocation267_spill] sm:$0xff] %v12334_v19  ;;  %v12338_v45 = vadd.f32 %v12018_v2, %v14129_v37  ;;  %v12350_v53 = vadd.f32 %v12013_v43, %v14135_v12  ;;  %v14137_v47 = vld [vmem:[#allocation301_spill] sm:$0xff]  ;;  %v14139_v19 = vld [vmem:[#allocation302_spill] sm:$0xff] }
 0x6b9   : > { %14120 = vst [vmem:[#allocation263_spill] sm:$0xff] %v12318_v34  ;;  %v14131_v34 = vld [vmem:[#allocation298_spill] sm:$0xff]  ;;  %14134 = vst [vmem:[#allocation270_spill] sm:$0xff] %v12346_v55  ;;  %v12354_v63 = vadd.f32 %v12018_v2, %v14137_v47  ;;  %v12358_v37 = vadd.f32 %v12003_v56, %v14139_v19  ;;  %v14145_v55 = vld [vmem:[#allocation305_spill] sm:$0xff] }
 0x6ba   : > { %14130 = vst [vmem:[#allocation268_spill] sm:$0xff] %v12338_v45  ;;  %v12342_v49 = vadd.f32 %v12003_v56, %v14131_v34  ;;  %14136 = vst [vmem:[#allocation274_spill] sm:$0xff] %v12350_v53  ;;  %v14141_v45 = vld [vmem:[#allocation303_spill] sm:$0xff]  ;;  %v12370_v12 = vadd.f32 %v12018_v2, %v14145_v55  ;;  %v14147_v53 = vld [vmem:[#allocation306_spill] sm:$0xff] }
 0x6bb   : > { %14138 = vst [vmem:[#allocation275_spill] sm:$0xff] %v12354_v63  ;;  %14140 = vst [vmem:[#allocation276_spill] sm:$0xff] %v12358_v37  ;;  %v12362_v34 = vadd.f32 %v12008_v52, %v14141_v45  ;;  %v12374_v47 = vadd.f32 %v12003_v56, %v14147_v53  ;;  %v14149_v63 = vld [vmem:[#allocation307_spill] sm:$0xff]  ;;  %v14151_v37 = vld [vmem:[#allocation308_spill] sm:$0xff] }
 0x6bc   : > { %14132 = vst [vmem:[#allocation269_spill] sm:$0xff] %v12342_v49  ;;  %v14143_v49 = vld [vmem:[#allocation304_spill] sm:$0xff]  ;;  %14146 = vst [vmem:[#allocation279_spill] sm:$0xff] %v12370_v12  ;;  %v12378_v19 = vadd.f32 %v12008_v52, %v14149_v63  ;;  %v12382_v45 = vadd.f32 %v12013_v43, %v14151_v37  ;;  %v14157_v12 = vld [vmem:[#allocation311_spill] sm:$0xff] }
 0x6bd   : > { %14142 = vst [vmem:[#allocation277_spill] sm:$0xff] %v12362_v34  ;;  %v12366_v41 = vadd.f32 %v12013_v43, %v14143_v49  ;;  %14148 = vst [vmem:[#allocation280_spill] sm:$0xff] %v12374_v47  ;;  %v14153_v34 = vld [vmem:[#allocation309_spill] sm:$0xff]  ;;  %v12394_v53 = vadd.f32 %v12008_v52, %v14157_v12  ;;  %v14159_v47 = vld [vmem:[#allocation312_spill] sm:$0xff] }
 0x6be   : > { %14150 = vst [vmem:[#allocation281_spill] sm:$0xff] %v12378_v19  ;;  %14152 = vst [vmem:[#allocation282_spill] sm:$0xff] %v12382_v45  ;;  %v12386_v49 = vadd.f32 %v12018_v2, %v14153_v34  ;;  %v12398_v63 = vadd.f32 %v12013_v43, %v14159_v47  ;;  %v14161_v19 = vld [vmem:[#allocation313_spill] sm:$0xff]  ;;  %v14163_v45 = vld [vmem:[#allocation314_spill] sm:$0xff] }
 0x6bf   : > { %14144 = vst [vmem:[#allocation278_spill] sm:$0xff] %v12366_v41  ;;  %v14155_v41 = vld [vmem:[#allocation310_spill] sm:$0xff]  ;;  %14158 = vst [vmem:[#allocation285_spill] sm:$0xff] %v12394_v53  ;;  %v12402_v37 = vadd.f32 %v12018_v2, %v14161_v19  ;;  %v12406_v34 = vadd.f32 %v12003_v56, %v14163_v45  ;;  %v14169_v53 = vld [vmem:[#allocation317_spill] sm:$0xff] }
 0x6c0   : > { %14154 = vst [vmem:[#allocation283_spill] sm:$0xff] %v12386_v49  ;;  %v12390_v55 = vadd.f32 %v12003_v56, %v14155_v41  ;;  %14160 = vst [vmem:[#allocation286_spill] sm:$0xff] %v12398_v63  ;;  %v14165_v49 = vld [vmem:[#allocation315_spill] sm:$0xff]  ;;  %v12418_v47 = vadd.f32 %v12018_v2, %v14169_v53  ;;  %v14171_v63 = vld [vmem:[#allocation318_spill] sm:$0xff] }
 0x6c1   : > { %14162 = vst [vmem:[#allocation287_spill] sm:$0xff] %v12402_v37  ;;  %14164 = vst [vmem:[#allocation288_spill] sm:$0xff] %v12406_v34  ;;  %v12410_v41 = vadd.f32 %v12008_v52, %v14165_v49  ;;  %v12422_v19 = vadd.f32 %v12003_v56, %v14171_v63  ;;  %v14173_v37 = vld [vmem:[#allocation319_spill] sm:$0xff]  ;;  %v14175_v34 = vld [vmem:[#allocation320_spill] sm:$0xff] }
 0x6c2   : > { %14156 = vst [vmem:[#allocation284_spill] sm:$0xff] %v12390_v55  ;;  %v14167_v55 = vld [vmem:[#allocation316_spill] sm:$0xff]  ;;  %14170 = vst [vmem:[#allocation291_spill] sm:$0xff] %v12418_v47  ;;  %v12426_v45 = vadd.f32 %v12008_v52, %v14173_v37  ;;  %v12430_v49 = vadd.f32 %v12013_v43, %v14175_v34  ;;  %v14181_v47 = vld [vmem:[#allocation323_spill] sm:$0xff] }
 0x6c3   : > { %14166 = vst [vmem:[#allocation289_spill] sm:$0xff] %v12410_v41  ;;  %v12414_v12 = vadd.f32 %v12013_v43, %v14167_v55  ;;  %14172 = vst [vmem:[#allocation292_spill] sm:$0xff] %v12422_v19  ;;  %v14177_v41 = vld [vmem:[#allocation321_spill] sm:$0xff]  ;;  %v12442_v63 = vadd.f32 %v12008_v52, %v14181_v47  ;;  %v14183_v19 = vld [vmem:[#allocation324_spill] sm:$0xff] }
 0x6c4   : > { %14174 = vst [vmem:[#allocation293_spill] sm:$0xff] %v12426_v45  ;;  %14176 = vst [vmem:[#allocation294_spill] sm:$0xff] %v12430_v49  ;;  %v12434_v55 = vadd.f32 %v12018_v2, %v14177_v41  ;;  %v12446_v37 = vadd.f32 %v12013_v43, %v14183_v19  ;;  %v14185_v45 = vld [vmem:[#allocation325_spill] sm:$0xff]  ;;  %v14187_v49 = vld [vmem:[#allocation326_spill] sm:$0xff] }
 0x6c5   : > { %14168 = vst [vmem:[#allocation290_spill] sm:$0xff] %v12414_v12  ;;  %v14179_v12 = vld [vmem:[#allocation322_spill] sm:$0xff]  ;;  %14182 = vst [vmem:[#allocation297_spill] sm:$0xff] %v12442_v63  ;;  %v12450_v34 = vadd.f32 %v12018_v2, %v14185_v45  ;;  %v12454_v41 = vadd.f32 %v12003_v56, %v14187_v49  ;;  %v14193_v63 = vld [vmem:[#allocation329_spill] sm:$0xff] }
 0x6c6   : > { %14178 = vst [vmem:[#allocation295_spill] sm:$0xff] %v12434_v55  ;;  %v12438_v53 = vadd.f32 %v12003_v56, %v14179_v12  ;;  %14184 = vst [vmem:[#allocation298_spill] sm:$0xff] %v12446_v37  ;;  %v14189_v55 = vld [vmem:[#allocation327_spill] sm:$0xff]  ;;  %v12466_v19 = vadd.f32 %v12018_v2, %v14193_v63  ;;  %v14195_v37 = vld [vmem:[#allocation330_spill] sm:$0xff] }
 0x6c7   : > { %14186 = vst [vmem:[#allocation299_spill] sm:$0xff] %v12450_v34  ;;  %14188 = vst [vmem:[#allocation300_spill] sm:$0xff] %v12454_v41  ;;  %v12458_v12 = vadd.f32 %v12008_v52, %v14189_v55  ;;  %v12470_v45 = vadd.f32 %v12003_v56, %v14195_v37  ;;  %v14197_v34 = vld [vmem:[#allocation331_spill] sm:$0xff]  ;;  %v4855_v41 = vcvt.f32.s32 %v11841_v50  ;;  %v4825_v55 = vcvt.f32.s32 %v11847_v42 }
 0x6c8   : > { %14180 = vst [vmem:[#allocation296_spill] sm:$0xff] %v12438_v53  ;;  %v14191_v53 = vld [vmem:[#allocation328_spill] sm:$0xff]  ;;  %14194 = vst [vmem:[#allocation303_spill] sm:$0xff] %v12466_v19  ;;  %v12474_v49 = vadd.f32 %v12008_v52, %v14197_v34  ;;  %v4870_v19 = vcvt.f32.s32 %v11849_v48  ;;  %v4840_v37 = vcvt.f32.s32 %v11857_v54  ;;  %v14203_v34 = vld [vmem:[#allocation334_spill] sm:$0xff]  ;;  %v4930_v42 = vcvt.f32.s32 %v11867_v18 }
 0x6c9   : > { %14190 = vst [vmem:[#allocation301_spill] sm:$0xff] %v12458_v12  ;;  %v12462_v47 = vadd.f32 %v12013_v43, %v14191_v53  ;;  %14196 = vst [vmem:[#allocation304_spill] sm:$0xff] %v12470_v45  ;;  %v14199_v12 = vld [vmem:[#allocation332_spill] sm:$0xff]  ;;  %v4915_v45 = vcvt.f32.s32 %v11860_v62  ;;  %v4885_v50 = vcvt.f32.s32 %v11872_v25  ;;  %v14209_v62 = vld [vmem:[#allocation337_spill] sm:$0xff]  ;;  %v4856_v25 = vshll.u32 %v4855_v41, 16 }
 0x6ca   : > { %14198 = vst [vmem:[#allocation305_spill] sm:$0xff] %v12474_v49  ;;  %v12480_v53 = vadd.f32 %v12013_v43, %v14199_v12  ;;  %v12491_v49 = vadd.f32 %v12003_v56, %v14203_v34  ;;  %v4900_v12 = vcvt.f32.s32 %v11877_v58  ;;  %v14207_v48 = vld [vmem:[#allocation336_spill] sm:$0xff]  ;;  %v12507_v34 = vadd.f32 %v12018_v2, %v14209_v62 }
 0x6cb   : > { %14192 = vst [vmem:[#allocation302_spill] sm:$0xff] %v12462_v47  ;;  %v14201_v47 = vld [vmem:[#allocation333_spill] sm:$0xff]  ;;  %v12503_v54 = vadd.f32 %v12013_v43, %v14207_v48  ;;  %v12513_v58 = vshll.u32 %v4825_v55, 16  ;;  %v12523_v48 = vshll.u32 %v4870_v19, 16  ;;  %v12532_v41 = vshll.u32 %v4885_v50, 16 }
 0x6cc   : > { %14200 = vst [vmem:[#allocation306_spill] sm:$0xff] %v12480_v53  ;;  %v12484_v63 = vadd.f32 %v12018_v2, %v14201_v47  ;;  %14204 = vst [vmem:[#allocation308_spill] sm:$0xff] %v12491_v49  ;;  %v4975_v53 = vcvt.f32.s32 %v11882_v24  ;;  %v14205_v47 = vld [vmem:[#allocation335_spill] sm:$0xff]  ;;  %v14211_v49 = vld [vmem:[#allocation338_spill] sm:$0xff]  ;;  %v12527_v2 = vshll.u32 %v4915_v45, 16  ;;  %v12534_v55 = vshll.u32 %v4900_v12, 16 }
 0x6cd   : > { %14208 = vst [vmem:[#allocation310_spill] sm:$0xff] %v12503_v54  ;;  %14210 = vst [vmem:[#allocation311_spill] sm:$0xff] %v12507_v34  ;;  %v12511_v18 = vadd.f32 %v12003_v56, %v14211_v49  ;;  %v14213_v24 = vld [vmem:[#allocation339_spill] sm:$0xff]  ;;  %v4990_v56 = vcvt.f32.s32 %v11887_v0  ;;  %v12530_v49 = vshll.u32 %v4930_v42, 16  ;;  %v4945_v62 = vcvt.f32.s32 %v11892_v3 }
 0x6ce   : > { %14202 = vst [vmem:[#allocation307_spill] sm:$0xff] %v12484_v63  ;;  %v12499_v63 = vadd.f32 %v12008_v52, %v14205_v47  ;;  %v12517_v13 = vadd.f32 %v12008_v52, %v14213_v24  ;;  %v12521_v47 = vadd.f32 %v12013_v43, %v11828_v21  ;;  %v12536_v52 = vshll.u32 %v4975_v53, 16 }
 0x6cf   : > { %14212 = vst [vmem:[#allocation312_spill] sm:$0xff] %v12511_v18  ;;  %v4960_v21 = vcvt.f32.s32 %v11897_v7  ;;  %v5035_v43 = vcvt.f32.s32 %v11902_v59  ;;  %v5050_v19 = vcvt.f32.s32 %v11907_v40  ;;  %v5005_v45 = vcvt.f32.s32 %v11912_v61 }
 0x6d0   : > { %14206 = vst [vmem:[#allocation309_spill] sm:$0xff] %v12499_v63  ;;  %14214 = vst [vmem:[#allocation313_spill] sm:$0xff] %v12517_v13  ;;  %v12525_v63 = vshll.u32 %v4840_v37, 16  ;;  %v5020_v0 = vcvt.f32.s32 %v11917_v29  ;;  %v5095_v37 = vcvt.f32.s32 %v11922_v11  ;;  %v5110_v42 = vcvt.f32.s32 %v11927_v32 }
 0x6d1   : > { %14215 = vst [vmem:[#allocation314_spill] sm:$0xff] %v12521_v47  ;;  %v12546_v50 = vshll.u32 %v4990_v56, 16  ;;  %v5065_v53 = vcvt.f32.s32 %v11932_v35  ;;  %v5080_v3 = vcvt.f32.s32 %v11937_v44  ;;  %v5155_v7 = vcvt.f32.s32 %v11942_v27 }
 0x6d2   : > { %v5170_v59 = vcvt.f32.s32 %v11947_v15  ;;  %v5125_v40 = vcvt.f32.s32 %v11952_v20  ;;  %v5140_v61 = vcvt.f32.s32 %v11957_v4  ;;  %v5215_v29 = vcvt.f32.s32 %v11962_v30 }
 0x6d3   : > { %v12555_v12 = vshll.u32 %v4945_v62, 16  ;;  %v12557_v11 = vshll.u32 %v4960_v21, 16  ;;  %v12559_v32 = vshll.u32 %v5035_v43, 16  ;;  %v12561_v24 = vshll.u32 %v5050_v19, 16 }
 0x6d4   : > { %v12563_v35 = vshll.u32 %v5005_v45, 16  ;;  %v12565_v44 = vshll.u32 %v5020_v0, 16  ;;  %v12567_v27 = vshll.u32 %v5095_v37, 16  ;;  %v12569_v15 = vshll.u32 %v5110_v42, 16 }
 0x6d5   : > { %v12571_v4 = vshll.u32 %v5065_v53, 16  ;;  %v12573_v30 = vshll.u32 %v5080_v3, 16  ;;  %v12575_v56 = vshll.u32 %v5155_v7, 16  ;;  %v12577_v21 = vshll.u32 %v5170_v59, 16 }
 0x6d6   : > { %v12579_v43 = vshll.u32 %v5125_v40, 16  ;;  %v12581_v19 = vshll.u32 %v5140_v61, 16  ;;  %v12583_v45 = vshll.u32 %v5215_v29, 16  ;;  %v5230_v0 = vcvt.f32.s32 %v11967_v10 }
 0x6d7   : > { %v5185_v37 = vcvt.f32.s32 %v11972_v14  ;;  %v5200_v42 = vcvt.f32.s32 %v11977_v46  ;;  %v5245_v3 = vcvt.f32.s32 %v11982_v6  ;;  %v5260_v7 = vcvt.f32.s32 %v11987_v17 }
 0x6d8   : > { %14216 = vst [vmem:[#allocation315_spill] sm:$0xff] %v12583_v45  ;;  %v5275_v59 = vcvt.f32.s32 %v11992_v39  ;;  %v5290_v40 = vcvt.f32.s32 %v11996_v23  ;;  %v13203_v10 = vmov 0.0  }
 0x6d9   : > { %v12604_v34 = vshll.u32 %v5200_v42, 16  ;;  %v12606_v54 = vshll.u32 %v5245_v3, 16  ;;  %v14217_v3 = vmov 0.0  }
 0x6e7   : > { %v4853_v20 = vpop.xlane.xlu0 %4852 }
 0x6e8   : > { %v4854_v62 = vcvt.f32.s32 %v4853_v20 }
 0x6ea   : > { %v4857_v53 = vadd.s32 %v4856_v25, %v4854_v62  ;;  %v12600_v62 = vshll.u32 %v5230_v0, 16 }
 0x6eb   : > { %v4823_v20 = vpop.xlane.xlu0 %4822  ;;  %v4868_v61 = vpop.xlane.xlu1 %4867 }
 0x6ec   : > { %vm5889_vm1 = vcmp.eq.s32.totalorder %v4857_v53, 0  ;;  %vm6086_vm6 = vcmp.eq.s32.totalorder %v4857_v53, 1  ;;  %vm6283_vm7 = vcmp.eq.s32.totalorder %v4857_v53, 2  ;;  %vm6480_vm8 = vcmp.eq.s32.totalorder %v4857_v53, 3 }
 0x6ed   : > { %v7227_v14 = vsel %vm5889_vm1, 1.0, %v13203_v10  ;;  %v7260_v46 = vsel %vm6086_vm6, 1.0, %v13203_v10  ;;  %v7293_v25 = vsel %vm6283_vm7, 1.0, %v13203_v10  ;;  %v7326_v6 = vsel %vm6480_vm8, 1.0, %v13203_v10 }
 0x6ee   : > { %v6022_v17 = vmul.f32 %v7227_v14, %v12054_v36  ;;  %v6219_v39 = vmul.f32 %v7260_v46, %v12062_v31  ;;  %v6416_v23 = vmul.f32 %v7293_v25, %v12058_v51  ;;  %v6613_v29 = vmul.f32 %v7326_v6, %v12066_v26 }
 0x6ef   : > { %v12602_v53 = vshll.u32 %v5185_v37, 16  ;;  %v4824_v13 = vcvt.f32.s32 %v4823_v20  ;;  %v4869_v47 = vcvt.f32.s32 %v4868_v61  ;;  %v4838_v18 = vpop.xlane.xlu1 %4837  ;;  %v12608_v14 = vshll.u32 %v5260_v7, 16 }
 0x6f0   : > { %v6251_v10 = vadd.f32 %v6219_v39, %v6022_v17  ;;  %v4839_v45 = vcvt.f32.s32 %v4838_v18  ;;  %v4913_v36 = vpop.xlane.xlu0 %4912  ;;  %v12610_v31 = vshll.u32 %v5275_v59, 16  ;;  %v12612_v51 = vshll.u32 %v5290_v40, 16 }
 0x6f1   : > { %v4827_v26 = vadd.s32 %v12513_v58, %v4824_v13  ;;  %v4872_v37 = vadd.s32 %v12523_v48, %v4869_v47  ;;  %v4914_v20 = vcvt.f32.s32 %v4913_v36 }
 0x6f2   : > { %v6448_v0 = vadd.f32 %v6416_v23, %v6251_v10  ;;  %v4842_v42 = vadd.s32 %v12525_v63, %v4839_v45 }
 0x6f3   : > { %vm5887_vm9 = vcmp.eq.s32.totalorder %v4827_v26, 0  ;;  %vm6084_vm10 = vcmp.eq.s32.totalorder %v4827_v26, 1  ;;  %vm6281_vm11 = vcmp.eq.s32.totalorder %v4827_v26, 2  ;;  %vm6478_vm12 = vcmp.eq.s32.totalorder %v4827_v26, 3  ;;  %v4928_v45 = vpop.xlane.xlu1 %4927 }
 0x6f4   : > { %v6645_v18 = vadd.f32 %v6613_v29, %v6448_v0  ;;  %v7225_v7 = vsel %vm5887_vm9, 1.0, %v14217_v3  ;;  %v7258_v59 = vsel %vm6084_vm10, 1.0, %v14217_v3  ;;  %v7291_v40 = vsel %vm6281_vm11, 1.0, %v14217_v3  ;;  %v12632_v6 = vpop.xlane.xlu0 %4882 }
 0x6f5   : > { %v6020_v13 = vmul.f32 %v7225_v7, %v12022_v57  ;;  %v6217_v58 = vmul.f32 %v7258_v59, %v12030_v8  ;;  %v6414_v47 = vmul.f32 %v7291_v40, %v12026_v28  ;;  %v7324_v63 = vsel %vm6478_vm12, 1.0, %v14217_v3 }
 0x6f6   : > { %6677 = vst [vmem:[%s8315_s23 + $0x10] sm:$0xff] %v6645_v18  ;;  %v6611_v48 = vmul.f32 %v7324_v63, %v12034_v9  ;;  %vm5890_vm13 = vcmp.eq.s32.totalorder %v4872_v37, 0  ;;  %vm6087_vm14 = vcmp.eq.s32.totalorder %v4872_v37, 1  ;;  %vm6284_vm15 = vcmp.eq.s32.totalorder %v4872_v37, 2  ;;  %v14220_v63 = vld [vmem:[#allocation207_spill] sm:$0xff] }
 0x6f7   : > { %v6249_v61 = vadd.f32 %v6217_v58, %v6020_v13  ;;  %v7228_v10 = vsel %vm5890_vm13, 1.0, %v14217_v3  ;;  %v7261_v46 = vsel %vm6087_vm14, 1.0, %v14217_v3  ;;  %v7294_v57 = vsel %vm6284_vm15, 1.0, %v14217_v3  ;;  %v4898_v18 = vpop.xlane.xlu1 %4897 }
 0x6f8   : > { %v6023_v8 = vmul.f32 %v7228_v10, %v12070_v22  ;;  %v6220_v28 = vmul.f32 %v7261_v46, %v12078_v1  ;;  %v6417_v25 = vmul.f32 %v7294_v57, %v12074_v33  ;;  %vm6481_vm0 = vcmp.eq.s32.totalorder %v4872_v37, 3  ;;  %v14221_v10 = vld [vmem:[#allocation273_spill] sm:$0xff] }
 0x6f9   : > { %v6446_v9 = vadd.f32 %v6414_v47, %v6249_v61  ;;  %v7327_v17 = vsel %vm6481_vm0, 1.0, %v14217_v3  ;;  %vm5888_vm2 = vcmp.eq.s32.totalorder %v4842_v42, 0  ;;  %vm6085_vm3 = vcmp.eq.s32.totalorder %v4842_v42, 1 }
 0x6fa   : > { %v6252_v39 = vadd.f32 %v6220_v28, %v6023_v8  ;;  %v6614_v23 = vmul.f32 %v7327_v17, %v12082_v60  ;;  %v7226_v29 = vsel %vm5888_vm2, 1.0, %v14217_v3  ;;  %v7259_v22 = vsel %vm6085_vm3, 1.0, %v14217_v3 }
 0x6fb   : > { %v6643_v36 = vadd.f32 %v6611_v48, %v6446_v9  ;;  %v6021_v1 = vmul.f32 %v7226_v29, %v12038_v38  ;;  %v6218_v33 = vmul.f32 %v7259_v22, %v12046_v5  ;;  %vm6282_vm4 = vcmp.eq.s32.totalorder %v4842_v42, 2  ;;  %v14218_v38 = vld [vmem:[#allocation242_spill] sm:$0xff]  ;;  %v12646_v5 = vpop.xlane.xlu0 %4972 }
 0x6fc   : > { %v6449_v26 = vadd.f32 %v6417_v25, %v6252_v39  ;;  %v7292_v0 = vsel %vm6282_vm4, 1.0, %v14217_v3  ;;  %vm6479_vm5 = vcmp.eq.s32.totalorder %v4842_v42, 3  ;;  %v4917_v37 = vadd.s32 %v12527_v2, %v4914_v20  ;;  %v14219_v20 = vld [vmem:[#allocation272_spill] sm:$0xff] }
 0x6fd   : > { %6675 = vst [vmem:[%s8315_s23] sm:$0xff] %v6643_v36  ;;  %v6250_v60 = vadd.f32 %v6218_v33, %v6021_v1  ;;  %v6415_v7 = vmul.f32 %v7292_v0, %v12042_v16  ;;  %v7325_v59 = vsel %vm6479_vm5, 1.0, %v14217_v3  ;;  %v4929_v40 = vcvt.f32.s32 %v4928_v45  ;;  %v14222_v25 = vld [vmem:[#allocation208_spill] sm:$0xff]  ;;  %v14223_v33 = vld [vmem:[#allocation209_spill] sm:$0xff]  ;;  %v14224_v0 = vld [vmem:[#allocation211_spill] sm:$0xff] }
 0x6fe   : > { %v6646_v13 = vadd.f32 %v6614_v23, %v6449_v26  ;;  %v6612_v58 = vmul.f32 %v7325_v59, %v14218_v38  ;;  %vm5893_vm1 = vcmp.eq.s32.totalorder %v4917_v37, 0  ;;  %vm6090_vm6 = vcmp.eq.s32.totalorder %v4917_v37, 1  ;;  %v4988_v23 = vpop.xlane.xlu1 %4987  ;;  %v14226_v59 = vld [vmem:[#allocation212_spill] sm:$0xff] }
 0x6ff   : > { %v6447_v47 = vadd.f32 %v6415_v7, %v6250_v60  ;;  %v7231_v42 = vsel %vm5893_vm1, 1.0, %v14217_v3  ;;  %v7264_v2 = vsel %vm6090_vm6, 1.0, %v14217_v3  ;;  %vm6287_vm7 = vcmp.eq.s32.totalorder %v4917_v37, 2  ;;  %v4943_v1 = vpop.xlane.xlu0 %4942 }
 0x700   : > { %6678 = vst [vmem:[%s8315_s23 + $0x18] sm:$0xff] %v6646_v13  ;;  %v6026_v16 = vmul.f32 %v7231_v42, %v14219_v20  ;;  %v6223_v48 = vmul.f32 %v7264_v2, %v14220_v63  ;;  %v7297_v45 = vsel %vm6287_vm7, 1.0, %v14217_v3  ;;  %vm6484_vm8 = vcmp.eq.s32.totalorder %v4917_v37, 3  ;;  %v14225_v37 = vld [vmem:[#allocation210_spill] sm:$0xff] }
 0x701   : > { %v6644_v61 = vadd.f32 %v6612_v58, %v6447_v47  ;;  %v6420_v46 = vmul.f32 %v7297_v45, %v14221_v10  ;;  %v7330_v57 = vsel %vm6484_vm8, 1.0, %v14217_v3  ;;  %v4932_v8 = vadd.s32 %v12530_v49, %v4929_v40  ;;  %v14229_v10 = vld [vmem:[#allocation249_spill] sm:$0xff] }
 0x702   : > { %v6255_v28 = vadd.f32 %v6223_v48, %v6026_v16  ;;  %v6617_v9 = vmul.f32 %v7330_v57, %v14222_v25  ;;  %v4884_v17 = vcvt.f32.s32 %v12632_v6  ;;  %v4899_v39 = vcvt.f32.s32 %v4898_v18  ;;  %v12672_v20 = vpop.xlane.xlu1 %4957  ;;  %v14227_v48 = vld [vmem:[#allocation246_spill] sm:$0xff] }
 0x703   : > { %6676 = vst [vmem:[%s8315_s23 + $0x8] sm:$0xff] %v6644_v61  ;;  %vm5894_vm9 = vcmp.eq.s32.totalorder %v4932_v8, 0  ;;  %vm6091_vm10 = vcmp.eq.s32.totalorder %v4932_v8, 1  ;;  %vm6288_vm11 = vcmp.eq.s32.totalorder %v4932_v8, 2  ;;  %vm6485_vm12 = vcmp.eq.s32.totalorder %v4932_v8, 3 }
 0x704   : > { %v6452_v29 = vadd.f32 %v6420_v46, %v6255_v28  ;;  %v7232_v22 = vsel %vm5894_vm9, 1.0, %v14217_v3  ;;  %v7265_v36 = vsel %vm6091_vm10, 1.0, %v14217_v3  ;;  %v7298_v49 = vsel %vm6288_vm11, 1.0, %v14217_v3  ;;  %v14230_v28 = vld [vmem:[#allocation254_spill] sm:$0xff] }
 0x705   : > { %v6027_v26 = vmul.f32 %v7232_v22, %v14223_v33  ;;  %v6224_v6 = vmul.f32 %v7265_v36, %v14224_v0  ;;  %v6421_v18 = vmul.f32 %v7298_v49, %v14225_v37  ;;  %v7331_v60 = vsel %vm6485_vm12, 1.0, %v14217_v3  ;;  %v14232_v22 = vld [vmem:[#allocation262_spill] sm:$0xff]  ;;  %v14233_v33 = vld [vmem:[#allocation261_spill] sm:$0xff]  ;;  %v12691_v37 = vpop.xlane.xlu0 %5032 }
 0x706   : > { %v6649_v7 = vadd.f32 %v6617_v9, %v6452_v29  ;;  %v6618_v40 = vmul.f32 %v7331_v60, %v14226_v59  ;;  %v4887_v13 = vadd.s32 %v12532_v41, %v4884_v17  ;;  %v4902_v38 = vadd.s32 %v12534_v55, %v4899_v39 }
 0x707   : > { %v6256_v58 = vadd.f32 %v6224_v6, %v6027_v26  ;;  %v4974_v47 = vcvt.f32.s32 %v12646_v5  ;;  %v4989_v42 = vcvt.f32.s32 %v4988_v23  ;;  %v4944_v2 = vcvt.f32.s32 %v4943_v1  ;;  %v14228_v5 = vld [vmem:[#allocation252_spill] sm:$0xff]  ;;  %v14231_v23 = vld [vmem:[#allocation258_spill] sm:$0xff] }
 0x708   : > { %6681 = vst [vmem:[%s8315_s23 + $0x30] sm:$0xff] %v6649_v7  ;;  %vm5891_vm13 = vcmp.eq.s32.totalorder %v4887_v13, 0  ;;  %vm6088_vm14 = vcmp.eq.s32.totalorder %v4887_v13, 1  ;;  %vm6285_vm15 = vcmp.eq.s32.totalorder %v4887_v13, 2  ;;  %vm6482_vm0 = vcmp.eq.s32.totalorder %v4887_v13, 3  ;;  %v14234_v7 = vld [vmem:[#allocation271_spill] sm:$0xff] }
 0x709   : > { %v6453_v16 = vadd.f32 %v6421_v18, %v6256_v58  ;;  %v7229_v63 = vsel %vm5891_vm13, 1.0, %v14217_v3  ;;  %v7262_v41 = vsel %vm6088_vm14, 1.0, %v14217_v3  ;;  %v7295_v55 = vsel %vm6285_vm15, 1.0, %v14217_v3  ;;  %v12693_v18 = vpop.xlane.xlu1 %5047 }
 0x70a   : > { %v6024_v45 = vmul.f32 %v7229_v63, %v14227_v48  ;;  %v6221_v61 = vmul.f32 %v7262_v41, %v14228_v5  ;;  %v6418_v46 = vmul.f32 %v7295_v55, %v14229_v10  ;;  %v7328_v57 = vsel %vm6482_vm0, 1.0, %v14217_v3  ;;  %v14235_v63 = vld [vmem:[#allocation221_spill] sm:$0xff]  ;;  %v14236_v55 = vld [vmem:[#allocation223_spill] sm:$0xff]  ;;  %v14238_v5 = vld [vmem:[#allocation224_spill] sm:$0xff] }
 0x70b   : > { %v6650_v8 = vadd.f32 %v6618_v40, %v6453_v16  ;;  %v6615_v25 = vmul.f32 %v7328_v57, %v14230_v28  ;;  %vm5892_vm2 = vcmp.eq.s32.totalorder %v4902_v38, 0  ;;  %vm6089_vm3 = vcmp.eq.s32.totalorder %v4902_v38, 1  ;;  %v12709_v57 = vpop.xlane.xlu0 %5002  ;;  %v14239_v28 = vld [vmem:[#allocation225_spill] sm:$0xff] }
 0x70c   : > { %v6253_v9 = vadd.f32 %v6221_v61, %v6024_v45  ;;  %v7230_v17 = vsel %vm5892_vm2, 1.0, %v14217_v3  ;;  %v7263_v39 = vsel %vm6089_vm3, 1.0, %v14217_v3  ;;  %vm6286_vm4 = vcmp.eq.s32.totalorder %v4902_v38, 2 }
 0x70d   : > { %6682 = vst [vmem:[%s8315_s23 + $0x38] sm:$0xff] %v6650_v8  ;;  %v6025_v29 = vmul.f32 %v7230_v17, %v14231_v23  ;;  %v6222_v36 = vmul.f32 %v7263_v39, %v14232_v22  ;;  %v7296_v49 = vsel %vm6286_vm4, 1.0, %v14217_v3  ;;  %vm6483_vm5 = vcmp.eq.s32.totalorder %v4902_v38, 3  ;;  %v12711_v8 = vpop.xlane.xlu1 %5017 }
 0x70e   : > { %v6450_v1 = vadd.f32 %v6418_v46, %v6253_v9  ;;  %v6419_v26 = vmul.f32 %v7296_v49, %v14233_v33  ;;  %v7329_v0 = vsel %vm6483_vm5, 1.0, %v14217_v3  ;;  %v4977_v6 = vadd.s32 %v12536_v52, %v4974_v47  ;;  %v14240_v9 = vld [vmem:[#allocation227_spill] sm:$0xff] }
 0x70f   : > { %v6254_v60 = vadd.f32 %v6222_v36, %v6025_v29  ;;  %v6616_v59 = vmul.f32 %v7329_v0, %v14234_v7  ;;  %v4992_v40 = vadd.s32 %v12546_v50, %v4989_v42  ;;  %v4947_v13 = vadd.s32 %v12555_v12, %v4944_v2  ;;  %v14237_v50 = vld [vmem:[#allocation222_spill] sm:$0xff] }
 0x710   : > { %v6647_v38 = vadd.f32 %v6615_v25, %v6450_v1  ;;  %vm5897_vm1 = vcmp.eq.s32.totalorder %v4977_v6, 0  ;;  %vm6094_vm6 = vcmp.eq.s32.totalorder %v4977_v6, 1  ;;  %vm6291_vm7 = vcmp.eq.s32.totalorder %v4977_v6, 2  ;;  %v14241_v36 = vld [vmem:[#allocation226_spill] sm:$0xff]  ;;  %v14242_v1 = vld [vmem:[#allocation228_spill] sm:$0xff] }
 0x711   : > { %v6451_v58 = vadd.f32 %v6419_v26, %v6254_v60  ;;  %v7235_v16 = vsel %vm5897_vm1, 1.0, %v14217_v3  ;;  %v7268_v52 = vsel %vm6094_vm6, 1.0, %v14217_v3  ;;  %v7301_v47 = vsel %vm6291_vm7, 1.0, %v14217_v3 }
 0x712   : > { %6679 = vst [vmem:[%s8315_s23 + $0x20] sm:$0xff] %v6647_v38  ;;  %v6030_v41 = vmul.f32 %v7235_v16, %v14235_v63  ;;  %v6227_v48 = vmul.f32 %v7268_v52, %v14236_v55  ;;  %v6424_v42 = vmul.f32 %v7301_v47, %v14237_v50  ;;  %vm6488_vm8 = vcmp.eq.s32.totalorder %v4977_v6, 3  ;;  %v14243_v6 = vld [vmem:[#allocation213_spill] sm:$0xff]  ;;  %v14244_v38 = vld [vmem:[#allocation215_spill] sm:$0xff]  ;;  %v14245_v16 = vld [vmem:[#allocation214_spill] sm:$0xff]  ;;  %v12731_v55 = vpop.xlane.xlu1 %5107 }
 0x713   : > { %v6648_v12 = vadd.f32 %v6616_v59, %v6451_v58  ;;  %v7334_v2 = vsel %vm6488_vm8, 1.0, %v14217_v3  ;;  %vm5898_vm9 = vcmp.eq.s32.totalorder %v4992_v40, 0  ;;  %vm6095_vm10 = vcmp.eq.s32.totalorder %v4992_v40, 1  ;;  %v14246_v50 = vld [vmem:[#allocation216_spill] sm:$0xff] }
 0x714   : > { %v6259_v45 = vadd.f32 %v6227_v48, %v6030_v41  ;;  %v6621_v61 = vmul.f32 %v7334_v2, %v14238_v5  ;;  %v7236_v10 = vsel %vm5898_vm9, 1.0, %v14217_v3  ;;  %v7269_v46 = vsel %vm6095_vm10, 1.0, %v14217_v3  ;;  %v12729_v41 = vpop.xlane.xlu0 %5092 }
 0x715   : > { %6680 = vst [vmem:[%s8315_s23 + $0x28] sm:$0xff] %v6648_v12  ;;  %v6031_v25 = vmul.f32 %v7236_v10, %v14239_v28  ;;  %v6228_v17 = vmul.f32 %v7269_v46, %v14240_v9  ;;  %vm6292_vm11 = vcmp.eq.s32.totalorder %v4992_v40, 2  ;;  %vm6489_vm12 = vcmp.eq.s32.totalorder %v4992_v40, 3 }
 0x716   : > { %v6456_v39 = vadd.f32 %v6424_v42, %v6259_v45  ;;  %v7302_v23 = vsel %vm6292_vm11, 1.0, %v14217_v3  ;;  %v7335_v29 = vsel %vm6489_vm12, 1.0, %v14217_v3  ;;  %vm5895_vm13 = vcmp.eq.s32.totalorder %v4947_v13, 0 }
 0x717   : > { %v6260_v22 = vadd.f32 %v6228_v17, %v6031_v25  ;;  %v6425_v49 = vmul.f32 %v7302_v23, %v14241_v36  ;;  %v6622_v33 = vmul.f32 %v7335_v29, %v14242_v1  ;;  %v7233_v26 = vsel %vm5895_vm13, 1.0, %v14217_v3  ;;  %v14249_v17 = vld [vmem:[#allocation218_spill] sm:$0xff] }
 0x718   : > { %v6653_v0 = vadd.f32 %v6621_v61, %v6456_v39  ;;  %v6028_v60 = vmul.f32 %v7233_v26, %v14243_v6  ;;  %vm6092_vm14 = vcmp.eq.s32.totalorder %v4947_v13, 1  ;;  %vm6289_vm15 = vcmp.eq.s32.totalorder %v4947_v13, 2 }
 0x719   : > { %v6457_v7 = vadd.f32 %v6425_v49, %v6260_v22  ;;  %v7266_v59 = vsel %vm6092_vm14, 1.0, %v14217_v3  ;;  %v7299_v40 = vsel %vm6289_vm15, 1.0, %v14217_v3  ;;  %vm6486_vm0 = vcmp.eq.s32.totalorder %v4947_v13, 3  ;;  %v14250_v22 = vld [vmem:[#allocation220_spill] sm:$0xff] }
 0x71a   : > { %6685 = vst [vmem:[%s8315_s23 + $0x50] sm:$0xff] %v6653_v0  ;;  %v6225_v58 = vmul.f32 %v7266_v59, %v14244_v38  ;;  %v6422_v52 = vmul.f32 %v7299_v40, %v14245_v16  ;;  %v7332_v47 = vsel %vm6486_vm0, 1.0, %v14217_v3  ;;  %v4959_v63 = vcvt.f32.s32 %v12672_v20  ;;  %v14252_v0 = vld [vmem:[#allocation239_spill] sm:$0xff]  ;;  %v14253_v59 = vld [vmem:[#allocation238_spill] sm:$0xff]  ;;  %v14254_v16 = vld [vmem:[#allocation240_spill] sm:$0xff] }
 0x71b   : > { %v6654_v48 = vadd.f32 %v6622_v33, %v6457_v7  ;;  %v6619_v42 = vmul.f32 %v7332_v47, %v14246_v50  ;;  %v5034_v12 = vcvt.f32.s32 %v12691_v37  ;;  %v5049_v13 = vcvt.f32.s32 %v12693_v18  ;;  %v14251_v33 = vld [vmem:[#allocation237_spill] sm:$0xff] }
 0x71c   : > { %v6257_v2 = vadd.f32 %v6225_v58, %v6028_v60  ;;  %v4962_v45 = vadd.s32 %v12557_v11, %v4959_v63  ;;  %v5004_v5 = vcvt.f32.s32 %v12709_v57  ;;  %v5019_v61 = vcvt.f32.s32 %v12711_v8 }
 0x71d   : > { %6686 = vst [vmem:[%s8315_s23 + $0x58] sm:$0xff] %v6654_v48  ;;  %v5037_v20 = vadd.s32 %v12559_v32, %v5034_v12  ;;  %v5052_v10 = vadd.s32 %v12561_v24, %v5049_v13  ;;  %v5094_v46 = vcvt.f32.s32 %v12729_v41  ;;  %v5109_v28 = vcvt.f32.s32 %v12731_v55  ;;  %v14247_v32 = vld [vmem:[#allocation217_spill] sm:$0xff]  ;;  %v14248_v24 = vld [vmem:[#allocation219_spill] sm:$0xff]  ;;  %v14256_v12 = vld [vmem:[#allocation244_spill] sm:$0xff] }
 0x71e   : > { %v6454_v25 = vadd.f32 %v6422_v52, %v6257_v2  ;;  %vm5896_vm2 = vcmp.eq.s32.totalorder %v4962_v45, 0  ;;  %vm6093_vm3 = vcmp.eq.s32.totalorder %v4962_v45, 1  ;;  %vm6290_vm4 = vcmp.eq.s32.totalorder %v4962_v45, 2  ;;  %v14255_v41 = vld [vmem:[#allocation241_spill] sm:$0xff] }
 0x71f   : > { %v7234_v11 = vsel %vm5896_vm2, 1.0, %v14217_v3  ;;  %v7267_v37 = vsel %vm6093_vm3, 1.0, %v14217_v3  ;;  %v7300_v18 = vsel %vm6290_vm4, 1.0, %v14217_v3  ;;  %vm6487_vm5 = vcmp.eq.s32.totalorder %v4962_v45, 3  ;;  %v14257_v45 = vld [vmem:[#allocation243_spill] sm:$0xff] }
 0x720   : > { %v6651_v57 = vadd.f32 %v6619_v42, %v6454_v25  ;;  %v6029_v8 = vmul.f32 %v7234_v11, %v14247_v32  ;;  %v6226_v9 = vmul.f32 %v7267_v37, %v14248_v24  ;;  %v6423_v39 = vmul.f32 %v7300_v18, %v14249_v17  ;;  %v14258_v32 = vld [vmem:[#allocation245_spill] sm:$0xff] }
 0x721   : > { %v7333_v23 = vsel %vm6487_vm5, 1.0, %v14217_v3  ;;  %vm5901_vm1 = vcmp.eq.s32.totalorder %v5037_v20, 0  ;;  %vm6098_vm6 = vcmp.eq.s32.totalorder %v5037_v20, 1  ;;  %vm6295_vm7 = vcmp.eq.s32.totalorder %v5037_v20, 2 }
 0x722   : > { %6683 = vst [vmem:[%s8315_s23 + $0x40] sm:$0xff] %v6651_v57  ;;  %v6258_v29 = vadd.f32 %v6226_v9, %v6029_v8  ;;  %v6620_v36 = vmul.f32 %v7333_v23, %v14250_v22  ;;  %v7239_v49 = vsel %vm5901_vm1, 1.0, %v14217_v3  ;;  %v7272_v1 = vsel %vm6098_vm6, 1.0, %v14217_v3 }
 0x723   : > { %v6034_v26 = vmul.f32 %v7239_v49, %v14251_v33  ;;  %v6231_v6 = vmul.f32 %v7272_v1, %v14252_v0  ;;  %v7305_v60 = vsel %vm6295_vm7, 1.0, %v14217_v3  ;;  %vm6492_vm8 = vcmp.eq.s32.totalorder %v5037_v20, 3  ;;  %v14263_v0 = vld [vmem:[#allocation233_spill] sm:$0xff] }
 0x724   : > { %v6455_v7 = vadd.f32 %v6423_v39, %v6258_v29  ;;  %v6428_v40 = vmul.f32 %v7305_v60, %v14253_v59  ;;  %v7338_v38 = vsel %vm6492_vm8, 1.0, %v14217_v3  ;;  %vm5902_vm9 = vcmp.eq.s32.totalorder %v5052_v10, 0  ;;  %v14260_v39 = vld [vmem:[#allocation231_spill] sm:$0xff] }
 0x725   : > { %v6263_v58 = vadd.f32 %v6231_v6, %v6034_v26  ;;  %v6625_v52 = vmul.f32 %v7338_v38, %v14254_v16  ;;  %v7240_v47 = vsel %vm5902_vm9, 1.0, %v14217_v3  ;;  %vm6099_vm10 = vcmp.eq.s32.totalorder %v5052_v10, 1  ;;  %v14264_v60 = vld [vmem:[#allocation235_spill] sm:$0xff] }
 0x726   : > { %v6652_v63 = vadd.f32 %v6620_v36, %v6455_v7  ;;  %v6035_v48 = vmul.f32 %v7240_v47, %v14255_v41  ;;  %v7273_v50 = vsel %vm6099_vm10, 1.0, %v14217_v3  ;;  %vm6296_vm11 = vcmp.eq.s32.totalorder %v5052_v10, 2  ;;  %v14262_v36 = vld [vmem:[#allocation232_spill] sm:$0xff] }
 0x727   : > { %v6460_v42 = vadd.f32 %v6428_v40, %v6263_v58  ;;  %v6232_v13 = vmul.f32 %v7273_v50, %v14256_v12  ;;  %v7306_v2 = vsel %vm6296_vm11, 1.0, %v14217_v3  ;;  %vm6493_vm12 = vcmp.eq.s32.totalorder %v5052_v10, 3  ;;  %v5078_v40 = vpop.xlane.xlu1 %5077  ;;  %v14265_v58 = vld [vmem:[#allocation234_spill] sm:$0xff]  ;;  %v14267_v12 = vld [vmem:[#allocation259_spill] sm:$0xff] }
 0x728   : > { %6684 = vst [vmem:[%s8315_s23 + $0x48] sm:$0xff] %v6652_v63  ;;  %v6429_v20 = vmul.f32 %v7306_v2, %v14257_v45  ;;  %v7339_v25 = vsel %vm6493_vm12, 1.0, %v14217_v3  ;;  %v5007_v11 = vadd.s32 %v12563_v35, %v5004_v5  ;;  %v5022_v37 = vadd.s32 %v12565_v44, %v5019_v61  ;;  %v12777_v44 = vpop.xlane.xlu0 %5062  ;;  %v14259_v5 = vld [vmem:[#allocation229_spill] sm:$0xff]  ;;  %v14266_v63 = vld [vmem:[#allocation236_spill] sm:$0xff] }
 0x729   : > { %v6657_v18 = vadd.f32 %v6625_v52, %v6460_v42  ;;  %v6264_v57 = vadd.f32 %v6232_v13, %v6035_v48  ;;  %v6626_v8 = vmul.f32 %v7339_v25, %v14258_v32  ;;  %v5097_v24 = vadd.s32 %v12567_v27, %v5094_v46  ;;  %v14261_v27 = vld [vmem:[#allocation230_spill] sm:$0xff] }
 0x72a   : > { %vm5899_vm13 = vcmp.eq.s32.totalorder %v5007_v11, 0  ;;  %vm6096_vm14 = vcmp.eq.s32.totalorder %v5007_v11, 1  ;;  %vm6293_vm15 = vcmp.eq.s32.totalorder %v5007_v11, 2  ;;  %vm6490_vm0 = vcmp.eq.s32.totalorder %v5007_v11, 3 }
 0x72b   : > { %6689 = vst [vmem:[%s8315_s23 + $0x70] sm:$0xff] %v6657_v18  ;;  %v6461_v10 = vadd.f32 %v6429_v20, %v6264_v57  ;;  %v7237_v9 = vsel %vm5899_vm13, 1.0, %v14217_v3  ;;  %v7270_v17 = vsel %vm6096_vm14, 1.0, %v14217_v3  ;;  %v7303_v35 = vsel %vm6293_vm15, 1.0, %v14217_v3  ;;  %v14268_v20 = vld [vmem:[#allocation263_spill] sm:$0xff] }
 0x72c   : > { %v6032_v61 = vmul.f32 %v7237_v9, %v14259_v5  ;;  %v6229_v23 = vmul.f32 %v7270_v17, %v14260_v39  ;;  %v6426_v46 = vmul.f32 %v7303_v35, %v14261_v27  ;;  %v7336_v29 = vsel %vm6490_vm0, 1.0, %v14217_v3  ;;  %v12794_v50 = vpop.xlane.xlu0 %5152  ;;  %v14270_v17 = vld [vmem:[#allocation264_spill] sm:$0xff]  ;;  %v14272_v27 = vld [vmem:[#allocation267_spill] sm:$0xff] }
 0x72d   : > { %v6658_v22 = vadd.f32 %v6626_v8, %v6461_v10  ;;  %v6623_v49 = vmul.f32 %v7336_v29, %v14262_v36  ;;  %vm5900_vm2 = vcmp.eq.s32.totalorder %v5022_v37, 0  ;;  %vm6097_vm3 = vcmp.eq.s32.totalorder %v5022_v37, 1  ;;  %v14273_v29 = vld [vmem:[#allocation266_spill] sm:$0xff] }
 0x72e   : > { %v6261_v1 = vadd.f32 %v6229_v23, %v6032_v61  ;;  %v7238_v33 = vsel %vm5900_vm2, 1.0, %v14217_v3  ;;  %v7271_v26 = vsel %vm6097_vm3, 1.0, %v14217_v3  ;;  %vm6294_vm4 = vcmp.eq.s32.totalorder %v5022_v37, 2  ;;  %v5168_v61 = vpop.xlane.xlu1 %5167 }
 0x72f   : > { %6690 = vst [vmem:[%s8315_s23 + $0x78] sm:$0xff] %v6658_v22  ;;  %v6033_v6 = vmul.f32 %v7238_v33, %v14263_v0  ;;  %v6230_v7 = vmul.f32 %v7271_v26, %v14264_v60  ;;  %v7304_v59 = vsel %vm6294_vm4, 1.0, %v14217_v3  ;;  %vm6491_vm5 = vcmp.eq.s32.totalorder %v5022_v37, 3  ;;  %v14269_v37 = vld [vmem:[#allocation260_spill] sm:$0xff] }
 0x730   : > { %v6458_v38 = vadd.f32 %v6426_v46, %v6261_v1  ;;  %v6427_v16 = vmul.f32 %v7304_v59, %v14265_v58  ;;  %v7337_v52 = vsel %vm6491_vm5, 1.0, %v14217_v3  ;;  %vm5905_vm1 = vcmp.eq.s32.totalorder %v5097_v24, 0  ;;  %v14274_v1 = vld [vmem:[#allocation268_spill] sm:$0xff] }
 0x731   : > { %v6262_v47 = vadd.f32 %v6230_v7, %v6033_v6  ;;  %v6624_v41 = vmul.f32 %v7337_v52, %v14266_v63  ;;  %v7243_v48 = vsel %vm5905_vm1, 1.0, %v14217_v3  ;;  %vm6102_vm6 = vcmp.eq.s32.totalorder %v5097_v24, 1 }
 0x732   : > { %v6655_v42 = vadd.f32 %v6623_v49, %v6458_v38  ;;  %v6038_v13 = vmul.f32 %v7243_v48, %v14267_v12  ;;  %v7276_v2 = vsel %vm6102_vm6, 1.0, %v14217_v3  ;;  %vm6299_vm7 = vcmp.eq.s32.totalorder %v5097_v24, 2  ;;  %v14278_v12 = vld [vmem:[#allocation251_spill] sm:$0xff] }
 0x733   : > { %v6459_v45 = vadd.f32 %v6427_v16, %v6262_v47  ;;  %v6235_v25 = vmul.f32 %v7276_v2, %v14268_v20  ;;  %v7309_v11 = vsel %vm6299_vm7, 1.0, %v14217_v3  ;;  %vm6496_vm8 = vcmp.eq.s32.totalorder %v5097_v24, 3  ;;  %v14275_v16 = vld [vmem:[#allocation247_spill] sm:$0xff]  ;;  %v14276_v47 = vld [vmem:[#allocation250_spill] sm:$0xff] }
 0x734   : > { %6687 = vst [vmem:[%s8315_s23 + $0x60] sm:$0xff] %v6655_v42  ;;  %v6432_v18 = vmul.f32 %v7309_v11, %v14269_v37  ;;  %v7342_v57 = vsel %vm6496_vm8, 1.0, %v14217_v3  ;;  %v5112_v32 = vadd.s32 %v12569_v15, %v5109_v28  ;;  %v5064_v8 = vcvt.f32.s32 %v12777_v44  ;;  %v5123_v28 = vpop.xlane.xlu0 %5122  ;;  %v14271_v44 = vld [vmem:[#allocation265_spill] sm:$0xff]  ;;  %v14280_v37 = vld [vmem:[#allocation256_spill] sm:$0xff] }
 0x735   : > { %v6656_v10 = vadd.f32 %v6624_v41, %v6459_v45  ;;  %v6267_v9 = vadd.f32 %v6235_v25, %v6038_v13  ;;  %v6629_v35 = vmul.f32 %v7342_v57, %v14270_v17  ;;  %v5079_v5 = vcvt.f32.s32 %v5078_v40  ;;  %v12821_v40 = vpop.xlane.xlu1 %5137  ;;  %v14277_v41 = vld [vmem:[#allocation248_spill] sm:$0xff]  ;;  %v14279_v25 = vld [vmem:[#allocation253_spill] sm:$0xff] }
 0x736   : > { %vm5906_vm9 = vcmp.eq.s32.totalorder %v5112_v32, 0  ;;  %vm6103_vm10 = vcmp.eq.s32.totalorder %v5112_v32, 1  ;;  %vm6300_vm11 = vcmp.eq.s32.totalorder %v5112_v32, 2  ;;  %vm6497_vm12 = vcmp.eq.s32.totalorder %v5112_v32, 3 }
 0x737   : > { %6688 = vst [vmem:[%s8315_s23 + $0x68] sm:$0xff] %v6656_v10  ;;  %v6464_v24 = vadd.f32 %v6432_v18, %v6267_v9  ;;  %v7244_v39 = vsel %vm5906_vm9, 1.0, %v14217_v3  ;;  %v7277_v55 = vsel %vm6103_vm10, 1.0, %v14217_v3  ;;  %v7310_v15 = vsel %vm6300_vm11, 1.0, %v14217_v3 }
 0x738   : > { %v6039_v23 = vmul.f32 %v7244_v39, %v14271_v44  ;;  %v6236_v46 = vmul.f32 %v7277_v55, %v14272_v27  ;;  %v6433_v22 = vmul.f32 %v7310_v15, %v14273_v29  ;;  %v7343_v36 = vsel %vm6497_vm12, 1.0, %v14217_v3 }
 0x739   : > { %v6661_v49 = vadd.f32 %v6629_v35, %v6464_v24  ;;  %v6630_v33 = vmul.f32 %v7343_v36, %v14274_v1  ;;  %v5067_v26 = vadd.s32 %v12571_v4, %v5064_v8  ;;  %v5082_v0 = vadd.s32 %v12573_v30, %v5079_v5  ;;  %v14281_v8 = vld [vmem:[#allocation255_spill] sm:$0xff]  ;;  %v12840_v35 = vpop.xlane.xlu0 %5212  ;;  %v12842_v5 = vpop.xlane.xlu1 %5227  ;;  %v14282_v24 = vld [vmem:[#allocation257_spill] sm:$0xff] }
 0x73a   : > { %v6268_v6 = vadd.f32 %v6236_v46, %v6039_v23  ;;  %v5154_v60 = vcvt.f32.s32 %v12794_v50  ;;  %v5169_v7 = vcvt.f32.s32 %v5168_v61  ;;  %v5124_v59 = vcvt.f32.s32 %v5123_v28  ;;  %v14283_v46 = vld [vmem:[#allocation280_spill] sm:$0xff] }
 0x73b   : > { %6693 = vst [vmem:[%s8315_s23 + $0x90] sm:$0xff] %v6661_v49  ;;  %vm5903_vm13 = vcmp.eq.s32.totalorder %v5067_v26, 0  ;;  %vm6100_vm14 = vcmp.eq.s32.totalorder %v5067_v26, 1  ;;  %vm6297_vm15 = vcmp.eq.s32.totalorder %v5067_v26, 2  ;;  %vm6494_vm0 = vcmp.eq.s32.totalorder %v5067_v26, 3  ;;  %v14286_v26 = vld [vmem:[#allocation283_spill] sm:$0xff] }
 0x73c   : > { %v6465_v38 = vadd.f32 %v6433_v22, %v6268_v6  ;;  %v7241_v58 = vsel %vm5903_vm13, 1.0, %v14217_v3  ;;  %v7274_v4 = vsel %vm6100_vm14, 1.0, %v14217_v3  ;;  %v7307_v30 = vsel %vm6297_vm15, 1.0, %v14217_v3  ;;  %v14284_v22 = vld [vmem:[#allocation282_spill] sm:$0xff] }
 0x73d   : > { %v6036_v52 = vmul.f32 %v7241_v58, %v14275_v16  ;;  %v6233_v63 = vmul.f32 %v7274_v4, %v14276_v47  ;;  %v6430_v48 = vmul.f32 %v7307_v30, %v14277_v41  ;;  %v7340_v50 = vsel %vm6494_vm0, 1.0, %v14217_v3  ;;  %v14288_v4 = vld [vmem:[#allocation286_spill] sm:$0xff]  ;;  %v14289_v41 = vld [vmem:[#allocation285_spill] sm:$0xff] }
 0x73e   : > { %v6662_v42 = vadd.f32 %v6630_v33, %v6465_v38  ;;  %v6627_v13 = vmul.f32 %v7340_v50, %v14278_v12  ;;  %vm5904_vm2 = vcmp.eq.s32.totalorder %v5082_v0, 0  ;;  %vm6101_vm3 = vcmp.eq.s32.totalorder %v5082_v0, 1  ;;  %v14287_v38 = vld [vmem:[#allocation284_spill] sm:$0xff]  ;;  %v14290_v50 = vld [vmem:[#allocation287_spill] sm:$0xff] }
 0x73f   : > { %v6265_v2 = vadd.f32 %v6233_v63, %v6036_v52  ;;  %v7242_v45 = vsel %vm5904_vm2, 1.0, %v14217_v3  ;;  %v7275_v20 = vsel %vm6101_vm3, 1.0, %v14217_v3  ;;  %vm6298_vm4 = vcmp.eq.s32.totalorder %v5082_v0, 2 }
 0x740   : > { %6694 = vst [vmem:[%s8315_s23 + $0x98] sm:$0xff] %v6662_v42  ;;  %v6037_v11 = vmul.f32 %v7242_v45, %v14279_v25  ;;  %v6234_v18 = vmul.f32 %v7275_v20, %v14280_v37  ;;  %v7308_v57 = vsel %vm6298_vm4, 1.0, %v14217_v3  ;;  %vm6495_vm5 = vcmp.eq.s32.totalorder %v5082_v0, 3  ;;  %v14292_v37 = vld [vmem:[#allocation274_spill] sm:$0xff] }
 0x741   : > { %v6462_v32 = vadd.f32 %v6430_v48, %v6265_v2  ;;  %v6431_v10 = vmul.f32 %v7308_v57, %v14281_v8  ;;  %v7341_v9 = vsel %vm6495_vm5, 1.0, %v14217_v3  ;;  %v5157_v17 = vadd.s32 %v12575_v56, %v5154_v60  ;;  %v14291_v2 = vld [vmem:[#allocation269_spill] sm:$0xff]  ;;  %v14293_v57 = vld [vmem:[#allocation270_spill] sm:$0xff] }
 0x742   : > { %v6266_v61 = vadd.f32 %v6234_v18, %v6037_v11  ;;  %v6628_v39 = vmul.f32 %v7341_v9, %v14282_v24  ;;  %v5172_v55 = vadd.s32 %v12577_v21, %v5169_v7  ;;  %v5127_v15 = vadd.s32 %v12579_v43, %v5124_v59  ;;  %v14285_v21 = vld [vmem:[#allocation281_spill] sm:$0xff]  ;;  %v12858_v7 = vpop.xlane.xlu0 %5182  ;;  %v12860_v59 = vpop.xlane.xlu1 %5197  ;;  %v14294_v24 = vld [vmem:[#allocation275_spill] sm:$0xff] }
 0x743   : > { %v6659_v28 = vadd.f32 %v6627_v13, %v6462_v32  ;;  %vm5909_vm1 = vcmp.eq.s32.totalorder %v5157_v17, 0  ;;  %vm6106_vm6 = vcmp.eq.s32.totalorder %v5157_v17, 1  ;;  %vm6303_vm7 = vcmp.eq.s32.totalorder %v5157_v17, 2 }
 0x744   : > { %v6463_v44 = vadd.f32 %v6431_v10, %v6266_v61  ;;  %v7247_v23 = vsel %vm5909_vm1, 1.0, %v14217_v3  ;;  %v7280_v56 = vsel %vm6106_vm6, 1.0, %v14217_v3  ;;  %v7313_v27 = vsel %vm6303_vm7, 1.0, %v14217_v3 }
 0x745   : > { %6691 = vst [vmem:[%s8315_s23 + $0x80] sm:$0xff] %v6659_v28  ;;  %v6042_v29 = vmul.f32 %v7247_v23, %v14283_v46  ;;  %v6239_v36 = vmul.f32 %v7280_v56, %v14284_v22  ;;  %v6436_v49 = vmul.f32 %v7313_v27, %v14285_v21  ;;  %vm6500_vm8 = vcmp.eq.s32.totalorder %v5157_v17, 3 }
 0x746   : > { %v6660_v43 = vadd.f32 %v6628_v39, %v6463_v44  ;;  %v7346_v1 = vsel %vm6500_vm8, 1.0, %v14217_v3  ;;  %vm5910_vm9 = vcmp.eq.s32.totalorder %v5172_v55, 0  ;;  %vm6107_vm10 = vcmp.eq.s32.totalorder %v5172_v55, 1  ;;  %v12878_v9 = vpop.xlane.xlu0 %5242  ;;  %v12880_v17 = vpop.xlane.xlu1 %5257 }
 0x747   : > { %v6271_v33 = vadd.f32 %v6239_v36, %v6042_v29  ;;  %v6633_v0 = vmul.f32 %v7346_v1, %v14286_v26  ;;  %v7248_v6 = vsel %vm5910_vm9, 1.0, %v14217_v3  ;;  %v7281_v60 = vsel %vm6107_vm10, 1.0, %v14217_v3 }
 0x748   : > { %6692 = vst [vmem:[%s8315_s23 + $0x88] sm:$0xff] %v6660_v43  ;;  %v6043_v58 = vmul.f32 %v7248_v6, %v14287_v38  ;;  %v6240_v30 = vmul.f32 %v7281_v60, %v14288_v4  ;;  %vm6304_vm11 = vcmp.eq.s32.totalorder %v5172_v55, 2  ;;  %vm6501_vm12 = vcmp.eq.s32.totalorder %v5172_v55, 3  ;;  %v14299_v60 = vld [vmem:[#allocation279_spill] sm:$0xff] }
 0x749   : > { %v6468_v16 = vadd.f32 %v6436_v49, %v6271_v33  ;;  %v7314_v52 = vsel %vm6304_vm11, 1.0, %v14217_v3  ;;  %v7347_v47 = vsel %vm6501_vm12, 1.0, %v14217_v3  ;;  %vm5907_vm13 = vcmp.eq.s32.totalorder %v5127_v15, 0  ;;  %v14296_v49 = vld [vmem:[#allocation276_spill] sm:$0xff]  ;;  %v14298_v33 = vld [vmem:[#allocation277_spill] sm:$0xff] }
 0x74a   : > { %v6272_v63 = vadd.f32 %v6240_v30, %v6043_v58  ;;  %v6437_v48 = vmul.f32 %v7314_v52, %v14289_v41  ;;  %v6634_v42 = vmul.f32 %v7347_v47, %v14290_v50  ;;  %v7245_v12 = vsel %vm5907_vm13, 1.0, %v14217_v3  ;;  %v14300_v58 = vld [vmem:[#allocation296_spill] sm:$0xff]  ;;  %v14301_v30 = vld [vmem:[#allocation298_spill] sm:$0xff] }
 0x74b   : > { %v6665_v13 = vadd.f32 %v6633_v0, %v6468_v16  ;;  %v6040_v45 = vmul.f32 %v7245_v12, %v14291_v2  ;;  %vm6104_vm14 = vcmp.eq.s32.totalorder %v5127_v15, 1  ;;  %vm6301_vm15 = vcmp.eq.s32.totalorder %v5127_v15, 2 }
 0x74c   : > { %v6469_v20 = vadd.f32 %v6437_v48, %v6272_v63  ;;  %v7278_v25 = vsel %vm6104_vm14, 1.0, %v14217_v3  ;;  %v7311_v11 = vsel %vm6301_vm15, 1.0, %v14217_v3  ;;  %vm6498_vm0 = vcmp.eq.s32.totalorder %v5127_v15, 3  ;;  %v14302_v63 = vld [vmem:[#allocation297_spill] sm:$0xff] }
 0x74d   : > { %6697 = vst [vmem:[%s8315_s23 + $0xb0] sm:$0xff] %v6665_v13  ;;  %v6237_v18 = vmul.f32 %v7278_v25, %v14292_v37  ;;  %v6434_v32 = vmul.f32 %v7311_v11, %v14293_v57  ;;  %v7344_v8 = vsel %vm6498_vm0, 1.0, %v14217_v3  ;;  %v5139_v10 = vcvt.f32.s32 %v12821_v40  ;;  %v14295_v40 = vld [vmem:[#allocation315_spill] sm:$0xff]  ;;  %v14305_v37 = vld [vmem:[#allocation302_spill] sm:$0xff] }
 0x74e   : > { %v6666_v61 = vadd.f32 %v6634_v42, %v6469_v20  ;;  %v6631_v39 = vmul.f32 %v7344_v8, %v14294_v24  ;;  %v5214_v55 = vcvt.f32.s32 %v12840_v35  ;;  %v5229_v15 = vcvt.f32.s32 %v12842_v5  ;;  %v14303_v42 = vld [vmem:[#allocation299_spill] sm:$0xff] }
 0x74f   : > { %v6269_v28 = vadd.f32 %v6237_v18, %v6040_v45  ;;  %v5142_v44 = vadd.s32 %v12581_v19, %v5139_v10  ;;  %v5184_v23 = vcvt.f32.s32 %v12858_v7  ;;  %v5199_v56 = vcvt.f32.s32 %v12860_v59  ;;  %v14304_v45 = vld [vmem:[#allocation300_spill] sm:$0xff] }
 0x750   : > { %6698 = vst [vmem:[%s8315_s23 + $0xb8] sm:$0xff] %v6666_v61  ;;  %v5217_v27 = vadd.s32 %v14295_v40, %v5214_v55  ;;  %v5232_v46 = vadd.s32 %v12600_v62, %v5229_v15  ;;  %v5244_v29 = vcvt.f32.s32 %v12878_v9  ;;  %v5259_v22 = vcvt.f32.s32 %v12880_v17  ;;  %v14297_v62 = vld [vmem:[#allocation278_spill] sm:$0xff]  ;;  %v14307_v55 = vld [vmem:[#allocation303_spill] sm:$0xff] }
 0x751   : > { %v6466_v36 = vadd.f32 %v6434_v32, %v6269_v28  ;;  %vm5908_vm2 = vcmp.eq.s32.totalorder %v5142_v44, 0  ;;  %vm6105_vm3 = vcmp.eq.s32.totalorder %v5142_v44, 1  ;;  %vm6302_vm4 = vcmp.eq.s32.totalorder %v5142_v44, 2  ;;  %v14306_v32 = vld [vmem:[#allocation301_spill] sm:$0xff] }
 0x752   : > { %v7246_v19 = vsel %vm5908_vm2, 1.0, %v14217_v3  ;;  %v7279_v35 = vsel %vm6105_vm3, 1.0, %v14217_v3  ;;  %v7312_v5 = vsel %vm6302_vm4, 1.0, %v14217_v3  ;;  %vm6499_vm5 = vcmp.eq.s32.totalorder %v5142_v44, 3 }
 0x753   : > { %v6663_v21 = vadd.f32 %v6631_v39, %v6466_v36  ;;  %v6041_v43 = vmul.f32 %v7246_v19, %v14296_v49  ;;  %v6238_v1 = vmul.f32 %v7279_v35, %v14297_v62  ;;  %v6435_v26 = vmul.f32 %v7312_v5, %v14298_v33  ;;  %v14310_v36 = vld [vmem:[#allocation289_spill] sm:$0xff]  ;;  %v14311_v35 = vld [vmem:[#allocation291_spill] sm:$0xff]  ;;  %v14312_v62 = vld [vmem:[#allocation292_spill] sm:$0xff] }
 0x754   : > { %v7345_v0 = vsel %vm6499_vm5, 1.0, %v14217_v3  ;;  %vm5913_vm1 = vcmp.eq.s32.totalorder %v5217_v27, 0  ;;  %vm6110_vm6 = vcmp.eq.s32.totalorder %v5217_v27, 1  ;;  %vm6307_vm7 = vcmp.eq.s32.totalorder %v5217_v27, 2  ;;  %v14313_v33 = vld [vmem:[#allocation294_spill] sm:$0xff] }
 0x755   : > { %6695 = vst [vmem:[%s8315_s23 + $0xa0] sm:$0xff] %v6663_v21  ;;  %v6270_v6 = vadd.f32 %v6238_v1, %v6041_v43  ;;  %v6632_v7 = vmul.f32 %v7345_v0, %v14299_v60  ;;  %v7251_v59 = vsel %vm5913_vm1, 1.0, %v14217_v3  ;;  %v7284_v38 = vsel %vm6110_vm6, 1.0, %v14217_v3  ;;  %v14314_v60 = vld [vmem:[#allocation293_spill] sm:$0xff] }
 0x756   : > { %v6046_v4 = vmul.f32 %v7251_v59, %v14300_v58  ;;  %v6243_v16 = vmul.f32 %v7284_v38, %v14301_v30  ;;  %v7317_v52 = vsel %vm6307_vm7, 1.0, %v14217_v3  ;;  %vm6504_vm8 = vcmp.eq.s32.totalorder %v5217_v27, 3  ;;  %v14315_v58 = vld [vmem:[#allocation295_spill] sm:$0xff] }
 0x757   : > { %v6467_v47 = vadd.f32 %v6435_v26, %v6270_v6  ;;  %v6440_v41 = vmul.f32 %v7317_v52, %v14302_v63  ;;  %v7350_v48 = vsel %vm6504_vm8, 1.0, %v14217_v3  ;;  %vm5914_vm9 = vcmp.eq.s32.totalorder %v5232_v46, 0 }
 0x758   : > { %v6275_v50 = vadd.f32 %v6243_v16, %v6046_v4  ;;  %v6637_v12 = vmul.f32 %v7350_v48, %v14303_v42  ;;  %v7252_v13 = vsel %vm5914_vm9, 1.0, %v14217_v3  ;;  %vm6111_vm10 = vcmp.eq.s32.totalorder %v5232_v46, 1  ;;  %v5273_v16 = vpop.xlane.xlu0 %5272  ;;  %v5288_v48 = vpop.xlane.xlu1 %5287  ;;  %v14317_v42 = vld [vmem:[#allocation306_spill] sm:$0xff] }
 0x759   : > { %v6664_v2 = vadd.f32 %v6632_v7, %v6467_v47  ;;  %v6047_v20 = vmul.f32 %v7252_v13, %v14304_v45  ;;  %v7285_v25 = vsel %vm6111_vm10, 1.0, %v14217_v3  ;;  %vm6308_vm11 = vcmp.eq.s32.totalorder %v5232_v46, 2  ;;  %v14316_v47 = vld [vmem:[#allocation304_spill] sm:$0xff] }
 0x75a   : > { %v6472_v11 = vadd.f32 %v6440_v41, %v6275_v50  ;;  %v6244_v18 = vmul.f32 %v7285_v25, %v14305_v37  ;;  %v7318_v57 = vsel %vm6308_vm11, 1.0, %v14217_v3  ;;  %vm6505_vm12 = vcmp.eq.s32.totalorder %v5232_v46, 3 }
 0x75b   : > { %6696 = vst [vmem:[%s8315_s23 + $0xa8] sm:$0xff] %v6664_v2  ;;  %v6441_v8 = vmul.f32 %v7318_v57, %v14306_v32  ;;  %v7351_v10 = vsel %vm6505_vm12, 1.0, %v14217_v3  ;;  %v5187_v9 = vadd.s32 %v12602_v53, %v5184_v23  ;;  %v5202_v61 = vadd.s32 %v12604_v34, %v5199_v56  ;;  %v14308_v34 = vld [vmem:[#allocation288_spill] sm:$0xff]  ;;  %v14309_v56 = vld [vmem:[#allocation290_spill] sm:$0xff]  ;;  %v14318_v2 = vld [vmem:[#allocation305_spill] sm:$0xff] }
 0x75c   : > { %v6669_v24 = vadd.f32 %v6637_v12, %v6472_v11  ;;  %v6276_v39 = vadd.f32 %v6244_v18, %v6047_v20  ;;  %v6638_v15 = vmul.f32 %v7351_v10, %v14307_v55  ;;  %v5247_v28 = vadd.s32 %v12606_v54, %v5244_v29  ;;  %v14319_v57 = vld [vmem:[#allocation307_spill] sm:$0xff]  ;;  %v14322_v55 = vld [vmem:[#allocation309_spill] sm:$0xff] }
 0x75d   : > { %vm5911_vm13 = vcmp.eq.s32.totalorder %v5187_v9, 0  ;;  %vm6108_vm14 = vcmp.eq.s32.totalorder %v5187_v9, 1  ;;  %vm6305_vm15 = vcmp.eq.s32.totalorder %v5187_v9, 2  ;;  %vm6502_vm0 = vcmp.eq.s32.totalorder %v5187_v9, 3 }
 0x75e   : > { %6701 = vst [vmem:[%s8315_s23 + $0xd0] sm:$0xff] %v6669_v24  ;;  %v6473_v44 = vadd.f32 %v6441_v8, %v6276_v39  ;;  %v7249_v40 = vsel %vm5911_vm13, 1.0, %v14217_v3  ;;  %v7282_v27 = vsel %vm6108_vm14, 1.0, %v14217_v3  ;;  %v7315_v53 = vsel %vm6305_vm15, 1.0, %v14217_v3  ;;  %v14320_v24 = vld [vmem:[#allocation308_spill] sm:$0xff] }
 0x75f   : > { %v6044_v23 = vmul.f32 %v7249_v40, %v14308_v34  ;;  %v6241_v46 = vmul.f32 %v7282_v27, %v14309_v56  ;;  %v6438_v19 = vmul.f32 %v7315_v53, %v14310_v36  ;;  %v7348_v54 = vsel %vm6502_vm0, 1.0, %v14217_v3  ;;  %v14323_v40 = vld [vmem:[#allocation340_spill] sm:$0xff]  ;;  %v14324_v34 = vld [vmem:[#allocation311_spill] sm:$0xff]  ;;  %v14325_v36 = vld [vmem:[#allocation341_spill] sm:$0xff] }
 0x760   : > { %v6670_v29 = vadd.f32 %v6638_v15, %v6473_v44  ;;  %v6635_v5 = vmul.f32 %v7348_v54, %v14311_v35  ;;  %vm5912_vm2 = vcmp.eq.s32.totalorder %v5202_v61, 0  ;;  %vm6109_vm3 = vcmp.eq.s32.totalorder %v5202_v61, 1  ;;  %v8133_v44 = vld [vmem:[%s13046_s8 + $0x3] ss:$0 sm:$0xff]  ;;  %v8135_v54 = vld [vmem:[%s13046_s8 + $0x2] ss:$0 sm:$0xff] }
 0x761   : > { %v6273_v21 = vadd.f32 %v6241_v46, %v6044_v23  ;;  %v7250_v49 = vsel %vm5912_vm2, 1.0, %v14217_v3  ;;  %v7283_v43 = vsel %vm6109_vm3, 1.0, %v14217_v3  ;;  %vm6306_vm4 = vcmp.eq.s32.totalorder %v5202_v61, 2  ;;  %v8134_v46 = vld [vmem:[%s13046_s8] ss:$0 sm:$0xff] }
 0x762   : > { %6702 = vst [vmem:[%s8315_s23 + $0xd8] sm:$0xff] %v6670_v29  ;;  %v6045_v1 = vmul.f32 %v7250_v49, %v14312_v62  ;;  %v6242_v26 = vmul.f32 %v7283_v43, %v14313_v33  ;;  %v7316_v0 = vsel %vm6306_vm4, 1.0, %v14217_v3  ;;  %vm6503_vm5 = vcmp.eq.s32.totalorder %v5202_v61, 3  ;;  %v14326_v29 = vld [vmem:[#allocation342_spill] sm:$0xff]  ;;  %v14327_v33 = vld [vmem:[#allocation343_spill] sm:$0xff] }
 0x763   : > { %v6470_v6 = vadd.f32 %v6438_v19, %v6273_v21  ;;  %v6439_v7 = vmul.f32 %v7316_v0, %v14314_v60  ;;  %v7349_v59 = vsel %vm6503_vm5, 1.0, %v14217_v3  ;;  %vm5915_vm1 = vcmp.eq.s32.totalorder %v5247_v28, 0 }
 0x764   : > { %v6274_v38 = vadd.f32 %v6242_v26, %v6045_v1  ;;  %v6636_v4 = vmul.f32 %v7349_v59, %v14315_v58  ;;  %v7253_v30 = vsel %vm5915_vm1, 1.0, %v14217_v3  ;;  %vm6112_vm6 = vcmp.eq.s32.totalorder %v5247_v28, 1  ;;  %v8136_v1 = vld [vmem:[%s13046_s8 + $0x1] ss:$0 sm:$0xff] }
 0x765   : > { %v6667_v52 = vadd.f32 %v6635_v5, %v6470_v6  ;;  %v6048_v63 = vmul.f32 %v7253_v30, %v14316_v47  ;;  %v7286_v41 = vsel %vm6112_vm6, 1.0, %v14217_v3  ;;  %vm6309_vm7 = vcmp.eq.s32.totalorder %v5247_v28, 2  ;;  %v14329_v6 = vld [vmem:[#allocation314_spill] sm:$0xff] }
 0x766   : > { %v6471_v50 = vadd.f32 %v6439_v7, %v6274_v38  ;;  %v6245_v12 = vmul.f32 %v7286_v41, %v14317_v42  ;;  %v7319_v13 = vsel %vm6309_vm7, 1.0, %v14217_v3  ;;  %vm6506_vm8 = vcmp.eq.s32.totalorder %v5247_v28, 3  ;;  %v14330_v7 = vld [vmem:[#allocation313_spill] sm:$0xff]  ;;  %v14331_v42 = vld [vmem:[#allocation344_spill] sm:$0xff] }
 0x767   : > { %6699 = vst [vmem:[%s8315_s23 + $0xc0] sm:$0xff] %v6667_v52  ;;  %v6442_v45 = vmul.f32 %v7319_v13, %v14318_v2  ;;  %v7352_v20 = vsel %vm6506_vm8, 1.0, %v14217_v3  ;;  %v5262_v25 = vadd.s32 %v12608_v14, %v5259_v22  ;;  %v5274_v11 = vcvt.f32.s32 %v5273_v16  ;;  %v14321_v22 = vld [vmem:[#allocation310_spill] sm:$0xff] }
 0x768   : > { %v6668_v37 = vadd.f32 %v6636_v4, %v6471_v50  ;;  %v6277_v18 = vadd.f32 %v6245_v12, %v6048_v63  ;;  %v6639_v32 = vmul.f32 %v7352_v20, %v14319_v57  ;;  %v5289_v8 = vcvt.f32.s32 %v5288_v48 }
 0x769   : > { %vm5916_vm9 = vcmp.eq.s32.totalorder %v5262_v25, 0  ;;  %vm6113_vm10 = vcmp.eq.s32.totalorder %v5262_v25, 1  ;;  %vm6310_vm11 = vcmp.eq.s32.totalorder %v5262_v25, 2  ;;  %vm6507_vm12 = vcmp.eq.s32.totalorder %v5262_v25, 3 }
 0x76a   : > { %6700 = vst [vmem:[%s8315_s23 + $0xc8] sm:$0xff] %v6668_v37  ;;  %v6474_v10 = vadd.f32 %v6442_v45, %v6277_v18  ;;  %v7254_v9 = vsel %vm5916_vm9, 1.0, %v14217_v3  ;;  %v7287_v61 = vsel %vm6113_vm10, 1.0, %v14217_v3  ;;  %v7320_v17 = vsel %vm6310_vm11, 1.0, %v14217_v3 }
 0x76b   : > { %v6049_v14 = vmul.f32 %v7254_v9, %v14320_v24  ;;  %v6246_v39 = vmul.f32 %v7287_v61, %v14321_v22  ;;  %v6443_v15 = vmul.f32 %v7320_v17, %v14322_v55  ;;  %v7353_v28 = vsel %vm6507_vm12, 1.0, %v14217_v3 }
 0x76c   : > { %v6609_v27 = vadd.f32 %v8133_v44, %v14323_v40  ;;  %v6671_v53 = vadd.f32 %v6639_v32, %v6474_v10  ;;  %v6640_v23 = vmul.f32 %v7353_v28, %v14324_v34  ;;  %v5277_v56 = vadd.s32 %v12610_v31, %v5274_v11 }
 0x76d   : > { %v6019_v19 = vadd.f32 %v8134_v46, %v14325_v36  ;;  %v6413_v35 = vadd.f32 %v8135_v54, %v14326_v29  ;;  %v6278_v5 = vadd.f32 %v6246_v39, %v6049_v14  ;;  %v5292_v21 = vadd.s32 %v12612_v51, %v5289_v8  ;;  %v14328_v51 = vld [vmem:[#allocation312_spill] sm:$0xff] }
 0x76e   : > { %6703 = vst [vmem:[%s8315_s23 + $0xe0] sm:$0xff] %v6671_v53  ;;  %vm5917_vm13 = vcmp.eq.s32.totalorder %v5277_v56, 0  ;;  %vm6114_vm14 = vcmp.eq.s32.totalorder %v5277_v56, 1  ;;  %vm6311_vm15 = vcmp.eq.s32.totalorder %v5277_v56, 2  ;;  %vm6508_vm0 = vcmp.eq.s32.totalorder %v5277_v56, 3 }
 0x76f   : > { %v6475_v31 = vadd.f32 %v6443_v15, %v6278_v5  ;;  %v7255_v49 = vsel %vm5917_vm13, 1.0, %v14217_v3  ;;  %v7288_v43 = vsel %vm6114_vm14, 1.0, %v14217_v3  ;;  %v7321_v62 = vsel %vm6311_vm15, 1.0, %v14217_v3 }
 0x770   : > { %v6216_v26 = vadd.f32 %v8136_v1, %v14327_v33  ;;  %v6050_v0 = vmul.f32 %v7255_v49, %v14328_v51  ;;  %v6247_v60 = vmul.f32 %v7288_v43, %v14329_v6  ;;  %v6444_v59 = vmul.f32 %v7321_v62, %v14330_v7 }
 0x771   : > { %v6672_v38 = vadd.f32 %v6640_v23, %v6475_v31  ;;  %v7354_v58 = vsel %vm6508_vm0, 1.0, %v14217_v3  ;;  %vm5918_vm2 = vcmp.eq.s32.totalorder %v5292_v21, 0  ;;  %vm6115_vm3 = vcmp.eq.s32.totalorder %v5292_v21, 1 }
 0x772   : > { %v6279_v4 = vadd.f32 %v6247_v60, %v6050_v0  ;;  %v7256_v30 = vsel %vm5918_vm2, 1.0, %v14217_v3  ;;  %v7289_v16 = vsel %vm6115_vm3, 1.0, %v14217_v3  ;;  %vm6312_vm4 = vcmp.eq.s32.totalorder %v5292_v21, 2 }
 0x773   : > { %6704 = vst [vmem:[%s8315_s23 + $0xe8] sm:$0xff] %v6672_v38  ;;  %v6051_v52 = vmul.f32 %v7256_v30, %v6019_v19  ;;  %v6248_v47 = vmul.f32 %v7289_v16, %v6216_v26  ;;  %v7322_v63 = vsel %vm6312_vm4, 1.0, %v14217_v3  ;;  %vm6509_vm5 = vcmp.eq.s32.totalorder %v5292_v21, 3 }
 0x774   : > { %v6476_v41 = vadd.f32 %v6444_v59, %v6279_v4  ;;  %v6641_v48 = vmul.f32 %v7354_v58, %v6609_v27  ;;  %v7355_v50 = vsel %vm6509_vm5, 1.0, %v14217_v3  ;;  %v6610_v12 = vadd.f32 %v8133_v44, %v14331_v42 }
 0x775   : > { %v6280_v13 = vadd.f32 %v6248_v47, %v6051_v52  ;;  %v6445_v2 = vmul.f32 %v7322_v63, %v6413_v35 }
 0x776   : > { %v6673_v45 = vadd.f32 %v6641_v48, %v6476_v41  ;;  %v6642_v25 = vmul.f32 %v7355_v50, %v6610_v12 }
 0x777   : > { %v6477_v20 = vadd.f32 %v6445_v2, %v6280_v13 }
 0x778   : > { %6705 = vst [vmem:[%s8315_s23 + $0xf0] sm:$0xff] %v6673_v45 }
 0x779   : > { %v6674_v11 = vadd.f32 %v6642_v25, %v6477_v20 }
 0x77b   : > { %6706 = vst [vmem:[%s8315_s23 + $0xf8] sm:$0xff] %v6674_v11 }
 0x77c PF: > { %p12997_p9 = scmp.eq.s32.totalorder %s6810_s18, 3  ;;  %s8211_s25 = smov [#allocation2]  }
 0x77d   : > { %s6719_s14 = sshll.u32 %s8211_s25, 4  ;;  %s6720_s14 = int_to_ptr.vmem [resolvable:$true] %s6719_s14 }
 0x77e   : > { %s8137_s26 = scalar_lea.vmem %s6720_s14, 8192  ;;  %p8144_p13 = scmp.lt.s32.totalorder %s6720_s14, %s6720_s14 }
 0x77f   : > { %p8138_p10 = scmp.ne.s32.totalorder %s6720_s14, %s8137_s26  ;;  %p8145_p0 = scmp.lt.s32.totalorder %s8137_s26, %s8137_s26 }
 0x781   : > { %p8139_p11 = pnand %p8138_p10, %p12997_p9  ;;  %p8146_p1 = por %p8145_p0, %p8144_p13 }
 0x783   : > { %p8140_p12 = pneg %p8139_p11 }
 0x785   : > { %p8147_p2 = pnand %p8146_p1, %p8140_p12 }
 0x787   : > { %8150 = shalt.err (!%p8147_p2)
}
 0x788   : > { %s8151_s18 = scalar_lea.hbm %s13047_s9, 8192 }
 0x789   : > { %p8152_p3 = scmp.ne.s32.totalorder %s13047_s9, %s8151_s18  ;;  %p8157_p6 = scmp.lt.u32.totalorder %s8151_s18, %s13047_s9 }
 0x78b   : > { %p8153_p4 = pnand %p8152_p3, %p12997_p9 }
 0x78d   : > { %p8154_p5 = pneg %p8153_p4 }
 0x78f   : > { %p8159_p7 = pnand %p8157_p6, %p8154_p5 }
 0x791   : > { %8162 = shalt.err (!%p8159_p7)
}
 0x792   : > { %s8212_s12 = smov 128   ;;  %s8213_s30 = smov 8  }
 0x793   : > { %7966 = dma.vmem_to_hbm [thread:$0]  (%p12997_p9), %s6720_s14, 8192, %s13047_s9, [#allocation3], %s8212_s12, %s8212_s12, %s8213_s30  }
 0x794   : > { %8184 = dma.done.wait (%p12997_p9), [#allocation3], 8192  }
 0x795   : > { %8186 = vsyncadd (%p12997_p9), [#allocation3], 4294959104 }
 0x796 PF: > { %s22_s17 = sadd.s32 1, %s8205_s17   ;;  %s14333_s13 = smov %s8197_s15 }
 0x797   : > { %p19_p8 = scmp.ge.s32.totalorder %s22_s17, 6   ;;  %s14334_s14 = smov %s8201_s16 }
 0x798   : > { %s14335_s15 = smov %s14338_s19  ;;  %s14336_s16 = smov %s14342_s20 }
 0x799   :  { %21 = sbr.rel (!%p19_p8) target bundleno = 3 (0x3), region = 106 }
 0x7a0   :  { %6749 = vsyncpa [#allocation3], 1 }
 0x7a1   :  { %6751 = vsyncpa [#allocation3 + $0x1], 1 }

</bundles_post_ra>
